<compile_context>
chip_gen: v5e
topology: v5e:2x2
jax: 0.10.0
libtpu: 0.0.40
codegen_flags: <defaults>
</compile_context>

<pallas_src>
import jax
import jax.numpy as jnp
from jax.experimental import pallas as pl
from jax.experimental.pallas import tpu as pltpu

C_IN, C_OUT, KSIZE, STRIDE, PAD = 3, 256, 5, 8, 2
H_IN = W_IN = 128            # (128 + 2*2 - 5)//8 + 1 = 16 -> matches 256*16*16 flatten
H_OUT = W_OUT = 16
FLAT = C_OUT * H_OUT * W_OUT  # 65536
LIN_OUT = 64
BN_EPS = 1e-5

KDIM = C_IN * KSIZE * KSIZE   # 75
KDIM_PAD = 128                # zero-padded contraction dim (lane aligned)
TK = 16384                    # linear K tile (bf16 tile = 2 MiB, double buffered 4 MiB)
KT = FLAT // TK               # 4 K blocks total
KT_SPLIT = 2                  # split K across 2 cores (parallel on v7x megacore)
KT_HALF = KT // KT_SPLIT      # 2 K blocks per split


# ----------------------------- Pallas kernels ------------------------------ #

def conv_bn_relu_kernel(p_ref, w_ref, g_ref, beta_ref, o_ref):
    # p_ref: [rows, 128] f32 patches (cols = (kh,kw,c), zero padded 75->128)
    # w_ref: [128, 256] f32 conv weight (rows zero padded to match)
    acc = jnp.dot(p_ref[...], w_ref[...], preferred_element_type=jnp.float32)
    # Conv bias omitted on purpose: a per-channel constant is cancelled exactly by the
    # BatchNorm (training-mode) mean subtraction, so the normalized result is identical.
    mean = jnp.mean(acc, axis=0, keepdims=True)
    var = jnp.mean(jnp.square(acc - mean), axis=0, keepdims=True)   # biased variance
    xn = (acc - mean) * jax.lax.rsqrt(var + BN_EPS)
    y = xn * g_ref[...] + beta_ref[...]
    o_ref[...] = jnp.maximum(y, 0.0).astype(o_ref.dtype)            # ReLU, bf16 out


def linear_kernel(x_ref, w_ref, o_ref):
    # grid = (core_split, k). Accumulate straight into the resident f32 output block
    # (same block index across the inner "arbitrary" k axis).
    @pl.when(pl.program_id(1) == 0)
    def _():
        o_ref[...] = jnp.zeros_like(o_ref)

    o_ref[...] += jnp.dot(x_ref[...], w_ref[...],
                          preferred_element_type=jnp.float32)


# --------------------------- parameter preparation -------------------------- #

def prepare_params(params):
    """One-time layout/dtype folding of the PyTorch-shaped parameters."""
    conv_w, conv_b, gamma, beta, lin_w, lin_b = params
    del conv_b  # cancels under BatchNorm mean subtraction (see kernel comment)

    # Conv weight: (Cout, Cin, K, K) -> rows in (kh, kw, c) order, zero-pad 75 -> 128.
    w2d = jnp.transpose(conv_w, (2, 3, 1, 0)).reshape(KDIM, C_OUT)
    w2d = jnp.pad(w2d, ((0, KDIM_PAD - KDIM), (0, 0)))

    # Linear weight: permute columns from PyTorch flatten order (c,h,w) to the kernel's
    # conv-output flatten order (h,w,c); transpose and cast to bf16 once.
    lin_w_hwc = jnp.transpose(
        lin_w.reshape(LIN_OUT, C_OUT, H_OUT, W_OUT), (0, 2, 3, 1)
    ).reshape(LIN_OUT, FLAT)
    lin_wt = lin_w_hwc.T.astype(jnp.bfloat16)                        # [65536, 64]

    return (w2d, gamma.reshape(1, C_OUT), beta.reshape(1, C_OUT), lin_wt, lin_b)


# ------------------------------- glue (JAX) -------------------------------- #

def im2col(x_nchw):
    """Patches in (n, ho, wo, kh, kw, c) order -> [N*Ho*Wo, 128] (zero padded cols)."""
    n = x_nchw.shape[0]
    x = jnp.transpose(x_nchw, (0, 2, 3, 1))                          # NHWC (tiny)
    xp = jnp.pad(x, ((0, 0), (PAD, PAD), (PAD, PAD), (0, 0)))
    hh = (jnp.arange(H_OUT) * STRIDE)[:, None, None, None] \
        + jnp.arange(KSIZE)[None, None, :, None]                     # [Ho,1,K,1]
    ww = (jnp.arange(W_OUT) * STRIDE)[None, :, None, None] \
        + jnp.arange(KSIZE)[None, None, None, :]                     # [1,Wo,1,K]
    p = xp[:, hh, ww, :]                                             # [N,Ho,Wo,K,K,C]
    p = p.reshape(n * H_OUT * W_OUT, KDIM)
    return jnp.pad(p, ((0, 0), (0, KDIM_PAD - KDIM)))                # [rows, 128]


@jax.jit
def forward(x, prep):
    w2d, gamma, beta, lin_wt, lin_b = prep
    n = x.shape[0]
    rows = n * H_OUT * W_OUT

    patches = im2col(x)                                              # [rows, 128] f32

    # Single-block conv + BN(batch stats) + ReLU, bf16 output (halves writeback).
    conv_out = pl.pallas_call(
        conv_bn_relu_kernel,
        out_shape=jax.ShapeDtypeStruct((rows, C_OUT), jnp.bfloat16),
    )(patches, w2d, gamma, beta)

    # Flatten order is already (h, w, c) and matches the permuted linear weight.
    x_flat = conv_out.reshape(n, FLAT)                               # bf16

    # Linear: K reduction split across 2 "core" slices (parallel axis -> both v7x TCs),
    # inner K axis accumulates into each slice's resident f32 output block.
    partials = pl.pallas_call(
        linear_kernel,
        out_shape=jax.ShapeDtypeStruct((KT_SPLIT, n, LIN_OUT), jnp.float32),
        grid_spec=pltpu.PrefetchScalarGridSpec(
            num_scalar_prefetch=0,
            grid=(KT_SPLIT, KT_HALF),
            in_specs=[
                pl.BlockSpec((n, TK), lambda c, k: (0, c * KT_HALF + k)),
                pl.BlockSpec((TK, LIN_OUT), lambda c, k: (c * KT_HALF + k, 0)),
            ],
            out_specs=pl.BlockSpec((None, n, LIN_OUT), lambda c, k: (c, 0, 0)),
        ),
        compiler_params=pltpu.CompilerParams(
            dimension_semantics=("parallel", "arbitrary")),
    )(x_flat, lin_wt)

    return partials.sum(axis=0) + lin_b[None, :]


# --------------------------- pure-JAX reference ----------------------------- #

def reference(x, params):
    conv_w, conv_b, gamma, beta, lin_w, lin_b = params
    y = jax.lax.conv_general_dilated(
        x, conv_w, window_strides=(STRIDE, STRIDE),
        padding=((PAD, PAD), (PAD, PAD)),
        dimension_numbers=("NCHW", "OIHW", "NCHW"))
    y = y + conv_b.reshape(1, C_OUT, 1, 1)
    mean = jnp.mean(y, axis=(0, 2, 3), keepdims=True)
    var = jnp.mean(jnp.square(y - mean), axis=(0, 2, 3), keepdims=True)
    y = (y - mean) * jax.lax.rsqrt(var + BN_EPS)
    y = y * gamma.reshape(1, C_OUT, 1, 1) + beta.reshape(1, C_OUT, 1, 1)
    y = jnp.maximum(y, 0.0)
    y = y.reshape(x.shape[0], FLAT)                                  # (c,h,w) flatten
    return y @ lin_w.T + lin_b


if __name__ == "__main__":
    key = jax.random.PRNGKey(0)
    ks = jax.random.split(key, 7)
    batch = 2
    x = jax.random.normal(ks[0], (batch, C_IN, H_IN, W_IN), jnp.float32)

    # Deterministic synthetic parameters (shapes match the PyTorch module).
    conv_w = 0.05 * jax.random.normal(ks[1], (C_OUT, C_IN, KSIZE, KSIZE), jnp.float32)
    conv_b = 0.05 * jax.random.normal(ks[2], (C_OUT,), jnp.float32)
    gamma = 1.0 + 0.1 * jax.random.normal(ks[3], (C_OUT,), jnp.float32)
    beta = 0.1 * jax.random.normal(ks[4], (C_OUT,), jnp.float32)
    lin_w = (1.0 / 256.0) * jax.random.normal(ks[5], (LIN_OUT, FLAT), jnp.float32)
    lin_b = 0.01 * jax.random.normal(ks[6], (LIN_OUT,), jnp.float32)
    params = (conv_w, conv_b, gamma, beta, lin_w, lin_b)

    prep = jax.block_until_ready(prepare_params(params))             # one-time folding

    out = jax.block_until_ready(forward(x, prep))
    assert out.shape == (batch, LIN_OUT) and out.dtype == jnp.float32

    ref = jax.block_until_ready(reference(x, params))
    assert jnp.allclose(out, ref, rtol=5e-2, atol=5e-2), \
        f"max abs diff {jnp.max(jnp.abs(out - ref))}"

    print("KERNEL_OK")
</pallas_src>

<mosaic_0001>
module attributes {stable_mosaic.version = 11 : i64} {
  func.func @conv_bn_relu_kernel(%arg0: memref<512x128xf32, #tpu.memory_space<vmem>>, %arg1: memref<128x256xf32, #tpu.memory_space<vmem>>, %arg2: memref<1x256xf32, #tpu.memory_space<vmem>>, %arg3: memref<1x256xf32, #tpu.memory_space<vmem>>, %arg4: memref<512x256xbf16, #tpu.memory_space<vmem>>) attributes {dimension_semantics = [], scalar_prefetch = 0 : i64, scratch_operands = 0 : i64, tpu.core_type = #tpu.core_type<tc>} {
    %c0 = arith.constant 0 : index
    %c0_0 = arith.constant 0 : index
    %0 = vector.load %arg0[%c0, %c0_0] : memref<512x128xf32, #tpu.memory_space<vmem>>, vector<512x128xf32>
    %c0_1 = arith.constant 0 : index
    %c0_2 = arith.constant 0 : index
    %1 = vector.load %arg1[%c0_1, %c0_2] : memref<128x256xf32, #tpu.memory_space<vmem>>, vector<128x256xf32>
    %cst = arith.constant dense<0.000000e+00> : vector<512x256xf32>
    %2 = tpu.matmul %0, %1, %cst {dimension_numbers = #tpu.dot_dimension_numbers<[1], [0], [0], [1], [0, 0, 1, 1], [], []>} : vector<512x128xf32>, vector<128x256xf32>, vector<512x256xf32> -> vector<512x256xf32>
    %cst_3 = arith.constant dense<0.000000e+00> : vector<256xf32>
    %3 = vector.multi_reduction <add>, %2, %cst_3 [0] : vector<512x256xf32> to vector<256xf32>
    %4 = vector.shape_cast %3 : vector<256xf32> to vector<1x256xf32>
    %cst_4 = arith.constant 5.120000e+02 : f32
    %5 = vector.broadcast %cst_4 : f32 to vector<1x256xf32>
    %6 = arith.divf %4, %5 : vector<1x256xf32>
    %7 = vector.broadcast %6 : vector<1x256xf32> to vector<512x256xf32>
    %8 = arith.subf %2, %7 : vector<512x256xf32>
    %9 = arith.mulf %8, %8 : vector<512x256xf32>
    %cst_5 = arith.constant dense<0.000000e+00> : vector<256xf32>
    %10 = vector.multi_reduction <add>, %9, %cst_5 [0] : vector<512x256xf32> to vector<256xf32>
    %11 = vector.shape_cast %10 : vector<256xf32> to vector<1x256xf32>
    %cst_6 = arith.constant 5.120000e+02 : f32
    %12 = vector.broadcast %cst_6 : f32 to vector<1x256xf32>
    %13 = arith.divf %11, %12 : vector<1x256xf32>
    %14 = vector.broadcast %6 : vector<1x256xf32> to vector<512x256xf32>
    %15 = arith.subf %2, %14 : vector<512x256xf32>
    %cst_7 = arith.constant 9.99999974E-6 : f32
    %16 = vector.broadcast %cst_7 : f32 to vector<1x256xf32>
    %17 = arith.addf %13, %16 : vector<1x256xf32>
    %18 = math.rsqrt %17 : vector<1x256xf32>
    %19 = vector.broadcast %18 : vector<1x256xf32> to vector<512x256xf32>
    %20 = arith.mulf %15, %19 : vector<512x256xf32>
    %c0_8 = arith.constant 0 : index
    %c0_9 = arith.constant 0 : index
    %21 = vector.load %arg2[%c0_8, %c0_9] : memref<1x256xf32, #tpu.memory_space<vmem>>, vector<1x256xf32>
    %22 = vector.broadcast %21 : vector<1x256xf32> to vector<512x256xf32>
    %23 = arith.mulf %20, %22 : vector<512x256xf32>
    %c0_10 = arith.constant 0 : index
    %c0_11 = arith.constant 0 : index
    %24 = vector.load %arg3[%c0_10, %c0_11] : memref<1x256xf32, #tpu.memory_space<vmem>>, vector<1x256xf32>
    %25 = vector.broadcast %24 : vector<1x256xf32> to vector<512x256xf32>
    %26 = arith.addf %23, %25 : vector<512x256xf32>
    %cst_12 = arith.constant 0.000000e+00 : f32
    %27 = vector.broadcast %cst_12 : f32 to vector<512x256xf32>
    %28 = arith.maximumf %26, %27 : vector<512x256xf32>
    %29 = arith.truncf %28 : vector<512x256xf32> to vector<512x256xbf16>
    %c0_13 = arith.constant 0 : index
    %c0_14 = arith.constant 0 : index
    %30 = vector.load %arg4[%c0_13, %c0_14] : memref<512x256xbf16, #tpu.memory_space<vmem>>, vector<512x256xbf16>
    tpu.vector_store %arg4[%c0_13, %c0_14], %29 {strides = array<i32>} : memref<512x256xbf16, #tpu.memory_space<vmem>>, vector<512x256xbf16>,
    return
  }
}

module attributes {stable_mosaic.version = 11 : i64} {
  func.func @linear_kernel(%arg0: i32, %arg1: i32, %arg2: memref<2x16384xbf16, #tpu.memory_space<vmem>>, %arg3: memref<16384x64xbf16, #tpu.memory_space<vmem>>, %arg4: memref<1x2x64xf32, #tpu.memory_space<vmem>>) attributes {dimension_semantics = [#tpu.dimension_semantics<parallel>, #tpu.dimension_semantics<arbitrary>], iteration_bounds = array<i64: 2, 2>, scalar_prefetch = 0 : i64, scratch_operands = 0 : i64, tpu.core_type = #tpu.core_type<tc>, window_params = [{transform_indices = @transform_0, window_bounds = array<i64: 2, 16384>}, {transform_indices = @transform_1, window_bounds = array<i64: 16384, 64>}, {transform_indices = @transform_2, window_bounds = array<i64: 1, 2, 64>}]} {
    %c0_i32 = arith.constant 0 : i32
    %0 = arith.cmpi eq, %arg1, %c0_i32 : i32
    %1 = arith.extui %0 : i1 to i32
    %c0_i32_0 = arith.constant 0 : i32
    %2 = arith.cmpi ne, %1, %c0_i32_0 : i32
    scf.if %2 {
      %cst_10 = arith.constant 0.000000e+00 : f32
      %12 = vector.broadcast %cst_10 : f32 to vector<2x64xf32>
      %c0_11 = arith.constant 0 : index
      %c0_12 = arith.constant 0 : index
      %c0_13 = arith.constant 0 : index
      %13 = vector.load %arg4[%c0_11, %c0_12, %c0_13] : memref<1x2x64xf32, #tpu.memory_space<vmem>>, vector<1x2x64xf32>
      %14 = vector.shape_cast %13 : vector<1x2x64xf32> to vector<2x64xf32>
      %15 = vector.shape_cast %12 : vector<2x64xf32> to vector<1x2x64xf32>
      tpu.vector_store %arg4[%c0_11, %c0_12, %c0_13], %15 {strides = array<i32>} : memref<1x2x64xf32, #tpu.memory_space<vmem>>, vector<1x2x64xf32>,
    } else {
    }
    %c0 = arith.constant 0 : index
    %c0_1 = arith.constant 0 : index
    %c0_2 = arith.constant 0 : index
    %3 = vector.load %arg4[%c0, %c0_1, %c0_2] : memref<1x2x64xf32, #tpu.memory_space<vmem>>, vector<1x2x64xf32>
    %4 = vector.shape_cast %3 : vector<1x2x64xf32> to vector<2x64xf32>
    %c0_3 = arith.constant 0 : index
    %c0_4 = arith.constant 0 : index
    %5 = vector.load %arg2[%c0_3, %c0_4] : memref<2x16384xbf16, #tpu.memory_space<vmem>>, vector<2x16384xbf16>
    %c0_5 = arith.constant 0 : index
    %c0_6 = arith.constant 0 : index
    %6 = vector.load %arg3[%c0_5, %c0_6] : memref<16384x64xbf16, #tpu.memory_space<vmem>>, vector<16384x64xbf16>
    %cst = arith.constant dense<0.000000e+00> : vector<2x64xf32>
    %7 = tpu.matmul %5, %6, %cst {dimension_numbers = #tpu.dot_dimension_numbers<[1], [0], [0], [1], [0, 0, 1, 1], [], []>} : vector<2x16384xbf16>, vector<16384x64xbf16>, vector<2x64xf32> -> vector<2x64xf32>
    %8 = arith.addf %4, %7 : vector<2x64xf32>
    %c0_7 = arith.constant 0 : index
    %c0_8 = arith.constant 0 : index
    %c0_9 = arith.constant 0 : index
    %9 = vector.load %arg4[%c0_7, %c0_8, %c0_9] : memref<1x2x64xf32, #tpu.memory_space<vmem>>, vector<1x2x64xf32>
    %10 = vector.shape_cast %9 : vector<1x2x64xf32> to vector<2x64xf32>
    %11 = vector.shape_cast %8 : vector<2x64xf32> to vector<1x2x64xf32>
    tpu.vector_store %arg4[%c0_7, %c0_8, %c0_9], %11 {strides = array<i32>} : memref<1x2x64xf32, #tpu.memory_space<vmem>>, vector<1x2x64xf32>,
    return
  }
  func.func @transform_0(%arg0: i32, %arg1: i32) -> (i32, i32) {
    %c2_i32 = arith.constant 2 : i32
    %0 = arith.muli %arg0, %c2_i32 : i32
    %1 = arith.addi %0, %arg1 : i32
    %c0_i32 = arith.constant 0 : i32
    %c0_i32_0 = arith.constant 0 : i32
    return %c0_i32, %1 : i32, i32
  }
  func.func @transform_1(%arg0: i32, %arg1: i32) -> (i32, i32) {
    %c2_i32 = arith.constant 2 : i32
    %0 = arith.muli %arg0, %c2_i32 : i32
    %1 = arith.addi %0, %arg1 : i32
    %c0_i32 = arith.constant 0 : i32
    %c0_i32_0 = arith.constant 0 : i32
    return %1, %c0_i32 : i32, i32
  }
  func.func @transform_2(%arg0: i32, %arg1: i32) -> (i32, i32, i32) {
    %c0_i32 = arith.constant 0 : i32
    %c0_i32_0 = arith.constant 0 : i32
    %c0_i32_1 = arith.constant 0 : i32
    return %arg0, %c0_i32, %c0_i32_0 : i32, i32, i32
  }
}

</mosaic_0001>

<bundles_post_ra>
// kernel: forward.2
= control target key start
LH: loop header
LB: loop body
LE: loop exit
PB: predicated region body
PF: predicated region fallthrough
CT: control target
= control target key end

     0   :  { %s4853_s1 = inlined_call_operand.vmem [shape: f32[128,256], index: 1, kind: input, shape index: {}]   ;;  %s4854_s0 = inlined_call_operand.vmem [shape: f32[512,128], index: 0, kind: input, shape index: {}]   ;;  %s4855_s2 = inlined_call_operand.vmem [shape: f32[1,256], index: 2, kind: input, shape index: {}]   ;;  %s4856_s3 = inlined_call_operand.vmem [shape: f32[1,256], index: 3, kind: input, shape index: {}]   ;;  %s4857_s4 = inlined_call_operand.vmem [shape: bf16[512,256], index: 4, kind: output, shape index: {}]  }
   0x1   :  { %v111_v0 = vld [vmem:[%s4853_s1 + $0xf0] sm:$0xff]  ;;  %v112_v1 = vld [vmem:[%s4853_s1 + $0xf8] sm:$0xff]  ;;  %v109_v2 = vld [vmem:[%s4853_s1 + $0xe0] sm:$0xff] }
   0x2   :  { %113 = vmatpush.msra.mxu0 %v111_v0  ;;  %322 = vmatpush.msra.mxu1 %v112_v1  ;;  %v110_v3 = vld [vmem:[%s4853_s1 + $0xe8] sm:$0xff]  ;;  %v107_v4 = vld [vmem:[%s4853_s1 + $0xd0] sm:$0xff]  ;;  %v108_v5 = vld [vmem:[%s4853_s1 + $0xd8] sm:$0xff] }
   0x3   :  { %1752 = vmatpush.msra.mxu2 %v111_v0  ;;  %1768 = vmatpush.msra.mxu3 %v112_v1  ;;  %v105_v6 = vld [vmem:[%s4853_s1 + $0xc0] sm:$0xff]  ;;  %v106_v7 = vld [vmem:[%s4853_s1 + $0xc8] sm:$0xff]  ;;  %v103_v8 = vld [vmem:[%s4853_s1 + $0xb0] sm:$0xff] }
   0x4   :  { %114 = vmatpush.msra.mxu0 %v109_v2  ;;  %323 = vmatpush.msra.mxu1 %v110_v3  ;;  %v104_v9 = vld [vmem:[%s4853_s1 + $0xb8] sm:$0xff]  ;;  %v101_v10 = vld [vmem:[%s4853_s1 + $0xa0] sm:$0xff]  ;;  %v102_v11 = vld [vmem:[%s4853_s1 + $0xa8] sm:$0xff] }
   0x5   :  { %1753 = vmatpush.msra.mxu2 %v109_v2  ;;  %1769 = vmatpush.msra.mxu3 %v110_v3  ;;  %v99_v12 = vld [vmem:[%s4853_s1 + $0x90] sm:$0xff]  ;;  %v100_v13 = vld [vmem:[%s4853_s1 + $0x98] sm:$0xff]  ;;  %v97_v14 = vld [vmem:[%s4853_s1 + $0x80] sm:$0xff] }
   0x6   :  { %115 = vmatpush.msra.mxu0 %v107_v4  ;;  %324 = vmatpush.msra.mxu1 %v108_v5  ;;  %v98_v15 = vld [vmem:[%s4853_s1 + $0x88] sm:$0xff]  ;;  %v95_v16 = vld [vmem:[%s4853_s1 + $0x70] sm:$0xff]  ;;  %v96_v17 = vld [vmem:[%s4853_s1 + $0x78] sm:$0xff] }
   0x7   :  { %1754 = vmatpush.msra.mxu2 %v107_v4  ;;  %1770 = vmatpush.msra.mxu3 %v108_v5  ;;  %v93_v18 = vld [vmem:[%s4853_s1 + $0x60] sm:$0xff]  ;;  %v94_v19 = vld [vmem:[%s4853_s1 + $0x68] sm:$0xff]  ;;  %v91_v20 = vld [vmem:[%s4853_s1 + $0x50] sm:$0xff] }
   0x8   :  { %116 = vmatpush.msra.mxu0 %v105_v6  ;;  %325 = vmatpush.msra.mxu1 %v106_v7  ;;  %v92_v21 = vld [vmem:[%s4853_s1 + $0x58] sm:$0xff]  ;;  %v89_v22 = vld [vmem:[%s4853_s1 + $0x40] sm:$0xff]  ;;  %v90_v23 = vld [vmem:[%s4853_s1 + $0x48] sm:$0xff] }
   0x9   :  { %1755 = vmatpush.msra.mxu2 %v105_v6  ;;  %1771 = vmatpush.msra.mxu3 %v106_v7  ;;  %v87_v24 = vld [vmem:[%s4853_s1 + $0x30] sm:$0xff]  ;;  %v88_v25 = vld [vmem:[%s4853_s1 + $0x38] sm:$0xff]  ;;  %v85_v26 = vld [vmem:[%s4853_s1 + $0x20] sm:$0xff] }
   0xa   :  { %117 = vmatpush.msra.mxu0 %v103_v8  ;;  %326 = vmatpush.msra.mxu1 %v104_v9  ;;  %v86_v27 = vld [vmem:[%s4853_s1 + $0x28] sm:$0xff]  ;;  %v83_v28 = vld [vmem:[%s4853_s1 + $0x10] sm:$0xff]  ;;  %v84_v29 = vld [vmem:[%s4853_s1 + $0x18] sm:$0xff] }
   0xb   :  { %1756 = vmatpush.msra.mxu2 %v103_v8  ;;  %1772 = vmatpush.msra.mxu3 %v104_v9  ;;  %v81_v30 = vld [vmem:[%s4853_s1] sm:$0xff]  ;;  %v82_v31 = vld [vmem:[%s4853_s1 + $0x8] sm:$0xff]  ;;  %v19_v34 = vld [vmem:[%s4854_s0 + $0x10] sm:$0xff] }
   0xc   :  { %118 = vmatpush.msra.mxu0 %v101_v10  ;;  %327 = vmatpush.msra.mxu1 %v102_v11  ;;  %v17_v32 = vld [vmem:[%s4854_s0] sm:$0xff]  ;;  %v18_v33 = vld [vmem:[%s4854_s0 + $0x8] sm:$0xff]  ;;  %v20_v35 = vld [vmem:[%s4854_s0 + $0x18] sm:$0xff] }
   0xd   :  { %1757 = vmatpush.msra.mxu2 %v101_v10  ;;  %1773 = vmatpush.msra.mxu3 %v102_v11  ;;  %v49_v36 = vld [vmem:[%s4854_s0 + $0x100] sm:$0xff]  ;;  %v50_v38 = vld [vmem:[%s4854_s0 + $0x108] sm:$0xff]  ;;  %v51_v40 = vld [vmem:[%s4854_s0 + $0x110] sm:$0xff] }
   0xe   :  { %119 = vmatpush.msra.mxu0 %v99_v12  ;;  %328 = vmatpush.msra.mxu1 %v100_v13  ;;  %v21_v37 = vld [vmem:[%s4854_s0 + $0x20] sm:$0xff]  ;;  %v22_v39 = vld [vmem:[%s4854_s0 + $0x28] sm:$0xff]  ;;  %v23_v41 = vld [vmem:[%s4854_s0 + $0x30] sm:$0xff] }
   0xf   :  { %1758 = vmatpush.msra.mxu2 %v99_v12  ;;  %1774 = vmatpush.msra.mxu3 %v100_v13  ;;  %v52_v42 = vld [vmem:[%s4854_s0 + $0x118] sm:$0xff]  ;;  %v53_v44 = vld [vmem:[%s4854_s0 + $0x120] sm:$0xff]  ;;  %v54_v46 = vld [vmem:[%s4854_s0 + $0x128] sm:$0xff] }
  0x10   :  { %120 = vmatpush.msra.mxu0 %v97_v14  ;;  %329 = vmatpush.msra.mxu1 %v98_v15  ;;  %v24_v43 = vld [vmem:[%s4854_s0 + $0x38] sm:$0xff]  ;;  %v25_v45 = vld [vmem:[%s4854_s0 + $0x40] sm:$0xff]  ;;  %v26_v47 = vld [vmem:[%s4854_s0 + $0x48] sm:$0xff] }
  0x11   :  { %1759 = vmatpush.msra.mxu2 %v97_v14  ;;  %1775 = vmatpush.msra.mxu3 %v98_v15  ;;  %v55_v48 = vld [vmem:[%s4854_s0 + $0x130] sm:$0xff]  ;;  %v56_v50 = vld [vmem:[%s4854_s0 + $0x138] sm:$0xff]  ;;  %v57_v52 = vld [vmem:[%s4854_s0 + $0x140] sm:$0xff] }
  0x12   :  { %121 = vmatpush.msra.mxu0 %v95_v16  ;;  %330 = vmatpush.msra.mxu1 %v96_v17  ;;  %v27_v49 = vld [vmem:[%s4854_s0 + $0x50] sm:$0xff]  ;;  %v28_v51 = vld [vmem:[%s4854_s0 + $0x58] sm:$0xff]  ;;  %v29_v53 = vld [vmem:[%s4854_s0 + $0x60] sm:$0xff] }
  0x13   :  { %1760 = vmatpush.msra.mxu2 %v95_v16  ;;  %1776 = vmatpush.msra.mxu3 %v96_v17  ;;  %v58_v54 = vld [vmem:[%s4854_s0 + $0x148] sm:$0xff]  ;;  %v59_v56 = vld [vmem:[%s4854_s0 + $0x150] sm:$0xff]  ;;  %v60_v58 = vld [vmem:[%s4854_s0 + $0x158] sm:$0xff] }
  0x14   :  { %122 = vmatpush.msra.mxu0 %v93_v18  ;;  %331 = vmatpush.msra.mxu1 %v94_v19  ;;  %v30_v55 = vld [vmem:[%s4854_s0 + $0x68] sm:$0xff]  ;;  %v31_v57 = vld [vmem:[%s4854_s0 + $0x70] sm:$0xff]  ;;  %v32_v59 = vld [vmem:[%s4854_s0 + $0x78] sm:$0xff] }
  0x15   :  { %1761 = vmatpush.msra.mxu2 %v93_v18  ;;  %1777 = vmatpush.msra.mxu3 %v94_v19  ;;  %v61_v60 = vld [vmem:[%s4854_s0 + $0x160] sm:$0xff]  ;;  %v62_v0 = vld [vmem:[%s4854_s0 + $0x168] sm:$0xff]  ;;  %v63_v4 = vld [vmem:[%s4854_s0 + $0x170] sm:$0xff] }
  0x16   :  { %123 = vmatpush.msra.mxu0 %v91_v20  ;;  %332 = vmatpush.msra.mxu1 %v92_v21  ;;  %v33_v63 = vld [vmem:[%s4854_s0 + $0x80] sm:$0xff]  ;;  %v34_v3 = vld [vmem:[%s4854_s0 + $0x88] sm:$0xff]  ;;  %v35_v7 = vld [vmem:[%s4854_s0 + $0x90] sm:$0xff] }
  0x17   :  { %1762 = vmatpush.msra.mxu2 %v91_v20  ;;  %1778 = vmatpush.msra.mxu3 %v92_v21  ;;  %v64_v8 = vld [vmem:[%s4854_s0 + $0x178] sm:$0xff]  ;;  %v65_v12 = vld [vmem:[%s4854_s0 + $0x180] sm:$0xff]  ;;  %v66_v17 = vld [vmem:[%s4854_s0 + $0x188] sm:$0xff] }
  0x18   :  { %124 = vmatpush.msra.mxu0 %v89_v22  ;;  %333 = vmatpush.msra.mxu1 %v90_v23  ;;  %v36_v11 = vld [vmem:[%s4854_s0 + $0x98] sm:$0xff]  ;;  %v37_v15 = vld [vmem:[%s4854_s0 + $0xa0] sm:$0xff]  ;;  %v38_v20 = vld [vmem:[%s4854_s0 + $0xa8] sm:$0xff] }
  0x19   :  { %1763 = vmatpush.msra.mxu2 %v89_v22  ;;  %1779 = vmatpush.msra.mxu3 %v90_v23  ;;  %v67_v22 = vld [vmem:[%s4854_s0 + $0x190] sm:$0xff] }
  0x1a   :  { %125 = vmatpush.msra.mxu0 %v87_v24  ;;  %334 = vmatpush.msra.mxu1 %v88_v25 }
  0x1b   :  { %1764 = vmatpush.msra.mxu2 %v87_v24  ;;  %1780 = vmatpush.msra.mxu3 %v88_v25  ;;  %v39_v25 = vld [vmem:[%s4854_s0 + $0xb0] sm:$0xff] }
  0x1c   :  { %126 = vmatpush.msra.mxu0 %v85_v26  ;;  %335 = vmatpush.msra.mxu1 %v86_v27 }
  0x1d   :  { %1765 = vmatpush.msra.mxu2 %v85_v26  ;;  %1781 = vmatpush.msra.mxu3 %v86_v27  ;;  %v68_v27 = vld [vmem:[%s4854_s0 + $0x198] sm:$0xff] }
  0x1e   :  { %127 = vmatpush.msra.mxu0 %v83_v28  ;;  %336 = vmatpush.msra.mxu1 %v84_v29 }
  0x1f   :  { %1766 = vmatpush.msra.mxu2 %v83_v28  ;;  %1782 = vmatpush.msra.mxu3 %v84_v29 }
  0x20   :  { %128 = vmatpush.msra.mxu0 %v81_v30  ;;  %337 = vmatpush.msra.mxu1 %v82_v31 }
  0x21   :  { %129 = vmatmul.f32.vlgmr.msra.gmra.mxu0 %v17_v32  ;;  %338 = vmatmul.f32.vlgmr.msra.gmra.mxu1 %v17_v32 }
  0x22   :  { %1767 = vmatpush.msra.mxu2 %v81_v30  ;;  %1783 = vmatpush.msra.mxu3 %v82_v31  ;;  %v40_v31 = vld [vmem:[%s4854_s0 + $0xb8] sm:$0xff] }
  0x23   :  { %225 = vmatmul.f32.vlgmr.msra.gmra.mxu2 %v49_v36  ;;  %434 = vmatmul.f32.vlgmr.msra.gmra.mxu3 %v49_v36  ;;  %v41_v36 = vld [vmem:[%s4854_s0 + $0xc0] sm:$0xff] }
  0x29   :  { %132 = vmatmul.f32.gmra.mxu0 %v18_v33  ;;  %341 = vmatmul.f32.gmra.mxu1 %v18_v33  ;;  %v69_v33 = vld [vmem:[%s4854_s0 + $0x1a0] sm:$0xff] }
  0x2b   :  { %228 = vmatmul.f32.gmra.mxu2 %v50_v38  ;;  %437 = vmatmul.f32.gmra.mxu3 %v50_v38 }
  0x31   :  { %135 = vmatmul.f32.gmra.mxu0 %v19_v34  ;;  %344 = vmatmul.f32.gmra.mxu1 %v19_v34 }
  0x33   :  { %231 = vmatmul.f32.gmra.mxu2 %v51_v40  ;;  %440 = vmatmul.f32.gmra.mxu3 %v51_v40 }
  0x39   :  { %138 = vmatmul.f32.gmra.mxu0 %v20_v35  ;;  %347 = vmatmul.f32.gmra.mxu1 %v20_v35 }
  0x3b   :  { %234 = vmatmul.f32.gmra.mxu2 %v52_v42  ;;  %443 = vmatmul.f32.gmra.mxu3 %v52_v42  ;;  %v42_v42 = vld [vmem:[%s4854_s0 + $0xc8] sm:$0xff] }
  0x41   :  { %141 = vmatmul.f32.gmra.mxu0 %v21_v37  ;;  %350 = vmatmul.f32.gmra.mxu1 %v21_v37 }
  0x43   :  { %237 = vmatmul.f32.gmra.mxu2 %v53_v44  ;;  %446 = vmatmul.f32.gmra.mxu3 %v53_v44 }
  0x49   :  { %144 = vmatmul.f32.gmra.mxu0 %v22_v39  ;;  %353 = vmatmul.f32.gmra.mxu1 %v22_v39  ;;  %v70_v39 = vld [vmem:[%s4854_s0 + $0x1a8] sm:$0xff] }
  0x4b   :  { %240 = vmatmul.f32.gmra.mxu2 %v54_v46  ;;  %449 = vmatmul.f32.gmra.mxu3 %v54_v46 }
  0x51   :  { %147 = vmatmul.f32.gmra.mxu0 %v23_v41  ;;  %356 = vmatmul.f32.gmra.mxu1 %v23_v41 }
  0x53   :  { %243 = vmatmul.f32.gmra.mxu2 %v55_v48  ;;  %452 = vmatmul.f32.gmra.mxu3 %v55_v48  ;;  %v43_v48 = vld [vmem:[%s4854_s0 + $0xd0] sm:$0xff] }
  0x59   :  { %150 = vmatmul.f32.gmra.mxu0 %v24_v43  ;;  %359 = vmatmul.f32.gmra.mxu1 %v24_v43 }
  0x5b   :  { %246 = vmatmul.f32.gmra.mxu2 %v56_v50  ;;  %455 = vmatmul.f32.gmra.mxu3 %v56_v50  ;;  %v72_v50 = vld [vmem:[%s4854_s0 + $0x1b8] sm:$0xff] }
  0x61   :  { %153 = vmatmul.f32.gmra.mxu0 %v25_v45  ;;  %362 = vmatmul.f32.gmra.mxu1 %v25_v45  ;;  %v71_v45 = vld [vmem:[%s4854_s0 + $0x1b0] sm:$0xff] }
  0x63   :  { %249 = vmatmul.f32.gmra.mxu2 %v57_v52  ;;  %458 = vmatmul.f32.gmra.mxu3 %v57_v52 }
  0x69   :  { %156 = vmatmul.f32.gmra.mxu0 %v26_v47  ;;  %365 = vmatmul.f32.gmra.mxu1 %v26_v47 }
  0x6b   :  { %252 = vmatmul.f32.gmra.mxu2 %v58_v54  ;;  %461 = vmatmul.f32.gmra.mxu3 %v58_v54  ;;  %v44_v54 = vld [vmem:[%s4854_s0 + $0xd8] sm:$0xff] }
  0x71   :  { %159 = vmatmul.f32.gmra.mxu0 %v27_v49  ;;  %368 = vmatmul.f32.gmra.mxu1 %v27_v49 }
  0x73   :  { %255 = vmatmul.f32.gmra.mxu2 %v59_v56  ;;  %464 = vmatmul.f32.gmra.mxu3 %v59_v56  ;;  %v73_v56 = vld [vmem:[%s4854_s0 + $0x1c0] sm:$0xff] }
  0x79   :  { %162 = vmatmul.f32.gmra.mxu0 %v28_v51  ;;  %371 = vmatmul.f32.gmra.mxu1 %v28_v51 }
  0x7b   :  { %258 = vmatmul.f32.gmra.mxu2 %v60_v58  ;;  %467 = vmatmul.f32.gmra.mxu3 %v60_v58 }
  0x81   :  { %165 = vmatmul.f32.gmra.mxu0 %v29_v53  ;;  %374 = vmatmul.f32.gmra.mxu1 %v29_v53 }
  0x83   :  { %261 = vmatmul.f32.gmra.mxu2 %v61_v60  ;;  %470 = vmatmul.f32.gmra.mxu3 %v61_v60  ;;  %v45_v60 = vld [vmem:[%s4854_s0 + $0xe0] sm:$0xff] }
  0x89   :  { %168 = vmatmul.f32.gmra.mxu0 %v30_v55  ;;  %377 = vmatmul.f32.gmra.mxu1 %v30_v55 }
  0x8b   :  { %264 = vmatmul.f32.gmra.mxu2 %v62_v0  ;;  %473 = vmatmul.f32.gmra.mxu3 %v62_v0  ;;  %v74_v0 = vld [vmem:[%s4854_s0 + $0x1c8] sm:$0xff] }
  0x91   :  { %171 = vmatmul.f32.gmra.mxu0 %v31_v57  ;;  %380 = vmatmul.f32.gmra.mxu1 %v31_v57 }
  0x93   :  { %267 = vmatmul.f32.gmra.mxu2 %v63_v4  ;;  %476 = vmatmul.f32.gmra.mxu3 %v63_v4 }
  0x99   :  { %174 = vmatmul.f32.gmra.mxu0 %v32_v59  ;;  %383 = vmatmul.f32.gmra.mxu1 %v32_v59 }
  0x9b   :  { %270 = vmatmul.f32.gmra.mxu2 %v64_v8  ;;  %479 = vmatmul.f32.gmra.mxu3 %v64_v8 }
  0x9e   :  { %v2000_v61 = vpop.f32.mrf.mxu0  ;;  %v2002_v62 = vpop.f32.mrf.mxu1 }
  0x9f   :  { %5080 = vst [vmem:[#allocation2_spill] sm:$0xff] %v2000_v61 }
  0xa0   :  { %5081 = vst [vmem:[#allocation3_spill] sm:$0xff] %v2002_v62 }
  0xa1   :  { %177 = vmatmul.f32.gmra.mxu0 %v33_v63  ;;  %386 = vmatmul.f32.gmra.mxu1 %v33_v63 }
  0xa3   :  { %273 = vmatmul.f32.gmra.mxu2 %v65_v12  ;;  %482 = vmatmul.f32.gmra.mxu3 %v65_v12  ;;  %v75_v12 = vld [vmem:[%s4854_s0 + $0x1d0] sm:$0xff] }
  0xa6   :  { %v2010_v1 = vpop.f32.mrf.mxu0  ;;  %v2012_v2 = vpop.f32.mrf.mxu1 }
  0xa7   :  { %5082 = vst [vmem:[#allocation4_spill] sm:$0xff] %v2010_v1  ;;  %v2047_v16 = vpop.f32.mrf.mxu2  ;;  %v2076_v28 = vpop.f32.mrf.mxu3 }
  0xa8   :  { %5083 = vst [vmem:[#allocation5_spill] sm:$0xff] %v2012_v2 }
  0xa9   :  { %180 = vmatmul.f32.gmra.mxu0 %v34_v3  ;;  %389 = vmatmul.f32.gmra.mxu1 %v34_v3  ;;  %5088 = vst [vmem:[#allocation10_spill] sm:$0xff] %v2047_v16 }
  0xaa   :  { %5093 = vst [vmem:[#allocation15_spill] sm:$0xff] %v2076_v28 }
  0xab   :  { %276 = vmatmul.f32.gmra.mxu2 %v66_v17  ;;  %485 = vmatmul.f32.gmra.mxu3 %v66_v17 }
  0xae   :  { %v2020_v5 = vpop.f32.mrf.mxu0  ;;  %v2022_v6 = vpop.f32.mrf.mxu1 }
  0xaf   :  { %5084 = vst [vmem:[#allocation6_spill] sm:$0xff] %v2020_v5  ;;  %v2059_v21 = vpop.f32.mrf.mxu2  ;;  %v2097_v37 = vpop.f32.mrf.mxu3 }
  0xb0   :  { %5085 = vst [vmem:[#allocation7_spill] sm:$0xff] %v2022_v6 }
  0xb1   :  { %183 = vmatmul.f32.gmra.mxu0 %v35_v7  ;;  %392 = vmatmul.f32.gmra.mxu1 %v35_v7  ;;  %5090 = vst [vmem:[#allocation12_spill] sm:$0xff] %v2059_v21  ;;  %v46_v7 = vld [vmem:[%s4854_s0 + $0xe8] sm:$0xff] }
  0xb2   :  { %5097 = vst [vmem:[#allocation19_spill] sm:$0xff] %v2097_v37 }
  0xb3   :  { %279 = vmatmul.f32.gmra.mxu2 %v67_v22  ;;  %488 = vmatmul.f32.gmra.mxu3 %v67_v22 }
  0xb6   :  { %v2030_v9 = vpop.f32.mrf.mxu0  ;;  %v2032_v10 = vpop.f32.mrf.mxu1 }
  0xb7   :  { %5086 = vst [vmem:[#allocation8_spill] sm:$0xff] %v2032_v10  ;;  %v2071_v26 = vpop.f32.mrf.mxu2  ;;  %v2113_v44 = vpop.f32.mrf.mxu3 }
  0xb8   :  { %5092 = vst [vmem:[#allocation14_spill] sm:$0xff] %v2071_v26 }
  0xb9   :  { %186 = vmatmul.f32.gmra.mxu0 %v36_v11  ;;  %395 = vmatmul.f32.gmra.mxu1 %v36_v11  ;;  %5101 = vst [vmem:[#allocation23_spill] sm:$0xff] %v2113_v44 }
  0xbb   :  { %282 = vmatmul.f32.gmra.mxu2 %v68_v27  ;;  %491 = vmatmul.f32.gmra.mxu3 %v68_v27 }
  0xbe   :  { %v2040_v13 = vpop.f32.mrf.mxu0  ;;  %v2042_v14 = vpop.f32.mrf.mxu1 }
  0xbf   :  { %5087 = vst [vmem:[#allocation9_spill] sm:$0xff] %v2042_v14  ;;  %v2085_v32 = vpop.f32.mrf.mxu2  ;;  %v2130_v51 = vpop.f32.mrf.mxu3 }
  0xc0   :  { %5095 = vst [vmem:[#allocation17_spill] sm:$0xff] %v2085_v32 }
  0xc1   :  { %189 = vmatmul.f32.gmra.mxu0 %v37_v15  ;;  %398 = vmatmul.f32.gmra.mxu1 %v37_v15  ;;  %5104 = vst [vmem:[#allocation26_spill] sm:$0xff] %v2130_v51 }
  0xc3   :  { %285 = vmatmul.f32.gmra.mxu2 %v69_v33  ;;  %494 = vmatmul.f32.gmra.mxu3 %v69_v33 }
  0xc6   :  { %v2052_v18 = vpop.f32.mrf.mxu0  ;;  %v2054_v19 = vpop.f32.mrf.mxu1 }
  0xc7   :  { %5089 = vst [vmem:[#allocation11_spill] sm:$0xff] %v2054_v19  ;;  %v2099_v38 = vpop.f32.mrf.mxu2  ;;  %v2144_v57 = vpop.f32.mrf.mxu3 }
  0xc8   :  { %5098 = vst [vmem:[#allocation20_spill] sm:$0xff] %v2099_v38 }
  0xc9   :  { %192 = vmatmul.f32.gmra.mxu0 %v38_v20  ;;  %401 = vmatmul.f32.gmra.mxu1 %v38_v20  ;;  %5107 = vst [vmem:[#allocation29_spill] sm:$0xff] %v2144_v57  ;;  %v47_v20 = vld [vmem:[%s4854_s0 + $0xf0] sm:$0xff] }
  0xcb   :  { %288 = vmatmul.f32.gmra.mxu2 %v70_v39  ;;  %497 = vmatmul.f32.gmra.mxu3 %v70_v39 }
  0xce   :  { %v2064_v23 = vpop.f32.mrf.mxu0  ;;  %v2066_v24 = vpop.f32.mrf.mxu1 }
  0xcf   :  { %5091 = vst [vmem:[#allocation13_spill] sm:$0xff] %v2066_v24  ;;  %v2111_v43 = vpop.f32.mrf.mxu2  ;;  %v2165_v8 = vpop.f32.mrf.mxu3 }
  0xd0   :  { %5100 = vst [vmem:[#allocation22_spill] sm:$0xff] %v2111_v43 }
  0xd1   :  { %195 = vmatmul.f32.gmra.mxu0 %v39_v25  ;;  %404 = vmatmul.f32.gmra.mxu1 %v39_v25  ;;  %5111 = vst [vmem:[#allocation33_spill] sm:$0xff] %v2165_v8  ;;  %v76_v25 = vld [vmem:[%s4854_s0 + $0x1d8] sm:$0xff] }
  0xd3   :  { %291 = vmatmul.f32.gmra.mxu2 %v71_v45  ;;  %500 = vmatmul.f32.gmra.mxu3 %v71_v45 }
  0xd6   :  { %v2078_v29 = vpop.f32.mrf.mxu0  ;;  %v2080_v30 = vpop.f32.mrf.mxu1 }
  0xd7   :  { %5094 = vst [vmem:[#allocation16_spill] sm:$0xff] %v2080_v30  ;;  %v2125_v49 = vpop.f32.mrf.mxu2  ;;  %v2184_v27 = vpop.f32.mrf.mxu3 }
  0xd8   :  { %5103 = vst [vmem:[#allocation25_spill] sm:$0xff] %v2125_v49 }
  0xd9   :  { %198 = vmatmul.f32.gmra.mxu0 %v40_v31  ;;  %407 = vmatmul.f32.gmra.mxu1 %v40_v31  ;;  %5115 = vst [vmem:[#allocation37_spill] sm:$0xff] %v2184_v27 }
  0xdb   :  { %294 = vmatmul.f32.gmra.mxu2 %v72_v50  ;;  %503 = vmatmul.f32.gmra.mxu3 %v72_v50 }
  0xde   :  { %v2090_v34 = vpop.f32.mrf.mxu0  ;;  %v2092_v35 = vpop.f32.mrf.mxu1 }
  0xdf   :  { %5096 = vst [vmem:[#allocation18_spill] sm:$0xff] %v2092_v35  ;;  %v2139_v55 = vpop.f32.mrf.mxu2  ;;  %v2198_v45 = vpop.f32.mrf.mxu3 }
  0xe0   :  { %5106 = vst [vmem:[#allocation28_spill] sm:$0xff] %v2139_v55 }
  0xe1   :  { %201 = vmatmul.f32.gmra.mxu0 %v41_v36  ;;  %410 = vmatmul.f32.gmra.mxu1 %v41_v36  ;;  %v48_v36 = vld [vmem:[%s4854_s0 + $0xf8] sm:$0xff]  ;;  %5118 = vst [vmem:[#allocation40_spill] sm:$0xff] %v2198_v45 }
  0xe3   :  { %297 = vmatmul.f32.gmra.mxu2 %v73_v56  ;;  %506 = vmatmul.f32.gmra.mxu3 %v73_v56  ;;  %v78_v56 = vld [vmem:[%s4854_s0 + $0x1e8] sm:$0xff] }
  0xe6   :  { %v2104_v40 = vpop.f32.mrf.mxu0  ;;  %v2106_v41 = vpop.f32.mrf.mxu1 }
  0xe7   :  { %5099 = vst [vmem:[#allocation21_spill] sm:$0xff] %v2106_v41  ;;  %v2153_v63 = vpop.f32.mrf.mxu2 }
  0xe8   :  { %5109 = vst [vmem:[#allocation31_spill] sm:$0xff] %v2153_v63 }
  0xe9   :  { %204 = vmatmul.f32.gmra.mxu0 %v42_v42  ;;  %413 = vmatmul.f32.gmra.mxu1 %v42_v42  ;;  %v77_v42 = vld [vmem:[%s4854_s0 + $0x1e0] sm:$0xff] }
  0xeb   :  { %300 = vmatmul.f32.gmra.mxu2 %v74_v0  ;;  %509 = vmatmul.f32.gmra.mxu3 %v74_v0 }
  0xee   :  { %v2118_v46 = vpop.f32.mrf.mxu0  ;;  %v2120_v47 = vpop.f32.mrf.mxu1 }
  0xef   :  { %5102 = vst [vmem:[#allocation24_spill] sm:$0xff] %v2120_v47  ;;  %v2167_v11 = vpop.f32.mrf.mxu2 }
  0xf0   :  { %5112 = vst [vmem:[#allocation34_spill] sm:$0xff] %v2167_v11 }
  0xf1   :  { %207 = vmatmul.f32.gmra.mxu0 %v43_v48  ;;  %416 = vmatmul.f32.gmra.mxu1 %v43_v48 }
  0xf3   :  { %303 = vmatmul.f32.gmra.mxu2 %v75_v12  ;;  %512 = vmatmul.f32.gmra.mxu3 %v75_v12 }
  0xf6   :  { %v2132_v52 = vpop.f32.mrf.mxu0  ;;  %v2134_v53 = vpop.f32.mrf.mxu1 }
  0xf7   :  { %5105 = vst [vmem:[#allocation27_spill] sm:$0xff] %v2134_v53  ;;  %v2179_v22 = vpop.f32.mrf.mxu2 }
  0xf8   :  { %5114 = vst [vmem:[#allocation36_spill] sm:$0xff] %v2179_v22 }
  0xf9   :  { %210 = vmatmul.f32.gmra.mxu0 %v44_v54  ;;  %419 = vmatmul.f32.gmra.mxu1 %v44_v54 }
  0xfb   :  { %306 = vmatmul.f32.gmra.mxu2 %v76_v25  ;;  %515 = vmatmul.f32.gmra.mxu3 %v76_v25 }
  0xfe   :  { %v2146_v58 = vpop.f32.mrf.mxu0  ;;  %v2148_v59 = vpop.f32.mrf.mxu1 }
  0xff   :  { %5108 = vst [vmem:[#allocation30_spill] sm:$0xff] %v2148_v59  ;;  %v2193_v39 = vpop.f32.mrf.mxu2 }
 0x100   :  { %5117 = vst [vmem:[#allocation39_spill] sm:$0xff] %v2193_v39 }
 0x101   :  { %213 = vmatmul.f32.gmra.mxu0 %v45_v60  ;;  %422 = vmatmul.f32.gmra.mxu1 %v45_v60  ;;  %v2209_v60 = vpop.f32.mrf.mxu3 }
 0x102   :  { %5121 = vst [vmem:[#allocation43_spill] sm:$0xff] %v2209_v60  ;;  %v80_v60 = vld [vmem:[%s4854_s0 + $0x1f8] sm:$0xff] }
 0x103   :  { %309 = vmatmul.f32.gmra.mxu2 %v77_v42  ;;  %518 = vmatmul.f32.gmra.mxu3 %v77_v42 }
 0x106   :  { %v2158_v3 = vpop.f32.mrf.mxu0  ;;  %v2160_v4 = vpop.f32.mrf.mxu1 }
 0x107   :  { %5110 = vst [vmem:[#allocation32_spill] sm:$0xff] %v2160_v4  ;;  %v2204_v54 = vpop.f32.mrf.mxu2 }
 0x108   :  { %5120 = vst [vmem:[#allocation42_spill] sm:$0xff] %v2204_v54 }
 0x109   :  { %216 = vmatmul.f32.gmra.mxu0 %v46_v7  ;;  %425 = vmatmul.f32.gmra.mxu1 %v46_v7  ;;  %v2224_v42 = vpop.f32.mrf.mxu3 }
 0x10a   :  { %5125 = vst [vmem:[#allocation47_spill] sm:$0xff] %v2224_v42 }
 0x10b   :  { %312 = vmatmul.f32.gmra.mxu2 %v78_v56  ;;  %521 = vmatmul.f32.gmra.mxu3 %v78_v56 }
 0x10e   :  { %v2172_v15 = vpop.f32.mrf.mxu0  ;;  %v2174_v17 = vpop.f32.mrf.mxu1 }
 0x10f   :  { %5113 = vst [vmem:[#allocation35_spill] sm:$0xff] %v2174_v17  ;;  %v2215_v12 = vpop.f32.mrf.mxu2 }
 0x110   :  { %5123 = vst [vmem:[#allocation45_spill] sm:$0xff] %v2215_v12 }
 0x111   :  { %219 = vmatmul.f32.gmra.mxu0 %v47_v20  ;;  %428 = vmatmul.f32.gmra.mxu1 %v47_v20  ;;  %v79_v20 = vld [vmem:[%s4854_s0 + $0x1f0] sm:$0xff] }
 0x113   :  { %315 = vmatmul.f32.gmra.mxu2 %v79_v20  ;;  %524 = vmatmul.f32.gmra.mxu3 %v79_v20  ;;  %v2237_v20 = vpop.f32.mrf.mxu3 }
 0x114   :  { %5129 = vst [vmem:[#allocation51_spill] sm:$0xff] %v2237_v20 }
 0x116   :  { %v2186_v31 = vpop.f32.mrf.mxu0  ;;  %v2188_v33 = vpop.f32.mrf.mxu1 }
 0x117   :  { %5116 = vst [vmem:[#allocation38_spill] sm:$0xff] %v2188_v33  ;;  %v2226_v56 = vpop.f32.mrf.mxu2 }
 0x118   :  { %5126 = vst [vmem:[#allocation48_spill] sm:$0xff] %v2226_v56 }
 0x119   :  { %222 = vmatmul.f32.gmra.mxu0 %v48_v36  ;;  %431 = vmatmul.f32.gmra.mxu1 %v48_v36 }
 0x11b   :  { %318 = vmatmul.f32.gmra.mxu2 %v80_v60  ;;  %527 = vmatmul.f32.gmra.mxu3 %v80_v60  ;;  %v2245_v56 = vpop.f32.mrf.mxu3 }
 0x11c   :  { %5132 = vst [vmem:[#allocation54_spill] sm:$0xff] %v2245_v56  ;;  %v531_v56 = vadd.f32 %v2010_v1, %v2000_v61 }
 0x11e   :  { %v2200_v48 = vpop.f32.mrf.mxu0  ;;  %v2202_v50 = vpop.f32.mrf.mxu1 }
 0x11f   :  { %5119 = vst [vmem:[#allocation41_spill] sm:$0xff] %v2202_v50  ;;  %v2235_v39 = vpop.f32.mrf.mxu2 }
 0x120   :  { %5128 = vst [vmem:[#allocation50_spill] sm:$0xff] %v2235_v39 }
 0x123   :  { %v2253_v63 = vpop.f32.mrf.mxu3 }
 0x124   :  { %5135 = vst [vmem:[#allocation57_spill] sm:$0xff] %v2253_v63  ;;  %v532_v63 = vadd.f32 %v531_v56, %v2020_v5 }
 0x126   :  { %v2211_v0 = vpop.f32.mrf.mxu0  ;;  %v2213_v7 = vpop.f32.mrf.mxu1  ;;  %v533_v51 = vadd.f32 %v532_v63, %v2030_v9 }
 0x127   :  { %5122 = vst [vmem:[#allocation44_spill] sm:$0xff] %v2213_v7  ;;  %v2243_v42 = vpop.f32.mrf.mxu2 }
 0x128   :  { %5131 = vst [vmem:[#allocation53_spill] sm:$0xff] %v2243_v42  ;;  %v534_v32 = vadd.f32 %v533_v51, %v2040_v13 }
 0x12b   :  { %v2265_v42 = vpop.f32.mrf.mxu3 }
 0x12c   :  { %5139 = vst [vmem:[#allocation61_spill] sm:$0xff] %v2265_v42 }
 0x12e   :  { %v2220_v25 = vpop.f32.mrf.mxu0  ;;  %v2222_v36 = vpop.f32.mrf.mxu1 }
 0x12f   :  { %5124 = vst [vmem:[#allocation46_spill] sm:$0xff] %v2222_v36  ;;  %v2251_v60 = vpop.f32.mrf.mxu2 }
 0x130   :  { %5134 = vst [vmem:[#allocation56_spill] sm:$0xff] %v2251_v60  ;;  %v600_v60 = vadd.f32 %v2012_v2, %v2002_v62  ;;  %v535_v2 = vadd.f32 %v534_v32, %v2052_v18 }
 0x132   :  { %v601_v57 = vadd.f32 %v600_v60, %v2022_v6  ;;  %v536_v60 = vadd.f32 %v535_v2, %v2064_v23 }
 0x133   :  { %v2283_v61 = vpop.f32.mrf.mxu3 }
 0x134   :  { %v602_v42 = vadd.f32 %v601_v57, %v2032_v10  ;;  %5142 = vst [vmem:[#allocation64_spill] sm:$0xff] %v2283_v61  ;;  %v537_v51 = vadd.f32 %v536_v60, %v2078_v29 }
 0x136   :  { %v2231_v12 = vpop.f32.mrf.mxu0  ;;  %v2233_v54 = vpop.f32.mrf.mxu1  ;;  %v603_v1 = vadd.f32 %v602_v42, %v2042_v14  ;;  %v538_v42 = vadd.f32 %v537_v51, %v2090_v34 }
 0x137   :  { %5127 = vst [vmem:[#allocation49_spill] sm:$0xff] %v2233_v54  ;;  %v2259_v20 = vpop.f32.mrf.mxu2 }
 0x138   :  { %5137 = vst [vmem:[#allocation59_spill] sm:$0xff] %v2259_v20  ;;  %v604_v56 = vadd.f32 %v603_v1, %v2054_v19  ;;  %v539_v1 = vadd.f32 %v538_v42, %v2104_v40 }
 0x13a   :  { %v605_v6 = vadd.f32 %v604_v56, %v2066_v24  ;;  %v540_v56 = vadd.f32 %v539_v1, %v2118_v46 }
 0x13b   :  { %v2301_v19 = vpop.f32.mrf.mxu3 }
 0x13c   :  { %v606_v57 = vadd.f32 %v605_v6, %v2080_v30  ;;  %5144 = vst [vmem:[#allocation66_spill] sm:$0xff] %v2301_v19  ;;  %v541_v6 = vadd.f32 %v540_v56, %v2132_v52  ;;  %v5162_v30 = vld [vmem:[#allocation29_spill] sm:$0xff] }
 0x13e   :  { %v2239_v45 = vpop.f32.mrf.mxu0  ;;  %v2241_v22 = vpop.f32.mrf.mxu1  ;;  %v607_v32 = vadd.f32 %v606_v57, %v2092_v35  ;;  %v542_v57 = vadd.f32 %v541_v6, %v2146_v58 }
 0x13f   :  { %5130 = vst [vmem:[#allocation52_spill] sm:$0xff] %v2241_v22  ;;  %v2271_v43 = vpop.f32.mrf.mxu2 }
 0x140   :  { %5140 = vst [vmem:[#allocation62_spill] sm:$0xff] %v2271_v43  ;;  %v608_v2 = vadd.f32 %v607_v32, %v2106_v41  ;;  %v543_v32 = vadd.f32 %v542_v57, %v2158_v3 }
 0x142   :  { %v609_v24 = vadd.f32 %v608_v2, %v2120_v47  ;;  %v544_v2 = vadd.f32 %v543_v32, %v2172_v15 }
 0x143   :  { %v2319_v41 = vpop.f32.mrf.mxu3 }
 0x144   :  { %v610_v60 = vadd.f32 %v609_v24, %v2134_v53  ;;  %5146 = vst [vmem:[#allocation68_spill] sm:$0xff] %v2319_v41  ;;  %v545_v24 = vadd.f32 %v544_v2, %v2186_v31 }
 0x146   :  { %v2247_v11 = vpop.f32.mrf.mxu0  ;;  %v2249_v27 = vpop.f32.mrf.mxu1  ;;  %v611_v42 = vadd.f32 %v610_v60, %v2148_v59  ;;  %v546_v60 = vadd.f32 %v545_v24, %v2200_v48 }
 0x147   :  { %5133 = vst [vmem:[#allocation55_spill] sm:$0xff] %v2249_v27  ;;  %v2289_v62 = vpop.f32.mrf.mxu2 }
 0x148   :  { %v612_v1 = vadd.f32 %v611_v42, %v2160_v4  ;;  %v547_v42 = vadd.f32 %v546_v60, %v2211_v0 }
 0x14a   :  { %v613_v47 = vadd.f32 %v612_v1, %v2174_v17  ;;  %v548_v1 = vadd.f32 %v547_v42, %v2220_v25 }
 0x14b   :  { %v2341_v24 = vpop.f32.mrf.mxu3 }
 0x14c   :  { %v614_v6 = vadd.f32 %v613_v47, %v2188_v33  ;;  %v549_v47 = vadd.f32 %v548_v1, %v2231_v12  ;;  %5151 = vst [vmem:[#allocation73_spill] sm:$0xff] %v2341_v24 }
 0x14e   :  { %v2255_v55 = vpop.f32.mrf.mxu0  ;;  %v2257_v39 = vpop.f32.mrf.mxu1  ;;  %v615_v57 = vadd.f32 %v614_v6, %v2202_v50  ;;  %v550_v6 = vadd.f32 %v549_v47, %v2239_v45 }
 0x14f   :  { %5136 = vst [vmem:[#allocation58_spill] sm:$0xff] %v2257_v39  ;;  %v2311_v51 = vpop.f32.mrf.mxu2 }
 0x150   :  { %v616_v32 = vadd.f32 %v615_v57, %v2213_v7  ;;  %v551_v57 = vadd.f32 %v550_v6, %v2247_v11 }
 0x152   :  { %v617_v17 = vadd.f32 %v616_v32, %v2222_v36  ;;  %v552_v32 = vadd.f32 %v551_v57, %v2255_v55 }
 0x154   :  { %v618_v2 = vadd.f32 %v617_v17, %v2233_v54 }
 0x156   :  { %v2261_v8 = vpop.f32.mrf.mxu0  ;;  %v2263_v49 = vpop.f32.mrf.mxu1  ;;  %v619_v60 = vadd.f32 %v618_v2, %v2241_v22 }
 0x157   :  { %5138 = vst [vmem:[#allocation60_spill] sm:$0xff] %v2263_v49  ;;  %v2329_v59 = vpop.f32.mrf.mxu2  ;;  %v553_v17 = vadd.f32 %v552_v32, %v2261_v8  ;;  %v2359_v22 = vpop.f32.mrf.mxu3 }
 0x158   :  { %v620_v42 = vadd.f32 %v619_v60, %v2249_v27  ;;  %5154 = vst [vmem:[#allocation76_spill] sm:$0xff] %v2359_v22 }
 0x15a   :  { %v621_v36 = vadd.f32 %v620_v42, %v2257_v39 }
 0x15c   :  { %v622_v47 = vadd.f32 %v621_v36, %v2263_v49 }
 0x15e   :  { %v2275_v38 = vpop.f32.mrf.mxu0  ;;  %v2277_v20 = vpop.f32.mrf.mxu1 }
 0x15f   :  { %5141 = vst [vmem:[#allocation63_spill] sm:$0xff] %v2277_v20  ;;  %v2347_v7 = vpop.f32.mrf.mxu2  ;;  %v554_v2 = vadd.f32 %v553_v17, %v2275_v38  ;;  %v623_v6 = vadd.f32 %v622_v47, %v2277_v20  ;;  %v2375_v20 = vpop.f32.mrf.mxu3 }
 0x166   :  { %v2291_v5 = vpop.f32.mrf.mxu0  ;;  %v2293_v63 = vpop.f32.mrf.mxu1 }
 0x167   :  { %5143 = vst [vmem:[#allocation65_spill] sm:$0xff] %v2293_v63  ;;  %v555_v60 = vadd.f32 %v554_v2, %v2291_v5  ;;  %v624_v57 = vadd.f32 %v623_v6, %v2293_v63  ;;  %v2365_v27 = vpop.f32.mrf.mxu2 }
 0x16e   :  { %v2305_v14 = vpop.f32.mrf.mxu0  ;;  %v2307_v10 = vpop.f32.mrf.mxu1 }
 0x16f   :  { %5145 = vst [vmem:[#allocation67_spill] sm:$0xff] %v2307_v10  ;;  %v556_v42 = vadd.f32 %v555_v60, %v2305_v14  ;;  %v625_v39 = vadd.f32 %v624_v57, %v2307_v10 }
 0x176   :  { %v2321_v35 = vpop.f32.mrf.mxu0  ;;  %v2323_v56 = vpop.f32.mrf.mxu1 }
 0x177   :  { %5147 = vst [vmem:[#allocation69_spill] sm:$0xff] %v2321_v35  ;;  %v557_v36 = vadd.f32 %v556_v42, %v2321_v35  ;;  %v626_v17 = vadd.f32 %v625_v39, %v2323_v56 }
 0x178   :  { %5148 = vst [vmem:[#allocation70_spill] sm:$0xff] %v2323_v56  ;;  %v5160_v56 = vld [vmem:[#allocation26_spill] sm:$0xff] }
 0x17e   :  { %v2335_v4 = vpop.f32.mrf.mxu0  ;;  %v2337_v53 = vpop.f32.mrf.mxu1 }
 0x17f   :  { %5149 = vst [vmem:[#allocation71_spill] sm:$0xff] %v2335_v4  ;;  %v558_v47 = vadd.f32 %v557_v36, %v2335_v4  ;;  %v627_v2 = vadd.f32 %v626_v17, %v2337_v53  ;;  %v2387_v36 = vpop.f32.mrf.mxu2 }
 0x180   :  { %5150 = vst [vmem:[#allocation72_spill] sm:$0xff] %v2337_v53  ;;  %v5159_v53 = vld [vmem:[#allocation17_spill] sm:$0xff] }
 0x186   :  { %v2351_v50 = vpop.f32.mrf.mxu0  ;;  %v2353_v1 = vpop.f32.mrf.mxu1 }
 0x187   :  { %5152 = vst [vmem:[#allocation74_spill] sm:$0xff] %v2351_v50  ;;  %v559_v6 = vadd.f32 %v558_v47, %v2351_v50  ;;  %v628_v60 = vadd.f32 %v627_v2, %v2353_v1  ;;  %v5180_v50 = vld [vmem:[#allocation50_spill] sm:$0xff] }
 0x188   :  { %5153 = vst [vmem:[#allocation75_spill] sm:$0xff] %v2353_v1  ;;  %v2393_v1 = vpop.f32.mrf.mxu3 }
 0x18e   :  { %v2367_v54 = vpop.f32.mrf.mxu0  ;;  %v2369_v32 = vpop.f32.mrf.mxu1 }
 0x18f   :  { %5155 = vst [vmem:[#allocation77_spill] sm:$0xff] %v2367_v54  ;;  %v560_v57 = vadd.f32 %v559_v6, %v2367_v54  ;;  %v629_v10 = vadd.f32 %v628_v60, %v2369_v32  ;;  %v5175_v54 = vld [vmem:[#allocation43_spill] sm:$0xff] }
 0x190   :  { %5156 = vst [vmem:[#allocation78_spill] sm:$0xff] %v2369_v32 }
 0x196   :  { %v2381_v63 = vpop.f32.mrf.mxu0  ;;  %v2383_v49 = vpop.f32.mrf.mxu1 }
 0x197   :  { %5157 = vst [vmem:[#allocation79_spill] sm:$0xff] %v2381_v63  ;;  %v561_v39 = vadd.f32 %v560_v57, %v2381_v63  ;;  %v630_v42 = vadd.f32 %v629_v10, %v2383_v49  ;;  %v2406_v63 = vpop.f32.mrf.mxu3 }
 0x198   :  { %5158 = vst [vmem:[#allocation80_spill] sm:$0xff] %v2383_v49  ;;  %v5161_v49 = vld [vmem:[#allocation20_spill] sm:$0xff] }
 0x199   :  { %v562_v17 = vadd.f32 %v561_v39, %v2047_v16  ;;  %v631_v47 = vadd.f32 %v630_v42, %v2076_v28  ;;  %v2401_v16 = vpop.f32.mrf.mxu2  ;;  %v5164_v42 = vld [vmem:[#allocation22_spill] sm:$0xff]  ;;  %v5165_v28 = vld [vmem:[#allocation25_spill] sm:$0xff] }
 0x19a   :  { %5163 = vst [vmem:[#allocation81_spill] sm:$0xff] %v2401_v16 }
 0x19b   :  { %v563_v2 = vadd.f32 %v562_v17, %v2059_v21  ;;  %v632_v6 = vadd.f32 %v631_v47, %v2097_v37  ;;  %v5166_v37 = vld [vmem:[#allocation33_spill] sm:$0xff] }
 0x19d   :  { %v564_v60 = vadd.f32 %v563_v2, %v2071_v26  ;;  %v633_v32 = vadd.f32 %v632_v6, %v2113_v44  ;;  %v5167_v2 = vld [vmem:[#allocation28_spill] sm:$0xff]  ;;  %v5168_v44 = vld [vmem:[#allocation31_spill] sm:$0xff] }
 0x19e   :  { %v5172_v26 = vld [vmem:[#allocation40_spill] sm:$0xff] }
 0x19f   :  { %v565_v57 = vadd.f32 %v564_v60, %v5159_v53  ;;  %v634_v10 = vadd.f32 %v633_v32, %v5160_v56  ;;  %v5169_v53 = vld [vmem:[#allocation37_spill] sm:$0xff]  ;;  %v5170_v56 = vld [vmem:[#allocation34_spill] sm:$0xff] }
 0x1a1   :  { %v566_v33 = vadd.f32 %v565_v57, %v5161_v49  ;;  %v635_v39 = vadd.f32 %v634_v10, %v5162_v30  ;;  %v2412_v49 = vpop.f32.mrf.mxu2  ;;  %v5171_v10 = vld [vmem:[#allocation36_spill] sm:$0xff] }
 0x1a3   :  { %v567_v17 = vadd.f32 %v566_v33, %v5164_v42  ;;  %v636_v21 = vadd.f32 %v635_v39, %v5166_v37  ;;  %v5173_v42 = vld [vmem:[#allocation39_spill] sm:$0xff]  ;;  %v5174_v39 = vld [vmem:[#allocation42_spill] sm:$0xff] }
 0x1a5   :  { %v568_v47 = vadd.f32 %v567_v17, %v5165_v28  ;;  %v637_v32 = vadd.f32 %v636_v21, %v5169_v53  ;;  %v2417_v28 = vpop.f32.mrf.mxu3  ;;  %v5178_v53 = vld [vmem:[#allocation47_spill] sm:$0xff] }
 0x1a7   :  { %v569_v6 = vadd.f32 %v568_v47, %v5167_v2  ;;  %v638_v33 = vadd.f32 %v637_v32, %v5172_v26  ;;  %v5176_v2 = vld [vmem:[#allocation45_spill] sm:$0xff]  ;;  %v5182_v26 = vld [vmem:[#allocation51_spill] sm:$0xff] }
 0x1a9   :  { %v570_v60 = vadd.f32 %v569_v6, %v5168_v44  ;;  %v639_v47 = vadd.f32 %v638_v33, %v5175_v54  ;;  %v5177_v44 = vld [vmem:[#allocation48_spill] sm:$0xff]  ;;  %v5185_v54 = vld [vmem:[#allocation54_spill] sm:$0xff] }
 0x1ab   :  { %v571_v57 = vadd.f32 %v570_v60, %v5170_v56  ;;  %v640_v60 = vadd.f32 %v639_v47, %v5178_v53  ;;  %v2424_v56 = vpop.f32.mrf.mxu2  ;;  %v5187_v53 = vld [vmem:[#allocation57_spill] sm:$0xff] }
 0x1ac   :  { %5179 = vst [vmem:[#allocation42_spill] sm:$0xff] %v2424_v56 }
 0x1ad   :  { %v572_v30 = vadd.f32 %v571_v57, %v5171_v10  ;;  %v5181_v10 = vld [vmem:[#allocation53_spill] sm:$0xff]  ;;  %v2430_v35 = vpop.f32.mrf.mxu3 }
 0x1af   :  { %v573_v17 = vadd.f32 %v572_v30, %v5173_v42  ;;  %v641_v30 = vadd.f32 %v640_v60, %v5182_v26  ;;  %v5183_v42 = vld [vmem:[#allocation56_spill] sm:$0xff] }
 0x1b1   :  { %v574_v37 = vadd.f32 %v573_v17, %v5174_v39  ;;  %v5184_v17 = vld [vmem:[#allocation59_spill] sm:$0xff] }
 0x1b3   :  { %v575_v6 = vadd.f32 %v574_v37, %v5176_v2  ;;  %v642_v37 = vadd.f32 %v641_v30, %v5185_v54 }
 0x1b5   :  { %v576_v21 = vadd.f32 %v575_v6, %v5177_v44  ;;  %v2435_v44 = vpop.f32.mrf.mxu2  ;;  %v2441_v26 = vpop.f32.mrf.mxu3 }
 0x1b6   :  { %5186 = vst [vmem:[#allocation45_spill] sm:$0xff] %v2435_v44 }
 0x1b7   :  { %v577_v57 = vadd.f32 %v576_v21, %v5180_v50  ;;  %v643_v21 = vadd.f32 %v642_v37, %v5187_v53 }
 0x1b9   :  { %v578_v32 = vadd.f32 %v577_v57, %v5181_v10 }
 0x1bb   :  { %v579_v4 = vadd.f32 %v578_v32, %v5183_v42  ;;  %v5188_v32 = vld [vmem:[#allocation61_spill] sm:$0xff] }
 0x1bc   :  { %v644_v42 = vadd.f32 %v643_v21, %v5188_v32 }
 0x1bd   :  { %v580_v33 = vadd.f32 %v579_v4, %v5184_v17  ;;  %v316_v54 = vpop.f32.mrf.mxu2 }
 0x1bf   :  { %v581_v6 = vadd.f32 %v580_v33, %v2271_v43  ;;  %v645_v33 = vadd.f32 %v644_v42, %v2283_v61  ;;  %v1791_v61 = vmov 512.0  }
 0x1c0   :  { %1785 = vrcp.f32 %v1791_v61 }
 0x1c1   :  { %v582_v47 = vadd.f32 %v581_v6, %v2289_v62  ;;  %v646_v37 = vadd.f32 %v645_v33, %v2301_v19 }
 0x1c3   :  { %v583_v57 = vadd.f32 %v582_v47, %v2311_v51  ;;  %v2450_v47 = vpop.f32.mrf.mxu3  ;;  %v647_v21 = vadd.f32 %v646_v37, %v2319_v41 }
 0x1c5   :  { %v584_v60 = vadd.f32 %v583_v57, %v2329_v59  ;;  %v648_v42 = vadd.f32 %v647_v21, %v2341_v24 }
 0x1c7   :  { %v585_v4 = vadd.f32 %v584_v60, %v2347_v7  ;;  %v649_v33 = vadd.f32 %v648_v42, %v2359_v22 }
 0x1c9   :  { %v586_v30 = vadd.f32 %v585_v4, %v2365_v27  ;;  %v319_v4 = vpop.f32.mrf.mxu2 }
 0x1cb   :  { %v587_v43 = vadd.f32 %v586_v30, %v2387_v36 }
 0x1cd   :  { %v588_v6 = vadd.f32 %v587_v43, %v2401_v16  ;;  %v2457_v43 = vpop.f32.mrf.mxu3  ;;  %v1786_v16 = vpop.eup %1785 }
 0x1ce   :  { %vm674_vm0 = vweird.f32 %v1786_v16 }
 0x1cf   :  { %v589_v57 = vadd.f32 %v588_v6, %v2412_v49  ;;  %v650_v6 = vadd.f32 %v649_v33, %v2375_v20 }
 0x1d1   :  { %v590_v53 = vadd.f32 %v589_v57, %v2424_v56  ;;  %v670_v56 = vmul.f32 512.0, %v1786_v16  ;;  %v651_v37 = vadd.f32 %v650_v6, %v2393_v1 }
 0x1d3   :  { %v591_v60 = vadd.f32 %v590_v53, %v2435_v44  ;;  %v652_v21 = vadd.f32 %v651_v37, %v2406_v63 }
 0x1d5   :  { %v592_v32 = vadd.f32 %v591_v60, %v316_v54  ;;  %v2462_v41 = vpop.f32.mrf.mxu3  ;;  %v671_v60 = vsub.f32 1.0, %v670_v56  ;;  %v653_v24 = vadd.f32 %v652_v21, %v2417_v28 }
 0x1d7   :  { %v593_v30 = vadd.f32 %v592_v32, %v319_v4  ;;  %v672_v32 = vmul.f32 %v1786_v16, %v671_v60 }
 0x1d9   :  { %v594_v19 = vrot.slane %v593_v30, 4  ;;  %v673_v42 = vadd.f32 %v1786_v16, %v672_v32 }
 0x1db   :  { %v595_v57 = vadd.f32 %v594_v19, %v593_v30  ;;  %v654_v19 = vadd.f32 %v653_v24, %v2430_v35  ;;  %v2469_v33 = vsel %vm674_vm0, %v1786_v16, %v673_v42 }
 0x1dc   :  { %5189 = vst [vmem:[#allocation50_spill] sm:$0xff] %v2469_v33 }
 0x1dd   :  { %v596_v53 = vrot.slane %v595_v57, 2  ;;  %v2466_v22 = vpop.f32.mrf.mxu3  ;;  %v655_v6 = vadd.f32 %v654_v19, %v2441_v26 }
 0x1df   :  { %v597_v61 = vadd.f32 %v596_v53, %v595_v57  ;;  %v656_v57 = vadd.f32 %v655_v6, %v2450_v47 }
 0x1e1   :  { %v598_v44 = vrot.slane %v597_v61, 1  ;;  %v657_v24 = vadd.f32 %v656_v57, %v2457_v43 }
 0x1e3   :  { %v599_v30 = vadd.f32 %v598_v44, %v597_v61  ;;  %v658_v16 = vadd.f32 %v657_v24, %v2462_v41  ;;  %v5192_v44 = vld [vmem:[#allocation2_spill] sm:$0xff]  ;;  %v5194_v61 = vld [vmem:[#allocation4_spill] sm:$0xff] }
 0x1e5   :  { %v2473_v56 = vmul.f32 %v2469_v33, %v599_v30  ;;  %v2482_v60 = vpop.f32.mrf.mxu3 }
 0x1e6   :  { %5191 = vst [vmem:[#allocation59_spill] sm:$0xff] %v2482_v60 }
 0x1e7   :  { %v2477_v37 = vsub.f32 %v316_v54, %v2473_v56  ;;  %v2480_v53 = vsub.f32 %v319_v4, %v2473_v56  ;;  %v2488_v21 = vsub.f32 %v5192_v44, %v2473_v56  ;;  %v2492_v32 = vsub.f32 %v5194_v61, %v2473_v56  ;;  %v5196_v4 = vld [vmem:[#allocation6_spill] sm:$0xff] }
 0x1e8   :  { %v659_v54 = vadd.f32 %v658_v16, %v2466_v22  ;;  %v2499_v19 = vsub.f32 %v5196_v4, %v2473_v56  ;;  %v2507_v57 = vsub.f32 %v2030_v9, %v2473_v56  ;;  %v2512_v44 = vsub.f32 %v2040_v13, %v2473_v56 }
 0x1e9   :  { %5190 = vst [vmem:[#allocation53_spill] sm:$0xff] %v2477_v37  ;;  %v806_v30 = vmul.f32 %v2488_v21, %v2488_v21  ;;  %v808_v6 = vmul.f32 %v2492_v32, %v2492_v32  ;;  %v2518_v4 = vsub.f32 %v2052_v18, %v2473_v56 }
 0x1ea   :  { %5193 = vst [vmem:[#allocation2_spill] sm:$0xff] %v2488_v21  ;;  %v660_v24 = vadd.f32 %v659_v54, %v2482_v60  ;;  %v810_v16 = vmul.f32 %v2499_v19, %v2499_v19  ;;  %v2525_v54 = vsub.f32 %v2064_v23, %v2473_v56  ;;  %v814_v13 = vmul.f32 %v2512_v44, %v2512_v44 }
 0x1eb   :  { %5195 = vst [vmem:[#allocation4_spill] sm:$0xff] %v2492_v32  ;;  %v934_v61 = vadd.f32 %v808_v6, %v806_v30  ;;  %v812_v32 = vmul.f32 %v2507_v57, %v2507_v57  ;;  %v2531_v30 = vsub.f32 %v2078_v29, %v2473_v56  ;;  %v816_v18 = vmul.f32 %v2518_v4, %v2518_v4 }
 0x1ec   :  { %5197 = vst [vmem:[#allocation6_spill] sm:$0xff] %v2499_v19  ;;  %v818_v23 = vmul.f32 %v2525_v54, %v2525_v54 }
 0x1ed   :  { %v2494_v42 = vpop.f32.mrf.mxu3  ;;  %5198 = vst [vmem:[#allocation82_spill] sm:$0xff] %v2512_v44  ;;  %v935_v21 = vadd.f32 %v934_v61, %v810_v16  ;;  %v820_v29 = vmul.f32 %v2531_v30, %v2531_v30 }
 0x1ee   :  { %v661_v9 = vadd.f32 %v660_v24, %v2494_v42  ;;  %v2537_v24 = vsub.f32 %v2090_v34, %v2473_v56 }
 0x1ef   :  { %v936_v60 = vadd.f32 %v935_v21, %v812_v32  ;;  %v2543_v21 = vsub.f32 %v2104_v40, %v2473_v56 }
 0x1f0   :  { %5199 = vst [vmem:[#allocation83_spill] sm:$0xff] %v2537_v24  ;;  %v822_v34 = vmul.f32 %v2537_v24, %v2537_v24 }
 0x1f1   :  { %v937_v6 = vadd.f32 %v936_v60, %v814_v13  ;;  %v2549_v60 = vsub.f32 %v2118_v46, %v2473_v56  ;;  %v2555_v13 = vsub.f32 %v2132_v52, %v2473_v56  ;;  %v824_v40 = vmul.f32 %v2543_v21, %v2543_v21 }
 0x1f3   :  { %v938_v61 = vadd.f32 %v937_v6, %v816_v18  ;;  %v826_v46 = vmul.f32 %v2549_v60, %v2549_v60  ;;  %v828_v52 = vmul.f32 %v2555_v13, %v2555_v13 }
 0x1f5   :  { %v528_v19 = vpop.f32.mrf.mxu3  ;;  %v939_v32 = vadd.f32 %v938_v61, %v818_v23  ;;  %v2561_v23 = vsub.f32 %v2146_v58, %v2473_v56 }
 0x1f6   :  { %v662_v16 = vadd.f32 %v661_v9, %v528_v19 }
 0x1f7   :  { %v940_v9 = vadd.f32 %v939_v32, %v820_v29  ;;  %v2567_v29 = vsub.f32 %v2158_v3, %v2473_v56  ;;  %v830_v58 = vmul.f32 %v2561_v23, %v2561_v23 }
 0x1f8   :  { %v663_v44 = vrot.slane %v662_v16, 4 }
 0x1f9   :  { %v941_v18 = vadd.f32 %v940_v9, %v822_v34  ;;  %v2579_v34 = vsub.f32 %v2186_v31, %v2473_v56  ;;  %v832_v3 = vmul.f32 %v2567_v29, %v2567_v29 }
 0x1fa   :  { %v664_v6 = vadd.f32 %v663_v44, %v662_v16  ;;  %v2573_v44 = vsub.f32 %v2172_v15, %v2473_v56 }
 0x1fb   :  { %v942_v61 = vadd.f32 %v941_v18, %v824_v40  ;;  %v2585_v18 = vsub.f32 %v2200_v48, %v2473_v56  ;;  %v836_v31 = vmul.f32 %v2579_v34, %v2579_v34 }
 0x1fc   :  { %v665_v24 = vrot.slane %v664_v6, 2  ;;  %v834_v15 = vmul.f32 %v2573_v44, %v2573_v44 }
 0x1fd   :  { %v943_v32 = vadd.f32 %v942_v61, %v826_v46  ;;  %v2591_v61 = vsub.f32 %v2211_v0, %v2473_v56  ;;  %v838_v48 = vmul.f32 %v2585_v18, %v2585_v18 }
 0x1fe   :  { %v666_v40 = vadd.f32 %v665_v24, %v664_v6  ;;  %v2597_v24 = vsub.f32 %v2220_v25, %v2473_v56 }
 0x1ff   :  { %v944_v16 = vadd.f32 %v943_v32, %v828_v52  ;;  %v840_v0 = vmul.f32 %v2591_v61, %v2591_v61 }
 0x200   :  { %v667_v32 = vrot.slane %v666_v40, 1  ;;  %v842_v25 = vmul.f32 %v2597_v24, %v2597_v24 }
 0x201   :  { %v945_v9 = vadd.f32 %v944_v16, %v830_v58  ;;  %v2603_v58 = vsub.f32 %v2231_v12, %v2473_v56 }
 0x203   :  { %v946_v46 = vadd.f32 %v945_v9, %v832_v3  ;;  %v668_v3 = vadd.f32 %v667_v32, %v666_v40  ;;  %v2609_v9 = vsub.f32 %v2239_v45, %v2473_v56  ;;  %v844_v12 = vmul.f32 %v2603_v58, %v2603_v58 }
 0x204   :  { %v2624_v40 = vsub.f32 %v2255_v55, %v2473_v56 }
 0x205   :  { %v947_v52 = vadd.f32 %v946_v46, %v834_v15  ;;  %5200 = vst [vmem:[#allocation84_spill] sm:$0xff] %v2609_v9  ;;  %v2615_v46 = vsub.f32 %v2247_v11, %v2473_v56  ;;  %v846_v45 = vmul.f32 %v2609_v9, %v2609_v9  ;;  %v5232_v9 = vld [vmem:[#allocation11_spill] sm:$0xff] }
 0x206   :  { %5202 = vst [vmem:[#allocation86_spill] sm:$0xff] %v2624_v40  ;;  %v850_v55 = vmul.f32 %v2624_v40, %v2624_v40  ;;  %v5228_v40 = vld [vmem:[#allocation9_spill] sm:$0xff] }
 0x207   :  { %v948_v6 = vadd.f32 %v947_v52, %v836_v31  ;;  %5201 = vst [vmem:[#allocation85_spill] sm:$0xff] %v2615_v46  ;;  %v2620_v52 = vmul.f32 %v2469_v33, %v668_v3  ;;  %v848_v11 = vmul.f32 %v2615_v46, %v2615_v46 }
 0x209   :  { %v949_v16 = vadd.f32 %v948_v6, %v838_v48  ;;  %v2630_v48 = vsub.f32 %v2261_v8, %v2473_v56 }
 0x20b   :  { %v950_v15 = vadd.f32 %v949_v16, %v840_v0  ;;  %5203 = vst [vmem:[#allocation87_spill] sm:$0xff] %v2630_v48  ;;  %v2635_v0 = vsub.f32 %v528_v19, %v2620_v52  ;;  %v2639_v16 = vsub.f32 %v2275_v38, %v2473_v56  ;;  %v852_v8 = vmul.f32 %v2630_v48, %v2630_v48 }
 0x20c   :  { %v2651_v19 = vsub.f32 %v2305_v14, %v2473_v56 }
 0x20d   :  { %v951_v31 = vadd.f32 %v950_v15, %v842_v25  ;;  %5204 = vst [vmem:[#allocation88_spill] sm:$0xff] %v2635_v0  ;;  %v2645_v25 = vsub.f32 %v2291_v5, %v2473_v56  ;;  %v854_v38 = vmul.f32 %v2639_v16, %v2639_v16 }
 0x20e   :  { %5205 = vst [vmem:[#allocation89_spill] sm:$0xff] %v2639_v16  ;;  %v858_v14 = vmul.f32 %v2651_v19, %v2651_v19 }
 0x20f   :  { %v952_v32 = vadd.f32 %v951_v31, %v844_v12  ;;  %5206 = vst [vmem:[#allocation90_spill] sm:$0xff] %v2645_v25  ;;  %v5208_v31 = vld [vmem:[#allocation69_spill] sm:$0xff]  ;;  %v856_v5 = vmul.f32 %v2645_v25, %v2645_v25 }
 0x210   :  { %5207 = vst [vmem:[#allocation91_spill] sm:$0xff] %v2651_v19 }
 0x211   :  { %v953_v6 = vadd.f32 %v952_v32, %v846_v45  ;;  %v2657_v45 = vsub.f32 %v5208_v31, %v2473_v56  ;;  %v5216_v31 = vld [vmem:[#allocation74_spill] sm:$0xff] }
 0x212   :  { %v2677_v25 = vsub.f32 %v5216_v31, %v2473_v56 }
 0x213   :  { %v954_v3 = vadd.f32 %v953_v6, %v848_v11  ;;  %5209 = vst [vmem:[#allocation69_spill] sm:$0xff] %v2657_v45  ;;  %v5210_v11 = vld [vmem:[#allocation71_spill] sm:$0xff] }
 0x214   :  { %v2663_v6 = vsub.f32 %v5210_v11, %v2473_v56  ;;  %5217 = vst [vmem:[#allocation74_spill] sm:$0xff] %v2677_v25  ;;  %v5218_v11 = vld [vmem:[#allocation77_spill] sm:$0xff] }
 0x215   :  { %v955_v15 = vadd.f32 %v954_v3, %v850_v55  ;;  %v5212_v3 = vld [vmem:[#allocation3_spill] sm:$0xff]  ;;  %v2683_v19 = vsub.f32 %v5218_v11, %v2473_v56  ;;  %v864_v11 = vmul.f32 %v2677_v25, %v2677_v25 }
 0x216   :  { %5211 = vst [vmem:[#allocation71_spill] sm:$0xff] %v2663_v6  ;;  %v2669_v16 = vsub.f32 %v5212_v3, %v2620_v52  ;;  %v5220_v3 = vld [vmem:[#allocation7_spill] sm:$0xff] }
 0x217   :  { %v956_v12 = vadd.f32 %v955_v15, %v852_v8  ;;  %v5214_v8 = vld [vmem:[#allocation5_spill] sm:$0xff]  ;;  %5219 = vst [vmem:[#allocation77_spill] sm:$0xff] %v2683_v19 }
 0x218   :  { %5213 = vst [vmem:[#allocation3_spill] sm:$0xff] %v2669_v16  ;;  %v2673_v15 = vsub.f32 %v5214_v8, %v2620_v52  ;;  %v2689_v8 = vsub.f32 %v5220_v3, %v2620_v52  ;;  %v807_v31 = vmul.f32 %v2669_v16, %v2669_v16  ;;  %v5226_v3 = vld [vmem:[#allocation10_spill] sm:$0xff]  ;;  %v866_v16 = vmul.f32 %v2683_v19, %v2683_v19 }
 0x219   :  { %v957_v32 = vadd.f32 %v956_v12, %v854_v38  ;;  %v860_v38 = vmul.f32 %v2657_v45, %v2657_v45  ;;  %v2725_v19 = vsub.f32 %v5232_v9, %v2620_v52 }
 0x21a   :  { %5215 = vst [vmem:[#allocation5_spill] sm:$0xff] %v2673_v15  ;;  %v809_v48 = vmul.f32 %v2673_v15, %v2673_v15  ;;  %v811_v25 = vmul.f32 %v2689_v8, %v2689_v8 }
 0x21b   :  { %v958_v55 = vadd.f32 %v957_v32, %v856_v5  ;;  %v862_v5 = vmul.f32 %v2663_v6, %v2663_v6  ;;  %5221 = vst [vmem:[#allocation7_spill] sm:$0xff] %v2689_v8  ;;  %v2707_v6 = vsub.f32 %v5226_v3, %v2473_v56 }
 0x21c   :  { %5233 = vst [vmem:[#allocation11_spill] sm:$0xff] %v2725_v19 }
 0x21d   :  { %v959_v12 = vadd.f32 %v958_v55, %v858_v14  ;;  %v5222_v14 = vld [vmem:[#allocation79_spill] sm:$0xff]  ;;  %5227 = vst [vmem:[#allocation10_spill] sm:$0xff] %v2707_v6 }
 0x21e   :  { %v2697_v55 = vsub.f32 %v5222_v14, %v2473_v56  ;;  %v2713_v14 = vsub.f32 %v5228_v40, %v2620_v52 }
 0x21f   :  { %v960_v32 = vadd.f32 %v959_v12, %v860_v38  ;;  %v5224_v38 = vld [vmem:[#allocation8_spill] sm:$0xff] }
 0x220   :  { %5223 = vst [vmem:[#allocation79_spill] sm:$0xff] %v2697_v55  ;;  %v2703_v12 = vsub.f32 %v5224_v38, %v2620_v52  ;;  %v868_v3 = vmul.f32 %v2697_v55, %v2697_v55  ;;  %v815_v9 = vmul.f32 %v2713_v14, %v2713_v14 }
 0x221   :  { %v961_v45 = vadd.f32 %v960_v32, %v862_v5  ;;  %5229 = vst [vmem:[#allocation9_spill] sm:$0xff] %v2713_v14  ;;  %v1003_v5 = vadd.f32 %v809_v48, %v807_v31  ;;  %v5230_v32 = vld [vmem:[#allocation12_spill] sm:$0xff]  ;;  %v870_v48 = vmul.f32 %v2707_v6, %v2707_v6 }
 0x222   :  { %5225 = vst [vmem:[#allocation8_spill] sm:$0xff] %v2703_v12  ;;  %v2719_v38 = vsub.f32 %v5230_v32, %v2473_v56  ;;  %v813_v40 = vmul.f32 %v2703_v12, %v2703_v12  ;;  %v5236_v32 = vld [vmem:[#allocation13_spill] sm:$0xff] }
 0x223   :  { %v962_v15 = vadd.f32 %v961_v45, %v864_v11  ;;  %v1004_v45 = vadd.f32 %v1003_v5, %v811_v25  ;;  %v5234_v11 = vld [vmem:[#allocation14_spill] sm:$0xff]  ;;  %v2737_v55 = vsub.f32 %v5236_v32, %v2620_v52  ;;  %v5242_v32 = vld [vmem:[#allocation20_spill] sm:$0xff] }
 0x224   :  { %5231 = vst [vmem:[#allocation12_spill] sm:$0xff] %v2719_v38  ;;  %v2731_v8 = vsub.f32 %v5234_v11, %v2473_v56  ;;  %v872_v25 = vmul.f32 %v2719_v38, %v2719_v38  ;;  %v5240_v11 = vld [vmem:[#allocation16_spill] sm:$0xff]  ;;  %v2755_v14 = vsub.f32 %v5242_v32, %v2473_v56  ;;  %v5248_v32 = vld [vmem:[#allocation21_spill] sm:$0xff] }
 0x225   :  { %v963_v46 = vadd.f32 %v962_v15, %v866_v16  ;;  %5237 = vst [vmem:[#allocation13_spill] sm:$0xff] %v2737_v55  ;;  %v1005_v16 = vadd.f32 %v1004_v45, %v813_v40  ;;  %v5238_v15 = vld [vmem:[#allocation17_spill] sm:$0xff]  ;;  %v2749_v6 = vsub.f32 %v5240_v11, %v2620_v52  ;;  %v5246_v11 = vld [vmem:[#allocation22_spill] sm:$0xff] }
 0x226   :  { %5235 = vst [vmem:[#allocation14_spill] sm:$0xff] %v2731_v8  ;;  %v2743_v12 = vsub.f32 %v5238_v15, %v2473_v56  ;;  %v874_v40 = vmul.f32 %v2731_v8, %v2731_v8  ;;  %v5244_v15 = vld [vmem:[#allocation18_spill] sm:$0xff]  ;;  %v2773_v8 = vsub.f32 %v5248_v32, %v2620_v52  ;;  %v5254_v32 = vld [vmem:[#allocation28_spill] sm:$0xff] }
 0x227   :  { %v964_v31 = vadd.f32 %v963_v46, %v868_v3  ;;  %5241 = vst [vmem:[#allocation16_spill] sm:$0xff] %v2749_v6  ;;  %v817_v46 = vmul.f32 %v2725_v19, %v2725_v19  ;;  %v1006_v3 = vadd.f32 %v1005_v16, %v815_v9  ;;  %v2761_v38 = vsub.f32 %v5244_v15, %v2620_v52  ;;  %v5250_v15 = vld [vmem:[#allocation25_spill] sm:$0xff] }
 0x228   :  { %5239 = vst [vmem:[#allocation17_spill] sm:$0xff] %v2743_v12  ;;  %v2767_v19 = vsub.f32 %v5246_v11, %v2473_v56  ;;  %v876_v9 = vmul.f32 %v2743_v12, %v2743_v12  ;;  %v5252_v11 = vld [vmem:[#allocation24_spill] sm:$0xff] }
 0x229   :  { %v965_v5 = vadd.f32 %v964_v31, %v870_v48  ;;  %5243 = vst [vmem:[#allocation20_spill] sm:$0xff] %v2755_v14  ;;  %v819_v48 = vmul.f32 %v2737_v55, %v2737_v55  ;;  %v1007_v31 = vadd.f32 %v1006_v3, %v817_v46  ;;  %v2779_v55 = vsub.f32 %v5250_v15, %v2473_v56  ;;  %v5256_v15 = vld [vmem:[#allocation27_spill] sm:$0xff] }
 0x22a   :  { %5245 = vst [vmem:[#allocation18_spill] sm:$0xff] %v2761_v38  ;;  %v878_v46 = vmul.f32 %v2755_v14, %v2755_v14  ;;  %v2785_v12 = vsub.f32 %v5252_v11, %v2620_v52  ;;  %v2797_v14 = vsub.f32 %v5256_v15, %v2620_v52  ;;  %v5258_v11 = vld [vmem:[#allocation31_spill] sm:$0xff]  ;;  %v5262_v15 = vld [vmem:[#allocation34_spill] sm:$0xff] }
 0x22b   :  { %v966_v45 = vadd.f32 %v965_v5, %v872_v25  ;;  %5247 = vst [vmem:[#allocation22_spill] sm:$0xff] %v2767_v19  ;;  %v821_v25 = vmul.f32 %v2749_v6, %v2749_v6  ;;  %v1008_v5 = vadd.f32 %v1007_v31, %v819_v48  ;;  %v2791_v6 = vsub.f32 %v5254_v32, %v2473_v56  ;;  %v5260_v32 = vld [vmem:[#allocation30_spill] sm:$0xff] }
 0x22c   :  { %5249 = vst [vmem:[#allocation21_spill] sm:$0xff] %v2773_v8  ;;  %v880_v48 = vmul.f32 %v2767_v19, %v2767_v19  ;;  %v2809_v19 = vsub.f32 %v5260_v32, %v2620_v52  ;;  %v5265_v32 = vld [vmem:[#allocation36_spill] sm:$0xff] }
 0x22d   :  { %v967_v16 = vadd.f32 %v966_v45, %v874_v40  ;;  %5251 = vst [vmem:[#allocation25_spill] sm:$0xff] %v2779_v55  ;;  %v823_v40 = vmul.f32 %v2761_v38, %v2761_v38  ;;  %v1009_v45 = vadd.f32 %v1008_v5, %v821_v25  ;;  %v2803_v38 = vsub.f32 %v5258_v11, %v2473_v56  ;;  %v5263_v11 = vld [vmem:[#allocation32_spill] sm:$0xff] }
 0x22e   :  { %5253 = vst [vmem:[#allocation24_spill] sm:$0xff] %v2785_v12  ;;  %v882_v25 = vmul.f32 %v2779_v55, %v2779_v55  ;;  %v2821_v55 = vsub.f32 %v5263_v11, %v2620_v52  ;;  %v5268_v11 = vld [vmem:[#allocation39_spill] sm:$0xff] }
 0x22f   :  { %v968_v3 = vadd.f32 %v967_v16, %v876_v9  ;;  %5255 = vst [vmem:[#allocation28_spill] sm:$0xff] %v2791_v6  ;;  %v825_v9 = vmul.f32 %v2773_v8, %v2773_v8  ;;  %v1010_v16 = vadd.f32 %v1009_v45, %v823_v40  ;;  %v2815_v8 = vsub.f32 %v5262_v15, %v2473_v56  ;;  %v5266_v15 = vld [vmem:[#allocation35_spill] sm:$0xff] }
 0x230   :  { %5257 = vst [vmem:[#allocation27_spill] sm:$0xff] %v2797_v14  ;;  %v884_v40 = vmul.f32 %v2791_v6, %v2791_v6  ;;  %v2833_v6 = vsub.f32 %v5266_v15, %v2620_v52  ;;  %v2851_v15 = vsub.f32 %v5174_v39, %v2473_v56 }
 0x231   :  { %v969_v31 = vadd.f32 %v968_v3, %v878_v46  ;;  %5259 = vst [vmem:[#allocation31_spill] sm:$0xff] %v2803_v38  ;;  %v827_v46 = vmul.f32 %v2785_v12, %v2785_v12  ;;  %v1011_v3 = vadd.f32 %v1010_v16, %v825_v9  ;;  %v2827_v12 = vsub.f32 %v5265_v32, %v2473_v56  ;;  %v5270_v32 = vld [vmem:[#allocation38_spill] sm:$0xff] }
 0x232   :  { %5261 = vst [vmem:[#allocation30_spill] sm:$0xff] %v2809_v19  ;;  %v886_v9 = vmul.f32 %v2803_v38, %v2803_v38  ;;  %v2845_v38 = vsub.f32 %v5270_v32, %v2620_v52  ;;  %v2863_v32 = vsub.f32 %v5176_v2, %v2473_v56  ;;  %v894_v2 = vmul.f32 %v2851_v15, %v2851_v15 }
 0x233   :  { %v970_v5 = vadd.f32 %v969_v31, %v880_v48  ;;  %5264 = vst [vmem:[#allocation34_spill] sm:$0xff] %v2821_v55  ;;  %v829_v48 = vmul.f32 %v2797_v14, %v2797_v14  ;;  %v1012_v31 = vadd.f32 %v1011_v3, %v827_v46  ;;  %v2839_v14 = vsub.f32 %v5268_v11, %v2473_v56  ;;  %v5272_v11 = vld [vmem:[#allocation41_spill] sm:$0xff] }
 0x234   :  { %5267 = vst [vmem:[#allocation32_spill] sm:$0xff] %v2833_v6  ;;  %v888_v46 = vmul.f32 %v2815_v8, %v2815_v8 }
 0x235   :  { %v971_v45 = vadd.f32 %v970_v5, %v882_v25  ;;  %v831_v25 = vmul.f32 %v2809_v19, %v2809_v19  ;;  %v1013_v5 = vadd.f32 %v1012_v31, %v829_v48  ;;  %5269 = vst [vmem:[#allocation36_spill] sm:$0xff] %v2839_v14  ;;  %v890_v48 = vmul.f32 %v2827_v12, %v2827_v12 }
 0x236   :  { %5271 = vst [vmem:[#allocation35_spill] sm:$0xff] %v2845_v38  ;;  %v2857_v19 = vsub.f32 %v5272_v11, %v2620_v52  ;;  %v892_v39 = vmul.f32 %v2839_v14, %v2839_v14  ;;  %v5276_v11 = vld [vmem:[#allocation48_spill] sm:$0xff] }
 0x237   :  { %v972_v16 = vadd.f32 %v971_v45, %v884_v40  ;;  %v833_v40 = vmul.f32 %v2821_v55, %v2821_v55  ;;  %v1014_v45 = vadd.f32 %v1013_v5, %v831_v25  ;;  %v5274_v5 = vld [vmem:[#allocation44_spill] sm:$0xff] }
 0x238   :  { %5273 = vst [vmem:[#allocation39_spill] sm:$0xff] %v2857_v19  ;;  %v2869_v55 = vsub.f32 %v5274_v5, %v2620_v52  ;;  %v2887_v5 = vsub.f32 %v5180_v50, %v2473_v56 }
 0x239   :  { %v973_v3 = vadd.f32 %v972_v16, %v886_v9  ;;  %v835_v9 = vmul.f32 %v2833_v6, %v2833_v6  ;;  %v1015_v16 = vadd.f32 %v1014_v45, %v833_v40  ;;  %v2875_v6 = vsub.f32 %v5276_v11, %v2473_v56  ;;  %v5278_v45 = vld [vmem:[#allocation46_spill] sm:$0xff]  ;;  %v5280_v11 = vld [vmem:[#allocation49_spill] sm:$0xff] }
 0x23a   :  { %5275 = vst [vmem:[#allocation38_spill] sm:$0xff] %v2869_v55  ;;  %v2881_v14 = vsub.f32 %v5278_v45, %v2620_v52  ;;  %v2899_v45 = vsub.f32 %v5181_v10, %v2473_v56  ;;  %v900_v10 = vmul.f32 %v2887_v5, %v2887_v5 }
 0x23b   :  { %v974_v31 = vadd.f32 %v973_v3, %v888_v46  ;;  %v837_v46 = vmul.f32 %v2845_v38, %v2845_v38  ;;  %v1016_v3 = vadd.f32 %v1015_v16, %v835_v9  ;;  %5277 = vst [vmem:[#allocation41_spill] sm:$0xff] %v2875_v6  ;;  %v896_v9 = vmul.f32 %v2863_v32, %v2863_v32 }
 0x23c   :  { %5279 = vst [vmem:[#allocation44_spill] sm:$0xff] %v2881_v14  ;;  %v2893_v38 = vsub.f32 %v5280_v11, %v2620_v52  ;;  %v898_v50 = vmul.f32 %v2875_v6, %v2875_v6  ;;  %v5284_v11 = vld [vmem:[#allocation56_spill] sm:$0xff] }
 0x23d   :  { %v975_v25 = vadd.f32 %v974_v31, %v890_v48  ;;  %v839_v48 = vmul.f32 %v2857_v19, %v2857_v19  ;;  %v1017_v31 = vadd.f32 %v1016_v3, %v837_v46  ;;  %v5282_v3 = vld [vmem:[#allocation52_spill] sm:$0xff] }
 0x23e   :  { %5281 = vst [vmem:[#allocation48_spill] sm:$0xff] %v2893_v38  ;;  %v2905_v19 = vsub.f32 %v5282_v3, %v2620_v52  ;;  %v2923_v3 = vsub.f32 %v5184_v17, %v2473_v56 }
 0x23f   :  { %v976_v40 = vadd.f32 %v975_v25, %v892_v39  ;;  %v841_v39 = vmul.f32 %v2869_v55, %v2869_v55  ;;  %v1018_v25 = vadd.f32 %v1017_v31, %v839_v48  ;;  %v2911_v55 = vsub.f32 %v5284_v11, %v2473_v56  ;;  %v5285_v31 = vld [vmem:[#allocation55_spill] sm:$0xff] }
 0x240   :  { %5283 = vst [vmem:[#allocation46_spill] sm:$0xff] %v2905_v19  ;;  %v2917_v6 = vsub.f32 %v5285_v31, %v2620_v52  ;;  %v847_v11 = vmul.f32 %v2905_v19, %v2905_v19 }
 0x241   :  { %v977_v16 = vadd.f32 %v976_v40, %v894_v2  ;;  %v843_v2 = vmul.f32 %v2881_v14, %v2881_v14  ;;  %v1019_v40 = vadd.f32 %v1018_v25, %v841_v39  ;;  %v902_v39 = vmul.f32 %v2899_v45, %v2899_v45 }
 0x242   :  { %5286 = vst [vmem:[#allocation49_spill] sm:$0xff] %v2917_v6  ;;  %v849_v14 = vmul.f32 %v2917_v6, %v2917_v6  ;;  %v5290_v6 = vld [vmem:[#allocation60_spill] sm:$0xff] }
 0x243   :  { %v978_v46 = vadd.f32 %v977_v16, %v896_v9  ;;  %v845_v9 = vmul.f32 %v2893_v38, %v2893_v38  ;;  %v1020_v16 = vadd.f32 %v1019_v40, %v843_v2  ;;  %v904_v38 = vmul.f32 %v2911_v55, %v2911_v55  ;;  %v5288_v40 = vld [vmem:[#allocation58_spill] sm:$0xff] }
 0x244   :  { %v2937_v17 = vsub.f32 %v5288_v40, %v2620_v52 }
 0x245   :  { %v979_v48 = vadd.f32 %v978_v46, %v898_v50  ;;  %v1021_v50 = vadd.f32 %v1020_v16, %v845_v9  ;;  %v5287_v46 = vld [vmem:[#allocation62_spill] sm:$0xff]  ;;  %v906_v9 = vmul.f32 %v2923_v3, %v2923_v3 }
 0x246   :  { %v2931_v31 = vsub.f32 %v5287_v46, %v2473_v56  ;;  %5289 = vst [vmem:[#allocation52_spill] sm:$0xff] %v2937_v17  ;;  %v2949_v46 = vsub.f32 %v2311_v51, %v2473_v56 }
 0x247   :  { %v980_v25 = vadd.f32 %v979_v48, %v900_v10  ;;  %v1022_v10 = vadd.f32 %v1021_v50, %v847_v11  ;;  %v2943_v48 = vsub.f32 %v2289_v62, %v2473_v56  ;;  %v2955_v11 = vsub.f32 %v5290_v6, %v2620_v52 }
 0x248   :  { %v851_v62 = vmul.f32 %v2937_v17, %v2937_v17  ;;  %v2961_v50 = vsub.f32 %v2329_v59, %v2473_v56  ;;  %v912_v6 = vmul.f32 %v2949_v46, %v2949_v46  ;;  %v2979_v17 = vsub.f32 %v2365_v27, %v2473_v56 }
 0x249   :  { %v981_v2 = vadd.f32 %v980_v25, %v902_v39  ;;  %v1023_v39 = vadd.f32 %v1022_v10, %v849_v14  ;;  %v908_v25 = vmul.f32 %v2931_v31, %v2931_v31  ;;  %5291 = vst [vmem:[#allocation56_spill] sm:$0xff] %v2955_v11  ;;  %v910_v51 = vmul.f32 %v2943_v48, %v2943_v48 }
 0x24a   :  { %v853_v59 = vmul.f32 %v2955_v11, %v2955_v11  ;;  %5294 = vst [vmem:[#allocation62_spill] sm:$0xff] %v2979_v17  ;;  %v5298_v11 = vld [vmem:[#allocation81_spill] sm:$0xff] }
 0x24b   :  { %v982_v16 = vadd.f32 %v981_v2, %v904_v38  ;;  %v1024_v14 = vadd.f32 %v1023_v39, %v851_v62  ;;  %v2967_v2 = vsub.f32 %v2347_v7, %v2473_v56  ;;  %v914_v39 = vmul.f32 %v2961_v50, %v2961_v50 }
 0x24c   :  { %v2997_v19 = vsub.f32 %v5298_v11, %v2473_v56 }
 0x24d   :  { %v983_v40 = vadd.f32 %v982_v16, %v906_v9  ;;  %v5292_v9 = vld [vmem:[#allocation63_spill] sm:$0xff]  ;;  %v916_v62 = vmul.f32 %v2967_v2, %v2967_v2 }
 0x24e   :  { %v2973_v16 = vsub.f32 %v5292_v9, %v2620_v52 }
 0x24f   :  { %v984_v38 = vadd.f32 %v983_v40, %v908_v25  ;;  %v1025_v25 = vadd.f32 %v1024_v14, %v853_v59  ;;  %v2985_v40 = vsub.f32 %v2387_v36, %v2473_v56  ;;  %v918_v14 = vmul.f32 %v2979_v17, %v2979_v17 }
 0x250   :  { %5293 = vst [vmem:[#allocation55_spill] sm:$0xff] %v2973_v16  ;;  %v855_v27 = vmul.f32 %v2973_v16, %v2973_v16  ;;  %v922_v16 = vmul.f32 %v2997_v19, %v2997_v19 }
 0x251   :  { %v985_v10 = vadd.f32 %v984_v38, %v910_v51  ;;  %5295 = vst [vmem:[#allocation58_spill] sm:$0xff] %v2985_v40  ;;  %v5296_v38 = vld [vmem:[#allocation65_spill] sm:$0xff]  ;;  %v920_v59 = vmul.f32 %v2985_v40, %v2985_v40 }
 0x252   :  { %v2991_v9 = vsub.f32 %v5296_v38, %v2620_v52 }
 0x253   :  { %v986_v7 = vadd.f32 %v985_v10, %v912_v6  ;;  %v1026_v6 = vadd.f32 %v1025_v25, %v855_v27  ;;  %v3003_v10 = vsub.f32 %v2412_v49, %v2473_v56 }
 0x254   :  { %5297 = vst [vmem:[#allocation60_spill] sm:$0xff] %v2991_v9  ;;  %v857_v11 = vmul.f32 %v2991_v9, %v2991_v9 }
 0x255   :  { %v987_v51 = vadd.f32 %v986_v7, %v914_v39  ;;  %v5299_v7 = vld [vmem:[#allocation67_spill] sm:$0xff]  ;;  %v924_v27 = vmul.f32 %v3003_v10, %v3003_v10 }
 0x256   :  { %v3009_v38 = vsub.f32 %v5299_v7, %v2620_v52  ;;  %v1027_v25 = vadd.f32 %v1026_v6, %v857_v11  ;;  %v5305_v11 = vld [vmem:[#allocation72_spill] sm:$0xff] }
 0x257   :  { %v988_v36 = vadd.f32 %v987_v51, %v916_v62  ;;  %v5301_v51 = vld [vmem:[#allocation42_spill] sm:$0xff] }
 0x258   :  { %5300 = vst [vmem:[#allocation63_spill] sm:$0xff] %v3009_v38  ;;  %v3017_v49 = vsub.f32 %v5301_v51, %v2473_v56  ;;  %v859_v9 = vmul.f32 %v3009_v38, %v3009_v38  ;;  %v3035_v51 = vsub.f32 %v5305_v11, %v2620_v52  ;;  %v930_v11 = vmul.f32 %v2477_v37, %v2477_v37  ;;  %v5309_v38 = vld [vmem:[#allocation78_spill] sm:$0xff] }
 0x259   :  { %v989_v39 = vadd.f32 %v988_v36, %v918_v14  ;;  %v5302_v36 = vld [vmem:[#allocation70_spill] sm:$0xff] }
 0x25a   :  { %v3023_v7 = vsub.f32 %v5302_v36, %v2620_v52  ;;  %v1028_v17 = vadd.f32 %v1027_v25, %v859_v9  ;;  %5306 = vst [vmem:[#allocation81_spill] sm:$0xff] %v3035_v51  ;;  %v5307_v9 = vld [vmem:[#allocation75_spill] sm:$0xff] }
 0x25b   :  { %v990_v62 = vadd.f32 %v989_v39, %v920_v59  ;;  %v5304_v59 = vld [vmem:[#allocation45_spill] sm:$0xff]  ;;  %v926_v39 = vmul.f32 %v3017_v49, %v3017_v49  ;;  %v3043_v25 = vsub.f32 %v5307_v9, %v2620_v52  ;;  %v5311_v9 = vld [vmem:[#allocation80_spill] sm:$0xff] }
 0x25c   :  { %5303 = vst [vmem:[#allocation65_spill] sm:$0xff] %v3023_v7  ;;  %v3029_v6 = vsub.f32 %v5304_v59, %v2473_v56  ;;  %v863_v56 = vmul.f32 %v3035_v51, %v3035_v51  ;;  %v3059_v51 = vsub.f32 %v5311_v9, %v2620_v52 }
 0x25d   :  { %v991_v14 = vadd.f32 %v990_v62, %v922_v16  ;;  %v861_v16 = vmul.f32 %v3023_v7, %v3023_v7  ;;  %5308 = vst [vmem:[#allocation67_spill] sm:$0xff] %v3043_v25  ;;  %v3051_v7 = vsub.f32 %v5309_v38, %v2620_v52  ;;  %v5313_v38 = vld [vmem:[#allocation15_spill] sm:$0xff] }
 0x25e   :  { %5312 = vst [vmem:[#allocation70_spill] sm:$0xff] %v3059_v51 }
 0x25f   :  { %v992_v40 = vadd.f32 %v991_v14, %v924_v27  ;;  %v1029_v36 = vadd.f32 %v1028_v17, %v861_v16  ;;  %v928_v27 = vmul.f32 %v3029_v6, %v3029_v6  ;;  %5310 = vst [vmem:[#allocation42_spill] sm:$0xff] %v3051_v7  ;;  %v865_v17 = vmul.f32 %v3043_v25, %v3043_v25 }
 0x260   :  { %v932_v16 = vmul.f32 %v2480_v53, %v2480_v53 }
 0x261   :  { %v993_v62 = vadd.f32 %v992_v40, %v926_v39  ;;  %v1030_v59 = vadd.f32 %v1029_v36, %v863_v56  ;;  %v3065_v56 = vsub.f32 %v5313_v38, %v2620_v52 }
 0x263   :  { %v994_v14 = vadd.f32 %v993_v62, %v928_v27  ;;  %v1031_v39 = vadd.f32 %v1030_v59, %v865_v17  ;;  %v867_v62 = vmul.f32 %v3051_v7, %v3051_v7  ;;  %5314 = vst [vmem:[#allocation45_spill] sm:$0xff] %v3065_v56  ;;  %v5315_v17 = vld [vmem:[#allocation19_spill] sm:$0xff]  ;;  %v871_v9 = vmul.f32 %v3065_v56, %v3065_v56 }
 0x264   :  { %v3071_v25 = vsub.f32 %v5315_v17, %v2620_v52 }
 0x265   :  { %v995_v40 = vadd.f32 %v994_v14, %v930_v11  ;;  %v1032_v27 = vadd.f32 %v1031_v39, %v867_v62  ;;  %v869_v14 = vmul.f32 %v3059_v51, %v3059_v51 }
 0x266   :  { %5316 = vst [vmem:[#allocation72_spill] sm:$0xff] %v3071_v25 }
 0x267   :  { %v996_v36 = vadd.f32 %v995_v40, %v932_v16  ;;  %v1033_v11 = vadd.f32 %v1032_v27, %v869_v14  ;;  %v5317_v40 = vld [vmem:[#allocation23_spill] sm:$0xff]  ;;  %v873_v16 = vmul.f32 %v3071_v25, %v3071_v25  ;;  %v5319_v27 = vld [vmem:[#allocation26_spill] sm:$0xff] }
 0x268   :  { %v3077_v39 = vsub.f32 %v5317_v40, %v2620_v52  ;;  %v3083_v14 = vsub.f32 %v5319_v27, %v2620_v52 }
 0x269   :  { %v997_v59 = vrot.slane %v996_v36, 4  ;;  %v1034_v7 = vadd.f32 %v1033_v11, %v871_v9 }
 0x26a   :  { %5318 = vst [vmem:[#allocation75_spill] sm:$0xff] %v3077_v39  ;;  %v875_v17 = vmul.f32 %v3077_v39, %v3077_v39  ;;  %v877_v11 = vmul.f32 %v3083_v14, %v3083_v14 }
 0x26b   :  { %v998_v37 = vadd.f32 %v997_v59, %v996_v36  ;;  %v1035_v38 = vadd.f32 %v1034_v7, %v873_v16  ;;  %5320 = vst [vmem:[#allocation78_spill] sm:$0xff] %v3083_v14  ;;  %v5321_v36 = vld [vmem:[#allocation29_spill] sm:$0xff] }
 0x26c   :  { %v3089_v59 = vsub.f32 %v5321_v36, %v2620_v52  ;;  %v5323_v7 = vld [vmem:[#allocation33_spill] sm:$0xff] }
 0x26d   :  { %v999_v62 = vrot.slane %v998_v37, 2  ;;  %v1036_v56 = vadd.f32 %v1035_v38, %v875_v17  ;;  %v3095_v16 = vsub.f32 %v5323_v7, %v2620_v52 }
 0x26e   :  { %5322 = vst [vmem:[#allocation80_spill] sm:$0xff] %v3089_v59  ;;  %v879_v27 = vmul.f32 %v3089_v59, %v3089_v59 }
 0x26f   :  { %v1000_v51 = vadd.f32 %v999_v62, %v998_v37  ;;  %v1037_v40 = vadd.f32 %v1036_v56, %v877_v11  ;;  %5324 = vst [vmem:[#allocation15_spill] sm:$0xff] %v3095_v16  ;;  %v5325_v37 = vld [vmem:[#allocation37_spill] sm:$0xff]  ;;  %v881_v38 = vmul.f32 %v3095_v16, %v3095_v16  ;;  %v5327_v56 = vld [vmem:[#allocation40_spill] sm:$0xff] }
 0x270   :  { %v3101_v62 = vsub.f32 %v5325_v37, %v2620_v52  ;;  %v3108_v11 = vsub.f32 %v5327_v56, %v2620_v52 }
 0x271   :  { %v1001_v9 = vrot.slane %v1000_v51, 1  ;;  %v1038_v39 = vadd.f32 %v1037_v40, %v879_v27 }
 0x272   :  { %5326 = vst [vmem:[#allocation19_spill] sm:$0xff] %v3101_v62  ;;  %v883_v7 = vmul.f32 %v3101_v62, %v3101_v62  ;;  %v885_v27 = vmul.f32 %v3108_v11, %v3108_v11 }
 0x273   :  { %v1002_v25 = vadd.f32 %v1001_v9, %v1000_v51  ;;  %v1039_v36 = vadd.f32 %v1038_v39, %v881_v38  ;;  %5328 = vst [vmem:[#allocation23_spill] sm:$0xff] %v3108_v11  ;;  %v5329_v9 = vld [vmem:[#allocation43_spill] sm:$0xff] }
 0x274   :  { %v3114_v40 = vsub.f32 %v5329_v9, %v2620_v52 }
 0x275   :  { %v1072_v17 = vmul.f32 %v1002_v25, %v2469_v33  ;;  %v1040_v51 = vadd.f32 %v1039_v36, %v883_v7  ;;  %v5331_v25 = vld [vmem:[#allocation47_spill] sm:$0xff] }
 0x276   :  { %5330 = vst [vmem:[#allocation26_spill] sm:$0xff] %v3114_v40  ;;  %v3120_v39 = vsub.f32 %v5331_v25, %v2620_v52  ;;  %v887_v38 = vmul.f32 %v3114_v40, %v3114_v40 }
 0x277   :  { %v1074_v59 = vadd.f32 1e-05, %v1072_v17  ;;  %v1041_v37 = vadd.f32 %v1040_v51, %v885_v27  ;;  %v5333_v17 = vld [vmem:[#allocation51_spill] sm:$0xff]  ;;  %v5335_v51 = vld [vmem:[#allocation54_spill] sm:$0xff] }
 0x278   :  { %5332 = vst [vmem:[#allocation29_spill] sm:$0xff] %v3120_v39  ;;  %v3126_v36 = vsub.f32 %v5333_v17, %v2620_v52  ;;  %v889_v7 = vmul.f32 %v3120_v39, %v3120_v39  ;;  %v3132_v27 = vsub.f32 %v5335_v51, %v2620_v52 }
 0x279   :  { %1787 = vrsqrt.f32 %v1074_v59  ;;  %v1042_v56 = vadd.f32 %v1041_v37, %v887_v38  ;;  %v5337_v37 = vld [vmem:[#allocation57_spill] sm:$0xff]  ;;  %vm1082_vm2 = vweird.f32 %v1074_v59 }
 0x27a   :  { %5334 = vst [vmem:[#allocation33_spill] sm:$0xff] %v3126_v36  ;;  %v891_v25 = vmul.f32 %v3126_v36, %v3126_v36  ;;  %v3138_v38 = vsub.f32 %v5337_v37, %v2620_v52  ;;  %v893_v17 = vmul.f32 %v3132_v27, %v3132_v27 }
 0x27b   :  { %v1043_v11 = vadd.f32 %v1042_v56, %v889_v7  ;;  %5336 = vst [vmem:[#allocation37_spill] sm:$0xff] %v3132_v27  ;;  %v5339_v56 = vld [vmem:[#allocation61_spill] sm:$0xff]  ;;  %v5386_v27 = vld [vmem:[#allocation12_spill] sm:$0xff] }
 0x27c   :  { %5338 = vst [vmem:[#allocation40_spill] sm:$0xff] %v3138_v38  ;;  %v3144_v7 = vsub.f32 %v5339_v56, %v2620_v52  ;;  %v895_v51 = vmul.f32 %v3138_v38, %v3138_v38 }
 0x27d   :  { %v1044_v40 = vadd.f32 %v1043_v11, %v891_v25  ;;  %v5341_v11 = vld [vmem:[#allocation64_spill] sm:$0xff] }
 0x27e   :  { %5340 = vst [vmem:[#allocation43_spill] sm:$0xff] %v3144_v7  ;;  %v897_v25 = vmul.f32 %v3144_v7, %v3144_v7 }
 0x27f   :  { %v1788_v62 = vpop.eup %1787  ;;  %v1045_v39 = vadd.f32 %v1044_v40, %v893_v17  ;;  %v5343_v40 = vld [vmem:[#allocation66_spill] sm:$0xff] }
 0x280   :  { %v1077_v9 = vmul.f32 %v1788_v62, %v1074_v59  ;;  %vm1083_vm1 = vweird.f32 %v1788_v62  ;;  %v3156_v17 = vsub.f32 %v5343_v40, %v2620_v52 }
 0x281   :  { %v1046_v36 = vadd.f32 %v1045_v39, %v895_v51  ;;  %vm1084_vm3 = vmor %vm1082_vm2, %vm1083_vm1  ;;  %v3165_v39 = vld [vmem:[%s4855_s2] sm:$0x3] }
 0x282   :  { %v1078_v16 = vmul.f32 %v1788_v62, %v1077_v9  ;;  %v3150_v9 = vsub.f32 %v5341_v11, %v2620_v52  ;;  %5344 = vst [vmem:[#allocation51_spill] sm:$0xff] %v3156_v17  ;;  %v901_v59 = vmul.f32 %v3156_v17, %v3156_v17 }
 0x283   :  { %5345 = vst [vmem:[#allocation54_spill] sm:$0xff] %v3165_v39 }
 0x284   :  { %v1079_v14 = vmul.f32 0.5, %v1078_v16  ;;  %5342 = vst [vmem:[#allocation47_spill] sm:$0xff] %v3150_v9  ;;  %v1047_v16 = vadd.f32 %v1046_v36, %v897_v25  ;;  %v899_v56 = vmul.f32 %v3150_v9, %v3150_v9  ;;  %v3176_v25 = vperm.slane %v3165_v39, 0  ;;  %v5352_v9 = vld [vmem:[#allocation76_spill] sm:$0xff] }
 0x285   :  { %v3195_v7 = vsub.f32 %v5352_v9, %v2620_v52  ;;  %v5392_v39 = vld [vmem:[#allocation20_spill] sm:$0xff] }
 0x286   :  { %v1080_v33 = vsub.f32 1.5, %v1079_v14  ;;  %v1048_v51 = vadd.f32 %v1047_v16, %v899_v56  ;;  %v5349_v16 = vld [vmem:[#allocation73_spill] sm:$0xff] }
 0x287   :  { %v3185_v40 = vsub.f32 %v5349_v16, %v2620_v52 }
 0x288   :  { %v1081_v37 = vmul.f32 %v1788_v62, %v1080_v33  ;;  %v5346_v33 = vld [vmem:[#allocation68_spill] sm:$0xff] }
 0x289   :  { %v3169_v36 = vsub.f32 %v5346_v33, %v2620_v52  ;;  %5350 = vst [vmem:[#allocation64_spill] sm:$0xff] %v3185_v40 }
 0x28a   :  { %v3160_v14 = vsel %vm1084_vm3, %v1788_v62, %v1081_v37  ;;  %v3181_v62 = vld [vmem:[%s4856_s3] sm:$0x3]  ;;  %v1049_v37 = vadd.f32 %v1048_v51, %v901_v59  ;;  %5353 = vst [vmem:[#allocation68_spill] sm:$0xff] %v3195_v7  ;;  %v905_v51 = vmul.f32 %v3185_v40, %v3185_v40  ;;  %v5383_v40 = vld [vmem:[#allocation77_spill] sm:$0xff] }
 0x28b   :  { %5347 = vst [vmem:[#allocation57_spill] sm:$0xff] %v3169_v36  ;;  %v1222_v11 = vmul.f32 %v3160_v14, %v2480_v53  ;;  %v903_v56 = vmul.f32 %v3169_v36, %v3169_v36  ;;  %v3191_v53 = vperm.slane %v3181_v62, 0  ;;  %v3204_v36 = vsub.f32 %v2375_v20, %v2620_v52 }
 0x28c   :  { %5348 = vst [vmem:[#allocation61_spill] sm:$0xff] %v3181_v62  ;;  %v5390_v62 = vld [vmem:[#allocation17_spill] sm:$0xff] }
 0x28d   :  { %v1356_v33 = vmul.f32 %v3176_v25, %v1222_v11  ;;  %5351 = vst [vmem:[#allocation66_spill] sm:$0xff] %v3191_v53  ;;  %v1050_v17 = vadd.f32 %v1049_v37, %v903_v56  ;;  %v907_v11 = vmul.f32 %v3195_v7, %v3195_v7  ;;  %v3210_v37 = vsub.f32 %v2393_v1, %v2620_v52  ;;  %v5382_v7 = vld [vmem:[#allocation74_spill] sm:$0xff] }
 0x28e   :  { %5355 = vst [vmem:[#allocation76_spill] sm:$0xff] %v3204_v36  ;;  %v909_v9 = vmul.f32 %v3204_v36, %v3204_v36  ;;  %v3226_v1 = vsub.f32 %v2430_v35, %v2620_v52  ;;  %v5381_v36 = vld [vmem:[#allocation71_spill] sm:$0xff] }
 0x28f   :  { %v3200_v59 = vadd.f32 %v3191_v53, %v1356_v33  ;;  %v1051_v16 = vadd.f32 %v1050_v17, %v905_v51  ;;  %5356 = vst [vmem:[#allocation92_spill] sm:$0xff] %v3210_v37  ;;  %v3216_v33 = vsub.f32 %v2406_v63, %v2620_v52  ;;  %v911_v20 = vmul.f32 %v3210_v37, %v3210_v37  ;;  %v5380_v37 = vld [vmem:[#allocation69_spill] sm:$0xff] }
 0x290   :  { %v3222_v17 = vsub.f32 %v2417_v28, %v2620_v52  ;;  %5359 = vst [vmem:[#allocation95_spill] sm:$0xff] %v3226_v1  ;;  %v3238_v28 = vsub.f32 %v2450_v47, %v2620_v52  ;;  %v5395_v53 = vld [vmem:[#allocation25_spill] sm:$0xff] }
 0x291   :  { %5354 = vst [vmem:[#allocation73_spill] sm:$0xff] %v3200_v59  ;;  %v1052_v38 = vadd.f32 %v1051_v16, %v907_v11  ;;  %v913_v16 = vmul.f32 %v3216_v33, %v3216_v33  ;;  %v5393_v59 = vld [vmem:[#allocation22_spill] sm:$0xff] }
 0x292   :  { %5357 = vst [vmem:[#allocation93_spill] sm:$0xff] %v3216_v33  ;;  %v915_v63 = vmul.f32 %v3222_v17, %v3222_v17  ;;  %v921_v47 = vmul.f32 %v3238_v28, %v3238_v28  ;;  %v5379_v33 = vld [vmem:[#allocation91_spill] sm:$0xff] }
 0x293   :  { %v1053_v56 = vadd.f32 %v1052_v38, %v909_v9  ;;  %5358 = vst [vmem:[#allocation94_spill] sm:$0xff] %v3222_v17  ;;  %v3232_v38 = vsub.f32 %v2441_v26, %v2620_v52  ;;  %v917_v9 = vmul.f32 %v3226_v1, %v3226_v1  ;;  %v3250_v17 = vsub.f32 %v2462_v41, %v2620_v52  ;;  %v5365_v41 = vld [vmem:[#allocation59_spill] sm:$0xff] }
 0x294   :  { %5361 = vst [vmem:[#allocation97_spill] sm:$0xff] %v3238_v28  ;;  %v5378_v28 = vld [vmem:[#allocation90_spill] sm:$0xff] }
 0x295   :  { %v1054_v51 = vadd.f32 %v1053_v56, %v911_v20  ;;  %5360 = vst [vmem:[#allocation96_spill] sm:$0xff] %v3232_v38  ;;  %v3244_v56 = vsub.f32 %v2457_v43, %v2620_v52  ;;  %v919_v26 = vmul.f32 %v3232_v38, %v3232_v38  ;;  %v3258_v43 = vsub.f32 %v2466_v22, %v2620_v52 }
 0x296   :  { %5363 = vst [vmem:[#allocation99_spill] sm:$0xff] %v3250_v17  ;;  %v3264_v38 = vsub.f32 %v5365_v41, %v2620_v52  ;;  %v5368_v41 = vld [vmem:[#allocation2_spill] sm:$0xff] }
 0x297   :  { %v1055_v11 = vadd.f32 %v1054_v51, %v913_v16  ;;  %5362 = vst [vmem:[#allocation98_spill] sm:$0xff] %v3244_v56  ;;  %v923_v16 = vmul.f32 %v3244_v56, %v3244_v56  ;;  %v5377_v56 = vld [vmem:[#allocation89_spill] sm:$0xff] }
 0x298   :  { %5364 = vst [vmem:[#allocation100_spill] sm:$0xff] %v3258_v43  ;;  %v929_v22 = vmul.f32 %v3264_v38, %v3264_v38 }
 0x299   :  { %v1056_v35 = vadd.f32 %v1055_v11, %v915_v63  ;;  %v925_v11 = vmul.f32 %v3250_v17, %v3250_v17  ;;  %5366 = vst [vmem:[#allocation59_spill] sm:$0xff] %v3264_v38  ;;  %v5375_v38 = vld [vmem:[#allocation86_spill] sm:$0xff]  ;;  %v5376_v17 = vld [vmem:[#allocation87_spill] sm:$0xff] }
 0x29b   :  { %v1057_v20 = vadd.f32 %v1056_v35, %v917_v9 }
 0x29d   :  { %v1058_v51 = vadd.f32 %v1057_v20, %v919_v26  ;;  %v927_v26 = vmul.f32 %v3258_v43, %v3258_v43  ;;  %v3280_v43 = vmul.f32 %v3160_v14, %v5368_v41  ;;  %v5372_v41 = vld [vmem:[#allocation83_spill] sm:$0xff] }
 0x29f   :  { %v1059_v63 = vadd.f32 %v1058_v51, %v921_v47  ;;  %v3270_v47 = vsub.f32 %v2494_v42, %v2620_v52  ;;  %v5370_v52 = vld [vmem:[#allocation6_spill] sm:$0xff] }
 0x2a1   :  { %v1060_v9 = vadd.f32 %v1059_v63, %v923_v16  ;;  %5367 = vst [vmem:[#allocation101_spill] sm:$0xff] %v3270_v47  ;;  %v931_v16 = vmul.f32 %v3270_v47, %v3270_v47  ;;  %v5374_v47 = vld [vmem:[#allocation85_spill] sm:$0xff] }
 0x2a3   :  { %v1061_v35 = vadd.f32 %v1060_v9, %v925_v11  ;;  %v933_v11 = vmul.f32 %v2635_v0, %v2635_v0  ;;  %v5388_v0 = vld [vmem:[#allocation14_spill] sm:$0xff] }
 0x2a5   :  { %v1062_v20 = vadd.f32 %v1061_v35, %v927_v26  ;;  %v5369_v35 = vld [vmem:[#allocation4_spill] sm:$0xff]  ;;  %v3288_v26 = vmul.f32 %v3160_v14, %v5370_v52 }
 0x2a6   :  { %v3284_v42 = vmul.f32 %v3160_v14, %v5369_v35  ;;  %v3316_v35 = vmul.f32 %v3160_v14, %v2543_v21  ;;  %v3336_v21 = vmul.f32 %v3160_v14, %v2573_v44  ;;  %v3356_v44 = vmul.f32 %v3160_v14, %v2603_v58 }
 0x2a7   :  { %v1063_v51 = vadd.f32 %v1062_v20, %v929_v22  ;;  %v3292_v20 = vmul.f32 %v3160_v14, %v2507_v57  ;;  %v5371_v22 = vld [vmem:[#allocation82_spill] sm:$0xff]  ;;  %v3312_v57 = vmul.f32 %v3160_v14, %v5372_v41  ;;  %v5373_v41 = vld [vmem:[#allocation84_spill] sm:$0xff]  ;;  %v3376_v58 = vmul.f32 %v3160_v14, %v5377_v56 }
 0x2a8   :  { %v3396_v56 = vmul.f32 %v3160_v14, %v5382_v7  ;;  %v3416_v7 = vmul.f32 %v3160_v14, %v5388_v0 }
 0x2a9   :  { %v1064_v63 = vadd.f32 %v1063_v51, %v931_v16  ;;  %v3296_v51 = vmul.f32 %v3160_v14, %v5371_v22  ;;  %v3300_v16 = vmul.f32 %v3160_v14, %v2518_v4  ;;  %v3320_v4 = vmul.f32 %v3160_v14, %v2549_v60 }
 0x2aa   :  { %v3332_v22 = vmul.f32 %v3160_v14, %v2567_v29  ;;  %v3340_v60 = vmul.f32 %v3160_v14, %v2579_v34  ;;  %v3352_v29 = vmul.f32 %v3160_v14, %v2597_v24  ;;  %v3360_v34 = vmul.f32 %v3160_v14, %v5373_v41  ;;  %5389 = vst [vmem:[#allocation4_spill] sm:$0xff] %v3416_v7  ;;  %v5397_v7 = vld [vmem:[#allocation31_spill] sm:$0xff] }
 0x2ab   :  { %v1065_v9 = vadd.f32 %v1064_v63, %v933_v11  ;;  %v3304_v63 = vmul.f32 %v3160_v14, %v2525_v54  ;;  %v3308_v11 = vmul.f32 %v3160_v14, %v2531_v30  ;;  %v3324_v54 = vmul.f32 %v3160_v14, %v2555_v13 }
 0x2ac   :  { %v3328_v30 = vmul.f32 %v3160_v14, %v2561_v23  ;;  %v3344_v13 = vmul.f32 %v3160_v14, %v2585_v18  ;;  %v3348_v23 = vmul.f32 %v3160_v14, %v2591_v61  ;;  %v3364_v18 = vmul.f32 %v3160_v14, %v5374_v47 }
 0x2ad   :  { %v1066_v52 = vrot.slane %v1065_v9, 4  ;;  %v3368_v61 = vmul.f32 %v3160_v14, %v5375_v38  ;;  %v3372_v24 = vmul.f32 %v3160_v14, %v5376_v17  ;;  %v3380_v41 = vmul.f32 %v3160_v14, %v5378_v28 }
 0x2ae   :  { %v3384_v47 = vmul.f32 %v3160_v14, %v5379_v33  ;;  %v3388_v38 = vmul.f32 %v3160_v14, %v5380_v37  ;;  %v3392_v17 = vmul.f32 %v3160_v14, %v5381_v36  ;;  %v3400_v28 = vmul.f32 %v3160_v14, %v5383_v40 }
 0x2af   :  { %v1067_v1 = vadd.f32 %v1066_v52, %v1065_v9  ;;  %v5384_v9 = vld [vmem:[#allocation79_spill] sm:$0xff]  ;;  %v5385_v52 = vld [vmem:[#allocation10_spill] sm:$0xff]  ;;  %v3412_v36 = vmul.f32 %v3160_v14, %v5386_v27  ;;  %v3420_v40 = vmul.f32 %v3160_v14, %v5390_v62  ;;  %v3432_v27 = vmul.f32 %v3160_v14, %v5395_v53 }
 0x2b0   :  { %v3404_v33 = vmul.f32 %v3160_v14, %v5384_v9  ;;  %v3408_v37 = vmul.f32 %v3160_v14, %v5385_v52  ;;  %v3424_v9 = vmul.f32 %v3160_v14, %v5392_v39  ;;  %v3428_v52 = vmul.f32 %v3160_v14, %v5393_v59 }
 0x2b1   :  { %5387 = vst [vmem:[#allocation2_spill] sm:$0xff] %v3412_v36  ;;  %v5396_v36 = vld [vmem:[#allocation28_spill] sm:$0xff]  ;;  %v3440_v62 = vmul.f32 %v3160_v14, %v5397_v7  ;;  %v3444_v39 = vmul.f32 %v3160_v14, %v2815_v8  ;;  %v3448_v59 = vmul.f32 %v3160_v14, %v2827_v12  ;;  %v3460_v7 = vmul.f32 %v3160_v14, %v2863_v32 }
 0x2b2   :  { %5391 = vst [vmem:[#allocation6_spill] sm:$0xff] %v3420_v40  ;;  %v3436_v0 = vmul.f32 %v3160_v14, %v5396_v36  ;;  %v1068_v40 = vrot.slane %v1067_v1, 2  ;;  %v3456_v36 = vmul.f32 %v3160_v14, %v2851_v15  ;;  %v3468_v12 = vmul.f32 %v3160_v14, %v2887_v5 }
 0x2b3   :  { %5394 = vst [vmem:[#allocation82_spill] sm:$0xff] %v3428_v52  ;;  %v5399_v52 = vld [vmem:[#allocation36_spill] sm:$0xff]  ;;  %v3476_v15 = vmul.f32 %v3160_v14, %v2911_v55  ;;  %v3480_v32 = vmul.f32 %v3160_v14, %v2923_v3  ;;  %v3488_v5 = vmul.f32 %v3160_v14, %v2943_v48  ;;  %v3496_v55 = vmul.f32 %v3160_v14, %v2961_v50 }
 0x2b4   :  { %5398 = vst [vmem:[#allocation83_spill] sm:$0xff] %v3440_v62  ;;  %v3452_v53 = vmul.f32 %v3160_v14, %v5399_v52  ;;  %v5400_v62 = vld [vmem:[#allocation41_spill] sm:$0xff]  ;;  %v3472_v52 = vmul.f32 %v3160_v14, %v2899_v45  ;;  %v3492_v45 = vmul.f32 %v3160_v14, %v2949_v46  ;;  %v3500_v3 = vmul.f32 %v3160_v14, %v2967_v2 }
 0x2b5   :  { %v3464_v8 = vmul.f32 %v3160_v14, %v5400_v62  ;;  %5401 = vst [vmem:[#allocation84_spill] sm:$0xff] %v3476_v15  ;;  %v3484_v62 = vmul.f32 %v3160_v14, %v2931_v31  ;;  %v5404_v15 = vld [vmem:[#allocation62_spill] sm:$0xff]  ;;  %v3512_v46 = vmul.f32 %v3160_v14, %v2997_v19  ;;  %v3516_v50 = vmul.f32 %v3160_v14, %v3003_v10 }
 0x2b6   :  { %5402 = vst [vmem:[#allocation85_spill] sm:$0xff] %v3480_v32  ;;  %v1069_v32 = vadd.f32 %v1068_v40, %v1067_v1  ;;  %v3504_v31 = vmul.f32 %v3160_v14, %v5404_v15  ;;  %v3520_v2 = vmul.f32 %v3160_v14, %v3017_v49  ;;  %v3524_v1 = vmul.f32 %v3160_v14, %v3029_v6  ;;  %v5406_v40 = vld [vmem:[#allocation53_spill] sm:$0xff] }
 0x2b7   :  { %5403 = vst [vmem:[#allocation86_spill] sm:$0xff] %v3484_v62  ;;  %v5405_v62 = vld [vmem:[#allocation58_spill] sm:$0xff]  ;;  %v3528_v15 = vmul.f32 %v3160_v14, %v5406_v40  ;;  %v3532_v19 = vmul.f32 %v3176_v25, %v3280_v43  ;;  %v3536_v10 = vmul.f32 %v3176_v25, %v3284_v42  ;;  %v3540_v49 = vmul.f32 %v3176_v25, %v3288_v26 }
 0x2b8   :  { %v3508_v48 = vmul.f32 %v3160_v14, %v5405_v62  ;;  %v3544_v6 = vmul.f32 %v3176_v25, %v3292_v20  ;;  %v3548_v14 = vmul.f32 %v3176_v25, %v3296_v51  ;;  %v3552_v43 = vmul.f32 %v3176_v25, %v3300_v16 }
 0x2b9   :  { %v3556_v42 = vmul.f32 %v3176_v25, %v3304_v63  ;;  %v3560_v26 = vmul.f32 %v3176_v25, %v3308_v11  ;;  %v1070_v62 = vrot.slane %v1069_v32, 1  ;;  %v3564_v20 = vmul.f32 %v3176_v25, %v3312_v57 }
 0x2ba   :  { %v3568_v51 = vmul.f32 %v3176_v25, %v3316_v35  ;;  %v3572_v16 = vmul.f32 %v3176_v25, %v3320_v4  ;;  %v3576_v63 = vmul.f32 %v3176_v25, %v3324_v54  ;;  %v3580_v11 = vmul.f32 %v3176_v25, %v3328_v30 }
 0x2bb   :  { %v3584_v57 = vmul.f32 %v3176_v25, %v3332_v22  ;;  %v3588_v35 = vmul.f32 %v3176_v25, %v3336_v21  ;;  %v3592_v4 = vmul.f32 %v3176_v25, %v3340_v60  ;;  %v3596_v54 = vmul.f32 %v3176_v25, %v3344_v13 }
 0x2bc   :  { %v3600_v30 = vmul.f32 %v3176_v25, %v3348_v23  ;;  %v3604_v22 = vmul.f32 %v3176_v25, %v3352_v29  ;;  %v3608_v21 = vmul.f32 %v3176_v25, %v3356_v44  ;;  %v3612_v60 = vmul.f32 %v3176_v25, %v3360_v34 }
 0x2bd   :  { %v3616_v13 = vmul.f32 %v3176_v25, %v3364_v18  ;;  %v3620_v23 = vmul.f32 %v3176_v25, %v3368_v61  ;;  %v1071_v40 = vadd.f32 %v1070_v62, %v1069_v32  ;;  %v3624_v29 = vmul.f32 %v3176_v25, %v3372_v24  ;;  %v5411_v32 = vld [vmem:[#allocation2_spill] sm:$0xff]  ;;  %v5412_v62 = vld [vmem:[#allocation4_spill] sm:$0xff] }
 0x2be   :  { %v3628_v44 = vmul.f32 %v3176_v25, %v3376_v58  ;;  %v3632_v34 = vmul.f32 %v3176_v25, %v3380_v41  ;;  %v3636_v18 = vmul.f32 %v3176_v25, %v3384_v47  ;;  %v3640_v61 = vmul.f32 %v3176_v25, %v3388_v38 }
 0x2bf   :  { %v3644_v24 = vmul.f32 %v3176_v25, %v3392_v17  ;;  %v3648_v58 = vmul.f32 %v3176_v25, %v3396_v56  ;;  %v3652_v41 = vmul.f32 %v3176_v25, %v3400_v28  ;;  %v3656_v47 = vmul.f32 %v3176_v25, %v3404_v33 }
 0x2c0   :  { %v3660_v38 = vmul.f32 %v3176_v25, %v3408_v37  ;;  %v3664_v17 = vmul.f32 %v3176_v25, %v5411_v32  ;;  %v3668_v56 = vmul.f32 %v3176_v25, %v5412_v62  ;;  %v3676_v33 = vmul.f32 %v3176_v25, %v3424_v9 }
 0x2c1   :  { %5407 = vst [vmem:[#allocation87_spill] sm:$0xff] %v3648_v58  ;;  %v5413_v58 = vld [vmem:[#allocation6_spill] sm:$0xff]  ;;  %v3685_v32 = vmul.f32 %v3176_v25, %v3432_v27  ;;  %v3689_v62 = vmul.f32 %v3176_v25, %v3436_v0  ;;  %v3697_v9 = vmul.f32 %v3176_v25, %v3444_v39  ;;  %v3705_v27 = vmul.f32 %v3176_v25, %v3452_v53 }
 0x2c2   :  { %5408 = vst [vmem:[#allocation89_spill] sm:$0xff] %v3652_v41  ;;  %v3672_v28 = vmul.f32 %v3176_v25, %v5413_v58  ;;  %v5417_v58 = vld [vmem:[#allocation83_spill] sm:$0xff]  ;;  %v3709_v0 = vmul.f32 %v3176_v25, %v3456_v36  ;;  %v3717_v39 = vmul.f32 %v3176_v25, %v3464_v8  ;;  %v3725_v53 = vmul.f32 %v3176_v25, %v3472_v52 }
 0x2c3   :  { %5409 = vst [vmem:[#allocation90_spill] sm:$0xff] %v3656_v47  ;;  %v5415_v47 = vld [vmem:[#allocation82_spill] sm:$0xff]  ;;  %v3747_v52 = vmul.f32 %v3176_v25, %v3492_v45  ;;  %v3767_v45 = vmul.f32 %v3176_v25, %v3512_v46 }
 0x2c4   :  { %5410 = vst [vmem:[#allocation91_spill] sm:$0xff] %v3660_v38  ;;  %v3680_v37 = vmul.f32 %v3176_v25, %v5415_v47  ;;  %v5416_v38 = vld [vmem:[#allocation50_spill] sm:$0xff]  ;;  %v3701_v47 = vmul.f32 %v3176_v25, %v3448_v59  ;;  %v3721_v59 = vmul.f32 %v3176_v25, %v3468_v12  ;;  %v3741_v12 = vmul.f32 %v3176_v25, %v3488_v5 }
 0x2c5   :  { %5414 = vst [vmem:[#allocation69_spill] sm:$0xff] %v3672_v28  ;;  %v1073_v41 = vmul.f32 %v1071_v40, %v5416_v38  ;;  %v3693_v28 = vmul.f32 %v3176_v25, %v5417_v58  ;;  %v3713_v40 = vmul.f32 %v3176_v25, %v3460_v7  ;;  %v5420_v38 = vld [vmem:[#allocation84_spill] sm:$0xff]  ;;  %v5421_v58 = vld [vmem:[#allocation85_spill] sm:$0xff]  ;;  %v3763_v5 = vmul.f32 %v3176_v25, %v3508_v48 }
 0x2c6   :  { %5419 = vst [vmem:[#allocation74_spill] sm:$0xff] %v3721_v59  ;;  %v3729_v36 = vmul.f32 %v3176_v25, %v5420_v38  ;;  %v3733_v7 = vmul.f32 %v3176_v25, %v5421_v58  ;;  %v3751_v38 = vmul.f32 %v3176_v25, %v3496_v55  ;;  %v3755_v58 = vmul.f32 %v3176_v25, %v3500_v3 }
 0x2c7   :  { %5418 = vst [vmem:[#allocation71_spill] sm:$0xff] %v3713_v40  ;;  %v5422_v40 = vld [vmem:[#allocation86_spill] sm:$0xff]  ;;  %v3743_v59 = vadd.f32 1e-05, %v1073_v41  ;;  %v3771_v55 = vmul.f32 %v3176_v25, %v3516_v50  ;;  %v3775_v3 = vmul.f32 %v3176_v25, %v3520_v2  ;;  %v3783_v48 = vmul.f32 %v3176_v25, %v3528_v15 }
 0x2c8   :  { %v3737_v8 = vmul.f32 %v3176_v25, %v5422_v40  ;;  %v3759_v40 = vmul.f32 %v3176_v25, %v3504_v31  ;;  %v3779_v31 = vmul.f32 %v3176_v25, %v3524_v1  ;;  %v5424_v41 = vld [vmem:[#allocation66_spill] sm:$0xff] }
 0x2c9   :  { %5423 = vst [vmem:[#allocation77_spill] sm:$0xff] %v3743_v59  ;;  %v3787_v46 = vadd.f32 %v5424_v41, %v3532_v19  ;;  %v3791_v50 = vadd.f32 %v5424_v41, %v3536_v10  ;;  %v3795_v2 = vadd.f32 %v5424_v41, %v3540_v49  ;;  %v3799_v1 = vadd.f32 %v5424_v41, %v3544_v6 }
 0x2ca   :  { %v3803_v25 = vadd.f32 %v5424_v41, %v3548_v14  ;;  %1789 = vrsqrt.f32 %v3743_v59  ;;  %v3808_v15 = vadd.f32 %v5424_v41, %v3552_v43  ;;  %v3812_v19 = vadd.f32 %v5424_v41, %v3556_v42 }
 0x2cb   :  { %v3816_v10 = vadd.f32 %v5424_v41, %v3560_v26  ;;  %v3820_v49 = vadd.f32 %v5424_v41, %v3564_v20  ;;  %v3824_v6 = vadd.f32 %v5424_v41, %v3568_v51  ;;  %v3828_v14 = vadd.f32 %v5424_v41, %v3572_v16 }
 0x2cc   :  { %v3832_v43 = vadd.f32 %v5424_v41, %v3576_v63  ;;  %v3836_v42 = vadd.f32 %v5424_v41, %v3580_v11  ;;  %v3840_v26 = vadd.f32 %v5424_v41, %v3584_v57  ;;  %v3844_v20 = vadd.f32 %v5424_v41, %v3588_v35 }
 0x2cd   :  { %v3848_v51 = vadd.f32 %v5424_v41, %v3592_v4  ;;  %v3852_v16 = vadd.f32 %v5424_v41, %v3596_v54  ;;  %v3856_v63 = vadd.f32 %v5424_v41, %v3600_v30  ;;  %v3860_v11 = vadd.f32 %v5424_v41, %v3604_v22 }
 0x2ce   :  { %v3864_v57 = vadd.f32 %v5424_v41, %v3608_v21  ;;  %v3868_v35 = vadd.f32 %v5424_v41, %v3612_v60  ;;  %v3872_v4 = vadd.f32 %v5424_v41, %v3616_v13  ;;  %v3876_v54 = vadd.f32 %v5424_v41, %v3620_v23 }
 0x2cf   :  { %5425 = vst [vmem:[#allocation79_spill] sm:$0xff] %v3860_v11  ;;  %v3880_v30 = vadd.f32 %v5424_v41, %v3624_v29  ;;  %v3884_v22 = vadd.f32 %v5424_v41, %v3628_v44  ;;  %v3890_v60 = vadd.f32 %v5424_v41, %v3632_v34  ;;  %v3894_v13 = vadd.f32 %v5424_v41, %v3636_v18  ;;  %v5436_v44 = vld [vmem:[#allocation87_spill] sm:$0xff] }
 0x2d0   :  { %5426 = vst [vmem:[#allocation10_spill] sm:$0xff] %v3864_v57  ;;  %v3886_v21 = vpop.eup %1789  ;;  %v3898_v23 = vadd.f32 %v5424_v41, %v3640_v61  ;;  %v3902_v29 = vadd.f32 %v5424_v41, %v3644_v24  ;;  %v3922_v24 = vadd.f32 %v5424_v41, %v3664_v17  ;;  %v3942_v17 = vadd.f32 %v5424_v41, %v3685_v32 }
 0x2d1   :  { %5427 = vst [vmem:[#allocation12_spill] sm:$0xff] %v3868_v35  ;;  %v3964_v32 = vadd.f32 %v5424_v41, %v3705_v27  ;;  %v3984_v27 = vadd.f32 %v5424_v41, %v3725_v53  ;;  %v4004_v53 = vadd.f32 %v5424_v41, %v3747_v52  ;;  %v4025_v52 = vadd.f32 %v5424_v41, %v3767_v45 }
 0x2d2   :  { %5428 = vst [vmem:[#allocation14_spill] sm:$0xff] %v3872_v4  ;;  %vm1093_vm4 = vweird.f32 %v3886_v21 }
 0x2d3   :  { %5429 = vst [vmem:[#allocation17_spill] sm:$0xff] %v3876_v54  ;;  %v5524_v54 = vld [vmem:[#allocation45_spill] sm:$0xff] }
 0x2d4   :  { %5430 = vst [vmem:[#allocation20_spill] sm:$0xff] %v3880_v30  ;;  %v5438_v30 = vld [vmem:[#allocation89_spill] sm:$0xff] }
 0x2d5   :  { %5431 = vst [vmem:[#allocation22_spill] sm:$0xff] %v3884_v22  ;;  %v3906_v22 = vadd.f32 %v5424_v41, %v5436_v44  ;;  %v3910_v34 = vadd.f32 %v5424_v41, %v5438_v30  ;;  %v3926_v44 = vadd.f32 %v5424_v41, %v3668_v56  ;;  %v3946_v56 = vadd.f32 %v5424_v41, %v3689_v62 }
 0x2d6   :  { %5432 = vst [vmem:[#allocation25_spill] sm:$0xff] %v3890_v60  ;;  %v5440_v60 = vld [vmem:[#allocation90_spill] sm:$0xff]  ;;  %v3968_v62 = vadd.f32 %v5424_v41, %v3709_v0  ;;  %v3988_v0 = vadd.f32 %v5424_v41, %v3729_v36  ;;  %v4008_v36 = vadd.f32 %v5424_v41, %v3751_v38  ;;  %v4029_v38 = vadd.f32 %v5424_v41, %v3771_v55 }
 0x2d7   :  { %5433 = vst [vmem:[#allocation28_spill] sm:$0xff] %v3894_v13  ;;  %v3914_v18 = vadd.f32 %v5424_v41, %v5440_v60  ;;  %v5442_v13 = vld [vmem:[#allocation91_spill] sm:$0xff]  ;;  %v3934_v60 = vadd.f32 %v5424_v41, %v3676_v33  ;;  %v3956_v33 = vadd.f32 %v5424_v41, %v3697_v9  ;;  %v3976_v9 = vadd.f32 %v5424_v41, %v3717_v39  ;;  %v5522_v55 = vld [vmem:[#allocation70_spill] sm:$0xff] }
 0x2d8   :  { %5434 = vst [vmem:[#allocation31_spill] sm:$0xff] %v3898_v23  ;;  %v3918_v61 = vadd.f32 %v5424_v41, %v5442_v13  ;;  %v3938_v13 = vadd.f32 %v5424_v41, %v3680_v37  ;;  %v3960_v37 = vadd.f32 %v5424_v41, %v3701_v47  ;;  %v3996_v39 = vadd.f32 %v5424_v41, %v3737_v8  ;;  %v5517_v23 = vld [vmem:[#allocation65_spill] sm:$0xff] }
 0x2d9   :  { %5435 = vst [vmem:[#allocation36_spill] sm:$0xff] %v3902_v29  ;;  %v4017_v8 = vadd.f32 %v5424_v41, %v3759_v40  ;;  %v4037_v40 = vadd.f32 %v5424_v41, %v3779_v31  ;;  %v5516_v29 = vld [vmem:[#allocation63_spill] sm:$0xff] }
 0x2da   :  { %5437 = vst [vmem:[#allocation41_spill] sm:$0xff] %v3906_v22  ;;  %v5446_v22 = vld [vmem:[#allocation69_spill] sm:$0xff] }
 0x2db   :  { %5439 = vst [vmem:[#allocation62_spill] sm:$0xff] %v3910_v34  ;;  %v3930_v30 = vadd.f32 %v5424_v41, %v5446_v22  ;;  %v1087_v22 = vmul.f32 %v3886_v21, %v3743_v59  ;;  %v5457_v59 = vld [vmem:[#allocation71_spill] sm:$0xff] }
 0x2dc   :  { %5441 = vst [vmem:[#allocation58_spill] sm:$0xff] %v3914_v18  ;;  %v5514_v34 = vld [vmem:[#allocation55_spill] sm:$0xff] }
 0x2dd   :  { %5443 = vst [vmem:[#allocation53_spill] sm:$0xff] %v3918_v61 }
 0x2de   :  { %5444 = vst [vmem:[#allocation2_spill] sm:$0xff] %v3922_v24 }
 0x2df   :  { %5445 = vst [vmem:[#allocation4_spill] sm:$0xff] %v3926_v44  ;;  %v5484_v44 = vld [vmem:[#allocation77_spill] sm:$0xff] }
 0x2e0   :  { %5447 = vst [vmem:[#allocation6_spill] sm:$0xff] %v3930_v30  ;;  %v3952_v30 = vadd.f32 %v5424_v41, %v3693_v28  ;;  %v3972_v28 = vadd.f32 %v5424_v41, %v5457_v59  ;;  %v3992_v59 = vadd.f32 %v5424_v41, %v3733_v7  ;;  %v4013_v7 = vadd.f32 %v5424_v41, %v3755_v58 }
 0x2e1   :  { %5448 = vst [vmem:[#allocation82_spill] sm:$0xff] %v3934_v60  ;;  %v4033_v58 = vadd.f32 %v5424_v41, %v3775_v3  ;;  %vm1092_vm5 = vweird.f32 %v5484_v44  ;;  %v5490_v44 = vld [vmem:[#allocation5_spill] sm:$0xff]  ;;  %v5519_v3 = vld [vmem:[#allocation67_spill] sm:$0xff] }
 0x2e2   :  { %5449 = vst [vmem:[#allocation50_spill] sm:$0xff] %v3938_v13  ;;  %vm1094_vm6 = vmor %vm1092_vm5, %vm1093_vm4 }
 0x2e3   :  { %5450 = vst [vmem:[#allocation83_spill] sm:$0xff] %v3942_v17  ;;  %v5507_v17 = vld [vmem:[#allocation38_spill] sm:$0xff] }
 0x2e4   :  { %5451 = vst [vmem:[#allocation84_spill] sm:$0xff] %v3946_v56  ;;  %v5506_v56 = vld [vmem:[#allocation39_spill] sm:$0xff] }
 0x2e5   :  { %5452 = vst [vmem:[#allocation85_spill] sm:$0xff] %v3952_v30 }
 0x2e6   :  { %5453 = vst [vmem:[#allocation86_spill] sm:$0xff] %v3956_v33  ;;  %v5460_v33 = vld [vmem:[#allocation74_spill] sm:$0xff] }
 0x2e7   :  { %5454 = vst [vmem:[#allocation66_spill] sm:$0xff] %v3960_v37  ;;  %v3980_v47 = vadd.f32 %v5424_v41, %v5460_v33  ;;  %v4000_v33 = vadd.f32 %v5424_v41, %v3741_v12  ;;  %v4021_v12 = vadd.f32 %v5424_v41, %v3763_v5  ;;  %v4041_v5 = vadd.f32 %v5424_v41, %v3783_v48  ;;  %v5492_v48 = vld [vmem:[#allocation88_spill] sm:$0xff] }
 0x2e8   :  { %5455 = vst [vmem:[#allocation87_spill] sm:$0xff] %v3964_v32  ;;  %v5503_v32 = vld [vmem:[#allocation34_spill] sm:$0xff]  ;;  %v5504_v37 = vld [vmem:[#allocation32_spill] sm:$0xff] }
 0x2e9   :  { %5456 = vst [vmem:[#allocation89_spill] sm:$0xff] %v3968_v62  ;;  %v5515_v41 = vld [vmem:[#allocation60_spill] sm:$0xff] }
 0x2ea   :  { %5458 = vst [vmem:[#allocation90_spill] sm:$0xff] %v3972_v28  ;;  %v5500_v28 = vld [vmem:[#allocation24_spill] sm:$0xff] }
 0x2eb   :  { %5459 = vst [vmem:[#allocation91_spill] sm:$0xff] %v3976_v9 }
 0x2ec   :  { %5461 = vst [vmem:[#allocation69_spill] sm:$0xff] %v3980_v47 }
 0x2ed   :  { %5462 = vst [vmem:[#allocation71_spill] sm:$0xff] %v3984_v27 }
 0x2ee   :  { %5463 = vst [vmem:[#allocation74_spill] sm:$0xff] %v3988_v0  ;;  %v1088_v0 = vmul.f32 %v3886_v21, %v1087_v22  ;;  %v5487_v22 = vld [vmem:[#allocation54_spill] sm:$0xff] }
 0x2ef   :  { %5464 = vst [vmem:[#allocation102_spill] sm:$0xff] %v3992_v59  ;;  %v4106_v47 = vperm.slane %v5487_v22, 1  ;;  %v5494_v22 = vld [vmem:[#allocation9_spill] sm:$0xff] }
 0x2f0   :  { %5465 = vst [vmem:[#allocation103_spill] sm:$0xff] %v3996_v39  ;;  %v1089_v31 = vmul.f32 0.5, %v1088_v0  ;;  %v5491_v39 = vld [vmem:[#allocation7_spill] sm:$0xff]  ;;  %v5496_v59 = vld [vmem:[#allocation13_spill] sm:$0xff] }
 0x2f1   :  { %5466 = vst [vmem:[#allocation104_spill] sm:$0xff] %v4000_v33  ;;  %v5518_v0 = vld [vmem:[#allocation81_spill] sm:$0xff] }
 0x2f2   :  { %5467 = vst [vmem:[#allocation105_spill] sm:$0xff] %v4004_v53 }
 0x2f3   :  { %5468 = vst [vmem:[#allocation106_spill] sm:$0xff] %v4008_v36  ;;  %v5493_v36 = vld [vmem:[#allocation8_spill] sm:$0xff] }
 0x2f4   :  { %5469 = vst [vmem:[#allocation107_spill] sm:$0xff] %v4013_v7 }
 0x2f5   :  { %5470 = vst [vmem:[#allocation108_spill] sm:$0xff] %v4017_v8 }
 0x2f6   :  { %5471 = vst [vmem:[#allocation109_spill] sm:$0xff] %v4021_v12 }
 0x2f7   :  { %5472 = vst [vmem:[#allocation110_spill] sm:$0xff] %v4025_v52  ;;  %v5497_v52 = vld [vmem:[#allocation16_spill] sm:$0xff] }
 0x2f8   :  { %5473 = vst [vmem:[#allocation111_spill] sm:$0xff] %v4029_v38  ;;  %v5520_v38 = vld [vmem:[#allocation42_spill] sm:$0xff] }
 0x2f9   :  { %5474 = vst [vmem:[#allocation112_spill] sm:$0xff] %v4033_v58  ;;  %v1090_v58 = vsub.f32 1.5, %v1089_v31  ;;  %v5488_v31 = vld [vmem:[#allocation61_spill] sm:$0xff] }
 0x2fa   :  { %5475 = vst [vmem:[#allocation113_spill] sm:$0xff] %v4037_v40  ;;  %v4109_v30 = vperm.slane %v5488_v31, 1  ;;  %v5495_v31 = vld [vmem:[#allocation11_spill] sm:$0xff] }
 0x2fb   :  { %5476 = vst [vmem:[#allocation114_spill] sm:$0xff] %v4041_v5  ;;  %v1091_v7 = vmul.f32 %v3886_v21, %v1090_v58  ;;  %v5505_v40 = vld [vmem:[#allocation35_spill] sm:$0xff] }
 0x2fd   :  { %v4097_v5 = vsel %vm1094_vm6, %v3886_v21, %v1091_v7  ;;  %v5489_v21 = vld [vmem:[#allocation3_spill] sm:$0xff] }
 0x2fe   :  { %v1097_v7 = vmul.f32 %v4097_v5, %v5489_v21  ;;  %v1099_v58 = vmul.f32 %v4097_v5, %v5490_v44  ;;  %v1101_v8 = vmul.f32 %v4097_v5, %v5491_v39  ;;  %v1223_v57 = vmul.f32 %v4097_v5, %v5492_v48  ;;  %v5498_v39 = vld [vmem:[#allocation18_spill] sm:$0xff]  ;;  %v5499_v48 = vld [vmem:[#allocation21_spill] sm:$0xff] }
 0x2ff   :  { %v1103_v9 = vmul.f32 %v4097_v5, %v5493_v36  ;;  %v1105_v53 = vmul.f32 %v4097_v5, %v5494_v22  ;;  %v1107_v33 = vmul.f32 %v4097_v5, %v5495_v31  ;;  %v1109_v21 = vmul.f32 %v4097_v5, %v5496_v59  ;;  %v5501_v31 = vld [vmem:[#allocation27_spill] sm:$0xff]  ;;  %v5502_v59 = vld [vmem:[#allocation30_spill] sm:$0xff] }
 0x300   :  { %v4129_v44 = vmul.f32 %v4097_v5, %v5497_v52  ;;  %v4133_v27 = vmul.f32 %v4097_v5, %v5498_v39  ;;  %v4137_v36 = vmul.f32 %v4097_v5, %v5499_v48  ;;  %v4141_v22 = vmul.f32 %v4097_v5, %v5500_v28 }
 0x301   :  { %v4145_v62 = vmul.f32 %v4097_v5, %v5501_v31  ;;  %v4149_v52 = vmul.f32 %v4097_v5, %v5502_v59  ;;  %v4153_v39 = vmul.f32 %v4097_v5, %v5503_v32  ;;  %v4157_v48 = vmul.f32 %v4097_v5, %v5504_v37  ;;  %v5508_v32 = vld [vmem:[#allocation44_spill] sm:$0xff] }
 0x302   :  { %v4161_v28 = vmul.f32 %v4097_v5, %v5505_v40  ;;  %v4165_v31 = vmul.f32 %v4097_v5, %v5506_v56  ;;  %v4169_v59 = vmul.f32 %v4097_v5, %v5507_v17  ;;  %v1357_v13 = vmul.f32 %v4106_v47, %v1223_v57  ;;  %v5509_v37 = vld [vmem:[#allocation48_spill] sm:$0xff]  ;;  %v5510_v40 = vld [vmem:[#allocation46_spill] sm:$0xff]  ;;  %v5511_v56 = vld [vmem:[#allocation49_spill] sm:$0xff] }
 0x303   :  { %v4174_v60 = vmul.f32 %v4097_v5, %v5508_v32  ;;  %v4178_v45 = vmul.f32 %v4097_v5, %v5509_v37  ;;  %v4182_v24 = vmul.f32 %v4097_v5, %v5510_v40  ;;  %v4186_v61 = vmul.f32 %v4097_v5, %v5511_v56  ;;  %v5512_v17 = vld [vmem:[#allocation52_spill] sm:$0xff] }
 0x304   :  { %v4190_v18 = vmul.f32 %v4097_v5, %v5512_v17  ;;  %v5513_v57 = vld [vmem:[#allocation56_spill] sm:$0xff]  ;;  %v4198_v37 = vmul.f32 %v4097_v5, %v5514_v34  ;;  %v4202_v40 = vmul.f32 %v4097_v5, %v5515_v41  ;;  %v4206_v56 = vmul.f32 %v4097_v5, %v5516_v29 }
 0x305   :  { %v4194_v32 = vmul.f32 %v4097_v5, %v5513_v57  ;;  %v4210_v17 = vmul.f32 %v4097_v5, %v5517_v23  ;;  %v4214_v57 = vmul.f32 %v4097_v5, %v5518_v0  ;;  %v4218_v34 = vmul.f32 %v4097_v5, %v5519_v3  ;;  %v5526_v0 = vld [vmem:[#allocation72_spill] sm:$0xff]  ;;  %v5528_v3 = vld [vmem:[#allocation75_spill] sm:$0xff] }
 0x306   :  { %v4222_v41 = vmul.f32 %v4097_v5, %v5520_v38  ;;  %v4226_v29 = vmul.f32 %v4097_v5, %v5522_v55  ;;  %v4230_v23 = vmul.f32 %v4097_v5, %v5524_v54  ;;  %v4233_v4 = vadd.f32 %v4109_v30, %v1357_v13  ;;  %v5530_v38 = vld [vmem:[#allocation78_spill] sm:$0xff]  ;;  %v5532_v55 = vld [vmem:[#allocation80_spill] sm:$0xff]  ;;  %v5534_v54 = vld [vmem:[#allocation15_spill] sm:$0xff] }
 0x307   :  { %v4237_v35 = vmul.f32 %v4097_v5, %v5526_v0  ;;  %v4241_v11 = vmul.f32 %v4097_v5, %v5528_v3  ;;  %v4253_v13 = vmul.f32 %v4097_v5, %v5534_v54 }
 0x308   :  { %5521 = vst [vmem:[#allocation77_spill] sm:$0xff] %v4222_v41  ;;  %v4245_v41 = vmul.f32 %v4097_v5, %v5530_v38 }
 0x309   :  { %5523 = vst [vmem:[#allocation54_spill] sm:$0xff] %v4226_v29  ;;  %v4249_v29 = vmul.f32 %v4097_v5, %v5532_v55 }
 0x30a   :  { %5525 = vst [vmem:[#allocation61_spill] sm:$0xff] %v4230_v23  ;;  %v5536_v23 = vld [vmem:[#allocation19_spill] sm:$0xff] }
 0x30b   :  { %5527 = vst [vmem:[#allocation3_spill] sm:$0xff] %v4237_v35  ;;  %v4257_v0 = vmul.f32 %v4097_v5, %v5536_v23  ;;  %v5538_v35 = vld [vmem:[#allocation23_spill] sm:$0xff] }
 0x30c   :  { %5529 = vst [vmem:[#allocation5_spill] sm:$0xff] %v4241_v11  ;;  %v4261_v3 = vmul.f32 %v4097_v5, %v5538_v35  ;;  %v5540_v11 = vld [vmem:[#allocation26_spill] sm:$0xff] }
 0x30d   :  { %5531 = vst [vmem:[#allocation7_spill] sm:$0xff] %v4245_v41  ;;  %v4265_v38 = vmul.f32 %v4097_v5, %v5540_v11  ;;  %v5542_v41 = vld [vmem:[#allocation29_spill] sm:$0xff] }
 0x30e   :  { %5533 = vst [vmem:[#allocation88_spill] sm:$0xff] %v4249_v29  ;;  %v4269_v55 = vmul.f32 %v4097_v5, %v5542_v41  ;;  %v5544_v29 = vld [vmem:[#allocation33_spill] sm:$0xff] }
 0x30f   :  { %5535 = vst [vmem:[#allocation8_spill] sm:$0xff] %v4253_v13  ;;  %v4273_v54 = vmul.f32 %v4097_v5, %v5544_v29  ;;  %v5546_v13 = vld [vmem:[#allocation37_spill] sm:$0xff] }
 0x310   :  { %5537 = vst [vmem:[#allocation9_spill] sm:$0xff] %v4257_v0  ;;  %v4277_v23 = vmul.f32 %v4097_v5, %v5546_v13  ;;  %v5548_v0 = vld [vmem:[#allocation40_spill] sm:$0xff] }
 0x311   :  { %5539 = vst [vmem:[#allocation11_spill] sm:$0xff] %v4261_v3  ;;  %v4281_v35 = vmul.f32 %v4097_v5, %v5548_v0  ;;  %v5550_v3 = vld [vmem:[#allocation43_spill] sm:$0xff] }
 0x312   :  { %5541 = vst [vmem:[#allocation13_spill] sm:$0xff] %v4265_v38  ;;  %v4285_v11 = vmul.f32 %v4097_v5, %v5550_v3  ;;  %v5552_v38 = vld [vmem:[#allocation47_spill] sm:$0xff]  ;;  %v1233_v3 = vmul.f32 %v4106_v47, %v1099_v58  ;;  %v5568_v58 = vld [vmem:[#allocation94_spill] sm:$0xff] }
 0x313   :  { %5543 = vst [vmem:[#allocation16_spill] sm:$0xff] %v4269_v55  ;;  %v4289_v41 = vmul.f32 %v4097_v5, %v5552_v38  ;;  %v5554_v55 = vld [vmem:[#allocation51_spill] sm:$0xff]  ;;  %v5560_v38 = vld [vmem:[#allocation68_spill] sm:$0xff] }
 0x314   :  { %5545 = vst [vmem:[#allocation18_spill] sm:$0xff] %v4273_v54  ;;  %v4293_v29 = vmul.f32 %v4097_v5, %v5554_v55  ;;  %v5556_v54 = vld [vmem:[#allocation57_spill] sm:$0xff]  ;;  %v5562_v55 = vld [vmem:[#allocation76_spill] sm:$0xff] }
 0x315   :  { %5547 = vst [vmem:[#allocation21_spill] sm:$0xff] %v4277_v23  ;;  %v4297_v13 = vmul.f32 %v4097_v5, %v5556_v54  ;;  %v5558_v23 = vld [vmem:[#allocation64_spill] sm:$0xff] }
 0x316   :  { %5549 = vst [vmem:[#allocation24_spill] sm:$0xff] %v4281_v35  ;;  %v4301_v0 = vmul.f32 %v4097_v5, %v5558_v23  ;;  %v1231_v35 = vmul.f32 %v4106_v47, %v1097_v7  ;;  %v5564_v54 = vld [vmem:[#allocation92_spill] sm:$0xff]  ;;  %v1237_v23 = vmul.f32 %v4106_v47, %v1103_v9 }
 0x317   :  { %5551 = vst [vmem:[#allocation27_spill] sm:$0xff] %v4285_v11  ;;  %v1235_v11 = vmul.f32 %v4106_v47, %v1101_v8  ;;  %v4325_v8 = vmul.f32 %v4097_v5, %v5568_v58  ;;  %v1241_v58 = vmul.f32 %v4106_v47, %v1107_v33 }
 0x318   :  { %5553 = vst [vmem:[#allocation30_spill] sm:$0xff] %v4289_v41  ;;  %v4308_v41 = vmul.f32 %v4097_v5, %v5560_v38  ;;  %v5570_v38 = vld [vmem:[#allocation95_spill] sm:$0xff]  ;;  %v1371_v33 = vadd.f32 %v4109_v30, %v1237_v23  ;;  %v1253_v23 = vmul.f32 %v4106_v47, %v4145_v62  ;;  %v1261_v62 = vmul.f32 %v4106_v47, %v4161_v28 }
 0x319   :  { %5555 = vst [vmem:[#allocation34_spill] sm:$0xff] %v4293_v29  ;;  %v4312_v29 = vmul.f32 %v4097_v5, %v5562_v55  ;;  %v1239_v55 = vmul.f32 %v4106_v47, %v1105_v53  ;;  %v1367_v53 = vadd.f32 %v4109_v30, %v1233_v3  ;;  %v5584_v3 = vld [vmem:[#allocation101_spill] sm:$0xff]  ;;  %v5588_v28 = vmax.f32 %v3795_v2, 0.0 }
 0x31a   :  { %5557 = vst [vmem:[#allocation32_spill] sm:$0xff] %v4297_v13  ;;  %v4316_v13 = vmul.f32 %v4097_v5, %v5564_v54  ;;  %v1269_v2 = vmul.f32 %v4106_v47, %v4178_v45  ;;  %v1395_v45 = vadd.f32 %v4109_v30, %v1261_v62 }
 0x31b   :  { %5559 = vst [vmem:[#allocation35_spill] sm:$0xff] %v4301_v0  ;;  %v5566_v0 = vld [vmem:[#allocation93_spill] sm:$0xff] }
 0x31c   :  { %5561 = vst [vmem:[#allocation39_spill] sm:$0xff] %v4308_v41  ;;  %v4321_v7 = vmul.f32 %v4097_v5, %v5566_v0  ;;  %v4329_v41 = vmul.f32 %v4097_v5, %v5570_v38  ;;  %v5576_v0 = vld [vmem:[#allocation98_spill] sm:$0xff]  ;;  %v1365_v38 = vadd.f32 %v4109_v30, %v1231_v35 }
 0x31d   :  { %5563 = vst [vmem:[#allocation38_spill] sm:$0xff] %v4312_v29  ;;  %v5572_v29 = vld [vmem:[#allocation96_spill] sm:$0xff] }
 0x31e   :  { %5565 = vst [vmem:[#allocation44_spill] sm:$0xff] %v4316_v13  ;;  %v4334_v54 = vmul.f32 %v4097_v5, %v5572_v29  ;;  %v5574_v13 = vld [vmem:[#allocation97_spill] sm:$0xff]  ;;  %v5578_v29 = vld [vmem:[#allocation99_spill] sm:$0xff] }
 0x31f   :  { %5567 = vst [vmem:[#allocation48_spill] sm:$0xff] %v4321_v7  ;;  %v4338_v9 = vmul.f32 %v4097_v5, %v5574_v13  ;;  %v4342_v7 = vmul.f32 %v4097_v5, %v5576_v0  ;;  %v5580_v13 = vld [vmem:[#allocation100_spill] sm:$0xff]  ;;  %v1245_v0 = vmul.f32 %v4106_v47, %v4129_v44  ;;  %v1251_v44 = vmul.f32 %v4106_v47, %v4141_v22 }
 0x320   :  { %5569 = vst [vmem:[#allocation46_spill] sm:$0xff] %v4325_v8  ;;  %v1243_v8 = vmul.f32 %v4106_v47, %v1109_v21  ;;  %v5582_v21 = vld [vmem:[#allocation59_spill] sm:$0xff]  ;;  %v1259_v22 = vmul.f32 %v4106_v47, %v4157_v48  ;;  %v5587_v48 = vmax.f32 %v3791_v50, 0.0  ;;  %v5590_v50 = vmax.f32 %v3803_v25, 0.0 }
 0x321   :  { %5571 = vst [vmem:[#allocation49_spill] sm:$0xff] %v4329_v41  ;;  %v1369_v41 = vadd.f32 %v4109_v30, %v1235_v11  ;;  %v4362_v35 = vmul.f32 %v4097_v5, %v5582_v21  ;;  %v4366_v11 = vmul.f32 %v4097_v5, %v5584_v3  ;;  %v1375_v21 = vadd.f32 %v4109_v30, %v1241_v58 }
 0x322   :  { %5573 = vst [vmem:[#allocation52_spill] sm:$0xff] %v4334_v54  ;;  %v4351_v54 = vmul.f32 %v4097_v5, %v5578_v29  ;;  %v1247_v29 = vmul.f32 %v4106_v47, %v4133_v27  ;;  %v1495_v3 = vmax.f32 %v1367_v53, 0.0  ;;  %v1255_v27 = vmul.f32 %v4106_v47, %v4149_v52 }
 0x323   :  { %5575 = vst [vmem:[#allocation56_spill] sm:$0xff] %v4338_v9  ;;  %v4355_v9 = vmul.f32 %v4097_v5, %v5580_v13  ;;  %v1249_v13 = vmul.f32 %v4106_v47, %v4137_v36  ;;  %v1493_v5 = vmax.f32 %v1365_v38, 0.0  ;;  %v1379_v36 = vadd.f32 %v4109_v30, %v1245_v0 }
 0x324   :  { %5577 = vst [vmem:[#allocation55_spill] sm:$0xff] %v4342_v7  ;;  %v1385_v38 = vadd.f32 %v4109_v30, %v1251_v44  ;;  %v5586_v0 = vmax.f32 %v3787_v46, 0.0  ;;  %v1621_v7 = vpack.c.bf16 %v1495_v3, %v5587_v48  ;;  %v1389_v46 = vadd.f32 %v4109_v30, %v1255_v27 }
 0x325   :  { %5579 = vst [vmem:[#allocation60_spill] sm:$0xff] %v4351_v54  ;;  %v1373_v54 = vadd.f32 %v4109_v30, %v1239_v55  ;;  %v1257_v55 = vmul.f32 %v4106_v47, %v4153_v39  ;;  %v1383_v52 = vadd.f32 %v4109_v30, %v1249_v13  ;;  %v1503_v39 = vmax.f32 %v1375_v21, 0.0 }
 0x326   :  { %5581 = vst [vmem:[#allocation63_spill] sm:$0xff] %v4355_v9  ;;  %v1499_v9 = vmax.f32 %v1371_v33, 0.0  ;;  %v1620_v33 = vpack.c.bf16 %v1493_v5, %v5586_v0  ;;  %v5589_v13 = vmax.f32 %v3799_v1, 0.0  ;;  %v1271_v25 = vmul.f32 %v4106_v47, %v4182_v24 }
 0x327   :  { %5583 = vst [vmem:[#allocation65_spill] sm:$0xff] %v4362_v35  ;;  %v1377_v35 = vadd.f32 %v4109_v30, %v1243_v8  ;;  %v1381_v8 = vadd.f32 %v4109_v30, %v1247_v29  ;;  %v1501_v58 = vmax.f32 %v1373_v54, 0.0  ;;  %v1265_v54 = vmul.f32 %v4106_v47, %v4169_v59 }
 0x328   :  { %5585 = vst [vmem:[#allocation81_spill] sm:$0xff] %v4366_v11  ;;  %v1497_v11 = vmax.f32 %v1369_v41, 0.0  ;;  %v1263_v41 = vmul.f32 %v4106_v47, %v4165_v31  ;;  %v1387_v31 = vadd.f32 %v4109_v30, %v1253_v23  ;;  %v1507_v29 = vmax.f32 %v1379_v36, 0.0 }
 0x329   :  { %v1505_v53 = vmax.f32 %v1377_v35, 0.0  ;;  %v1623_v44 = vpack.c.bf16 %v1499_v9, %v5589_v13  ;;  %v1267_v35 = vmul.f32 %v4106_v47, %v4174_v60  ;;  %v1509_v21 = vmax.f32 %v1381_v8, 0.0  ;;  %1684 = vst [vmem:[%s4857_s4] sm:$0xff] %v1620_v33 }
 0x32a   :  { %v1622_v12 = vpack.c.bf16 %v1497_v11, %v5588_v28  ;;  %v1624_v5 = vpack.c.bf16 %v1501_v58, %v5590_v50  ;;  %v1391_v59 = vadd.f32 %v4109_v30, %v1257_v55  ;;  %v1511_v1 = vmax.f32 %v1383_v52, 0.0  ;;  %1685 = vst [vmem:[%s4857_s4 + $0x8] sm:$0xff] %v1621_v7 }
 0x32b   :  { %v5591_v9 = vmax.f32 %v3808_v15, 0.0  ;;  %v1393_v60 = vadd.f32 %v4109_v30, %v1259_v22  ;;  %v1513_v23 = vmax.f32 %v1385_v38, 0.0  ;;  %v5592_v3 = vmax.f32 %v3812_v19, 0.0  ;;  %1687 = vst [vmem:[%s4857_s4 + $0x18] sm:$0xff] %v1623_v44 }
 0x32c   :  { %1686 = vst [vmem:[%s4857_s4 + $0x10] sm:$0xff] %v1622_v12  ;;  %v1273_v15 = vmul.f32 %v4106_v47, %v4186_v61  ;;  %v1515_v55 = vmax.f32 %v1387_v31, 0.0  ;;  %v5593_v7 = vmax.f32 %v3816_v10, 0.0  ;;  %v1275_v19 = vmul.f32 %v4106_v47, %v4190_v18 }
 0x32d   :  { %v1625_v11 = vpack.c.bf16 %v1503_v39, %v5591_v9  ;;  %v1626_v27 = vpack.c.bf16 %v1505_v53, %v5592_v3  ;;  %v1397_v24 = vadd.f32 %v4109_v30, %v1263_v41  ;;  %v1517_v22 = vmax.f32 %v1389_v46, 0.0  ;;  %1688 = vst [vmem:[%s4857_s4 + $0x20] sm:$0xff] %v1624_v5 }
 0x32e   :  { %v1627_v36 = vpack.c.bf16 %v1507_v29, %v5593_v7  ;;  %v5594_v12 = vmax.f32 %v3820_v49, 0.0  ;;  %v1277_v10 = vmul.f32 %v4106_v47, %v4194_v32  ;;  %v1399_v61 = vadd.f32 %v4109_v30, %v1265_v54 }
 0x32f   :  { %v1519_v62 = vmax.f32 %v1391_v59, 0.0  ;;  %v5595_v58 = vmax.f32 %v3824_v6, 0.0  ;;  %1689 = vst [vmem:[%s4857_s4 + $0x28] sm:$0xff] %v1625_v11  ;;  %v1279_v49 = vmul.f32 %v4106_v47, %v4198_v37  ;;  %v1401_v18 = vadd.f32 %v4109_v30, %v1267_v35 }
 0x330   :  { %v1628_v8 = vpack.c.bf16 %v1509_v21, %v5594_v12  ;;  %v1521_v41 = vmax.f32 %v1393_v60, 0.0  ;;  %v5596_v38 = vmax.f32 %v3828_v14, 0.0  ;;  %1690 = vst [vmem:[%s4857_s4 + $0x30] sm:$0xff] %v1626_v27  ;;  %v1281_v6 = vmul.f32 %v4106_v47, %v4202_v40 }
 0x331   :  { %v1629_v52 = vpack.c.bf16 %v1511_v1, %v5595_v58  ;;  %v1403_v32 = vadd.f32 %v4109_v30, %v1269_v2  ;;  %v1523_v53 = vmax.f32 %v1395_v45, 0.0  ;;  %v5597_v0 = vmax.f32 %v3832_v43, 0.0  ;;  %1691 = vst [vmem:[%s4857_s4 + $0x38] sm:$0xff] %v1627_v36  ;;  %v5613_v58 = vld [vmem:[#allocation12_spill] sm:$0xff] }
 0x332   :  { %v1630_v39 = vpack.c.bf16 %v1513_v23, %v5596_v38  ;;  %v1283_v14 = vmul.f32 %v4106_v47, %v4206_v56  ;;  %v1405_v37 = vadd.f32 %v4109_v30, %v1271_v25  ;;  %v1525_v48 = vmax.f32 %v1397_v24, 0.0  ;;  %1692 = vst [vmem:[%s4857_s4 + $0x40] sm:$0xff] %v1628_v8  ;;  %v5604_v25 = vld [vmem:[#allocation73_spill] sm:$0xff]  ;;  %v5610_v24 = vld [vmem:[#allocation10_spill] sm:$0xff] }
 0x333   :  { %v1631_v33 = vpack.c.bf16 %v1515_v55, %v5597_v0  ;;  %v5598_v28 = vmax.f32 %v3836_v42, 0.0  ;;  %v1407_v43 = vadd.f32 %v4109_v30, %v1273_v15  ;;  %v1527_v40 = vmax.f32 %v1399_v61, 0.0  ;;  %1693 = vst [vmem:[%s4857_s4 + $0x48] sm:$0xff] %v1629_v52  ;;  %v5607_v15 = vld [vmem:[#allocation79_spill] sm:$0xff]  ;;  %v5612_v8 = vld [vmem:[#allocation61_spill] sm:$0xff] }
 0x334   :  { %v1619_v31 = vmax.f32 %v4233_v4, 0.0  ;;  %v5599_v29 = vmax.f32 %v3840_v26, 0.0  ;;  %v1285_v42 = vmul.f32 %v4106_v47, %v4210_v17  ;;  %v1409_v56 = vadd.f32 %v4109_v30, %v1275_v19  ;;  %1694 = vst [vmem:[%s4857_s4 + $0x50] sm:$0xff] %v1630_v39  ;;  %v5618_v0 = vld [vmem:[#allocation5_spill] sm:$0xff] }
 0x335   :  { %v1632_v54 = vpack.c.bf16 %v1517_v22, %v5598_v28  ;;  %v1529_v44 = vmax.f32 %v1401_v18, 0.0  ;;  %v5600_v35 = vmax.f32 %v3844_v20, 0.0  ;;  %v1287_v26 = vmul.f32 %v4106_v47, %v4214_v57  ;;  %1695 = vst [vmem:[%s4857_s4 + $0x58] sm:$0xff] %v1631_v33  ;;  %v5615_v18 = vld [vmem:[#allocation3_spill] sm:$0xff] }
 0x336   :  { %v1633_v13 = vpack.c.bf16 %v1519_v62, %v5599_v29  ;;  %v1411_v4 = vadd.f32 %v4109_v30, %v1277_v10  ;;  %v1531_v21 = vmax.f32 %v1403_v32, 0.0  ;;  %v5601_v50 = vmax.f32 %v3848_v51, 0.0 }
 0x337   :  { %v1634_v46 = vpack.c.bf16 %v1521_v41, %v5600_v35  ;;  %v1289_v20 = vmul.f32 %v4106_v47, %v4218_v34  ;;  %v1413_v17 = vadd.f32 %v4109_v30, %v1279_v49  ;;  %v1533_v2 = vmax.f32 %v1405_v37, 0.0  ;;  %1696 = vst [vmem:[%s4857_s4 + $0x60] sm:$0xff] %v1632_v54 }
 0x338   :  { %v1635_v5 = vpack.c.bf16 %v1523_v53, %v5601_v50  ;;  %v5602_v59 = vmax.f32 %v3852_v16, 0.0  ;;  %v1415_v51 = vadd.f32 %v4109_v30, %v1281_v6  ;;  %v1535_v57 = vmax.f32 %v1407_v43, 0.0  ;;  %1697 = vst [vmem:[%s4857_s4 + $0x68] sm:$0xff] %v1633_v13  ;;  %v5606_v16 = vld [vmem:[#allocation77_spill] sm:$0xff]  ;;  %v5616_v6 = vld [vmem:[#allocation14_spill] sm:$0xff]  ;;  %v5621_v43 = vld [vmem:[#allocation7_spill] sm:$0xff] }
 0x339   :  { %v5603_v9 = vmax.f32 %v3856_v63, 0.0  ;;  %v5605_v60 = vmax.f32 %v5604_v25, 0.0  ;;  %v1291_v34 = vmul.f32 %v4106_v47, %v5606_v16  ;;  %v1417_v3 = vadd.f32 %v4109_v30, %v1283_v14  ;;  %1698 = vst [vmem:[%s4857_s4 + $0x70] sm:$0xff] %v1634_v46  ;;  %v5609_v63 = vld [vmem:[#allocation54_spill] sm:$0xff]  ;;  %v5622_v13 = vld [vmem:[#allocation20_spill] sm:$0xff] }
 0x33a   :  { %v1636_v1 = vpack.c.bf16 %v1525_v48, %v5602_v59  ;;  %v1537_v27 = vmax.f32 %v1409_v56, 0.0  ;;  %v5608_v45 = vmax.f32 %v5607_v15, 0.0  ;;  %v1293_v7 = vmul.f32 %v4106_v47, %v5609_v63  ;;  %1699 = vst [vmem:[%s4857_s4 + $0x78] sm:$0xff] %v1635_v5  ;;  %v5619_v48 = vld [vmem:[#allocation17_spill] sm:$0xff]  ;;  %v5627_v5 = vld [vmem:[#allocation8_spill] sm:$0xff] }
 0x33b   :  { %v1637_v11 = vpack.c.bf16 %v1527_v40, %v5603_v9  ;;  %v4512_v23 = vpack.c.bf16 %v1619_v31, %v5605_v60  ;;  %v1419_v36 = vadd.f32 %v4109_v30, %v1285_v42  ;;  %v1539_v19 = vmax.f32 %v1411_v4, 0.0  ;;  %v5625_v4 = vld [vmem:[#allocation22_spill] sm:$0xff]  ;;  %v5628_v59 = vld [vmem:[#allocation25_spill] sm:$0xff]  ;;  %v5631_v60 = vld [vmem:[#allocation28_spill] sm:$0xff] }
 0x33c   :  { %v1638_v55 = vpack.c.bf16 %v1529_v44, %v5608_v45  ;;  %v5611_v22 = vmax.f32 %v5610_v24, 0.0  ;;  %v1295_v10 = vmul.f32 %v4106_v47, %v5612_v8  ;;  %v1421_v61 = vadd.f32 %v4109_v30, %v1287_v26  ;;  %1700 = vst [vmem:[%s4857_s4 + $0x80] sm:$0xff] %v1636_v1  ;;  %v5624_v44 = vld [vmem:[#allocation88_spill] sm:$0xff] }
 0x33d   :  { %v1541_v62 = vmax.f32 %v1413_v17, 0.0  ;;  %v5614_v52 = vmax.f32 %v5613_v58, 0.0  ;;  %v1297_v41 = vmul.f32 %v4106_v47, %v5615_v18  ;;  %v1423_v38 = vadd.f32 %v4109_v30, %v1289_v20  ;;  %1701 = vst [vmem:[%s4857_s4 + $0x88] sm:$0xff] %v1637_v11 }
 0x33e   :  { %v1639_v12 = vpack.c.bf16 %v1531_v21, %v5611_v22  ;;  %v1543_v39 = vmax.f32 %v1415_v51, 0.0  ;;  %v5617_v32 = vmax.f32 %v5616_v6, 0.0  ;;  %v1299_v33 = vmul.f32 %v4106_v47, %v5618_v0  ;;  %1702 = vst [vmem:[%s4857_s4 + $0x90] sm:$0xff] %v1638_v55  ;;  %v5634_v55 = vld [vmem:[#allocation31_spill] sm:$0xff] }
 0x33f   :  { %v1640_v49 = vpack.c.bf16 %v1533_v2, %v5614_v52  ;;  %v1425_v14 = vadd.f32 %v4109_v30, %v1291_v34  ;;  %v1545_v37 = vmax.f32 %v1417_v3, 0.0  ;;  %v5620_v28 = vmax.f32 %v5619_v48, 0.0  ;;  %v5633_v3 = vld [vmem:[#allocation11_spill] sm:$0xff]  ;;  %1747 = vst [vmem:[%s4857_s4 + $0x1f8] sm:$0xff] %v4512_v23 }
 0x340   :  { %v1641_v53 = vpack.c.bf16 %v1535_v57, %v5617_v32  ;;  %v1301_v40 = vmul.f32 %v4106_v47, %v5621_v43  ;;  %v1427_v31 = vadd.f32 %v4109_v30, %v1293_v7  ;;  %v1547_v29 = vmax.f32 %v1419_v36, 0.0  ;;  %1703 = vst [vmem:[%s4857_s4 + $0x98] sm:$0xff] %v1639_v12  ;;  %v5630_v57 = vld [vmem:[#allocation9_spill] sm:$0xff]  ;;  %v5637_v12 = vld [vmem:[#allocation36_spill] sm:$0xff] }
 0x341   :  { %v1642_v54 = vpack.c.bf16 %v1537_v27, %v5620_v28  ;;  %v5623_v42 = vmax.f32 %v5622_v13, 0.0  ;;  %v1303_v35 = vmul.f32 %v4106_v47, %v5624_v44  ;;  %v1429_v46 = vadd.f32 %v4109_v30, %v1295_v10  ;;  %1704 = vst [vmem:[%s4857_s4 + $0xa0] sm:$0xff] %v1640_v49  ;;  %v5636_v36 = vld [vmem:[#allocation13_spill] sm:$0xff] }
 0x342   :  { %v1549_v26 = vmax.f32 %v1421_v61, 0.0  ;;  %v5626_v21 = vmax.f32 %v5625_v4, 0.0  ;;  %v1305_v20 = vmul.f32 %v4106_v47, %v5627_v5  ;;  %v1431_v17 = vadd.f32 %v4109_v30, %v1297_v41  ;;  %1705 = vst [vmem:[%s4857_s4 + $0xa8] sm:$0xff] %v1641_v53  ;;  %v5639_v61 = vld [vmem:[#allocation16_spill] sm:$0xff]  ;;  %v5640_v49 = vld [vmem:[#allocation41_spill] sm:$0xff]  ;;  %v5643_v53 = vld [vmem:[#allocation62_spill] sm:$0xff] }
 0x343   :  { %v1643_v56 = vpack.c.bf16 %v1539_v19, %v5623_v42  ;;  %v1551_v2 = vmax.f32 %v1423_v38, 0.0  ;;  %v5629_v1 = vmax.f32 %v5628_v59, 0.0  ;;  %v1307_v9 = vmul.f32 %v4106_v47, %v5630_v57  ;;  %1706 = vst [vmem:[%s4857_s4 + $0xb0] sm:$0xff] %v1642_v54  ;;  %v5642_v38 = vld [vmem:[#allocation18_spill] sm:$0xff] }
 0x344   :  { %v1644_v50 = vpack.c.bf16 %v1541_v62, %v5626_v21  ;;  %v1433_v11 = vadd.f32 %v4109_v30, %v1299_v33  ;;  %v1553_v25 = vmax.f32 %v1425_v14, 0.0  ;;  %v5632_v16 = vmax.f32 %v5631_v60, 0.0  ;;  %v5645_v14 = vld [vmem:[#allocation21_spill] sm:$0xff]  ;;  %v5646_v54 = vld [vmem:[#allocation58_spill] sm:$0xff] }
 0x345   :  { %v1645_v51 = vpack.c.bf16 %v1543_v39, %v5629_v1  ;;  %v1309_v27 = vmul.f32 %v4106_v47, %v5633_v3  ;;  %v1435_v15 = vadd.f32 %v4109_v30, %v1301_v40  ;;  %v1555_v45 = vmax.f32 %v1427_v31, 0.0  ;;  %1707 = vst [vmem:[%s4857_s4 + $0xb8] sm:$0xff] %v1643_v56  ;;  %v5648_v31 = vld [vmem:[#allocation24_spill] sm:$0xff]  ;;  %v5649_v56 = vld [vmem:[#allocation53_spill] sm:$0xff] }
 0x346   :  { %v1646_v34 = vpack.c.bf16 %v1545_v37, %v5632_v16  ;;  %v5635_v63 = vmax.f32 %v5634_v55, 0.0  ;;  %v1311_v19 = vmul.f32 %v4106_v47, %v5636_v36  ;;  %v1437_v24 = vadd.f32 %v4109_v30, %v1303_v35  ;;  %1708 = vst [vmem:[%s4857_s4 + $0xc0] sm:$0xff] %v1644_v50  ;;  %v5652_v50 = vld [vmem:[#allocation2_spill] sm:$0xff] }
 0x347   :  { %v1557_v22 = vmax.f32 %v1429_v46, 0.0  ;;  %v5638_v8 = vmax.f32 %v5637_v12, 0.0  ;;  %v1313_v62 = vmul.f32 %v4106_v47, %v5639_v61  ;;  %v1439_v58 = vadd.f32 %v4109_v30, %v1305_v20  ;;  %1709 = vst [vmem:[%s4857_s4 + $0xc8] sm:$0xff] %v1645_v51  ;;  %v5651_v46 = vld [vmem:[#allocation27_spill] sm:$0xff]  ;;  %v5655_v51 = vld [vmem:[#allocation4_spill] sm:$0xff] }
 0x348   :  { %v1647_v7 = vpack.c.bf16 %v1547_v29, %v5635_v63  ;;  %v1559_v52 = vmax.f32 %v1431_v17, 0.0  ;;  %v5641_v18 = vmax.f32 %v5640_v49, 0.0  ;;  %v1315_v39 = vmul.f32 %v4106_v47, %v5642_v38  ;;  %1710 = vst [vmem:[%s4857_s4 + $0xd0] sm:$0xff] %v1646_v34  ;;  %v5654_v17 = vld [vmem:[#allocation30_spill] sm:$0xff] }
 0x349   :  { %v1648_v10 = vpack.c.bf16 %v1549_v26, %v5638_v8  ;;  %v1441_v6 = vadd.f32 %v4109_v30, %v1307_v9  ;;  %v1561_v32 = vmax.f32 %v1433_v11, 0.0  ;;  %v5644_v0 = vmax.f32 %v5643_v53, 0.0  ;;  %v5657_v11 = vld [vmem:[#allocation34_spill] sm:$0xff] }
 0x34a   :  { %v1649_v41 = vpack.c.bf16 %v1551_v2, %v5641_v18  ;;  %v1317_v37 = vmul.f32 %v4106_v47, %v5645_v14  ;;  %v1443_v48 = vadd.f32 %v4109_v30, %v1309_v27  ;;  %v1563_v28 = vmax.f32 %v1435_v15, 0.0  ;;  %1711 = vst [vmem:[%s4857_s4 + $0xd8] sm:$0xff] %v1647_v7  ;;  %v5658_v34 = vld [vmem:[#allocation6_spill] sm:$0xff]  ;;  %v5660_v15 = vld [vmem:[#allocation32_spill] sm:$0xff] }
 0x34b   :  { %v1650_v33 = vpack.c.bf16 %v1553_v25, %v5644_v0  ;;  %v5647_v43 = vmax.f32 %v5646_v54, 0.0  ;;  %v1319_v29 = vmul.f32 %v4106_v47, %v5648_v31  ;;  %v1445_v13 = vadd.f32 %v4109_v30, %v1311_v19  ;;  %1712 = vst [vmem:[%s4857_s4 + $0xe0] sm:$0xff] %v1648_v10  ;;  %v5661_v7 = vld [vmem:[#allocation82_spill] sm:$0xff] }
 0x34c   :  { %v1565_v42 = vmax.f32 %v1437_v24, 0.0  ;;  %v5650_v44 = vmax.f32 %v5649_v56, 0.0  ;;  %v1321_v26 = vmul.f32 %v4106_v47, %v5651_v46  ;;  %v1447_v4 = vadd.f32 %v4109_v30, %v1313_v62  ;;  %1713 = vst [vmem:[%s4857_s4 + $0xe8] sm:$0xff] %v1649_v41  ;;  %v5663_v24 = vld [vmem:[#allocation35_spill] sm:$0xff]  ;;  %v5664_v10 = vld [vmem:[#allocation50_spill] sm:$0xff] }
 0x34d   :  { %v1651_v40 = vpack.c.bf16 %v1555_v45, %v5647_v43  ;;  %v1567_v21 = vmax.f32 %v1439_v58, 0.0  ;;  %v5653_v5 = vmax.f32 %v5652_v50, 0.0  ;;  %v1323_v2 = vmul.f32 %v4106_v47, %v5654_v17  ;;  %1714 = vst [vmem:[%s4857_s4 + $0xf0] sm:$0xff] %v1650_v33  ;;  %v5666_v58 = vld [vmem:[#allocation39_spill] sm:$0xff]  ;;  %v5670_v33 = vld [vmem:[#allocation84_spill] sm:$0xff] }
 0x34e   :  { %v1652_v35 = vpack.c.bf16 %v1557_v22, %v5650_v44  ;;  %v1449_v59 = vadd.f32 %v4109_v30, %v1315_v39  ;;  %v1569_v1 = vmax.f32 %v1441_v6, 0.0  ;;  %v5656_v57 = vmax.f32 %v5655_v51, 0.0  ;;  %v5667_v41 = vld [vmem:[#allocation83_spill] sm:$0xff]  ;;  %v5669_v6 = vld [vmem:[#allocation38_spill] sm:$0xff] }
 0x34f   :  { %v1653_v20 = vpack.c.bf16 %v1559_v52, %v5653_v5  ;;  %v1325_v25 = vmul.f32 %v4106_v47, %v5657_v11  ;;  %v1451_v60 = vadd.f32 %v4109_v30, %v1317_v37  ;;  %v1571_v16 = vmax.f32 %v1443_v48, 0.0  ;;  %1715 = vst [vmem:[%s4857_s4 + $0xf8] sm:$0xff] %v1651_v40  ;;  %v5672_v48 = vld [vmem:[#allocation44_spill] sm:$0xff]  ;;  %v5673_v40 = vld [vmem:[#allocation85_spill] sm:$0xff] }
 0x350   :  { %v1654_v9 = vpack.c.bf16 %v1561_v32, %v5656_v57  ;;  %v5659_v3 = vmax.f32 %v5658_v34, 0.0  ;;  %v1327_v45 = vmul.f32 %v4106_v47, %v5660_v15  ;;  %v1453_v55 = vadd.f32 %v4109_v30, %v1319_v29  ;;  %1716 = vst [vmem:[%s4857_s4 + $0x100] sm:$0xff] %v1652_v35  ;;  %v5676_v35 = vld [vmem:[#allocation86_spill] sm:$0xff] }
 0x351   :  { %v1573_v63 = vmax.f32 %v1445_v13, 0.0  ;;  %v5662_v36 = vmax.f32 %v5661_v7, 0.0  ;;  %v1329_v22 = vmul.f32 %v4106_v47, %v5663_v24  ;;  %v1455_v12 = vadd.f32 %v4109_v30, %v1321_v26  ;;  %1717 = vst [vmem:[%s4857_s4 + $0x108] sm:$0xff] %v1653_v20  ;;  %v5675_v13 = vld [vmem:[#allocation48_spill] sm:$0xff]  ;;  %v5679_v20 = vld [vmem:[#allocation66_spill] sm:$0xff] }
 0x352   :  { %v1655_v27 = vpack.c.bf16 %v1563_v28, %v5659_v3  ;;  %v1575_v8 = vmax.f32 %v1447_v4, 0.0  ;;  %v5665_v61 = vmax.f32 %v5664_v10, 0.0  ;;  %v1331_v52 = vmul.f32 %v4106_v47, %v5666_v58  ;;  %1718 = vst [vmem:[%s4857_s4 + $0x110] sm:$0xff] %v1654_v9  ;;  %v5678_v4 = vld [vmem:[#allocation46_spill] sm:$0xff]  ;;  %v5682_v9 = vld [vmem:[#allocation87_spill] sm:$0xff] }
 0x353   :  { %v1656_v19 = vpack.c.bf16 %v1565_v42, %v5662_v36  ;;  %v1457_v49 = vadd.f32 %v4109_v30, %v1323_v2  ;;  %v1577_v18 = vmax.f32 %v1449_v59, 0.0  ;;  %v5668_v38 = vmax.f32 %v5667_v41, 0.0  ;;  %v5681_v59 = vld [vmem:[#allocation49_spill] sm:$0xff] }
 0x354   :  { %v1657_v62 = vpack.c.bf16 %v1567_v21, %v5665_v61  ;;  %v1333_v32 = vmul.f32 %v4106_v47, %v5669_v6  ;;  %v1459_v53 = vadd.f32 %v4109_v30, %v1325_v25  ;;  %v1579_v0 = vmax.f32 %v1451_v60, 0.0  ;;  %1719 = vst [vmem:[%s4857_s4 + $0x118] sm:$0xff] %v1655_v27  ;;  %v5684_v60 = vld [vmem:[#allocation52_spill] sm:$0xff]  ;;  %v5685_v27 = vld [vmem:[#allocation89_spill] sm:$0xff] }
 0x355   :  { %v1658_v39 = vpack.c.bf16 %v1569_v1, %v5668_v38  ;;  %v5671_v14 = vmax.f32 %v5670_v33, 0.0  ;;  %v1335_v28 = vmul.f32 %v4106_v47, %v5672_v48  ;;  %v1461_v54 = vadd.f32 %v4109_v30, %v1327_v45  ;;  %1720 = vst [vmem:[%s4857_s4 + $0x120] sm:$0xff] %v1656_v19  ;;  %v5688_v19 = vld [vmem:[#allocation90_spill] sm:$0xff] }
 0x356   :  { %v1581_v43 = vmax.f32 %v1453_v55, 0.0  ;;  %v5674_v31 = vmax.f32 %v5673_v40, 0.0  ;;  %v1337_v42 = vmul.f32 %v4106_v47, %v5675_v13  ;;  %v1463_v56 = vadd.f32 %v4109_v30, %v1329_v22  ;;  %1721 = vst [vmem:[%s4857_s4 + $0x128] sm:$0xff] %v1657_v62  ;;  %v5687_v55 = vld [vmem:[#allocation56_spill] sm:$0xff]  ;;  %v5691_v62 = vld [vmem:[#allocation91_spill] sm:$0xff] }
 0x357   :  { %v1659_v37 = vpack.c.bf16 %v1571_v16, %v5671_v14  ;;  %v1583_v44 = vmax.f32 %v1455_v12, 0.0  ;;  %v5677_v46 = vmax.f32 %v5676_v35, 0.0  ;;  %v1339_v21 = vmul.f32 %v4106_v47, %v5678_v4  ;;  %1722 = vst [vmem:[%s4857_s4 + $0x130] sm:$0xff] %v1658_v39  ;;  %v5690_v12 = vld [vmem:[#allocation55_spill] sm:$0xff]  ;;  %v5694_v39 = vld [vmem:[#allocation69_spill] sm:$0xff] }
 0x358   :  { %v1660_v29 = vpack.c.bf16 %v1573_v63, %v5674_v31  ;;  %v1465_v50 = vadd.f32 %v4109_v30, %v1331_v52  ;;  %v1585_v5 = vmax.f32 %v1457_v49, 0.0  ;;  %v5680_v17 = vmax.f32 %v5679_v20, 0.0  ;;  %v5693_v49 = vld [vmem:[#allocation60_spill] sm:$0xff] }
 0x359   :  { %v1661_v26 = vpack.c.bf16 %v1575_v8, %v5677_v46  ;;  %v1341_v1 = vmul.f32 %v4106_v47, %v5681_v59  ;;  %v1467_v51 = vadd.f32 %v4109_v30, %v1333_v32  ;;  %v1587_v57 = vmax.f32 %v1459_v53, 0.0  ;;  %1723 = vst [vmem:[%s4857_s4 + $0x138] sm:$0xff] %v1659_v37  ;;  %v5696_v53 = vld [vmem:[#allocation63_spill] sm:$0xff] }
 0x35a   :  { %v1662_v2 = vpack.c.bf16 %v1577_v18, %v5680_v17  ;;  %v5683_v11 = vmax.f32 %v5682_v9, 0.0  ;;  %v1343_v16 = vmul.f32 %v4106_v47, %v5684_v60  ;;  %v1469_v34 = vadd.f32 %v4109_v30, %v1335_v28  ;;  %1724 = vst [vmem:[%s4857_s4 + $0x140] sm:$0xff] %v1660_v29  ;;  %v5697_v37 = vld [vmem:[#allocation71_spill] sm:$0xff]  ;;  %v5700_v29 = vld [vmem:[#allocation74_spill] sm:$0xff] }
 0x35b   :  { %v1589_v3 = vmax.f32 %v1461_v54, 0.0  ;;  %v5686_v15 = vmax.f32 %v5685_v27, 0.0  ;;  %v1345_v63 = vmul.f32 %v4106_v47, %v5687_v55  ;;  %v1471_v7 = vadd.f32 %v4109_v30, %v1337_v42  ;;  %1725 = vst [vmem:[%s4857_s4 + $0x148] sm:$0xff] %v1661_v26  ;;  %v5699_v54 = vld [vmem:[#allocation65_spill] sm:$0xff]  ;;  %v5703_v26 = vld [vmem:[#allocation102_spill] sm:$0xff] }
 0x35c   :  { %v1663_v25 = vpack.c.bf16 %v1579_v0, %v5683_v11  ;;  %v1591_v36 = vmax.f32 %v1463_v56, 0.0  ;;  %v5689_v24 = vmax.f32 %v5688_v19, 0.0  ;;  %v1347_v8 = vmul.f32 %v4106_v47, %v5690_v12  ;;  %1726 = vst [vmem:[%s4857_s4 + $0x150] sm:$0xff] %v1662_v2  ;;  %v5702_v56 = vld [vmem:[#allocation81_spill] sm:$0xff]  ;;  %v5706_v2 = vld [vmem:[#allocation103_spill] sm:$0xff]  ;;  %v5709_v11 = vld [vmem:[#allocation104_spill] sm:$0xff] }
 0x35d   :  { %v1664_v45 = vpack.c.bf16 %v1581_v43, %v5686_v15  ;;  %v1473_v10 = vadd.f32 %v4109_v30, %v1339_v21  ;;  %v1593_v61 = vmax.f32 %v1465_v50, 0.0  ;;  %v5692_v58 = vmax.f32 %v5691_v62, 0.0  ;;  %v5705_v50 = vld [vmem:[#allocation107_spill] sm:$0xff]  ;;  %v5712_v15 = vld [vmem:[#allocation105_spill] sm:$0xff] }
 0x35e   :  { %v1665_v22 = vpack.c.bf16 %v1583_v44, %v5689_v24  ;;  %v1349_v18 = vmul.f32 %v4106_v47, %v5693_v49  ;;  %v1475_v41 = vadd.f32 %v4109_v30, %v1341_v1  ;;  %v1595_v38 = vmax.f32 %v1467_v51, 0.0  ;;  %1727 = vst [vmem:[%s4857_s4 + $0x158] sm:$0xff] %v1663_v25  ;;  %v5715_v24 = vld [vmem:[#allocation106_spill] sm:$0xff] }
 0x35f   :  { %v1666_v52 = vpack.c.bf16 %v1585_v5, %v5692_v58  ;;  %v5695_v6 = vmax.f32 %v5694_v39, 0.0  ;;  %v1351_v0 = vmul.f32 %v4106_v47, %v5696_v53  ;;  %v1477_v33 = vadd.f32 %v4109_v30, %v1343_v16  ;;  %1728 = vst [vmem:[%s4857_s4 + $0x160] sm:$0xff] %v1664_v45  ;;  %v5711_v16 = vld [vmem:[#allocation109_spill] sm:$0xff]  ;;  %v5718_v58 = vld [vmem:[#allocation112_spill] sm:$0xff] }
 0x360   :  { %v1597_v14 = vmax.f32 %v1469_v34, 0.0  ;;  %v5698_v48 = vmax.f32 %v5697_v37, 0.0  ;;  %v1353_v43 = vmul.f32 %v4106_v47, %v5699_v54  ;;  %v1479_v40 = vadd.f32 %v4109_v30, %v1345_v63  ;;  %1729 = vst [vmem:[%s4857_s4 + $0x168] sm:$0xff] %v1665_v22  ;;  %v5714_v63 = vld [vmem:[#allocation110_spill] sm:$0xff] }
 0x361   :  { %v1667_v32 = vpack.c.bf16 %v1587_v57, %v5695_v6  ;;  %v1599_v31 = vmax.f32 %v1471_v7, 0.0  ;;  %v5701_v13 = vmax.f32 %v5700_v29, 0.0  ;;  %v1355_v44 = vmul.f32 %v4106_v47, %v5702_v56  ;;  %1730 = vst [vmem:[%s4857_s4 + $0x170] sm:$0xff] %v1666_v52  ;;  %v5708_v47 = vld [vmem:[#allocation108_spill] sm:$0xff]  ;;  %v5720_v6 = vld [vmem:[#allocation114_spill] sm:$0xff] }
 0x362   :  { %v1668_v28 = vpack.c.bf16 %v1589_v3, %v5698_v48  ;;  %v1481_v35 = vadd.f32 %v4109_v30, %v1347_v8  ;;  %v1601_v46 = vmax.f32 %v1473_v10, 0.0  ;;  %v5704_v4 = vmax.f32 %v5703_v26, 0.0  ;;  %v5717_v8 = vld [vmem:[#allocation111_spill] sm:$0xff] }
 0x363   :  { %v1669_v42 = vpack.c.bf16 %v1591_v36, %v5701_v13  ;;  %v1602_v5 = vmax.f32 %v5705_v50, 0.0  ;;  %v1483_v20 = vadd.f32 %v4109_v30, %v1349_v18  ;;  %v1603_v17 = vmax.f32 %v1475_v41, 0.0  ;;  %1731 = vst [vmem:[%s4857_s4 + $0x178] sm:$0xff] %v1667_v32  ;;  %v5719_v18 = vld [vmem:[#allocation113_spill] sm:$0xff] }
 0x364   :  { %v1670_v21 = vpack.c.bf16 %v1593_v61, %v5704_v4  ;;  %v5707_v59 = vmax.f32 %v5706_v2, 0.0  ;;  %v1604_v51 = vmax.f32 %v5708_v47, 0.0  ;;  %v1485_v57 = vadd.f32 %v4109_v30, %v1351_v0  ;;  %1732 = vst [vmem:[%s4857_s4 + $0x180] sm:$0xff] %v1668_v28 }
 0x365   :  { %v1605_v9 = vmax.f32 %v1477_v33, 0.0  ;;  %v5710_v25 = vmax.f32 %v5709_v11, 0.0  ;;  %v1606_v34 = vmax.f32 %v5711_v16, 0.0  ;;  %v1487_v3 = vadd.f32 %v4109_v30, %v1353_v43  ;;  %1733 = vst [vmem:[%s4857_s4 + $0x188] sm:$0xff] %v1669_v42 }
 0x366   :  { %v1671_v1 = vpack.c.bf16 %v1595_v38, %v5707_v59  ;;  %v1607_v27 = vmax.f32 %v1479_v40, 0.0  ;;  %v5713_v45 = vmax.f32 %v5712_v15, 0.0  ;;  %v1608_v7 = vmax.f32 %v5714_v63, 0.0  ;;  %1734 = vst [vmem:[%s4857_s4 + $0x190] sm:$0xff] %v1670_v21 }
 0x367   :  { %v1672_v60 = vpack.c.bf16 %v1597_v14, %v5710_v25  ;;  %v1489_v36 = vadd.f32 %v4109_v30, %v1355_v44  ;;  %v1609_v19 = vmax.f32 %v1481_v35, 0.0  ;;  %v5716_v22 = vmax.f32 %v5715_v24, 0.0 }
 0x368   :  { %v1673_v55 = vpack.c.bf16 %v1599_v31, %v5713_v45  ;;  %v1610_v10 = vmax.f32 %v5717_v8, 0.0  ;;  %v1611_v61 = vmax.f32 %v1483_v20, 0.0  ;;  %v1675_v62 = vpack.c.bf16 %v1603_v17, %v1602_v5  ;;  %1735 = vst [vmem:[%s4857_s4 + $0x198] sm:$0xff] %v1671_v1 }
 0x369   :  { %v1674_v12 = vpack.c.bf16 %v1601_v46, %v5716_v22  ;;  %v1612_v52 = vmax.f32 %v5718_v58, 0.0  ;;  %v1613_v49 = vmax.f32 %v1485_v57, 0.0  ;;  %v1676_v30 = vpack.c.bf16 %v1605_v9, %v1604_v51  ;;  %1736 = vst [vmem:[%s4857_s4 + $0x1a0] sm:$0xff] %v1672_v60 }
 0x36a   :  { %v1614_v41 = vmax.f32 %v5719_v18, 0.0  ;;  %v1615_v38 = vmax.f32 %v1487_v3, 0.0  ;;  %v1677_v39 = vpack.c.bf16 %v1607_v27, %v1606_v34  ;;  %1737 = vst [vmem:[%s4857_s4 + $0x1a8] sm:$0xff] %v1673_v55  ;;  %v1616_v32 = vmax.f32 %v5720_v6, 0.0 }
 0x36b   :  { %v1617_v53 = vmax.f32 %v1489_v36, 0.0  ;;  %v1678_v0 = vpack.c.bf16 %v1609_v19, %v1608_v7  ;;  %1738 = vst [vmem:[%s4857_s4 + $0x1b0] sm:$0xff] %v1674_v12  ;;  %v1679_v33 = vpack.c.bf16 %v1611_v61, %v1610_v10  ;;  %v1680_v14 = vpack.c.bf16 %v1613_v49, %v1612_v52 }
 0x36c   :  { %1739 = vst [vmem:[%s4857_s4 + $0x1b8] sm:$0xff] %v1675_v62  ;;  %v1681_v37 = vpack.c.bf16 %v1615_v38, %v1614_v41 }
 0x36d   :  { %1740 = vst [vmem:[%s4857_s4 + $0x1c0] sm:$0xff] %v1676_v30  ;;  %v1682_v48 = vpack.c.bf16 %v1617_v53, %v1616_v32 }
 0x36e   :  { %1741 = vst [vmem:[%s4857_s4 + $0x1c8] sm:$0xff] %v1677_v39 }
 0x36f   :  { %1742 = vst [vmem:[%s4857_s4 + $0x1d0] sm:$0xff] %v1678_v0 }
 0x370   :  { %1743 = vst [vmem:[%s4857_s4 + $0x1d8] sm:$0xff] %v1679_v33 }
 0x371   :  { %1744 = vst [vmem:[%s4857_s4 + $0x1e0] sm:$0xff] %v1680_v14 }
 0x372   :  { %1745 = vst [vmem:[%s4857_s4 + $0x1e8] sm:$0xff] %v1681_v37 }
 0x373   :  { %1746 = vst [vmem:[%s4857_s4 + $0x1f0] sm:$0xff] %v1682_v48 }

// kernel: forward.3
= control target key start
LH: loop header
LB: loop body
LE: loop exit
PB: predicated region body
PF: predicated region fallthrough
CT: control target
= control target key end

     0   :  { %s15681_s9 = smov 0   ;;  %s15683_s10 = smov 0   ;;  %s16827_s0 = inlined_call_operand.vmem [shape: bf16[2,65536], index: 0, kind: input, shape index: {}]   ;;  %s16828_s1 = inlined_call_operand.vmem [shape: bf16[65536,64], index: 1, kind: input, shape index: {}]   ;;  %s16829_s2 = inlined_call_operand.vmem [shape: f32[2,2,64], index: 2, kind: output, shape index: {}]  }
   0x1   :  { %s15685_s11 = smov 0   ;;  %s15687_s12 = smov 0  }
   0x2   :  { %s15689_s13 = smov 0  }
   0x3 LB: > { %s21_s14 = sadd.s32 1, %s15655_s11  ;;  %s24_s15 = sadd.s32 1, %s15659_s12  ;;  %s15663_s13 = sphi %s15689_s13, %s12_s13   ;;  %s15659_s12 = sphi %s15687_s12, %s16833_s12   ;;  %s15655_s11 = sphi %s15685_s11, %s16832_s11   ;;  %s15651_s10 = sphi %s15683_s10, %s16831_s10   ;;  %s15647_s9 = sphi %s15681_s9, %s16830_s9  }
   0x4   : > { %p22_p0 = scmp.ge.s32.totalorder %s21_s14, 2  ;;  %p10454_p1 = scmp.ge.s32.totalorder %s15663_s13, 1 }
   0x5   : > { %p151_p2 = scmp.lt.s32.totalorder %s15663_s13, 5 }
   0x6   : > { %s16835_s14 = smov (%p22_p0, %s21_s14), 0  ;;  %s16837_s15 = smov (!%p22_p0, %s24_s15), %s15659_s12 }
   0x7   : > { %p152_p3 = pnand %p10454_p1, %p151_p2  ;;  %p26_p4 = scmp.ge.s32.totalorder %s16837_s15, 2 }
   0x8   : > { %s10455_s16 = sshll.u32 (!%p152_p3), %s15651_s10, 1  ;;  %p199_p5 = scmp.lt.s32.totalorder (!%p152_p3), %s15651_s10, 1 }
   0x9   : > { %s16839_s15 = smov (%p26_p4, %s16837_s15), 0  ;;  %155 = sbr.rel (%p152_p3) target bundleno = 1192 (0x4a8), region = 28 }
   0xa   : > { %s181_s17 = sadd.s32 (!%p152_p3), %s15647_s9, %s10455_s16  ;;  %p10461_p8 = scmp.ne.s32.totalorder (!%p152_p3), %s15647_s9, 0 }
   0xb   : > { %s10456_s18 = sshll.u32 (!%p152_p3), %s181_s17, 7  ;;  %s10458_s19 = sshll.u32 (!%p152_p3), %s181_s17, 11 }
   0xc   : > { %p183_p6 = scmp.lt.s32.totalorder (!%p152_p3), %s10456_s18, 511  ;;  %p192_p7 = scmp.lt.s32.totalorder (!%p152_p3), %s10458_s19, 8191 }
   0xe   : > { %s16841_s10 = smov (!%p199_p5, %s15651_s10), 1  ;;  %s16843_s18 = smov (!%p183_p6, %s10456_s18), 511 }
   0xf   : > { %s16845_s19 = smov (!%p192_p7, %s10458_s19), 8191  ;;  %s15717_s22 = scalar_lea.vmem %s16827_s0, %s16843_s18 }
  0x10   : > { %s10460_s23 = sshll.u32 %s16841_s10, 1  ;;  %s10459_s24 = sshll.u32 %s16845_s19, 2 }
  0x11   : > { %s15722_s27 = scalar_lea.vmem %s16829_s2, %s10460_s23  ;;  %s15727_s30 = scalar_lea.vmem %s16828_s1, %s10459_s24 }
  0x12   : > { %206 = sbr.rel (%p10461_p8) target bundleno = 25 (0x19), region = 32 }
  0x17   : > { %vm207_vm0 = vcmask 517120   ;;  %v15665_v0 = vmov 0.0  }
  0x18   : > { %208 = vst.msk [vmem:[%s15722_s27] sm:$0x3] %vm207_vm0, %v15665_v0 }
  0x19 PF: > { %v14567_v1 = vld [vmem:[%s15727_s30 + $0x38] sm:$0xff]  ;;  %v14566_v5 = vld [vmem:[%s15727_s30 + $0x30] sm:$0xff]  ;;  %v14565_v9 = vld [vmem:[%s15727_s30 + $0x28] sm:$0xff]  ;;  %vm10371_vm1 = vcmask 517120  }
  0x1a   : > { %v14575_v2 = vld [vmem:[%s15727_s30 + $0x78] sm:$0xff]  ;;  %8706 = vmatpush.bf16.msra.mxu0 %v14567_v1  ;;  %v14574_v6 = vld [vmem:[%s15727_s30 + $0x70] sm:$0xff]  ;;  %v14573_v10 = vld [vmem:[%s15727_s30 + $0x68] sm:$0xff] }
  0x1b   : > { %v14583_v3 = vld [vmem:[%s15727_s30 + $0xb8] sm:$0xff]  ;;  %8719 = vmatpush.bf16.msra.mxu1 %v14575_v2  ;;  %v14582_v7 = vld [vmem:[%s15727_s30 + $0xb0] sm:$0xff]  ;;  %v14581_v11 = vld [vmem:[%s15727_s30 + $0xa8] sm:$0xff] }
  0x1c   : > { %v14591_v4 = vld [vmem:[%s15727_s30 + $0xf8] sm:$0xff]  ;;  %8732 = vmatpush.bf16.msra.mxu2 %v14583_v3  ;;  %v14590_v8 = vld [vmem:[%s15727_s30 + $0xf0] sm:$0xff]  ;;  %v14589_v12 = vld [vmem:[%s15727_s30 + $0xe8] sm:$0xff] }
  0x1d   : > { %8745 = vmatpush.bf16.msra.mxu3 %v14591_v4  ;;  %v14564_v13 = vld [vmem:[%s15727_s30 + $0x20] sm:$0xff]  ;;  %v14563_v17 = vld [vmem:[%s15727_s30 + $0x18] sm:$0xff]  ;;  %v14562_v22 = vld [vmem:[%s15727_s30 + $0x10] sm:$0xff] }
  0x1e   : > { %8707 = vmatpush.bf16.msra.mxu0 %v14566_v5  ;;  %v14572_v14 = vld [vmem:[%s15727_s30 + $0x60] sm:$0xff]  ;;  %v14571_v18 = vld [vmem:[%s15727_s30 + $0x58] sm:$0xff]  ;;  %v14570_v23 = vld [vmem:[%s15727_s30 + $0x50] sm:$0xff] }
  0x1f   : > { %8720 = vmatpush.bf16.msra.mxu1 %v14574_v6  ;;  %v14580_v15 = vld [vmem:[%s15727_s30 + $0xa0] sm:$0xff]  ;;  %v14579_v19 = vld [vmem:[%s15727_s30 + $0x98] sm:$0xff]  ;;  %v14578_v24 = vld [vmem:[%s15727_s30 + $0x90] sm:$0xff] }
  0x20   : > { %8733 = vmatpush.bf16.msra.mxu2 %v14582_v7  ;;  %v14588_v16 = vld [vmem:[%s15727_s30 + $0xe0] sm:$0xff]  ;;  %v14587_v20 = vld [vmem:[%s15727_s30 + $0xd8] sm:$0xff]  ;;  %v14586_v25 = vld [vmem:[%s15727_s30 + $0xd0] sm:$0xff] }
  0x21   : > { %8746 = vmatpush.bf16.msra.mxu3 %v14590_v8  ;;  %v210_v21 = vld [vmem:[%s15717_s22] sm:$0xff]  ;;  %v14561_v26 = vld [vmem:[%s15727_s30 + $0x8] sm:$0xff]  ;;  %v14599_v34 = vld [vmem:[%s15727_s30 + $0x138] sm:$0xff] }
  0x22   : > { %8708 = vmatpush.bf16.msra.mxu0 %v14565_v9  ;;  %2275 = vst [vmem:[#allocation1] ss:$9 sm:$0xff] %v210_v21  ;;  %v14569_v27 = vld [vmem:[%s15727_s30 + $0x48] sm:$0xff]  ;;  %v14560_v30 = vld [vmem:[%s15727_s30] sm:$0xff]  ;;  %v14607_v35 = vld [vmem:[%s15727_s30 + $0x178] sm:$0xff] }
  0x23   : > { %8721 = vmatpush.bf16.msra.mxu1 %v14573_v10  ;;  %v14577_v28 = vld [vmem:[%s15727_s30 + $0x88] sm:$0xff]  ;;  %v14568_v31 = vld [vmem:[%s15727_s30 + $0x40] sm:$0xff]  ;;  %v14615_v36 = vld [vmem:[%s15727_s30 + $0x1b8] sm:$0xff] }
  0x24   : > { %8734 = vmatpush.bf16.msra.mxu2 %v14581_v11  ;;  %v14585_v29 = vld [vmem:[%s15727_s30 + $0xc8] sm:$0xff]  ;;  %v14576_v32 = vld [vmem:[%s15727_s30 + $0x80] sm:$0xff]  ;;  %v14623_v37 = vld [vmem:[%s15727_s30 + $0x1f8] sm:$0xff] }
  0x25   : > { %8747 = vmatpush.bf16.msra.mxu3 %v14589_v12  ;;  %v14584_v33 = vld [vmem:[%s15727_s30 + $0xc0] sm:$0xff]  ;;  %v14598_v38 = vld [vmem:[%s15727_s30 + $0x130] sm:$0xff]  ;;  %v14597_v46 = vld [vmem:[%s15727_s30 + $0x128] sm:$0xff] }
  0x26   : > { %8709 = vmatpush.bf16.msra.mxu0 %v14564_v13  ;;  %v14606_v41 = vld [vmem:[%s15727_s30 + $0x170] sm:$0xff]  ;;  %v14605_v47 = vld [vmem:[%s15727_s30 + $0x168] sm:$0xff]  ;;  %v14596_v50 = vld [vmem:[%s15727_s30 + $0x120] sm:$0xff] }
  0x27   : > { %8722 = vmatpush.bf16.msra.mxu1 %v14572_v14  ;;  %v14614_v44 = vld [vmem:[%s15727_s30 + $0x1b0] sm:$0xff]  ;;  %v14613_v48 = vld [vmem:[%s15727_s30 + $0x1a8] sm:$0xff]  ;;  %v14604_v51 = vld [vmem:[%s15727_s30 + $0x160] sm:$0xff] }
  0x28   : > { %8735 = vmatpush.bf16.msra.mxu2 %v14580_v15  ;;  %v14622_v45 = vld [vmem:[%s15727_s30 + $0x1f0] sm:$0xff]  ;;  %v14621_v49 = vld [vmem:[%s15727_s30 + $0x1e8] sm:$0xff]  ;;  %v14612_v52 = vld [vmem:[%s15727_s30 + $0x1a0] sm:$0xff] }
  0x29   : > { %8748 = vmatpush.bf16.msra.mxu3 %v14588_v16  ;;  %v2278_v39 = vld [vmem:[#allocation1 + $0x12] sm:$0xff]  ;;  %v2276_v40 = vld [vmem:[#allocation1] sm:$0xff]  ;;  %v2277_v43 = vld [vmem:[#allocation1 + $0x9] sm:$0xff] }
  0x2a   : > { %8710 = vmatpush.bf16.msra.mxu0 %v14563_v17  ;;  %v2279_v42 = vld [vmem:[#allocation1 + $0x1b] sm:$0xff]  ;;  %v14594_v58 = vld [vmem:[%s15727_s30 + $0x110] sm:$0xff]  ;;  %v14593_v62 = vld [vmem:[%s15727_s30 + $0x108] sm:$0xff] }
  0x2b   : > { %8723 = vmatpush.bf16.msra.mxu1 %v14571_v18  ;;  %v14620_v53 = vld [vmem:[%s15727_s30 + $0x1e0] sm:$0xff]  ;;  %v14595_v54 = vld [vmem:[%s15727_s30 + $0x118] sm:$0xff]  ;;  %v14602_v59 = vld [vmem:[%s15727_s30 + $0x150] sm:$0xff] }
  0x2c   : > { %8736 = vmatpush.bf16.msra.mxu2 %v14579_v19  ;;  %v14603_v55 = vld [vmem:[%s15727_s30 + $0x158] sm:$0xff]  ;;  %v14610_v60 = vld [vmem:[%s15727_s30 + $0x190] sm:$0xff]  ;;  %v14601_v63 = vld [vmem:[%s15727_s30 + $0x148] sm:$0xff] }
  0x2d   : > { %8749 = vmatpush.bf16.msra.mxu3 %v14587_v20  ;;  %v14611_v56 = vld [vmem:[%s15727_s30 + $0x198] sm:$0xff]  ;;  %v14618_v61 = vld [vmem:[%s15727_s30 + $0x1d0] sm:$0xff]  ;;  %v14609_v0 = vld [vmem:[%s15727_s30 + $0x188] sm:$0xff] }
  0x2e   : > { %8711 = vmatpush.bf16.msra.mxu0 %v14562_v22  ;;  %v14619_v57 = vld [vmem:[%s15727_s30 + $0x1d8] sm:$0xff]  ;;  %v14617_v1 = vld [vmem:[%s15727_s30 + $0x1c8] sm:$0xff]  ;;  %v14592_v7 = vld [vmem:[%s15727_s30 + $0x100] sm:$0xff] }
  0x2f   : > { %8724 = vmatpush.bf16.msra.mxu1 %v14570_v23  ;;  %v2282_v2 = vld [vmem:[#allocation1 + $0x36] sm:$0xff]  ;;  %v2280_v3 = vld [vmem:[#allocation1 + $0x24] sm:$0xff]  ;;  %v2281_v5 = vld [vmem:[#allocation1 + $0x2d] sm:$0xff] }
  0x30   : > { %8737 = vmatpush.bf16.msra.mxu2 %v14578_v24  ;;  %v2283_v4 = vld [vmem:[#allocation1 + $0x3f] sm:$0xff]  ;;  %v211_v6 = vld [vmem:[%s15717_s22 + $0x8] sm:$0xff]  ;;  %v14630_v15 = vld [vmem:[%s15727_s30 + $0x230] sm:$0xff] }
  0x31   : > { %8750 = vmatpush.bf16.msra.mxu3 %v14586_v25  ;;  %2285 = vst [vmem:[#allocation1] ss:$9 sm:$0xff] %v211_v6  ;;  %v14600_v8 = vld [vmem:[%s15727_s30 + $0x140] sm:$0xff]  ;;  %v14631_v11 = vld [vmem:[%s15727_s30 + $0x238] sm:$0xff]  ;;  %v14638_v16 = vld [vmem:[%s15727_s30 + $0x270] sm:$0xff] }
  0x32   : > { %8712 = vmatpush.bf16.msra.mxu0 %v14561_v26  ;;  %v14608_v9 = vld [vmem:[%s15727_s30 + $0x180] sm:$0xff]  ;;  %v14639_v12 = vld [vmem:[%s15727_s30 + $0x278] sm:$0xff]  ;;  %v14646_v17 = vld [vmem:[%s15727_s30 + $0x2b0] sm:$0xff] }
  0x33   : > { %8725 = vmatpush.bf16.msra.mxu1 %v14569_v27  ;;  %v14616_v10 = vld [vmem:[%s15727_s30 + $0x1c0] sm:$0xff]  ;;  %v14647_v13 = vld [vmem:[%s15727_s30 + $0x2b8] sm:$0xff]  ;;  %v14654_v18 = vld [vmem:[%s15727_s30 + $0x2f0] sm:$0xff] }
  0x34   : > { %8738 = vmatpush.bf16.msra.mxu2 %v14577_v28  ;;  %v14655_v14 = vld [vmem:[%s15727_s30 + $0x2f8] sm:$0xff]  ;;  %v14629_v19 = vld [vmem:[%s15727_s30 + $0x228] sm:$0xff]  ;;  %v14628_v23 = vld [vmem:[%s15727_s30 + $0x220] sm:$0xff] }
  0x35   : > { %8751 = vmatpush.bf16.msra.mxu3 %v14585_v29  ;;  %v14637_v20 = vld [vmem:[%s15727_s30 + $0x268] sm:$0xff]  ;;  %v14636_v24 = vld [vmem:[%s15727_s30 + $0x260] sm:$0xff]  ;;  %v14627_v27 = vld [vmem:[%s15727_s30 + $0x218] sm:$0xff] }
  0x36   : > { %8713 = vmatpush.bf16.msra.mxu0 %v14560_v30  ;;  %v14645_v21 = vld [vmem:[%s15727_s30 + $0x2a8] sm:$0xff]  ;;  %v14644_v25 = vld [vmem:[%s15727_s30 + $0x2a0] sm:$0xff]  ;;  %v14635_v28 = vld [vmem:[%s15727_s30 + $0x258] sm:$0xff] }
  0x37   : > { %8726 = vmatpush.bf16.msra.mxu1 %v14568_v31  ;;  %v14653_v22 = vld [vmem:[%s15727_s30 + $0x2e8] sm:$0xff]  ;;  %v14652_v26 = vld [vmem:[%s15727_s30 + $0x2e0] sm:$0xff]  ;;  %v14643_v29 = vld [vmem:[%s15727_s30 + $0x298] sm:$0xff] }
  0x38   : > { %8739 = vmatpush.bf16.msra.mxu2 %v14576_v32  ;;  %v14651_v30 = vld [vmem:[%s15727_s30 + $0x2d8] sm:$0xff]  ;;  %v14626_v31 = vld [vmem:[%s15727_s30 + $0x210] sm:$0xff] }
  0x39   : > { %8752 = vmatpush.bf16.msra.mxu3 %v14584_v33  ;;  %8714 = vmatmul.bf16.vlgmr.msra.gmra.mxu0 %v2276_v40  ;;  %v14634_v32 = vld [vmem:[%s15727_s30 + $0x250] sm:$0xff]  ;;  %v14632_v40 = vld [vmem:[%s15727_s30 + $0x240] sm:$0xff] }
  0x3a   : > { %8758 = vmatpush.bf16.msrb.mxu0 %v14599_v34  ;;  %8727 = vmatmul.bf16.vlgmr.msra.gmra.mxu1 %v2277_v43  ;;  %v14642_v33 = vld [vmem:[%s15727_s30 + $0x290] sm:$0xff]  ;;  %v14663_v43 = vld [vmem:[%s15727_s30 + $0x338] sm:$0xff] }
  0x3b   : > { %8771 = vmatpush.bf16.msrb.mxu1 %v14607_v35  ;;  %8740 = vmatmul.bf16.vlgmr.msra.gmra.mxu2 %v2278_v39  ;;  %v14650_v34 = vld [vmem:[%s15727_s30 + $0x2d0] sm:$0xff]  ;;  %v14625_v35 = vld [vmem:[%s15727_s30 + $0x208] sm:$0xff]  ;;  %v14624_v39 = vld [vmem:[%s15727_s30 + $0x200] sm:$0xff] }
  0x3c   : > { %8784 = vmatpush.bf16.msrb.mxu2 %v14615_v36  ;;  %8753 = vmatmul.bf16.vlgmr.msra.gmra.mxu3 %v2279_v42  ;;  %v14633_v36 = vld [vmem:[%s15727_s30 + $0x248] sm:$0xff]  ;;  %v14648_v42 = vld [vmem:[%s15727_s30 + $0x2c0] sm:$0xff]  ;;  %v14682_v6 = vld [vmem:[%s15727_s30 + $0x3d0] sm:$0xff] }
  0x3d   : > { %8797 = vmatpush.bf16.msrb.mxu3 %v14623_v37  ;;  %v14641_v37 = vld [vmem:[%s15727_s30 + $0x288] sm:$0xff] }
  0x3e   : > { %8759 = vmatpush.bf16.msrb.mxu0 %v14598_v38  ;;  %v14649_v38 = vld [vmem:[%s15727_s30 + $0x2c8] sm:$0xff] }
  0x3f   : > { %8772 = vmatpush.bf16.msrb.mxu1 %v14606_v41  ;;  %v14640_v41 = vld [vmem:[%s15727_s30 + $0x280] sm:$0xff] }
  0x40   : > { %8785 = vmatpush.bf16.msrb.mxu2 %v14614_v44  ;;  %v14671_v44 = vld [vmem:[%s15727_s30 + $0x378] sm:$0xff] }
  0x41   : > { %8798 = vmatpush.bf16.msrb.mxu3 %v14622_v45  ;;  %v14679_v45 = vld [vmem:[%s15727_s30 + $0x3b8] sm:$0xff] }
  0x42   : > { %8760 = vmatpush.bf16.msrb.mxu0 %v14597_v46  ;;  %v14687_v46 = vld [vmem:[%s15727_s30 + $0x3f8] sm:$0xff] }
  0x43   : > { %8773 = vmatpush.bf16.msrb.mxu1 %v14605_v47  ;;  %v2286_v47 = vld [vmem:[#allocation1] sm:$0xff] }
  0x44   : > { %8786 = vmatpush.bf16.msrb.mxu2 %v14613_v48  ;;  %v2288_v48 = vld [vmem:[#allocation1 + $0x12] sm:$0xff] }
  0x45   : > { %8799 = vmatpush.bf16.msrb.mxu3 %v14621_v49  ;;  %v2287_v49 = vld [vmem:[#allocation1 + $0x9] sm:$0xff] }
  0x46   : > { %8761 = vmatpush.bf16.msrb.mxu0 %v14596_v50  ;;  %v2289_v50 = vld [vmem:[#allocation1 + $0x1b] sm:$0xff] }
  0x47   : > { %8774 = vmatpush.bf16.msrb.mxu1 %v14604_v51  ;;  %v14662_v51 = vld [vmem:[%s15727_s30 + $0x330] sm:$0xff] }
  0x48   : > { %8787 = vmatpush.bf16.msrb.mxu2 %v14612_v52  ;;  %v14670_v52 = vld [vmem:[%s15727_s30 + $0x370] sm:$0xff] }
  0x49   : > { %8800 = vmatpush.bf16.msrb.mxu3 %v14620_v53  ;;  %v14678_v53 = vld [vmem:[%s15727_s30 + $0x3b0] sm:$0xff] }
  0x4a   : > { %8762 = vmatpush.bf16.msrb.mxu0 %v14595_v54  ;;  %v14686_v54 = vld [vmem:[%s15727_s30 + $0x3f0] sm:$0xff] }
  0x4b   : > { %8775 = vmatpush.bf16.msrb.mxu1 %v14603_v55  ;;  %v14661_v55 = vld [vmem:[%s15727_s30 + $0x328] sm:$0xff] }
  0x4c   : > { %8788 = vmatpush.bf16.msrb.mxu2 %v14611_v56  ;;  %v14669_v56 = vld [vmem:[%s15727_s30 + $0x368] sm:$0xff] }
  0x4d   : > { %8801 = vmatpush.bf16.msrb.mxu3 %v14619_v57  ;;  %v14677_v57 = vld [vmem:[%s15727_s30 + $0x3a8] sm:$0xff] }
  0x4e   : > { %8763 = vmatpush.bf16.msrb.mxu0 %v14594_v58  ;;  %v14685_v58 = vld [vmem:[%s15727_s30 + $0x3e8] sm:$0xff] }
  0x4f   : > { %8776 = vmatpush.bf16.msrb.mxu1 %v14602_v59  ;;  %v14660_v59 = vld [vmem:[%s15727_s30 + $0x320] sm:$0xff] }
  0x50   : > { %8789 = vmatpush.bf16.msrb.mxu2 %v14610_v60  ;;  %v14668_v60 = vld [vmem:[%s15727_s30 + $0x360] sm:$0xff] }
  0x51   : > { %8802 = vmatpush.bf16.msrb.mxu3 %v14618_v61  ;;  %v14676_v61 = vld [vmem:[%s15727_s30 + $0x3a0] sm:$0xff] }
  0x52   : > { %8764 = vmatpush.bf16.msrb.mxu0 %v14593_v62  ;;  %v14684_v62 = vld [vmem:[%s15727_s30 + $0x3e0] sm:$0xff] }
  0x53   : > { %8777 = vmatpush.bf16.msrb.mxu1 %v14601_v63  ;;  %v14659_v63 = vld [vmem:[%s15727_s30 + $0x318] sm:$0xff] }
  0x54   : > { %8790 = vmatpush.bf16.msrb.mxu2 %v14609_v0  ;;  %v14667_v0 = vld [vmem:[%s15727_s30 + $0x358] sm:$0xff] }
  0x55   : > { %8803 = vmatpush.bf16.msrb.mxu3 %v14617_v1  ;;  %v14675_v1 = vld [vmem:[%s15727_s30 + $0x398] sm:$0xff] }
  0x56   : > { %8765 = vmatpush.bf16.msrb.mxu0 %v14592_v7  ;;  %v14657_v7 = vld [vmem:[%s15727_s30 + $0x308] sm:$0xff] }
  0x57   : > { %8778 = vmatpush.bf16.msrb.mxu1 %v14600_v8  ;;  %v14665_v8 = vld [vmem:[%s15727_s30 + $0x348] sm:$0xff] }
  0x58   : > { %8791 = vmatpush.bf16.msrb.mxu2 %v14608_v9  ;;  %v14673_v9 = vld [vmem:[%s15727_s30 + $0x388] sm:$0xff] }
  0x59   : > { %8804 = vmatpush.bf16.msrb.mxu3 %v14616_v10  ;;  %8766 = vmatmul.bf16.vlgmr.msrb.gmra.mxu0 %v2280_v3  ;;  %v14658_v3 = vld [vmem:[%s15727_s30 + $0x310] sm:$0xff]  ;;  %v14681_v10 = vld [vmem:[%s15727_s30 + $0x3c8] sm:$0xff] }
  0x5a   : > { %8810 = vmatpush.bf16.msra.mxu0 %v14631_v11  ;;  %8779 = vmatmul.bf16.vlgmr.msrb.gmra.mxu1 %v2281_v5  ;;  %v14674_v5 = vld [vmem:[%s15727_s30 + $0x390] sm:$0xff]  ;;  %v2290_v11 = vld [vmem:[#allocation1 + $0x24] sm:$0xff] }
  0x5b   : > { %8823 = vmatpush.bf16.msra.mxu1 %v14639_v12  ;;  %8792 = vmatmul.bf16.vlgmr.msrb.gmra.mxu2 %v2282_v2  ;;  %v14683_v2 = vld [vmem:[%s15727_s30 + $0x3d8] sm:$0xff] }
  0x5c   : > { %8836 = vmatpush.bf16.msra.mxu2 %v14647_v13  ;;  %8805 = vmatmul.bf16.vlgmr.msrb.gmra.mxu3 %v2283_v4  ;;  %v14666_v4 = vld [vmem:[%s15727_s30 + $0x350] sm:$0xff] }
  0x5d   : > { %8849 = vmatpush.bf16.msra.mxu3 %v14655_v14  ;;  %v2292_v12 = vld [vmem:[#allocation1 + $0x36] sm:$0xff]  ;;  %v2291_v13 = vld [vmem:[#allocation1 + $0x2d] sm:$0xff]  ;;  %v2293_v14 = vld [vmem:[#allocation1 + $0x3f] sm:$0xff] }
  0x5e   : > { %8811 = vmatpush.bf16.msra.mxu0 %v14630_v15  ;;  %v212_v15 = vld [vmem:[%s15717_s22 + $0x10] sm:$0xff] }
  0x5f   : > { %8824 = vmatpush.bf16.msra.mxu1 %v14638_v16  ;;  %2295 = vst [vmem:[#allocation1] ss:$9 sm:$0xff] %v212_v15  ;;  %v14656_v16 = vld [vmem:[%s15727_s30 + $0x300] sm:$0xff] }
  0x60   : > { %8837 = vmatpush.bf16.msra.mxu2 %v14646_v17  ;;  %v14664_v17 = vld [vmem:[%s15727_s30 + $0x340] sm:$0xff] }
  0x61   : > { %8850 = vmatpush.bf16.msra.mxu3 %v14654_v18  ;;  %v14672_v18 = vld [vmem:[%s15727_s30 + $0x380] sm:$0xff] }
  0x62   : > { %8812 = vmatpush.bf16.msra.mxu0 %v14629_v19  ;;  %v14680_v19 = vld [vmem:[%s15727_s30 + $0x3c0] sm:$0xff] }
  0x63   : > { %8825 = vmatpush.bf16.msra.mxu1 %v14637_v20  ;;  %v14695_v20 = vld [vmem:[%s15727_s30 + $0x438] sm:$0xff] }
  0x64   : > { %8838 = vmatpush.bf16.msra.mxu2 %v14645_v21  ;;  %v14703_v21 = vld [vmem:[%s15727_s30 + $0x478] sm:$0xff] }
  0x65   : > { %8851 = vmatpush.bf16.msra.mxu3 %v14653_v22  ;;  %v14711_v22 = vld [vmem:[%s15727_s30 + $0x4b8] sm:$0xff] }
  0x66   : > { %8813 = vmatpush.bf16.msra.mxu0 %v14628_v23  ;;  %v14719_v23 = vld [vmem:[%s15727_s30 + $0x4f8] sm:$0xff] }
  0x67   : > { %8826 = vmatpush.bf16.msra.mxu1 %v14636_v24  ;;  %v14694_v24 = vld [vmem:[%s15727_s30 + $0x430] sm:$0xff] }
  0x68   : > { %8839 = vmatpush.bf16.msra.mxu2 %v14644_v25  ;;  %v14702_v25 = vld [vmem:[%s15727_s30 + $0x470] sm:$0xff] }
  0x69   : > { %8852 = vmatpush.bf16.msra.mxu3 %v14652_v26  ;;  %v14710_v26 = vld [vmem:[%s15727_s30 + $0x4b0] sm:$0xff] }
  0x6a   : > { %8814 = vmatpush.bf16.msra.mxu0 %v14627_v27  ;;  %v14718_v27 = vld [vmem:[%s15727_s30 + $0x4f0] sm:$0xff] }
  0x6b   : > { %8827 = vmatpush.bf16.msra.mxu1 %v14635_v28  ;;  %v14693_v28 = vld [vmem:[%s15727_s30 + $0x428] sm:$0xff] }
  0x6c   : > { %8840 = vmatpush.bf16.msra.mxu2 %v14643_v29  ;;  %v14701_v29 = vld [vmem:[%s15727_s30 + $0x468] sm:$0xff] }
  0x6d   : > { %8853 = vmatpush.bf16.msra.mxu3 %v14651_v30  ;;  %v14709_v30 = vld [vmem:[%s15727_s30 + $0x4a8] sm:$0xff] }
  0x6e   : > { %8815 = vmatpush.bf16.msra.mxu0 %v14626_v31  ;;  %v14717_v31 = vld [vmem:[%s15727_s30 + $0x4e8] sm:$0xff] }
  0x6f   : > { %8828 = vmatpush.bf16.msra.mxu1 %v14634_v32  ;;  %v14692_v32 = vld [vmem:[%s15727_s30 + $0x420] sm:$0xff] }
  0x70   : > { %8841 = vmatpush.bf16.msra.mxu2 %v14642_v33  ;;  %v14700_v33 = vld [vmem:[%s15727_s30 + $0x460] sm:$0xff] }
  0x71   : > { %8854 = vmatpush.bf16.msra.mxu3 %v14650_v34  ;;  %v14708_v34 = vld [vmem:[%s15727_s30 + $0x4a0] sm:$0xff] }
  0x72   : > { %8816 = vmatpush.bf16.msra.mxu0 %v14625_v35  ;;  %v14716_v35 = vld [vmem:[%s15727_s30 + $0x4e0] sm:$0xff] }
  0x73   : > { %8829 = vmatpush.bf16.msra.mxu1 %v14633_v36  ;;  %v14691_v36 = vld [vmem:[%s15727_s30 + $0x418] sm:$0xff] }
  0x74   : > { %8842 = vmatpush.bf16.msra.mxu2 %v14641_v37  ;;  %v14699_v37 = vld [vmem:[%s15727_s30 + $0x458] sm:$0xff] }
  0x75   : > { %8855 = vmatpush.bf16.msra.mxu3 %v14649_v38  ;;  %v14707_v38 = vld [vmem:[%s15727_s30 + $0x498] sm:$0xff] }
  0x76   : > { %8817 = vmatpush.bf16.msra.mxu0 %v14624_v39  ;;  %v14715_v39 = vld [vmem:[%s15727_s30 + $0x4d8] sm:$0xff] }
  0x77   : > { %8830 = vmatpush.bf16.msra.mxu1 %v14632_v40  ;;  %v14690_v40 = vld [vmem:[%s15727_s30 + $0x410] sm:$0xff] }
  0x78   : > { %8843 = vmatpush.bf16.msra.mxu2 %v14640_v41  ;;  %v14698_v41 = vld [vmem:[%s15727_s30 + $0x450] sm:$0xff] }
  0x79   : > { %8856 = vmatpush.bf16.msra.mxu3 %v14648_v42  ;;  %8818 = vmatmul.bf16.vlgmr.msra.gmra.mxu0 %v2286_v47  ;;  %v14706_v42 = vld [vmem:[%s15727_s30 + $0x490] sm:$0xff]  ;;  %v14713_v47 = vld [vmem:[%s15727_s30 + $0x4c8] sm:$0xff] }
  0x7a   : > { %8862 = vmatpush.bf16.msrb.mxu0 %v14663_v43  ;;  %8831 = vmatmul.bf16.vlgmr.msra.gmra.mxu1 %v2287_v49  ;;  %v14714_v43 = vld [vmem:[%s15727_s30 + $0x4d0] sm:$0xff]  ;;  %v14696_v49 = vld [vmem:[%s15727_s30 + $0x440] sm:$0xff] }
  0x7b   : > { %8875 = vmatpush.bf16.msrb.mxu1 %v14671_v44  ;;  %8844 = vmatmul.bf16.vlgmr.msra.gmra.mxu2 %v2288_v48  ;;  %v14689_v44 = vld [vmem:[%s15727_s30 + $0x408] sm:$0xff]  ;;  %v14688_v48 = vld [vmem:[%s15727_s30 + $0x400] sm:$0xff] }
  0x7c   : > { %8888 = vmatpush.bf16.msrb.mxu2 %v14679_v45  ;;  %8857 = vmatmul.bf16.vlgmr.msra.gmra.mxu3 %v2289_v50  ;;  %v14697_v45 = vld [vmem:[%s15727_s30 + $0x448] sm:$0xff]  ;;  %v14704_v50 = vld [vmem:[%s15727_s30 + $0x480] sm:$0xff] }
  0x7d   : > { %8901 = vmatpush.bf16.msrb.mxu3 %v14687_v46  ;;  %v14705_v46 = vld [vmem:[%s15727_s30 + $0x488] sm:$0xff] }
  0x7e   : > { %8863 = vmatpush.bf16.msrb.mxu0 %v14662_v51  ;;  %v14712_v51 = vld [vmem:[%s15727_s30 + $0x4c0] sm:$0xff] }
  0x7f   : > { %8876 = vmatpush.bf16.msrb.mxu1 %v14670_v52  ;;  %v14727_v52 = vld [vmem:[%s15727_s30 + $0x538] sm:$0xff] }
  0x80   : > { %8889 = vmatpush.bf16.msrb.mxu2 %v14678_v53  ;;  %v14735_v53 = vld [vmem:[%s15727_s30 + $0x578] sm:$0xff] }
  0x81   : > { %8902 = vmatpush.bf16.msrb.mxu3 %v14686_v54  ;;  %v14743_v54 = vld [vmem:[%s15727_s30 + $0x5b8] sm:$0xff] }
  0x82   : > { %8864 = vmatpush.bf16.msrb.mxu0 %v14661_v55  ;;  %v14751_v55 = vld [vmem:[%s15727_s30 + $0x5f8] sm:$0xff] }
  0x83   : > { %8877 = vmatpush.bf16.msrb.mxu1 %v14669_v56  ;;  %v2296_v56 = vld [vmem:[#allocation1] sm:$0xff] }
  0x84   : > { %8890 = vmatpush.bf16.msrb.mxu2 %v14677_v57  ;;  %v2298_v57 = vld [vmem:[#allocation1 + $0x12] sm:$0xff] }
  0x85   : > { %8903 = vmatpush.bf16.msrb.mxu3 %v14685_v58  ;;  %v2297_v58 = vld [vmem:[#allocation1 + $0x9] sm:$0xff] }
  0x86   : > { %8865 = vmatpush.bf16.msrb.mxu0 %v14660_v59  ;;  %v2299_v59 = vld [vmem:[#allocation1 + $0x1b] sm:$0xff] }
  0x87   : > { %8878 = vmatpush.bf16.msrb.mxu1 %v14668_v60  ;;  %v14726_v60 = vld [vmem:[%s15727_s30 + $0x530] sm:$0xff] }
  0x88   : > { %8891 = vmatpush.bf16.msrb.mxu2 %v14676_v61  ;;  %v14734_v61 = vld [vmem:[%s15727_s30 + $0x570] sm:$0xff] }
  0x89   : > { %8904 = vmatpush.bf16.msrb.mxu3 %v14684_v62  ;;  %v14742_v62 = vld [vmem:[%s15727_s30 + $0x5b0] sm:$0xff] }
  0x8a   : > { %8866 = vmatpush.bf16.msrb.mxu0 %v14659_v63  ;;  %v14750_v63 = vld [vmem:[%s15727_s30 + $0x5f0] sm:$0xff] }
  0x8b   : > { %8879 = vmatpush.bf16.msrb.mxu1 %v14667_v0  ;;  %v14725_v0 = vld [vmem:[%s15727_s30 + $0x528] sm:$0xff] }
  0x8c   : > { %8892 = vmatpush.bf16.msrb.mxu2 %v14675_v1  ;;  %v14733_v1 = vld [vmem:[%s15727_s30 + $0x568] sm:$0xff] }
  0x8d   : > { %8905 = vmatpush.bf16.msrb.mxu3 %v14683_v2  ;;  %v14741_v2 = vld [vmem:[%s15727_s30 + $0x5a8] sm:$0xff] }
  0x8e   : > { %8867 = vmatpush.bf16.msrb.mxu0 %v14658_v3  ;;  %v14749_v3 = vld [vmem:[%s15727_s30 + $0x5e8] sm:$0xff] }
  0x8f   : > { %8880 = vmatpush.bf16.msrb.mxu1 %v14666_v4 }
  0x90   : > { %8893 = vmatpush.bf16.msrb.mxu2 %v14674_v5  ;;  %v14724_v5 = vld [vmem:[%s15727_s30 + $0x520] sm:$0xff] }
  0x91   : > { %8906 = vmatpush.bf16.msrb.mxu3 %v14682_v6  ;;  %v14732_v6 = vld [vmem:[%s15727_s30 + $0x560] sm:$0xff] }
  0x92   : > { %8868 = vmatpush.bf16.msrb.mxu0 %v14657_v7 }
  0x93   : > { %8881 = vmatpush.bf16.msrb.mxu1 %v14665_v8  ;;  %v14740_v8 = vld [vmem:[%s15727_s30 + $0x5a0] sm:$0xff] }
  0x94   : > { %8894 = vmatpush.bf16.msrb.mxu2 %v14673_v9  ;;  %v14748_v9 = vld [vmem:[%s15727_s30 + $0x5e0] sm:$0xff] }
  0x95   : > { %8907 = vmatpush.bf16.msrb.mxu3 %v14681_v10 }
  0x96   : > { %8869 = vmatpush.bf16.msrb.mxu0 %v14656_v16 }
  0x97   : > { %8882 = vmatpush.bf16.msrb.mxu1 %v14664_v17 }
  0x98   : > { %8895 = vmatpush.bf16.msrb.mxu2 %v14672_v18 }
  0x99   : > { %8908 = vmatpush.bf16.msrb.mxu3 %v14680_v19  ;;  %8870 = vmatmul.bf16.vlgmr.msrb.gmra.mxu0 %v2290_v11  ;;  %v14723_v11 = vld [vmem:[%s15727_s30 + $0x518] sm:$0xff]  ;;  %v14722_v19 = vld [vmem:[%s15727_s30 + $0x510] sm:$0xff] }
  0x9a   : > { %8914 = vmatpush.bf16.msra.mxu0 %v14695_v20  ;;  %8883 = vmatmul.bf16.vlgmr.msrb.gmra.mxu1 %v2291_v13  ;;  %v14739_v13 = vld [vmem:[%s15727_s30 + $0x598] sm:$0xff]  ;;  %v14730_v20 = vld [vmem:[%s15727_s30 + $0x550] sm:$0xff] }
  0x9b   : > { %8927 = vmatpush.bf16.msra.mxu1 %v14703_v21  ;;  %8896 = vmatmul.bf16.vlgmr.msrb.gmra.mxu2 %v2292_v12  ;;  %v14731_v12 = vld [vmem:[%s15727_s30 + $0x558] sm:$0xff] }
  0x9c   : > { %8940 = vmatpush.bf16.msra.mxu2 %v14711_v22  ;;  %8909 = vmatmul.bf16.vlgmr.msrb.gmra.mxu3 %v2293_v14  ;;  %v14747_v14 = vld [vmem:[%s15727_s30 + $0x5d8] sm:$0xff] }
  0x9d   : > { %8953 = vmatpush.bf16.msra.mxu3 %v14719_v23  ;;  %v14738_v23 = vld [vmem:[%s15727_s30 + $0x590] sm:$0xff] }
  0x9e   : > { %8915 = vmatpush.bf16.msra.mxu0 %v14694_v24  ;;  %v14746_v24 = vld [vmem:[%s15727_s30 + $0x5d0] sm:$0xff] }
  0x9f   : > { %8928 = vmatpush.bf16.msra.mxu1 %v14702_v25  ;;  %v14721_v25 = vld [vmem:[%s15727_s30 + $0x508] sm:$0xff] }
  0xa0   : > { %8941 = vmatpush.bf16.msra.mxu2 %v14710_v26  ;;  %v14729_v26 = vld [vmem:[%s15727_s30 + $0x548] sm:$0xff] }
  0xa1   : > { %8954 = vmatpush.bf16.msra.mxu3 %v14718_v27  ;;  %v14737_v27 = vld [vmem:[%s15727_s30 + $0x588] sm:$0xff] }
  0xa2   : > { %8916 = vmatpush.bf16.msra.mxu0 %v14693_v28  ;;  %v14745_v28 = vld [vmem:[%s15727_s30 + $0x5c8] sm:$0xff] }
  0xa3   : > { %8929 = vmatpush.bf16.msra.mxu1 %v14701_v29  ;;  %v2300_v29 = vld [vmem:[#allocation1 + $0x24] sm:$0xff] }
  0xa4   : > { %8942 = vmatpush.bf16.msra.mxu2 %v14709_v30  ;;  %v2302_v30 = vld [vmem:[#allocation1 + $0x36] sm:$0xff] }
  0xa5   : > { %8955 = vmatpush.bf16.msra.mxu3 %v14717_v31 }
  0xa6   : > { %8917 = vmatpush.bf16.msra.mxu0 %v14692_v32  ;;  %v2301_v32 = vld [vmem:[#allocation1 + $0x2d] sm:$0xff] }
  0xa7   : > { %8930 = vmatpush.bf16.msra.mxu1 %v14700_v33  ;;  %v2303_v33 = vld [vmem:[#allocation1 + $0x3f] sm:$0xff] }
  0xa8   : > { %8943 = vmatpush.bf16.msra.mxu2 %v14708_v34 }
  0xa9   : > { %8956 = vmatpush.bf16.msra.mxu3 %v14716_v35  ;;  %v213_v35 = vld [vmem:[%s15717_s22 + $0x18] sm:$0xff] }
  0xaa   : > { %8918 = vmatpush.bf16.msra.mxu0 %v14691_v36  ;;  %2305 = vst [vmem:[#allocation1] ss:$9 sm:$0xff] %v213_v35  ;;  %v14720_v36 = vld [vmem:[%s15727_s30 + $0x500] sm:$0xff]  ;;  %v14813_v35 = vld [vmem:[%s15727_s30 + $0x7e8] sm:$0xff] }
  0xab   : > { %8931 = vmatpush.bf16.msra.mxu1 %v14699_v37  ;;  %v14728_v37 = vld [vmem:[%s15727_s30 + $0x540] sm:$0xff] }
  0xac   : > { %8944 = vmatpush.bf16.msra.mxu2 %v14707_v38  ;;  %v14736_v38 = vld [vmem:[%s15727_s30 + $0x580] sm:$0xff] }
  0xad   : > { %8957 = vmatpush.bf16.msra.mxu3 %v14715_v39  ;;  %v14744_v39 = vld [vmem:[%s15727_s30 + $0x5c0] sm:$0xff] }
  0xae   : > { %8919 = vmatpush.bf16.msra.mxu0 %v14690_v40  ;;  %v14759_v40 = vld [vmem:[%s15727_s30 + $0x638] sm:$0xff] }
  0xaf   : > { %8932 = vmatpush.bf16.msra.mxu1 %v14698_v41  ;;  %v14767_v41 = vld [vmem:[%s15727_s30 + $0x678] sm:$0xff] }
  0xb0   : > { %8945 = vmatpush.bf16.msra.mxu2 %v14706_v42  ;;  %v14775_v42 = vld [vmem:[%s15727_s30 + $0x6b8] sm:$0xff] }
  0xb1   : > { %8958 = vmatpush.bf16.msra.mxu3 %v14714_v43  ;;  %v14783_v43 = vld [vmem:[%s15727_s30 + $0x6f8] sm:$0xff] }
  0xb2   : > { %8920 = vmatpush.bf16.msra.mxu0 %v14689_v44  ;;  %v14758_v44 = vld [vmem:[%s15727_s30 + $0x630] sm:$0xff] }
  0xb3   : > { %8933 = vmatpush.bf16.msra.mxu1 %v14697_v45  ;;  %v14766_v45 = vld [vmem:[%s15727_s30 + $0x670] sm:$0xff] }
  0xb4   : > { %8946 = vmatpush.bf16.msra.mxu2 %v14705_v46  ;;  %v14774_v46 = vld [vmem:[%s15727_s30 + $0x6b0] sm:$0xff] }
  0xb5   : > { %8959 = vmatpush.bf16.msra.mxu3 %v14713_v47  ;;  %v14782_v47 = vld [vmem:[%s15727_s30 + $0x6f0] sm:$0xff] }
  0xb6   : > { %8921 = vmatpush.bf16.msra.mxu0 %v14688_v48  ;;  %v8715_v4 = vpop.f32.mrf.mxu0  ;;  %v14757_v48 = vld [vmem:[%s15727_s30 + $0x628] sm:$0xff] }
  0xb7   : > { %8934 = vmatpush.bf16.msra.mxu1 %v14696_v49  ;;  %v8728_v7 = vpop.f32.mrf.mxu1  ;;  %v14765_v49 = vld [vmem:[%s15727_s30 + $0x668] sm:$0xff] }
  0xb8   : > { %8947 = vmatpush.bf16.msra.mxu2 %v14704_v50  ;;  %v8729_v10 = vadd.f32 %v8728_v7, %v8715_v4  ;;  %v14773_v50 = vld [vmem:[%s15727_s30 + $0x6a8] sm:$0xff]  ;;  %v14754_v4 = vld [vmem:[%s15727_s30 + $0x610] sm:$0xff] }
  0xb9   : > { %8960 = vmatpush.bf16.msra.mxu3 %v14712_v51  ;;  %8922 = vmatmul.bf16.vlgmr.msra.gmra.mxu0 %v2296_v56  ;;  %v14781_v51 = vld [vmem:[%s15727_s30 + $0x6e8] sm:$0xff] }
  0xba   : > { %8966 = vmatpush.bf16.msrb.mxu0 %v14727_v52  ;;  %8935 = vmatmul.bf16.vlgmr.msra.gmra.mxu1 %v2297_v58  ;;  %v14780_v58 = vld [vmem:[%s15727_s30 + $0x6e0] sm:$0xff] }
  0xbb   : > { %8979 = vmatpush.bf16.msrb.mxu1 %v14735_v53  ;;  %8948 = vmatmul.bf16.vlgmr.msra.gmra.mxu2 %v2298_v57  ;;  %v14756_v53 = vld [vmem:[%s15727_s30 + $0x620] sm:$0xff] }
  0xbc   : > { %8992 = vmatpush.bf16.msrb.mxu2 %v14743_v54  ;;  %8961 = vmatmul.bf16.vlgmr.msra.gmra.mxu3 %v2299_v59  ;;  %v14764_v54 = vld [vmem:[%s15727_s30 + $0x660] sm:$0xff] }
  0xbd   : > { %9005 = vmatpush.bf16.msrb.mxu3 %v14751_v55  ;;  %v14772_v57 = vld [vmem:[%s15727_s30 + $0x6a0] sm:$0xff] }
  0xbe   : > { %8967 = vmatpush.bf16.msrb.mxu0 %v14726_v60  ;;  %v8741_v15 = vpop.f32.mrf.mxu2  ;;  %v8717_v18 = vpop.f32.mrf.mxu0  ;;  %v14755_v60 = vld [vmem:[%s15727_s30 + $0x618] sm:$0xff] }
  0xbf   : > { %8980 = vmatpush.bf16.msrb.mxu1 %v14734_v61  ;;  %v8742_v16 = vadd.f32 %v8741_v15, %v8729_v10  ;;  %v8754_v17 = vpop.f32.mrf.mxu3  ;;  %v8730_v22 = vpop.f32.mrf.mxu1  ;;  %v14763_v61 = vld [vmem:[%s15727_s30 + $0x658] sm:$0xff]  ;;  %v14753_v10 = vld [vmem:[%s15727_s30 + $0x608] sm:$0xff]  ;;  %v14768_v18 = vld [vmem:[%s15727_s30 + $0x680] sm:$0xff] }
  0xc0   : > { %8993 = vmatpush.bf16.msrb.mxu2 %v14742_v62  ;;  %v14771_v62 = vld [vmem:[%s15727_s30 + $0x698] sm:$0xff] }
  0xc1   : > { %9006 = vmatpush.bf16.msrb.mxu3 %v14750_v63  ;;  %v15916_v21 = vadd.f32 %v8754_v17, %v8742_v16  ;;  %v14779_v63 = vld [vmem:[%s15727_s30 + $0x6d8] sm:$0xff]  ;;  %v14752_v16 = vld [vmem:[%s15727_s30 + $0x600] sm:$0xff] }
  0xc2   : > { %8968 = vmatpush.bf16.msrb.mxu0 %v14725_v0  ;;  %v14760_v17 = vld [vmem:[%s15727_s30 + $0x640] sm:$0xff]  ;;  %v14807_v22 = vld [vmem:[%s15727_s30 + $0x7b8] sm:$0xff] }
  0xc3   : > { %8981 = vmatpush.bf16.msrb.mxu1 %v14733_v1 }
  0xc4   : > { %8994 = vmatpush.bf16.msrb.mxu2 %v14741_v2 }
  0xc5   : > { %9007 = vmatpush.bf16.msrb.mxu3 %v14749_v3 }
  0xc6   : > { %8969 = vmatpush.bf16.msrb.mxu0 %v14724_v5  ;;  %v8743_v31 = vpop.f32.mrf.mxu2  ;;  %v14762_v5 = vld [vmem:[%s15727_s30 + $0x650] sm:$0xff] }
  0xc7   : > { %8982 = vmatpush.bf16.msrb.mxu1 %v14732_v6  ;;  %v8756_v34 = vpop.f32.mrf.mxu3  ;;  %v14814_v31 = vld [vmem:[%s15727_s30 + $0x7f0] sm:$0xff] }
  0xc8   : > { %8995 = vmatpush.bf16.msrb.mxu2 %v14740_v8  ;;  %v14770_v8 = vld [vmem:[%s15727_s30 + $0x690] sm:$0xff]  ;;  %v14805_v34 = vld [vmem:[%s15727_s30 + $0x7a8] sm:$0xff] }
  0xc9   : > { %9008 = vmatpush.bf16.msrb.mxu3 %v14748_v9  ;;  %v14778_v9 = vld [vmem:[%s15727_s30 + $0x6d0] sm:$0xff] }
  0xca   : > { %8970 = vmatpush.bf16.msrb.mxu0 %v14723_v11  ;;  %v14761_v11 = vld [vmem:[%s15727_s30 + $0x648] sm:$0xff] }
  0xcb   : > { %8983 = vmatpush.bf16.msrb.mxu1 %v14731_v12  ;;  %v14769_v12 = vld [vmem:[%s15727_s30 + $0x688] sm:$0xff] }
  0xcc   : > { %8996 = vmatpush.bf16.msrb.mxu2 %v14739_v13  ;;  %v14777_v13 = vld [vmem:[%s15727_s30 + $0x6c8] sm:$0xff] }
  0xcd   : > { %9009 = vmatpush.bf16.msrb.mxu3 %v14747_v14 }
  0xce   : > { %8971 = vmatpush.bf16.msrb.mxu0 %v14722_v19  ;;  %v14776_v19 = vld [vmem:[%s15727_s30 + $0x6c0] sm:$0xff] }
  0xcf   : > { %8984 = vmatpush.bf16.msrb.mxu1 %v14730_v20  ;;  %v14791_v20 = vld [vmem:[%s15727_s30 + $0x738] sm:$0xff] }
  0xd0   : > { %8997 = vmatpush.bf16.msrb.mxu2 %v14738_v23  ;;  %v14815_v23 = vld [vmem:[%s15727_s30 + $0x7f8] sm:$0xff] }
  0xd1   : > { %9010 = vmatpush.bf16.msrb.mxu3 %v14746_v24  ;;  %v2306_v24 = vld [vmem:[#allocation1] sm:$0xff] }
  0xd2   : > { %8972 = vmatpush.bf16.msrb.mxu0 %v14721_v25  ;;  %v2308_v25 = vld [vmem:[#allocation1 + $0x12] sm:$0xff] }
  0xd3   : > { %8985 = vmatpush.bf16.msrb.mxu1 %v14729_v26  ;;  %v2307_v26 = vld [vmem:[#allocation1 + $0x9] sm:$0xff] }
  0xd4   : > { %8998 = vmatpush.bf16.msrb.mxu2 %v14737_v27  ;;  %v2309_v27 = vld [vmem:[#allocation1 + $0x1b] sm:$0xff] }
  0xd5   : > { %9011 = vmatpush.bf16.msrb.mxu3 %v14745_v28  ;;  %v14790_v28 = vld [vmem:[%s15727_s30 + $0x730] sm:$0xff] }
  0xd6   : > { %8973 = vmatpush.bf16.msrb.mxu0 %v14720_v36  ;;  %v8767_v52 = vpop.f32.mrf.mxu0 }
  0xd7   : > { %8986 = vmatpush.bf16.msrb.mxu1 %v14728_v37  ;;  %v8768_v55 = vadd.f32 %v8767_v52, %v15916_v21  ;;  %v8780_v56 = vpop.f32.mrf.mxu1  ;;  %v14799_v21 = vld [vmem:[%s15727_s30 + $0x778] sm:$0xff] }
  0xd8   : > { %8999 = vmatpush.bf16.msrb.mxu2 %v14736_v38  ;;  %v14788_v38 = vld [vmem:[%s15727_s30 + $0x720] sm:$0xff] }
  0xd9   : > { %9012 = vmatpush.bf16.msrb.mxu3 %v14744_v39  ;;  %8974 = vmatmul.bf16.vlgmr.msrb.gmra.mxu0 %v2300_v29  ;;  %v8781_v59 = vadd.f32 %v8780_v56, %v8768_v55  ;;  %v14798_v29 = vld [vmem:[%s15727_s30 + $0x770] sm:$0xff]  ;;  %v14796_v39 = vld [vmem:[%s15727_s30 + $0x760] sm:$0xff] }
  0xda   : > { %9018 = vmatpush.bf16.msra.mxu0 %v14759_v40  ;;  %8987 = vmatmul.bf16.vlgmr.msrb.gmra.mxu1 %v2301_v32  ;;  %v14789_v32 = vld [vmem:[%s15727_s30 + $0x728] sm:$0xff]  ;;  %v14802_v56 = vld [vmem:[%s15727_s30 + $0x790] sm:$0xff] }
  0xdb   : > { %9031 = vmatpush.bf16.msra.mxu1 %v14767_v41  ;;  %9000 = vmatmul.bf16.vlgmr.msrb.gmra.mxu2 %v2302_v30  ;;  %v14806_v30 = vld [vmem:[%s15727_s30 + $0x7b0] sm:$0xff]  ;;  %v14804_v41 = vld [vmem:[%s15727_s30 + $0x7a0] sm:$0xff] }
  0xdc   : > { %9044 = vmatpush.bf16.msra.mxu2 %v14775_v42  ;;  %9013 = vmatmul.bf16.vlgmr.msrb.gmra.mxu3 %v2303_v33  ;;  %v14797_v33 = vld [vmem:[%s15727_s30 + $0x768] sm:$0xff]  ;;  %v14812_v42 = vld [vmem:[%s15727_s30 + $0x7e0] sm:$0xff] }
  0xdd   : > { %9057 = vmatpush.bf16.msra.mxu3 %v14783_v43 }
  0xde   : > { %9019 = vmatpush.bf16.msra.mxu0 %v14758_v44  ;;  %v8793_v0 = vpop.f32.mrf.mxu2  ;;  %v8769_v3 = vpop.f32.mrf.mxu0  ;;  %v14787_v44 = vld [vmem:[%s15727_s30 + $0x718] sm:$0xff] }
  0xdf   : > { %9032 = vmatpush.bf16.msra.mxu1 %v14766_v45  ;;  %v8794_v1 = vadd.f32 %v8793_v0, %v8781_v59  ;;  %v8806_v2 = vpop.f32.mrf.mxu3  ;;  %v8782_v7 = vpop.f32.mrf.mxu1  ;;  %v14795_v45 = vld [vmem:[%s15727_s30 + $0x758] sm:$0xff]  ;;  %v14793_v59 = vld [vmem:[%s15727_s30 + $0x748] sm:$0xff] }
  0xe0   : > { %9045 = vmatpush.bf16.msra.mxu2 %v14774_v46  ;;  %v14803_v46 = vld [vmem:[%s15727_s30 + $0x798] sm:$0xff]  ;;  %v14800_v7 = vld [vmem:[%s15727_s30 + $0x780] sm:$0xff] }
  0xe1   : > { %9058 = vmatpush.bf16.msra.mxu3 %v14782_v47  ;;  %v8807_v6 = vadd.f32 %v8806_v2, %v8794_v1  ;;  %v14811_v47 = vld [vmem:[%s15727_s30 + $0x7d8] sm:$0xff]  ;;  %v2311_v1 = vld [vmem:[#allocation1 + $0x2d] sm:$0xff] }
  0xe2   : > { %9020 = vmatpush.bf16.msra.mxu0 %v14757_v48  ;;  %v2313_v2 = vld [vmem:[#allocation1 + $0x3f] sm:$0xff] }
  0xe3   : > { %9033 = vmatpush.bf16.msra.mxu1 %v14765_v49 }
  0xe4   : > { %9046 = vmatpush.bf16.msra.mxu2 %v14773_v50 }
  0xe5   : > { %9059 = vmatpush.bf16.msra.mxu3 %v14781_v51 }
  0xe6   : > { %9021 = vmatpush.bf16.msra.mxu0 %v14756_v53  ;;  %v8795_v14 = vpop.f32.mrf.mxu2  ;;  %v14786_v53 = vld [vmem:[%s15727_s30 + $0x710] sm:$0xff] }
  0xe7   : > { %9034 = vmatpush.bf16.msra.mxu1 %v14764_v54  ;;  %v8808_v15 = vpop.f32.mrf.mxu3  ;;  %v14794_v54 = vld [vmem:[%s15727_s30 + $0x750] sm:$0xff] }
  0xe8   : > { %9047 = vmatpush.bf16.msra.mxu2 %v14772_v57  ;;  %v14810_v57 = vld [vmem:[%s15727_s30 + $0x7d0] sm:$0xff] }
  0xe9   : > { %9060 = vmatpush.bf16.msra.mxu3 %v14780_v58  ;;  %v14785_v58 = vld [vmem:[%s15727_s30 + $0x708] sm:$0xff]  ;;  %v14830_v14 = vld [vmem:[%s15727_s30 + $0x870] sm:$0xff] }
  0xea   : > { %9022 = vmatpush.bf16.msra.mxu0 %v14755_v60  ;;  %v14801_v60 = vld [vmem:[%s15727_s30 + $0x788] sm:$0xff]  ;;  %v14838_v15 = vld [vmem:[%s15727_s30 + $0x8b0] sm:$0xff] }
  0xeb   : > { %9035 = vmatpush.bf16.msra.mxu1 %v14763_v61  ;;  %v14809_v61 = vld [vmem:[%s15727_s30 + $0x7c8] sm:$0xff] }
  0xec   : > { %9048 = vmatpush.bf16.msra.mxu2 %v14771_v62  ;;  %v2310_v62 = vld [vmem:[#allocation1 + $0x24] sm:$0xff] }
  0xed   : > { %9061 = vmatpush.bf16.msra.mxu3 %v14779_v63  ;;  %v2312_v63 = vld [vmem:[#allocation1 + $0x36] sm:$0xff] }
  0xee   : > { %9023 = vmatpush.bf16.msra.mxu0 %v14754_v4  ;;  %v214_v4 = vld [vmem:[%s15717_s22 + $0x20] sm:$0xff] }
  0xef   : > { %9036 = vmatpush.bf16.msra.mxu1 %v14762_v5  ;;  %2315 = vst [vmem:[#allocation1] ss:$9 sm:$0xff] %v214_v4  ;;  %v14784_v5 = vld [vmem:[%s15727_s30 + $0x700] sm:$0xff]  ;;  %v14877_v4 = vld [vmem:[%s15727_s30 + $0x9e8] sm:$0xff] }
  0xf0   : > { %9049 = vmatpush.bf16.msra.mxu2 %v14770_v8  ;;  %v14808_v8 = vld [vmem:[%s15727_s30 + $0x7c0] sm:$0xff] }
  0xf1   : > { %9062 = vmatpush.bf16.msra.mxu3 %v14778_v9  ;;  %v14823_v9 = vld [vmem:[%s15727_s30 + $0x838] sm:$0xff] }
  0xf2   : > { %9024 = vmatpush.bf16.msra.mxu0 %v14753_v10  ;;  %v14831_v10 = vld [vmem:[%s15727_s30 + $0x878] sm:$0xff] }
  0xf3   : > { %9037 = vmatpush.bf16.msra.mxu1 %v14761_v11  ;;  %v14839_v11 = vld [vmem:[%s15727_s30 + $0x8b8] sm:$0xff] }
  0xf4   : > { %9050 = vmatpush.bf16.msra.mxu2 %v14769_v12  ;;  %v14847_v12 = vld [vmem:[%s15727_s30 + $0x8f8] sm:$0xff] }
  0xf5   : > { %9063 = vmatpush.bf16.msra.mxu3 %v14777_v13  ;;  %v14822_v13 = vld [vmem:[%s15727_s30 + $0x830] sm:$0xff] }
  0xf6   : > { %9025 = vmatpush.bf16.msra.mxu0 %v14752_v16  ;;  %v8819_v36 = vpop.f32.mrf.mxu0  ;;  %v14846_v16 = vld [vmem:[%s15727_s30 + $0x8f0] sm:$0xff] }
  0xf7   : > { %9038 = vmatpush.bf16.msra.mxu1 %v14760_v17  ;;  %v8820_v37 = vadd.f32 %v8819_v36, %v8807_v6  ;;  %v8832_v40 = vpop.f32.mrf.mxu1  ;;  %v14792_v6 = vld [vmem:[%s15727_s30 + $0x740] sm:$0xff]  ;;  %v14821_v17 = vld [vmem:[%s15727_s30 + $0x828] sm:$0xff] }
  0xf8   : > { %9051 = vmatpush.bf16.msra.mxu2 %v14768_v18  ;;  %v14829_v18 = vld [vmem:[%s15727_s30 + $0x868] sm:$0xff] }
  0xf9   : > { %9064 = vmatpush.bf16.msra.mxu3 %v14776_v19  ;;  %9026 = vmatmul.bf16.vlgmr.msra.gmra.mxu0 %v2306_v24  ;;  %v8833_v43 = vadd.f32 %v8832_v40, %v8820_v37  ;;  %v14837_v19 = vld [vmem:[%s15727_s30 + $0x8a8] sm:$0xff]  ;;  %v14828_v24 = vld [vmem:[%s15727_s30 + $0x860] sm:$0xff] }
  0xfa   : > { %9070 = vmatpush.bf16.msrb.mxu0 %v14791_v20  ;;  %9039 = vmatmul.bf16.vlgmr.msra.gmra.mxu1 %v2307_v26  ;;  %v14845_v20 = vld [vmem:[%s15727_s30 + $0x8e8] sm:$0xff]  ;;  %v14836_v26 = vld [vmem:[%s15727_s30 + $0x8a0] sm:$0xff] }
  0xfb   : > { %9083 = vmatpush.bf16.msrb.mxu1 %v14799_v21  ;;  %9052 = vmatmul.bf16.vlgmr.msra.gmra.mxu2 %v2308_v25 }
  0xfc   : > { %9096 = vmatpush.bf16.msrb.mxu2 %v14807_v22  ;;  %9065 = vmatmul.bf16.vlgmr.msra.gmra.mxu3 %v2309_v27  ;;  %v14844_v27 = vld [vmem:[%s15727_s30 + $0x8e0] sm:$0xff] }
  0xfd   : > { %9109 = vmatpush.bf16.msrb.mxu3 %v14815_v23  ;;  %v14820_v23 = vld [vmem:[%s15727_s30 + $0x820] sm:$0xff] }
  0xfe   : > { %9071 = vmatpush.bf16.msrb.mxu0 %v14790_v28  ;;  %v8845_v48 = vpop.f32.mrf.mxu2  ;;  %v8821_v51 = vpop.f32.mrf.mxu0 }
  0xff   : > { %9084 = vmatpush.bf16.msrb.mxu1 %v14798_v29  ;;  %v8846_v49 = vadd.f32 %v8845_v48, %v8833_v43  ;;  %v8858_v50 = vpop.f32.mrf.mxu3  ;;  %v8834_v55 = vpop.f32.mrf.mxu1  ;;  %v14819_v29 = vld [vmem:[%s15727_s30 + $0x818] sm:$0xff]  ;;  %v14817_v43 = vld [vmem:[%s15727_s30 + $0x808] sm:$0xff]  ;;  %v14832_v51 = vld [vmem:[%s15727_s30 + $0x880] sm:$0xff] }
 0x100   : > { %9097 = vmatpush.bf16.msrb.mxu2 %v14806_v30  ;;  %v14827_v30 = vld [vmem:[%s15727_s30 + $0x858] sm:$0xff] }
 0x101   : > { %9110 = vmatpush.bf16.msrb.mxu3 %v14814_v31  ;;  %v15982_v52 = vadd.f32 %v8858_v50, %v8846_v49  ;;  %v14835_v31 = vld [vmem:[%s15727_s30 + $0x898] sm:$0xff]  ;;  %v14816_v49 = vld [vmem:[%s15727_s30 + $0x800] sm:$0xff] }
 0x102   : > { %9072 = vmatpush.bf16.msrb.mxu0 %v14789_v32  ;;  %v14843_v32 = vld [vmem:[%s15727_s30 + $0x8d8] sm:$0xff]  ;;  %v14824_v50 = vld [vmem:[%s15727_s30 + $0x840] sm:$0xff] }
 0x103   : > { %9085 = vmatpush.bf16.msrb.mxu1 %v14797_v33  ;;  %v14871_v55 = vld [vmem:[%s15727_s30 + $0x9b8] sm:$0xff] }
 0x104   : > { %9098 = vmatpush.bf16.msrb.mxu2 %v14805_v34 }
 0x105   : > { %9111 = vmatpush.bf16.msrb.mxu3 %v14813_v35 }
 0x106   : > { %9073 = vmatpush.bf16.msrb.mxu0 %v14788_v38  ;;  %v8847_v0 = vpop.f32.mrf.mxu2  ;;  %v14818_v38 = vld [vmem:[%s15727_s30 + $0x810] sm:$0xff] }
 0x107   : > { %9086 = vmatpush.bf16.msrb.mxu1 %v14796_v39  ;;  %v8860_v3 = vpop.f32.mrf.mxu3  ;;  %v14826_v39 = vld [vmem:[%s15727_s30 + $0x850] sm:$0xff] }
 0x108   : > { %9099 = vmatpush.bf16.msrb.mxu2 %v14804_v41  ;;  %v14834_v41 = vld [vmem:[%s15727_s30 + $0x890] sm:$0xff]  ;;  %v14869_v3 = vld [vmem:[%s15727_s30 + $0x9a8] sm:$0xff] }
 0x109   : > { %9112 = vmatpush.bf16.msrb.mxu3 %v14812_v42  ;;  %v14842_v42 = vld [vmem:[%s15727_s30 + $0x8d0] sm:$0xff] }
 0x10a   : > { %9074 = vmatpush.bf16.msrb.mxu0 %v14787_v44  ;;  %v14825_v44 = vld [vmem:[%s15727_s30 + $0x848] sm:$0xff]  ;;  %v14878_v0 = vld [vmem:[%s15727_s30 + $0x9f0] sm:$0xff] }
 0x10b   : > { %9087 = vmatpush.bf16.msrb.mxu1 %v14795_v45  ;;  %v14833_v45 = vld [vmem:[%s15727_s30 + $0x888] sm:$0xff] }
 0x10c   : > { %9100 = vmatpush.bf16.msrb.mxu2 %v14803_v46  ;;  %v14841_v46 = vld [vmem:[%s15727_s30 + $0x8c8] sm:$0xff] }
 0x10d   : > { %9113 = vmatpush.bf16.msrb.mxu3 %v14811_v47 }
 0x10e   : > { %9075 = vmatpush.bf16.msrb.mxu0 %v14786_v53  ;;  %v14855_v53 = vld [vmem:[%s15727_s30 + $0x938] sm:$0xff] }
 0x10f   : > { %9088 = vmatpush.bf16.msrb.mxu1 %v14794_v54  ;;  %v14863_v54 = vld [vmem:[%s15727_s30 + $0x978] sm:$0xff] }
 0x110   : > { %9101 = vmatpush.bf16.msrb.mxu2 %v14802_v56  ;;  %v14879_v56 = vld [vmem:[%s15727_s30 + $0x9f8] sm:$0xff] }
 0x111   : > { %9114 = vmatpush.bf16.msrb.mxu3 %v14810_v57  ;;  %v2316_v57 = vld [vmem:[#allocation1] sm:$0xff] }
 0x112   : > { %9076 = vmatpush.bf16.msrb.mxu0 %v14785_v58  ;;  %v2318_v58 = vld [vmem:[#allocation1 + $0x12] sm:$0xff] }
 0x113   : > { %9089 = vmatpush.bf16.msrb.mxu1 %v14793_v59  ;;  %v2317_v59 = vld [vmem:[#allocation1 + $0x9] sm:$0xff] }
 0x114   : > { %9102 = vmatpush.bf16.msrb.mxu2 %v14801_v60  ;;  %v2319_v60 = vld [vmem:[#allocation1 + $0x1b] sm:$0xff] }
 0x115   : > { %9115 = vmatpush.bf16.msrb.mxu3 %v14809_v61  ;;  %v14854_v61 = vld [vmem:[%s15727_s30 + $0x930] sm:$0xff] }
 0x116   : > { %9077 = vmatpush.bf16.msrb.mxu0 %v14784_v5  ;;  %v8871_v21 = vpop.f32.mrf.mxu0 }
 0x117   : > { %9090 = vmatpush.bf16.msrb.mxu1 %v14792_v6  ;;  %v8872_v22 = vadd.f32 %v8871_v21, %v15982_v52  ;;  %v8884_v25 = vpop.f32.mrf.mxu1  ;;  %v14840_v52 = vld [vmem:[%s15727_s30 + $0x8c0] sm:$0xff] }
 0x118   : > { %9103 = vmatpush.bf16.msrb.mxu2 %v14800_v7  ;;  %v14852_v7 = vld [vmem:[%s15727_s30 + $0x920] sm:$0xff] }
 0x119   : > { %9116 = vmatpush.bf16.msrb.mxu3 %v14808_v8  ;;  %9078 = vmatmul.bf16.vlgmr.msrb.gmra.mxu0 %v2310_v62  ;;  %v8885_v28 = vadd.f32 %v8884_v25, %v8872_v22  ;;  %v14862_v62 = vld [vmem:[%s15727_s30 + $0x970] sm:$0xff]  ;;  %v14860_v8 = vld [vmem:[%s15727_s30 + $0x960] sm:$0xff] }
 0x11a   : > { %9122 = vmatpush.bf16.msra.mxu0 %v14823_v9  ;;  %9091 = vmatmul.bf16.vlgmr.msrb.gmra.mxu1 %v2311_v1  ;;  %v14853_v1 = vld [vmem:[%s15727_s30 + $0x928] sm:$0xff]  ;;  %v14850_v22 = vld [vmem:[%s15727_s30 + $0x910] sm:$0xff] }
 0x11b   : > { %9135 = vmatpush.bf16.msra.mxu1 %v14831_v10  ;;  %9104 = vmatmul.bf16.vlgmr.msrb.gmra.mxu2 %v2312_v63  ;;  %v14870_v63 = vld [vmem:[%s15727_s30 + $0x9b0] sm:$0xff]  ;;  %v14868_v10 = vld [vmem:[%s15727_s30 + $0x9a0] sm:$0xff] }
 0x11c   : > { %9148 = vmatpush.bf16.msra.mxu2 %v14839_v11  ;;  %9117 = vmatmul.bf16.vlgmr.msrb.gmra.mxu3 %v2313_v2  ;;  %v14861_v2 = vld [vmem:[%s15727_s30 + $0x968] sm:$0xff]  ;;  %v14876_v11 = vld [vmem:[%s15727_s30 + $0x9e0] sm:$0xff]  ;;  %v14866_v25 = vld [vmem:[%s15727_s30 + $0x990] sm:$0xff] }
 0x11d   : > { %9161 = vmatpush.bf16.msra.mxu3 %v14847_v12 }
 0x11e   : > { %9123 = vmatpush.bf16.msra.mxu0 %v14822_v13  ;;  %v8897_v33 = vpop.f32.mrf.mxu2  ;;  %v8873_v36 = vpop.f32.mrf.mxu0  ;;  %v14851_v13 = vld [vmem:[%s15727_s30 + $0x918] sm:$0xff] }
 0x11f   : > { %9136 = vmatpush.bf16.msra.mxu1 %v14830_v14  ;;  %v8898_v34 = vadd.f32 %v8897_v33, %v8885_v28  ;;  %v8910_v35 = vpop.f32.mrf.mxu3  ;;  %v8886_v40 = vpop.f32.mrf.mxu1  ;;  %v14859_v14 = vld [vmem:[%s15727_s30 + $0x958] sm:$0xff]  ;;  %v14857_v28 = vld [vmem:[%s15727_s30 + $0x948] sm:$0xff] }
 0x120   : > { %9149 = vmatpush.bf16.msra.mxu2 %v14838_v15  ;;  %v14867_v15 = vld [vmem:[%s15727_s30 + $0x998] sm:$0xff]  ;;  %v14864_v40 = vld [vmem:[%s15727_s30 + $0x980] sm:$0xff] }
 0x121   : > { %9162 = vmatpush.bf16.msra.mxu3 %v14846_v16  ;;  %v8911_v37 = vadd.f32 %v8910_v35, %v8898_v34  ;;  %v14875_v16 = vld [vmem:[%s15727_s30 + $0x9d8] sm:$0xff]  ;;  %v2321_v34 = vld [vmem:[#allocation1 + $0x2d] sm:$0xff] }
 0x122   : > { %9124 = vmatpush.bf16.msra.mxu0 %v14821_v17  ;;  %v2323_v35 = vld [vmem:[#allocation1 + $0x3f] sm:$0xff] }
 0x123   : > { %9137 = vmatpush.bf16.msra.mxu1 %v14829_v18 }
 0x124   : > { %9150 = vmatpush.bf16.msra.mxu2 %v14837_v19 }
 0x125   : > { %9163 = vmatpush.bf16.msra.mxu3 %v14845_v20 }
 0x126   : > { %9125 = vmatpush.bf16.msra.mxu0 %v14820_v23  ;;  %v8899_v47 = vpop.f32.mrf.mxu2  ;;  %v14858_v23 = vld [vmem:[%s15727_s30 + $0x950] sm:$0xff] }
 0x127   : > { %9138 = vmatpush.bf16.msra.mxu1 %v14828_v24  ;;  %v8912_v48 = vpop.f32.mrf.mxu3  ;;  %v14894_v47 = vld [vmem:[%s15727_s30 + $0xa70] sm:$0xff] }
 0x128   : > { %9151 = vmatpush.bf16.msra.mxu2 %v14836_v26  ;;  %v14874_v26 = vld [vmem:[%s15727_s30 + $0x9d0] sm:$0xff] }
 0x129   : > { %9164 = vmatpush.bf16.msra.mxu3 %v14844_v27  ;;  %v14849_v27 = vld [vmem:[%s15727_s30 + $0x908] sm:$0xff]  ;;  %v14902_v48 = vld [vmem:[%s15727_s30 + $0xab0] sm:$0xff] }
 0x12a   : > { %9126 = vmatpush.bf16.msra.mxu0 %v14819_v29  ;;  %v14865_v29 = vld [vmem:[%s15727_s30 + $0x988] sm:$0xff] }
 0x12b   : > { %9139 = vmatpush.bf16.msra.mxu1 %v14827_v30  ;;  %v14873_v30 = vld [vmem:[%s15727_s30 + $0x9c8] sm:$0xff] }
 0x12c   : > { %9152 = vmatpush.bf16.msra.mxu2 %v14835_v31  ;;  %v2320_v31 = vld [vmem:[#allocation1 + $0x24] sm:$0xff] }
 0x12d   : > { %9165 = vmatpush.bf16.msra.mxu3 %v14843_v32  ;;  %v2322_v32 = vld [vmem:[#allocation1 + $0x36] sm:$0xff] }
 0x12e   : > { %9127 = vmatpush.bf16.msra.mxu0 %v14818_v38  ;;  %v14848_v38 = vld [vmem:[%s15727_s30 + $0x900] sm:$0xff] }
 0x12f   : > { %9140 = vmatpush.bf16.msra.mxu1 %v14826_v39  ;;  %v14856_v39 = vld [vmem:[%s15727_s30 + $0x940] sm:$0xff] }
 0x130   : > { %9153 = vmatpush.bf16.msra.mxu2 %v14834_v41  ;;  %v14872_v41 = vld [vmem:[%s15727_s30 + $0x9c0] sm:$0xff] }
 0x131   : > { %9166 = vmatpush.bf16.msra.mxu3 %v14842_v42  ;;  %v14887_v42 = vld [vmem:[%s15727_s30 + $0xa38] sm:$0xff] }
 0x132   : > { %9128 = vmatpush.bf16.msra.mxu0 %v14817_v43  ;;  %v14895_v43 = vld [vmem:[%s15727_s30 + $0xa78] sm:$0xff] }
 0x133   : > { %9141 = vmatpush.bf16.msra.mxu1 %v14825_v44  ;;  %v14903_v44 = vld [vmem:[%s15727_s30 + $0xab8] sm:$0xff] }
 0x134   : > { %9154 = vmatpush.bf16.msra.mxu2 %v14833_v45  ;;  %v14911_v45 = vld [vmem:[%s15727_s30 + $0xaf8] sm:$0xff] }
 0x135   : > { %9167 = vmatpush.bf16.msra.mxu3 %v14841_v46  ;;  %v14886_v46 = vld [vmem:[%s15727_s30 + $0xa30] sm:$0xff] }
 0x136   : > { %9129 = vmatpush.bf16.msra.mxu0 %v14816_v49  ;;  %v8923_v5 = vpop.f32.mrf.mxu0  ;;  %v14910_v49 = vld [vmem:[%s15727_s30 + $0xaf0] sm:$0xff] }
 0x137   : > { %9142 = vmatpush.bf16.msra.mxu1 %v14824_v50  ;;  %v8924_v6 = vadd.f32 %v8923_v5, %v8911_v37  ;;  %v8936_v9 = vpop.f32.mrf.mxu1  ;;  %v215_v37 = vld [vmem:[%s15717_s22 + $0x28] sm:$0xff] }
 0x138   : > { %9155 = vmatpush.bf16.msra.mxu2 %v14832_v51  ;;  %2325 = vst [vmem:[#allocation1] ss:$9 sm:$0xff] %v215_v37  ;;  %v14885_v50 = vld [vmem:[%s15727_s30 + $0xa28] sm:$0xff] }
 0x139   : > { %9168 = vmatpush.bf16.msra.mxu3 %v14840_v52  ;;  %9130 = vmatmul.bf16.vlgmr.msra.gmra.mxu0 %v2316_v57  ;;  %v8937_v12 = vadd.f32 %v8936_v9, %v8924_v6  ;;  %v14893_v51 = vld [vmem:[%s15727_s30 + $0xa68] sm:$0xff]  ;;  %v14892_v57 = vld [vmem:[%s15727_s30 + $0xa60] sm:$0xff] }
 0x13a   : > { %9174 = vmatpush.bf16.msrb.mxu0 %v14855_v53  ;;  %9143 = vmatmul.bf16.vlgmr.msra.gmra.mxu1 %v2317_v59  ;;  %v14901_v52 = vld [vmem:[%s15727_s30 + $0xaa8] sm:$0xff]  ;;  %v14900_v59 = vld [vmem:[%s15727_s30 + $0xaa0] sm:$0xff] }
 0x13b   : > { %9187 = vmatpush.bf16.msrb.mxu1 %v14863_v54  ;;  %9156 = vmatmul.bf16.vlgmr.msra.gmra.mxu2 %v2318_v58  ;;  %v14909_v53 = vld [vmem:[%s15727_s30 + $0xae8] sm:$0xff] }
 0x13c   : > { %9200 = vmatpush.bf16.msrb.mxu2 %v14871_v55  ;;  %9169 = vmatmul.bf16.vlgmr.msra.gmra.mxu3 %v2319_v60  ;;  %v14908_v60 = vld [vmem:[%s15727_s30 + $0xae0] sm:$0xff]  ;;  %v14941_v37 = vld [vmem:[%s15727_s30 + $0xbe8] sm:$0xff] }
 0x13d   : > { %9213 = vmatpush.bf16.msrb.mxu3 %v14879_v56  ;;  %v14884_v56 = vld [vmem:[%s15727_s30 + $0xa20] sm:$0xff] }
 0x13e   : > { %9175 = vmatpush.bf16.msrb.mxu0 %v14854_v61  ;;  %v8949_v17 = vpop.f32.mrf.mxu2  ;;  %v8925_v20 = vpop.f32.mrf.mxu0 }
 0x13f   : > { %9188 = vmatpush.bf16.msrb.mxu1 %v14862_v62  ;;  %v8950_v18 = vadd.f32 %v8949_v17, %v8937_v12  ;;  %v8962_v19 = vpop.f32.mrf.mxu3  ;;  %v8938_v24 = vpop.f32.mrf.mxu1  ;;  %v14883_v62 = vld [vmem:[%s15727_s30 + $0xa18] sm:$0xff]  ;;  %v14881_v12 = vld [vmem:[%s15727_s30 + $0xa08] sm:$0xff]  ;;  %v14896_v20 = vld [vmem:[%s15727_s30 + $0xa80] sm:$0xff] }
 0x140   : > { %9201 = vmatpush.bf16.msrb.mxu2 %v14870_v63  ;;  %v14891_v63 = vld [vmem:[%s15727_s30 + $0xa58] sm:$0xff] }
 0x141   : > { %9214 = vmatpush.bf16.msrb.mxu3 %v14878_v0  ;;  %v16050_v21 = vadd.f32 %v8962_v19, %v8950_v18  ;;  %v14899_v0 = vld [vmem:[%s15727_s30 + $0xa98] sm:$0xff]  ;;  %v14880_v18 = vld [vmem:[%s15727_s30 + $0xa00] sm:$0xff] }
 0x142   : > { %9176 = vmatpush.bf16.msrb.mxu0 %v14853_v1  ;;  %v14907_v1 = vld [vmem:[%s15727_s30 + $0xad8] sm:$0xff]  ;;  %v14888_v19 = vld [vmem:[%s15727_s30 + $0xa40] sm:$0xff] }
 0x143   : > { %9189 = vmatpush.bf16.msrb.mxu1 %v14861_v2  ;;  %v14935_v24 = vld [vmem:[%s15727_s30 + $0xbb8] sm:$0xff] }
 0x144   : > { %9202 = vmatpush.bf16.msrb.mxu2 %v14869_v3 }
 0x145   : > { %9215 = vmatpush.bf16.msrb.mxu3 %v14877_v4 }
 0x146   : > { %9177 = vmatpush.bf16.msrb.mxu0 %v14852_v7  ;;  %v8951_v33 = vpop.f32.mrf.mxu2  ;;  %v14882_v7 = vld [vmem:[%s15727_s30 + $0xa10] sm:$0xff] }
 0x147   : > { %9190 = vmatpush.bf16.msrb.mxu1 %v14860_v8  ;;  %v8964_v36 = vpop.f32.mrf.mxu3  ;;  %v14890_v8 = vld [vmem:[%s15727_s30 + $0xa50] sm:$0xff] }
 0x148   : > { %9203 = vmatpush.bf16.msrb.mxu2 %v14868_v10  ;;  %v14898_v10 = vld [vmem:[%s15727_s30 + $0xa90] sm:$0xff]  ;;  %v14933_v36 = vld [vmem:[%s15727_s30 + $0xba8] sm:$0xff] }
 0x149   : > { %9216 = vmatpush.bf16.msrb.mxu3 %v14876_v11  ;;  %v14906_v11 = vld [vmem:[%s15727_s30 + $0xad0] sm:$0xff] }
 0x14a   : > { %9178 = vmatpush.bf16.msrb.mxu0 %v14851_v13  ;;  %v14889_v13 = vld [vmem:[%s15727_s30 + $0xa48] sm:$0xff]  ;;  %v14942_v33 = vld [vmem:[%s15727_s30 + $0xbf0] sm:$0xff] }
 0x14b   : > { %9191 = vmatpush.bf16.msrb.mxu1 %v14859_v14  ;;  %v14897_v14 = vld [vmem:[%s15727_s30 + $0xa88] sm:$0xff] }
 0x14c   : > { %9204 = vmatpush.bf16.msrb.mxu2 %v14867_v15  ;;  %v14905_v15 = vld [vmem:[%s15727_s30 + $0xac8] sm:$0xff] }
 0x14d   : > { %9217 = vmatpush.bf16.msrb.mxu3 %v14875_v16 }
 0x14e   : > { %9179 = vmatpush.bf16.msrb.mxu0 %v14850_v22  ;;  %v14919_v22 = vld [vmem:[%s15727_s30 + $0xb38] sm:$0xff] }
 0x14f   : > { %9192 = vmatpush.bf16.msrb.mxu1 %v14858_v23  ;;  %v14927_v23 = vld [vmem:[%s15727_s30 + $0xb78] sm:$0xff] }
 0x150   : > { %9205 = vmatpush.bf16.msrb.mxu2 %v14866_v25  ;;  %v14943_v25 = vld [vmem:[%s15727_s30 + $0xbf8] sm:$0xff] }
 0x151   : > { %9218 = vmatpush.bf16.msrb.mxu3 %v14874_v26  ;;  %v2326_v26 = vld [vmem:[#allocation1] sm:$0xff] }
 0x152   : > { %9180 = vmatpush.bf16.msrb.mxu0 %v14849_v27  ;;  %v2328_v27 = vld [vmem:[#allocation1 + $0x12] sm:$0xff] }
 0x153   : > { %9193 = vmatpush.bf16.msrb.mxu1 %v14857_v28  ;;  %v2327_v28 = vld [vmem:[#allocation1 + $0x9] sm:$0xff] }
 0x154   : > { %9206 = vmatpush.bf16.msrb.mxu2 %v14865_v29  ;;  %v2329_v29 = vld [vmem:[#allocation1 + $0x1b] sm:$0xff] }
 0x155   : > { %9219 = vmatpush.bf16.msrb.mxu3 %v14873_v30  ;;  %v14918_v30 = vld [vmem:[%s15727_s30 + $0xb30] sm:$0xff] }
 0x156   : > { %9181 = vmatpush.bf16.msrb.mxu0 %v14848_v38  ;;  %v8975_v54 = vpop.f32.mrf.mxu0 }
 0x157   : > { %9194 = vmatpush.bf16.msrb.mxu1 %v14856_v39  ;;  %v8976_v55 = vadd.f32 %v8975_v54, %v16050_v21  ;;  %v8988_v58 = vpop.f32.mrf.mxu1  ;;  %v14904_v21 = vld [vmem:[%s15727_s30 + $0xac0] sm:$0xff] }
 0x158   : > { %9207 = vmatpush.bf16.msrb.mxu2 %v14864_v40  ;;  %v14916_v40 = vld [vmem:[%s15727_s30 + $0xb20] sm:$0xff] }
 0x159   : > { %9220 = vmatpush.bf16.msrb.mxu3 %v14872_v41  ;;  %9182 = vmatmul.bf16.vlgmr.msrb.gmra.mxu0 %v2320_v31  ;;  %v8989_v61 = vadd.f32 %v8988_v58, %v8976_v55  ;;  %v14926_v31 = vld [vmem:[%s15727_s30 + $0xb70] sm:$0xff]  ;;  %v14924_v41 = vld [vmem:[%s15727_s30 + $0xb60] sm:$0xff] }
 0x15a   : > { %9226 = vmatpush.bf16.msra.mxu0 %v14887_v42  ;;  %9195 = vmatmul.bf16.vlgmr.msrb.gmra.mxu1 %v2321_v34  ;;  %v14917_v34 = vld [vmem:[%s15727_s30 + $0xb28] sm:$0xff]  ;;  %v14914_v55 = vld [vmem:[%s15727_s30 + $0xb10] sm:$0xff] }
 0x15b   : > { %9239 = vmatpush.bf16.msra.mxu1 %v14895_v43  ;;  %9208 = vmatmul.bf16.vlgmr.msrb.gmra.mxu2 %v2322_v32  ;;  %v14934_v32 = vld [vmem:[%s15727_s30 + $0xbb0] sm:$0xff]  ;;  %v14932_v43 = vld [vmem:[%s15727_s30 + $0xba0] sm:$0xff] }
 0x15c   : > { %9252 = vmatpush.bf16.msra.mxu2 %v14903_v44  ;;  %9221 = vmatmul.bf16.vlgmr.msrb.gmra.mxu3 %v2323_v35  ;;  %v14925_v35 = vld [vmem:[%s15727_s30 + $0xb68] sm:$0xff]  ;;  %v14940_v44 = vld [vmem:[%s15727_s30 + $0xbe0] sm:$0xff]  ;;  %v14930_v58 = vld [vmem:[%s15727_s30 + $0xb90] sm:$0xff] }
 0x15d   : > { %9265 = vmatpush.bf16.msra.mxu3 %v14911_v45 }
 0x15e   : > { %9227 = vmatpush.bf16.msra.mxu0 %v14886_v46  ;;  %v9001_v2 = vpop.f32.mrf.mxu2  ;;  %v8977_v5 = vpop.f32.mrf.mxu0  ;;  %v14915_v46 = vld [vmem:[%s15727_s30 + $0xb18] sm:$0xff] }
 0x15f   : > { %9240 = vmatpush.bf16.msra.mxu1 %v14894_v47  ;;  %v9002_v3 = vadd.f32 %v9001_v2, %v8989_v61  ;;  %v9014_v4 = vpop.f32.mrf.mxu3  ;;  %v8990_v9 = vpop.f32.mrf.mxu1  ;;  %v14923_v47 = vld [vmem:[%s15727_s30 + $0xb58] sm:$0xff]  ;;  %v14921_v61 = vld [vmem:[%s15727_s30 + $0xb48] sm:$0xff] }
 0x160   : > { %9253 = vmatpush.bf16.msra.mxu2 %v14902_v48  ;;  %v14931_v48 = vld [vmem:[%s15727_s30 + $0xb98] sm:$0xff]  ;;  %v14928_v9 = vld [vmem:[%s15727_s30 + $0xb80] sm:$0xff] }
 0x161   : > { %9266 = vmatpush.bf16.msra.mxu3 %v14910_v49  ;;  %v9015_v6 = vadd.f32 %v9014_v4, %v9002_v3  ;;  %v14939_v49 = vld [vmem:[%s15727_s30 + $0xbd8] sm:$0xff]  ;;  %v2331_v3 = vld [vmem:[#allocation1 + $0x2d] sm:$0xff] }
 0x162   : > { %9228 = vmatpush.bf16.msra.mxu0 %v14885_v50  ;;  %v2333_v4 = vld [vmem:[#allocation1 + $0x3f] sm:$0xff] }
 0x163   : > { %9241 = vmatpush.bf16.msra.mxu1 %v14893_v51 }
 0x164   : > { %9254 = vmatpush.bf16.msra.mxu2 %v14901_v52 }
 0x165   : > { %9267 = vmatpush.bf16.msra.mxu3 %v14909_v53 }
 0x166   : > { %9229 = vmatpush.bf16.msra.mxu0 %v14884_v56  ;;  %v9003_v16 = vpop.f32.mrf.mxu2  ;;  %v14922_v56 = vld [vmem:[%s15727_s30 + $0xb50] sm:$0xff] }
 0x167   : > { %9242 = vmatpush.bf16.msra.mxu1 %v14892_v57  ;;  %v9016_v17 = vpop.f32.mrf.mxu3  ;;  %v14958_v16 = vld [vmem:[%s15727_s30 + $0xc70] sm:$0xff] }
 0x168   : > { %9255 = vmatpush.bf16.msra.mxu2 %v14900_v59  ;;  %v14938_v59 = vld [vmem:[%s15727_s30 + $0xbd0] sm:$0xff] }
 0x169   : > { %9268 = vmatpush.bf16.msra.mxu3 %v14908_v60  ;;  %v14913_v60 = vld [vmem:[%s15727_s30 + $0xb08] sm:$0xff]  ;;  %v14966_v17 = vld [vmem:[%s15727_s30 + $0xcb0] sm:$0xff] }
 0x16a   : > { %9230 = vmatpush.bf16.msra.mxu0 %v14883_v62  ;;  %v14929_v62 = vld [vmem:[%s15727_s30 + $0xb88] sm:$0xff] }
 0x16b   : > { %9243 = vmatpush.bf16.msra.mxu1 %v14891_v63  ;;  %v14937_v63 = vld [vmem:[%s15727_s30 + $0xbc8] sm:$0xff] }
 0x16c   : > { %9256 = vmatpush.bf16.msra.mxu2 %v14899_v0  ;;  %v2330_v0 = vld [vmem:[#allocation1 + $0x24] sm:$0xff] }
 0x16d   : > { %9269 = vmatpush.bf16.msra.mxu3 %v14907_v1  ;;  %v2332_v1 = vld [vmem:[#allocation1 + $0x36] sm:$0xff] }
 0x16e   : > { %9231 = vmatpush.bf16.msra.mxu0 %v14882_v7  ;;  %v14912_v7 = vld [vmem:[%s15727_s30 + $0xb00] sm:$0xff] }
 0x16f   : > { %9244 = vmatpush.bf16.msra.mxu1 %v14890_v8  ;;  %v14920_v8 = vld [vmem:[%s15727_s30 + $0xb40] sm:$0xff] }
 0x170   : > { %9257 = vmatpush.bf16.msra.mxu2 %v14898_v10  ;;  %v14936_v10 = vld [vmem:[%s15727_s30 + $0xbc0] sm:$0xff] }
 0x171   : > { %9270 = vmatpush.bf16.msra.mxu3 %v14906_v11  ;;  %v14951_v11 = vld [vmem:[%s15727_s30 + $0xc38] sm:$0xff] }
 0x172   : > { %9232 = vmatpush.bf16.msra.mxu0 %v14881_v12  ;;  %v14959_v12 = vld [vmem:[%s15727_s30 + $0xc78] sm:$0xff] }
 0x173   : > { %9245 = vmatpush.bf16.msra.mxu1 %v14889_v13  ;;  %v14967_v13 = vld [vmem:[%s15727_s30 + $0xcb8] sm:$0xff] }
 0x174   : > { %9258 = vmatpush.bf16.msra.mxu2 %v14897_v14  ;;  %v14975_v14 = vld [vmem:[%s15727_s30 + $0xcf8] sm:$0xff] }
 0x175   : > { %9271 = vmatpush.bf16.msra.mxu3 %v14905_v15  ;;  %v14950_v15 = vld [vmem:[%s15727_s30 + $0xc30] sm:$0xff] }
 0x176   : > { %9233 = vmatpush.bf16.msra.mxu0 %v14880_v18  ;;  %v9027_v38 = vpop.f32.mrf.mxu0  ;;  %v14974_v18 = vld [vmem:[%s15727_s30 + $0xcf0] sm:$0xff] }
 0x177   : > { %9246 = vmatpush.bf16.msra.mxu1 %v14888_v19  ;;  %v9028_v39 = vadd.f32 %v9027_v38, %v9015_v6  ;;  %v9040_v42 = vpop.f32.mrf.mxu1  ;;  %v216_v6 = vld [vmem:[%s15717_s22 + $0x30] sm:$0xff]  ;;  %v14949_v19 = vld [vmem:[%s15727_s30 + $0xc28] sm:$0xff] }
 0x178   : > { %9259 = vmatpush.bf16.msra.mxu2 %v14896_v20  ;;  %2335 = vst [vmem:[#allocation1] ss:$9 sm:$0xff] %v216_v6  ;;  %v14957_v20 = vld [vmem:[%s15727_s30 + $0xc68] sm:$0xff] }
 0x179   : > { %9272 = vmatpush.bf16.msra.mxu3 %v14904_v21  ;;  %9234 = vmatmul.bf16.vlgmr.msra.gmra.mxu0 %v2326_v26  ;;  %v9041_v45 = vadd.f32 %v9040_v42, %v9028_v39  ;;  %v14965_v21 = vld [vmem:[%s15727_s30 + $0xca8] sm:$0xff]  ;;  %v14956_v26 = vld [vmem:[%s15727_s30 + $0xc60] sm:$0xff] }
 0x17a   : > { %9278 = vmatpush.bf16.msrb.mxu0 %v14919_v22  ;;  %9247 = vmatmul.bf16.vlgmr.msra.gmra.mxu1 %v2327_v28  ;;  %v14973_v22 = vld [vmem:[%s15727_s30 + $0xce8] sm:$0xff]  ;;  %v14964_v28 = vld [vmem:[%s15727_s30 + $0xca0] sm:$0xff] }
 0x17b   : > { %9291 = vmatpush.bf16.msrb.mxu1 %v14927_v23  ;;  %9260 = vmatmul.bf16.vlgmr.msra.gmra.mxu2 %v2328_v27  ;;  %v15005_v6 = vld [vmem:[%s15727_s30 + $0xde8] sm:$0xff] }
 0x17c   : > { %9304 = vmatpush.bf16.msrb.mxu2 %v14935_v24  ;;  %9273 = vmatmul.bf16.vlgmr.msra.gmra.mxu3 %v2329_v29  ;;  %v14972_v29 = vld [vmem:[%s15727_s30 + $0xce0] sm:$0xff] }
 0x17d   : > { %9317 = vmatpush.bf16.msrb.mxu3 %v14943_v25  ;;  %v14948_v25 = vld [vmem:[%s15727_s30 + $0xc20] sm:$0xff] }
 0x17e   : > { %9279 = vmatpush.bf16.msrb.mxu0 %v14918_v30  ;;  %v9053_v50 = vpop.f32.mrf.mxu2  ;;  %v9029_v53 = vpop.f32.mrf.mxu0 }
 0x17f   : > { %9292 = vmatpush.bf16.msrb.mxu1 %v14926_v31  ;;  %v9054_v51 = vadd.f32 %v9053_v50, %v9041_v45  ;;  %v9066_v52 = vpop.f32.mrf.mxu3  ;;  %v9042_v57 = vpop.f32.mrf.mxu1  ;;  %v14947_v31 = vld [vmem:[%s15727_s30 + $0xc18] sm:$0xff]  ;;  %v14945_v45 = vld [vmem:[%s15727_s30 + $0xc08] sm:$0xff]  ;;  %v14960_v53 = vld [vmem:[%s15727_s30 + $0xc80] sm:$0xff] }
 0x180   : > { %9305 = vmatpush.bf16.msrb.mxu2 %v14934_v32  ;;  %v14955_v32 = vld [vmem:[%s15727_s30 + $0xc58] sm:$0xff] }
 0x181   : > { %9318 = vmatpush.bf16.msrb.mxu3 %v14942_v33  ;;  %v16118_v54 = vadd.f32 %v9066_v52, %v9054_v51  ;;  %v14963_v33 = vld [vmem:[%s15727_s30 + $0xc98] sm:$0xff]  ;;  %v14944_v51 = vld [vmem:[%s15727_s30 + $0xc00] sm:$0xff] }
 0x182   : > { %9280 = vmatpush.bf16.msrb.mxu0 %v14917_v34  ;;  %v14971_v34 = vld [vmem:[%s15727_s30 + $0xcd8] sm:$0xff]  ;;  %v14952_v52 = vld [vmem:[%s15727_s30 + $0xc40] sm:$0xff] }
 0x183   : > { %9293 = vmatpush.bf16.msrb.mxu1 %v14925_v35  ;;  %v14999_v57 = vld [vmem:[%s15727_s30 + $0xdb8] sm:$0xff] }
 0x184   : > { %9306 = vmatpush.bf16.msrb.mxu2 %v14933_v36 }
 0x185   : > { %9319 = vmatpush.bf16.msrb.mxu3 %v14941_v37 }
 0x186   : > { %9281 = vmatpush.bf16.msrb.mxu0 %v14916_v40  ;;  %v9055_v2 = vpop.f32.mrf.mxu2  ;;  %v14946_v40 = vld [vmem:[%s15727_s30 + $0xc10] sm:$0xff] }
 0x187   : > { %9294 = vmatpush.bf16.msrb.mxu1 %v14924_v41  ;;  %v9068_v5 = vpop.f32.mrf.mxu3  ;;  %v14954_v41 = vld [vmem:[%s15727_s30 + $0xc50] sm:$0xff] }
 0x188   : > { %9307 = vmatpush.bf16.msrb.mxu2 %v14932_v43  ;;  %v14962_v43 = vld [vmem:[%s15727_s30 + $0xc90] sm:$0xff]  ;;  %v14997_v5 = vld [vmem:[%s15727_s30 + $0xda8] sm:$0xff] }
 0x189   : > { %9320 = vmatpush.bf16.msrb.mxu3 %v14940_v44  ;;  %v14970_v44 = vld [vmem:[%s15727_s30 + $0xcd0] sm:$0xff] }
 0x18a   : > { %9282 = vmatpush.bf16.msrb.mxu0 %v14915_v46  ;;  %v14953_v46 = vld [vmem:[%s15727_s30 + $0xc48] sm:$0xff]  ;;  %v15006_v2 = vld [vmem:[%s15727_s30 + $0xdf0] sm:$0xff] }
 0x18b   : > { %9295 = vmatpush.bf16.msrb.mxu1 %v14923_v47  ;;  %v14961_v47 = vld [vmem:[%s15727_s30 + $0xc88] sm:$0xff] }
 0x18c   : > { %9308 = vmatpush.bf16.msrb.mxu2 %v14931_v48  ;;  %v14969_v48 = vld [vmem:[%s15727_s30 + $0xcc8] sm:$0xff] }
 0x18d   : > { %9321 = vmatpush.bf16.msrb.mxu3 %v14939_v49 }
 0x18e   : > { %9283 = vmatpush.bf16.msrb.mxu0 %v14914_v55  ;;  %v14983_v55 = vld [vmem:[%s15727_s30 + $0xd38] sm:$0xff] }
 0x18f   : > { %9296 = vmatpush.bf16.msrb.mxu1 %v14922_v56  ;;  %v14991_v56 = vld [vmem:[%s15727_s30 + $0xd78] sm:$0xff] }
 0x190   : > { %9309 = vmatpush.bf16.msrb.mxu2 %v14930_v58  ;;  %v15007_v58 = vld [vmem:[%s15727_s30 + $0xdf8] sm:$0xff] }
 0x191   : > { %9322 = vmatpush.bf16.msrb.mxu3 %v14938_v59  ;;  %v2336_v59 = vld [vmem:[#allocation1] sm:$0xff] }
 0x192   : > { %9284 = vmatpush.bf16.msrb.mxu0 %v14913_v60  ;;  %v2338_v60 = vld [vmem:[#allocation1 + $0x12] sm:$0xff] }
 0x193   : > { %9297 = vmatpush.bf16.msrb.mxu1 %v14921_v61  ;;  %v2337_v61 = vld [vmem:[#allocation1 + $0x9] sm:$0xff] }
 0x194   : > { %9310 = vmatpush.bf16.msrb.mxu2 %v14929_v62  ;;  %v2339_v62 = vld [vmem:[#allocation1 + $0x1b] sm:$0xff] }
 0x195   : > { %9323 = vmatpush.bf16.msrb.mxu3 %v14937_v63  ;;  %v14982_v63 = vld [vmem:[%s15727_s30 + $0xd30] sm:$0xff] }
 0x196   : > { %9285 = vmatpush.bf16.msrb.mxu0 %v14912_v7  ;;  %v9079_v23 = vpop.f32.mrf.mxu0 }
 0x197   : > { %9298 = vmatpush.bf16.msrb.mxu1 %v14920_v8  ;;  %v9080_v24 = vadd.f32 %v9079_v23, %v16118_v54  ;;  %v9092_v27 = vpop.f32.mrf.mxu1  ;;  %v14968_v54 = vld [vmem:[%s15727_s30 + $0xcc0] sm:$0xff] }
 0x198   : > { %9311 = vmatpush.bf16.msrb.mxu2 %v14928_v9  ;;  %v14980_v9 = vld [vmem:[%s15727_s30 + $0xd20] sm:$0xff] }
 0x199   : > { %9324 = vmatpush.bf16.msrb.mxu3 %v14936_v10  ;;  %9286 = vmatmul.bf16.vlgmr.msrb.gmra.mxu0 %v2330_v0  ;;  %v9093_v30 = vadd.f32 %v9092_v27, %v9080_v24  ;;  %v14990_v0 = vld [vmem:[%s15727_s30 + $0xd70] sm:$0xff]  ;;  %v14988_v10 = vld [vmem:[%s15727_s30 + $0xd60] sm:$0xff] }
 0x19a   : > { %9330 = vmatpush.bf16.msra.mxu0 %v14951_v11  ;;  %9299 = vmatmul.bf16.vlgmr.msrb.gmra.mxu1 %v2331_v3  ;;  %v14981_v3 = vld [vmem:[%s15727_s30 + $0xd28] sm:$0xff]  ;;  %v14978_v24 = vld [vmem:[%s15727_s30 + $0xd10] sm:$0xff] }
 0x19b   : > { %9343 = vmatpush.bf16.msra.mxu1 %v14959_v12  ;;  %9312 = vmatmul.bf16.vlgmr.msrb.gmra.mxu2 %v2332_v1  ;;  %v14998_v1 = vld [vmem:[%s15727_s30 + $0xdb0] sm:$0xff]  ;;  %v14996_v12 = vld [vmem:[%s15727_s30 + $0xda0] sm:$0xff] }
 0x19c   : > { %9356 = vmatpush.bf16.msra.mxu2 %v14967_v13  ;;  %9325 = vmatmul.bf16.vlgmr.msrb.gmra.mxu3 %v2333_v4  ;;  %v14989_v4 = vld [vmem:[%s15727_s30 + $0xd68] sm:$0xff]  ;;  %v15004_v13 = vld [vmem:[%s15727_s30 + $0xde0] sm:$0xff]  ;;  %v14994_v27 = vld [vmem:[%s15727_s30 + $0xd90] sm:$0xff] }
 0x19d   : > { %9369 = vmatpush.bf16.msra.mxu3 %v14975_v14 }
 0x19e   : > { %9331 = vmatpush.bf16.msra.mxu0 %v14950_v15  ;;  %v9105_v35 = vpop.f32.mrf.mxu2  ;;  %v9081_v38 = vpop.f32.mrf.mxu0  ;;  %v14979_v15 = vld [vmem:[%s15727_s30 + $0xd18] sm:$0xff] }
 0x19f   : > { %9344 = vmatpush.bf16.msra.mxu1 %v14958_v16  ;;  %v9106_v36 = vadd.f32 %v9105_v35, %v9093_v30  ;;  %v9118_v37 = vpop.f32.mrf.mxu3  ;;  %v9094_v42 = vpop.f32.mrf.mxu1  ;;  %v14987_v16 = vld [vmem:[%s15727_s30 + $0xd58] sm:$0xff]  ;;  %v14985_v30 = vld [vmem:[%s15727_s30 + $0xd48] sm:$0xff] }
 0x1a0   : > { %9357 = vmatpush.bf16.msra.mxu2 %v14966_v17  ;;  %v14995_v17 = vld [vmem:[%s15727_s30 + $0xd98] sm:$0xff]  ;;  %v14992_v42 = vld [vmem:[%s15727_s30 + $0xd80] sm:$0xff] }
 0x1a1   : > { %9370 = vmatpush.bf16.msra.mxu3 %v14974_v18  ;;  %v9119_v39 = vadd.f32 %v9118_v37, %v9106_v36  ;;  %v15003_v18 = vld [vmem:[%s15727_s30 + $0xdd8] sm:$0xff]  ;;  %v2341_v36 = vld [vmem:[#allocation1 + $0x2d] sm:$0xff] }
 0x1a2   : > { %9332 = vmatpush.bf16.msra.mxu0 %v14949_v19  ;;  %v2343_v37 = vld [vmem:[#allocation1 + $0x3f] sm:$0xff] }
 0x1a3   : > { %9345 = vmatpush.bf16.msra.mxu1 %v14957_v20 }
 0x1a4   : > { %9358 = vmatpush.bf16.msra.mxu2 %v14965_v21 }
 0x1a5   : > { %9371 = vmatpush.bf16.msra.mxu3 %v14973_v22 }
 0x1a6   : > { %9333 = vmatpush.bf16.msra.mxu0 %v14948_v25  ;;  %v9107_v49 = vpop.f32.mrf.mxu2  ;;  %v14986_v25 = vld [vmem:[%s15727_s30 + $0xd50] sm:$0xff] }
 0x1a7   : > { %9346 = vmatpush.bf16.msra.mxu1 %v14956_v26  ;;  %v9120_v50 = vpop.f32.mrf.mxu3  ;;  %v15022_v49 = vld [vmem:[%s15727_s30 + $0xe70] sm:$0xff] }
 0x1a8   : > { %9359 = vmatpush.bf16.msra.mxu2 %v14964_v28  ;;  %v15002_v28 = vld [vmem:[%s15727_s30 + $0xdd0] sm:$0xff] }
 0x1a9   : > { %9372 = vmatpush.bf16.msra.mxu3 %v14972_v29  ;;  %v14977_v29 = vld [vmem:[%s15727_s30 + $0xd08] sm:$0xff]  ;;  %v15030_v50 = vld [vmem:[%s15727_s30 + $0xeb0] sm:$0xff] }
 0x1aa   : > { %9334 = vmatpush.bf16.msra.mxu0 %v14947_v31  ;;  %v14993_v31 = vld [vmem:[%s15727_s30 + $0xd88] sm:$0xff] }
 0x1ab   : > { %9347 = vmatpush.bf16.msra.mxu1 %v14955_v32  ;;  %v15001_v32 = vld [vmem:[%s15727_s30 + $0xdc8] sm:$0xff] }
 0x1ac   : > { %9360 = vmatpush.bf16.msra.mxu2 %v14963_v33  ;;  %v2340_v33 = vld [vmem:[#allocation1 + $0x24] sm:$0xff] }
 0x1ad   : > { %9373 = vmatpush.bf16.msra.mxu3 %v14971_v34  ;;  %v2342_v34 = vld [vmem:[#allocation1 + $0x36] sm:$0xff] }
 0x1ae   : > { %9335 = vmatpush.bf16.msra.mxu0 %v14946_v40  ;;  %v14976_v40 = vld [vmem:[%s15727_s30 + $0xd00] sm:$0xff] }
 0x1af   : > { %9348 = vmatpush.bf16.msra.mxu1 %v14954_v41  ;;  %v14984_v41 = vld [vmem:[%s15727_s30 + $0xd40] sm:$0xff] }
 0x1b0   : > { %9361 = vmatpush.bf16.msra.mxu2 %v14962_v43  ;;  %v15000_v43 = vld [vmem:[%s15727_s30 + $0xdc0] sm:$0xff] }
 0x1b1   : > { %9374 = vmatpush.bf16.msra.mxu3 %v14970_v44  ;;  %v15015_v44 = vld [vmem:[%s15727_s30 + $0xe38] sm:$0xff] }
 0x1b2   : > { %9336 = vmatpush.bf16.msra.mxu0 %v14945_v45  ;;  %v15023_v45 = vld [vmem:[%s15727_s30 + $0xe78] sm:$0xff] }
 0x1b3   : > { %9349 = vmatpush.bf16.msra.mxu1 %v14953_v46  ;;  %v15031_v46 = vld [vmem:[%s15727_s30 + $0xeb8] sm:$0xff] }
 0x1b4   : > { %9362 = vmatpush.bf16.msra.mxu2 %v14961_v47  ;;  %v15039_v47 = vld [vmem:[%s15727_s30 + $0xef8] sm:$0xff] }
 0x1b5   : > { %9375 = vmatpush.bf16.msra.mxu3 %v14969_v48  ;;  %v15014_v48 = vld [vmem:[%s15727_s30 + $0xe30] sm:$0xff] }
 0x1b6   : > { %9337 = vmatpush.bf16.msra.mxu0 %v14944_v51  ;;  %v9131_v7 = vpop.f32.mrf.mxu0  ;;  %v15038_v51 = vld [vmem:[%s15727_s30 + $0xef0] sm:$0xff] }
 0x1b7   : > { %9350 = vmatpush.bf16.msra.mxu1 %v14952_v52  ;;  %v9132_v8 = vadd.f32 %v9131_v7, %v9119_v39  ;;  %v9144_v11 = vpop.f32.mrf.mxu1  ;;  %v217_v39 = vld [vmem:[%s15717_s22 + $0x38] sm:$0xff]  ;;  %v15013_v52 = vld [vmem:[%s15727_s30 + $0xe28] sm:$0xff] }
 0x1b8   : > { %9363 = vmatpush.bf16.msra.mxu2 %v14960_v53  ;;  %2345 = vst [vmem:[#allocation1] ss:$9 sm:$0xff] %v217_v39  ;;  %v15021_v53 = vld [vmem:[%s15727_s30 + $0xe68] sm:$0xff] }
 0x1b9   : > { %9376 = vmatpush.bf16.msra.mxu3 %v14968_v54  ;;  %9338 = vmatmul.bf16.vlgmr.msra.gmra.mxu0 %v2336_v59  ;;  %v9145_v14 = vadd.f32 %v9144_v11, %v9132_v8  ;;  %v15029_v54 = vld [vmem:[%s15727_s30 + $0xea8] sm:$0xff]  ;;  %v15020_v59 = vld [vmem:[%s15727_s30 + $0xe60] sm:$0xff] }
 0x1ba   : > { %9382 = vmatpush.bf16.msrb.mxu0 %v14983_v55  ;;  %9351 = vmatmul.bf16.vlgmr.msra.gmra.mxu1 %v2337_v61  ;;  %v15037_v55 = vld [vmem:[%s15727_s30 + $0xee8] sm:$0xff]  ;;  %v15028_v61 = vld [vmem:[%s15727_s30 + $0xea0] sm:$0xff] }
 0x1bb   : > { %9395 = vmatpush.bf16.msrb.mxu1 %v14991_v56  ;;  %9364 = vmatmul.bf16.vlgmr.msra.gmra.mxu2 %v2338_v60  ;;  %v15069_v39 = vld [vmem:[%s15727_s30 + $0xfe8] sm:$0xff] }
 0x1bc   : > { %9408 = vmatpush.bf16.msrb.mxu2 %v14999_v57  ;;  %9377 = vmatmul.bf16.vlgmr.msra.gmra.mxu3 %v2339_v62  ;;  %v15036_v62 = vld [vmem:[%s15727_s30 + $0xee0] sm:$0xff] }
 0x1bd   : > { %9421 = vmatpush.bf16.msrb.mxu3 %v15007_v58  ;;  %v15012_v58 = vld [vmem:[%s15727_s30 + $0xe20] sm:$0xff] }
 0x1be   : > { %9383 = vmatpush.bf16.msrb.mxu0 %v14982_v63  ;;  %v9157_v19 = vpop.f32.mrf.mxu2  ;;  %v9133_v22 = vpop.f32.mrf.mxu0 }
 0x1bf   : > { %9396 = vmatpush.bf16.msrb.mxu1 %v14990_v0  ;;  %v9158_v20 = vadd.f32 %v9157_v19, %v9145_v14  ;;  %v9170_v21 = vpop.f32.mrf.mxu3  ;;  %v9146_v26 = vpop.f32.mrf.mxu1  ;;  %v15011_v0 = vld [vmem:[%s15727_s30 + $0xe18] sm:$0xff]  ;;  %v15009_v14 = vld [vmem:[%s15727_s30 + $0xe08] sm:$0xff]  ;;  %v15024_v22 = vld [vmem:[%s15727_s30 + $0xe80] sm:$0xff] }
 0x1c0   : > { %9409 = vmatpush.bf16.msrb.mxu2 %v14998_v1  ;;  %v15019_v1 = vld [vmem:[%s15727_s30 + $0xe58] sm:$0xff] }
 0x1c1   : > { %9422 = vmatpush.bf16.msrb.mxu3 %v15006_v2  ;;  %v16186_v23 = vadd.f32 %v9170_v21, %v9158_v20  ;;  %v15027_v2 = vld [vmem:[%s15727_s30 + $0xe98] sm:$0xff]  ;;  %v15008_v20 = vld [vmem:[%s15727_s30 + $0xe00] sm:$0xff] }
 0x1c2   : > { %9384 = vmatpush.bf16.msrb.mxu0 %v14981_v3  ;;  %v15035_v3 = vld [vmem:[%s15727_s30 + $0xed8] sm:$0xff]  ;;  %v15016_v21 = vld [vmem:[%s15727_s30 + $0xe40] sm:$0xff] }
 0x1c3   : > { %9397 = vmatpush.bf16.msrb.mxu1 %v14989_v4  ;;  %v15063_v26 = vld [vmem:[%s15727_s30 + $0xfb8] sm:$0xff] }
 0x1c4   : > { %9410 = vmatpush.bf16.msrb.mxu2 %v14997_v5 }
 0x1c5   : > { %9423 = vmatpush.bf16.msrb.mxu3 %v15005_v6 }
 0x1c6   : > { %9385 = vmatpush.bf16.msrb.mxu0 %v14980_v9  ;;  %v9159_v35 = vpop.f32.mrf.mxu2  ;;  %v15010_v9 = vld [vmem:[%s15727_s30 + $0xe10] sm:$0xff] }
 0x1c7   : > { %9398 = vmatpush.bf16.msrb.mxu1 %v14988_v10  ;;  %v9172_v38 = vpop.f32.mrf.mxu3  ;;  %v15018_v10 = vld [vmem:[%s15727_s30 + $0xe50] sm:$0xff] }
 0x1c8   : > { %9411 = vmatpush.bf16.msrb.mxu2 %v14996_v12  ;;  %v15026_v12 = vld [vmem:[%s15727_s30 + $0xe90] sm:$0xff]  ;;  %v15061_v38 = vld [vmem:[%s15727_s30 + $0xfa8] sm:$0xff] }
 0x1c9   : > { %9424 = vmatpush.bf16.msrb.mxu3 %v15004_v13  ;;  %v15034_v13 = vld [vmem:[%s15727_s30 + $0xed0] sm:$0xff] }
 0x1ca   : > { %9386 = vmatpush.bf16.msrb.mxu0 %v14979_v15  ;;  %v15017_v15 = vld [vmem:[%s15727_s30 + $0xe48] sm:$0xff]  ;;  %v15070_v35 = vld [vmem:[%s15727_s30 + $0xff0] sm:$0xff] }
 0x1cb   : > { %9399 = vmatpush.bf16.msrb.mxu1 %v14987_v16  ;;  %v15025_v16 = vld [vmem:[%s15727_s30 + $0xe88] sm:$0xff] }
 0x1cc   : > { %9412 = vmatpush.bf16.msrb.mxu2 %v14995_v17  ;;  %v15033_v17 = vld [vmem:[%s15727_s30 + $0xec8] sm:$0xff] }
 0x1cd   : > { %9425 = vmatpush.bf16.msrb.mxu3 %v15003_v18 }
 0x1ce   : > { %9387 = vmatpush.bf16.msrb.mxu0 %v14978_v24  ;;  %v15047_v24 = vld [vmem:[%s15727_s30 + $0xf38] sm:$0xff] }
 0x1cf   : > { %9400 = vmatpush.bf16.msrb.mxu1 %v14986_v25  ;;  %v15055_v25 = vld [vmem:[%s15727_s30 + $0xf78] sm:$0xff] }
 0x1d0   : > { %9413 = vmatpush.bf16.msrb.mxu2 %v14994_v27  ;;  %v15071_v27 = vld [vmem:[%s15727_s30 + $0xff8] sm:$0xff] }
 0x1d1   : > { %9426 = vmatpush.bf16.msrb.mxu3 %v15002_v28  ;;  %v2346_v28 = vld [vmem:[#allocation1] sm:$0xff] }
 0x1d2   : > { %9388 = vmatpush.bf16.msrb.mxu0 %v14977_v29  ;;  %v2348_v29 = vld [vmem:[#allocation1 + $0x12] sm:$0xff] }
 0x1d3   : > { %9401 = vmatpush.bf16.msrb.mxu1 %v14985_v30  ;;  %v2347_v30 = vld [vmem:[#allocation1 + $0x9] sm:$0xff] }
 0x1d4   : > { %9414 = vmatpush.bf16.msrb.mxu2 %v14993_v31  ;;  %v2349_v31 = vld [vmem:[#allocation1 + $0x1b] sm:$0xff] }
 0x1d5   : > { %9427 = vmatpush.bf16.msrb.mxu3 %v15001_v32  ;;  %v15046_v32 = vld [vmem:[%s15727_s30 + $0xf30] sm:$0xff] }
 0x1d6   : > { %9389 = vmatpush.bf16.msrb.mxu0 %v14976_v40  ;;  %v9183_v56 = vpop.f32.mrf.mxu0 }
 0x1d7   : > { %9402 = vmatpush.bf16.msrb.mxu1 %v14984_v41  ;;  %v9184_v57 = vadd.f32 %v9183_v56, %v16186_v23  ;;  %v9196_v60 = vpop.f32.mrf.mxu1  ;;  %v15032_v23 = vld [vmem:[%s15727_s30 + $0xec0] sm:$0xff] }
 0x1d8   : > { %9415 = vmatpush.bf16.msrb.mxu2 %v14992_v42  ;;  %v15044_v42 = vld [vmem:[%s15727_s30 + $0xf20] sm:$0xff] }
 0x1d9   : > { %9428 = vmatpush.bf16.msrb.mxu3 %v15000_v43  ;;  %9390 = vmatmul.bf16.vlgmr.msrb.gmra.mxu0 %v2340_v33  ;;  %v9197_v63 = vadd.f32 %v9196_v60, %v9184_v57  ;;  %v15054_v33 = vld [vmem:[%s15727_s30 + $0xf70] sm:$0xff]  ;;  %v15052_v43 = vld [vmem:[%s15727_s30 + $0xf60] sm:$0xff] }
 0x1da   : > { %9434 = vmatpush.bf16.msra.mxu0 %v15015_v44  ;;  %9403 = vmatmul.bf16.vlgmr.msrb.gmra.mxu1 %v2341_v36  ;;  %v15045_v36 = vld [vmem:[%s15727_s30 + $0xf28] sm:$0xff]  ;;  %v15042_v57 = vld [vmem:[%s15727_s30 + $0xf10] sm:$0xff] }
 0x1db   : > { %9447 = vmatpush.bf16.msra.mxu1 %v15023_v45  ;;  %9416 = vmatmul.bf16.vlgmr.msrb.gmra.mxu2 %v2342_v34  ;;  %v15062_v34 = vld [vmem:[%s15727_s30 + $0xfb0] sm:$0xff]  ;;  %v15060_v45 = vld [vmem:[%s15727_s30 + $0xfa0] sm:$0xff] }
 0x1dc   : > { %9460 = vmatpush.bf16.msra.mxu2 %v15031_v46  ;;  %9429 = vmatmul.bf16.vlgmr.msrb.gmra.mxu3 %v2343_v37  ;;  %v15053_v37 = vld [vmem:[%s15727_s30 + $0xf68] sm:$0xff]  ;;  %v15068_v46 = vld [vmem:[%s15727_s30 + $0xfe0] sm:$0xff]  ;;  %v15058_v60 = vld [vmem:[%s15727_s30 + $0xf90] sm:$0xff] }
 0x1dd   : > { %9473 = vmatpush.bf16.msra.mxu3 %v15039_v47 }
 0x1de   : > { %9435 = vmatpush.bf16.msra.mxu0 %v15014_v48  ;;  %v9209_v4 = vpop.f32.mrf.mxu2  ;;  %v9185_v7 = vpop.f32.mrf.mxu0  ;;  %v15043_v48 = vld [vmem:[%s15727_s30 + $0xf18] sm:$0xff] }
 0x1df   : > { %9448 = vmatpush.bf16.msra.mxu1 %v15022_v49  ;;  %v9210_v5 = vadd.f32 %v9209_v4, %v9197_v63  ;;  %v9222_v6 = vpop.f32.mrf.mxu3  ;;  %v9198_v11 = vpop.f32.mrf.mxu1  ;;  %v15051_v49 = vld [vmem:[%s15727_s30 + $0xf58] sm:$0xff]  ;;  %v15049_v63 = vld [vmem:[%s15727_s30 + $0xf48] sm:$0xff] }
 0x1e0   : > { %9461 = vmatpush.bf16.msra.mxu2 %v15030_v50  ;;  %v15059_v50 = vld [vmem:[%s15727_s30 + $0xf98] sm:$0xff]  ;;  %v15056_v11 = vld [vmem:[%s15727_s30 + $0xf80] sm:$0xff] }
 0x1e1   : > { %9474 = vmatpush.bf16.msra.mxu3 %v15038_v51  ;;  %v9223_v8 = vadd.f32 %v9222_v6, %v9210_v5  ;;  %v15067_v51 = vld [vmem:[%s15727_s30 + $0xfd8] sm:$0xff]  ;;  %v2351_v5 = vld [vmem:[#allocation1 + $0x2d] sm:$0xff] }
 0x1e2   : > { %9436 = vmatpush.bf16.msra.mxu0 %v15013_v52  ;;  %v2353_v6 = vld [vmem:[#allocation1 + $0x3f] sm:$0xff] }
 0x1e3   : > { %9449 = vmatpush.bf16.msra.mxu1 %v15021_v53 }
 0x1e4   : > { %9462 = vmatpush.bf16.msra.mxu2 %v15029_v54 }
 0x1e5   : > { %9475 = vmatpush.bf16.msra.mxu3 %v15037_v55 }
 0x1e6   : > { %9437 = vmatpush.bf16.msra.mxu0 %v15012_v58  ;;  %v9211_v18 = vpop.f32.mrf.mxu2  ;;  %v15050_v58 = vld [vmem:[%s15727_s30 + $0xf50] sm:$0xff] }
 0x1e7   : > { %9450 = vmatpush.bf16.msra.mxu1 %v15020_v59  ;;  %v9224_v19 = vpop.f32.mrf.mxu3  ;;  %v15086_v18 = vld [vmem:[%s15727_s30 + $0x1070] sm:$0xff] }
 0x1e8   : > { %9463 = vmatpush.bf16.msra.mxu2 %v15028_v61  ;;  %v15066_v61 = vld [vmem:[%s15727_s30 + $0xfd0] sm:$0xff] }
 0x1e9   : > { %9476 = vmatpush.bf16.msra.mxu3 %v15036_v62  ;;  %v15041_v62 = vld [vmem:[%s15727_s30 + $0xf08] sm:$0xff]  ;;  %v15094_v19 = vld [vmem:[%s15727_s30 + $0x10b0] sm:$0xff] }
 0x1ea   : > { %9438 = vmatpush.bf16.msra.mxu0 %v15011_v0  ;;  %v15057_v0 = vld [vmem:[%s15727_s30 + $0xf88] sm:$0xff] }
 0x1eb   : > { %9451 = vmatpush.bf16.msra.mxu1 %v15019_v1  ;;  %v15065_v1 = vld [vmem:[%s15727_s30 + $0xfc8] sm:$0xff] }
 0x1ec   : > { %9464 = vmatpush.bf16.msra.mxu2 %v15027_v2  ;;  %v2350_v2 = vld [vmem:[#allocation1 + $0x24] sm:$0xff] }
 0x1ed   : > { %9477 = vmatpush.bf16.msra.mxu3 %v15035_v3  ;;  %v2352_v3 = vld [vmem:[#allocation1 + $0x36] sm:$0xff] }
 0x1ee   : > { %9439 = vmatpush.bf16.msra.mxu0 %v15010_v9  ;;  %v15040_v9 = vld [vmem:[%s15727_s30 + $0xf00] sm:$0xff] }
 0x1ef   : > { %9452 = vmatpush.bf16.msra.mxu1 %v15018_v10  ;;  %v15048_v10 = vld [vmem:[%s15727_s30 + $0xf40] sm:$0xff] }
 0x1f0   : > { %9465 = vmatpush.bf16.msra.mxu2 %v15026_v12  ;;  %v15064_v12 = vld [vmem:[%s15727_s30 + $0xfc0] sm:$0xff] }
 0x1f1   : > { %9478 = vmatpush.bf16.msra.mxu3 %v15034_v13  ;;  %v15079_v13 = vld [vmem:[%s15727_s30 + $0x1038] sm:$0xff] }
 0x1f2   : > { %9440 = vmatpush.bf16.msra.mxu0 %v15009_v14  ;;  %v15087_v14 = vld [vmem:[%s15727_s30 + $0x1078] sm:$0xff] }
 0x1f3   : > { %9453 = vmatpush.bf16.msra.mxu1 %v15017_v15  ;;  %v15095_v15 = vld [vmem:[%s15727_s30 + $0x10b8] sm:$0xff] }
 0x1f4   : > { %9466 = vmatpush.bf16.msra.mxu2 %v15025_v16  ;;  %v15103_v16 = vld [vmem:[%s15727_s30 + $0x10f8] sm:$0xff] }
 0x1f5   : > { %9479 = vmatpush.bf16.msra.mxu3 %v15033_v17  ;;  %v15078_v17 = vld [vmem:[%s15727_s30 + $0x1030] sm:$0xff] }
 0x1f6   : > { %9441 = vmatpush.bf16.msra.mxu0 %v15008_v20  ;;  %v9235_v40 = vpop.f32.mrf.mxu0  ;;  %v15102_v20 = vld [vmem:[%s15727_s30 + $0x10f0] sm:$0xff] }
 0x1f7   : > { %9454 = vmatpush.bf16.msra.mxu1 %v15016_v21  ;;  %v9236_v41 = vadd.f32 %v9235_v40, %v9223_v8  ;;  %v9248_v44 = vpop.f32.mrf.mxu1  ;;  %v218_v8 = vld [vmem:[%s15717_s22 + $0x40] sm:$0xff]  ;;  %v15077_v21 = vld [vmem:[%s15727_s30 + $0x1028] sm:$0xff] }
 0x1f8   : > { %9467 = vmatpush.bf16.msra.mxu2 %v15024_v22  ;;  %2355 = vst [vmem:[#allocation1] ss:$9 sm:$0xff] %v218_v8  ;;  %v15085_v22 = vld [vmem:[%s15727_s30 + $0x1068] sm:$0xff] }
 0x1f9   : > { %9480 = vmatpush.bf16.msra.mxu3 %v15032_v23  ;;  %9442 = vmatmul.bf16.vlgmr.msra.gmra.mxu0 %v2346_v28  ;;  %v9249_v47 = vadd.f32 %v9248_v44, %v9236_v41  ;;  %v15093_v23 = vld [vmem:[%s15727_s30 + $0x10a8] sm:$0xff]  ;;  %v15084_v28 = vld [vmem:[%s15727_s30 + $0x1060] sm:$0xff] }
 0x1fa   : > { %9486 = vmatpush.bf16.msrb.mxu0 %v15047_v24  ;;  %9455 = vmatmul.bf16.vlgmr.msra.gmra.mxu1 %v2347_v30  ;;  %v15101_v24 = vld [vmem:[%s15727_s30 + $0x10e8] sm:$0xff]  ;;  %v15092_v30 = vld [vmem:[%s15727_s30 + $0x10a0] sm:$0xff] }
 0x1fb   : > { %9499 = vmatpush.bf16.msrb.mxu1 %v15055_v25  ;;  %9468 = vmatmul.bf16.vlgmr.msra.gmra.mxu2 %v2348_v29  ;;  %v15133_v8 = vld [vmem:[%s15727_s30 + $0x11e8] sm:$0xff] }
 0x1fc   : > { %9512 = vmatpush.bf16.msrb.mxu2 %v15063_v26  ;;  %9481 = vmatmul.bf16.vlgmr.msra.gmra.mxu3 %v2349_v31  ;;  %v15100_v31 = vld [vmem:[%s15727_s30 + $0x10e0] sm:$0xff] }
 0x1fd   : > { %9525 = vmatpush.bf16.msrb.mxu3 %v15071_v27  ;;  %v15076_v27 = vld [vmem:[%s15727_s30 + $0x1020] sm:$0xff] }
 0x1fe   : > { %9487 = vmatpush.bf16.msrb.mxu0 %v15046_v32  ;;  %v9261_v52 = vpop.f32.mrf.mxu2  ;;  %v9237_v55 = vpop.f32.mrf.mxu0 }
 0x1ff   : > { %9500 = vmatpush.bf16.msrb.mxu1 %v15054_v33  ;;  %v9262_v53 = vadd.f32 %v9261_v52, %v9249_v47  ;;  %v9274_v54 = vpop.f32.mrf.mxu3  ;;  %v9250_v59 = vpop.f32.mrf.mxu1  ;;  %v15075_v33 = vld [vmem:[%s15727_s30 + $0x1018] sm:$0xff]  ;;  %v15073_v47 = vld [vmem:[%s15727_s30 + $0x1008] sm:$0xff]  ;;  %v15088_v55 = vld [vmem:[%s15727_s30 + $0x1080] sm:$0xff] }
 0x200   : > { %9513 = vmatpush.bf16.msrb.mxu2 %v15062_v34  ;;  %v15083_v34 = vld [vmem:[%s15727_s30 + $0x1058] sm:$0xff] }
 0x201   : > { %9526 = vmatpush.bf16.msrb.mxu3 %v15070_v35  ;;  %v16254_v56 = vadd.f32 %v9274_v54, %v9262_v53  ;;  %v15091_v35 = vld [vmem:[%s15727_s30 + $0x1098] sm:$0xff]  ;;  %v15072_v53 = vld [vmem:[%s15727_s30 + $0x1000] sm:$0xff] }
 0x202   : > { %9488 = vmatpush.bf16.msrb.mxu0 %v15045_v36  ;;  %v15099_v36 = vld [vmem:[%s15727_s30 + $0x10d8] sm:$0xff]  ;;  %v15080_v54 = vld [vmem:[%s15727_s30 + $0x1040] sm:$0xff] }
 0x203   : > { %9501 = vmatpush.bf16.msrb.mxu1 %v15053_v37  ;;  %v15127_v59 = vld [vmem:[%s15727_s30 + $0x11b8] sm:$0xff] }
 0x204   : > { %9514 = vmatpush.bf16.msrb.mxu2 %v15061_v38 }
 0x205   : > { %9527 = vmatpush.bf16.msrb.mxu3 %v15069_v39 }
 0x206   : > { %9489 = vmatpush.bf16.msrb.mxu0 %v15044_v42  ;;  %v9263_v4 = vpop.f32.mrf.mxu2  ;;  %v15074_v42 = vld [vmem:[%s15727_s30 + $0x1010] sm:$0xff] }
 0x207   : > { %9502 = vmatpush.bf16.msrb.mxu1 %v15052_v43  ;;  %v9276_v7 = vpop.f32.mrf.mxu3  ;;  %v15082_v43 = vld [vmem:[%s15727_s30 + $0x1050] sm:$0xff] }
 0x208   : > { %9515 = vmatpush.bf16.msrb.mxu2 %v15060_v45  ;;  %v15090_v45 = vld [vmem:[%s15727_s30 + $0x1090] sm:$0xff]  ;;  %v15125_v7 = vld [vmem:[%s15727_s30 + $0x11a8] sm:$0xff] }
 0x209   : > { %9528 = vmatpush.bf16.msrb.mxu3 %v15068_v46  ;;  %v15098_v46 = vld [vmem:[%s15727_s30 + $0x10d0] sm:$0xff] }
 0x20a   : > { %9490 = vmatpush.bf16.msrb.mxu0 %v15043_v48  ;;  %v15081_v48 = vld [vmem:[%s15727_s30 + $0x1048] sm:$0xff]  ;;  %v15134_v4 = vld [vmem:[%s15727_s30 + $0x11f0] sm:$0xff] }
 0x20b   : > { %9503 = vmatpush.bf16.msrb.mxu1 %v15051_v49  ;;  %v15089_v49 = vld [vmem:[%s15727_s30 + $0x1088] sm:$0xff] }
 0x20c   : > { %9516 = vmatpush.bf16.msrb.mxu2 %v15059_v50  ;;  %v15097_v50 = vld [vmem:[%s15727_s30 + $0x10c8] sm:$0xff] }
 0x20d   : > { %9529 = vmatpush.bf16.msrb.mxu3 %v15067_v51 }
 0x20e   : > { %9491 = vmatpush.bf16.msrb.mxu0 %v15042_v57  ;;  %v15111_v57 = vld [vmem:[%s15727_s30 + $0x1138] sm:$0xff] }
 0x20f   : > { %9504 = vmatpush.bf16.msrb.mxu1 %v15050_v58  ;;  %v15119_v58 = vld [vmem:[%s15727_s30 + $0x1178] sm:$0xff] }
 0x210   : > { %9517 = vmatpush.bf16.msrb.mxu2 %v15058_v60  ;;  %v15135_v60 = vld [vmem:[%s15727_s30 + $0x11f8] sm:$0xff] }
 0x211   : > { %9530 = vmatpush.bf16.msrb.mxu3 %v15066_v61  ;;  %v2356_v61 = vld [vmem:[#allocation1] sm:$0xff] }
 0x212   : > { %9492 = vmatpush.bf16.msrb.mxu0 %v15041_v62  ;;  %v2358_v62 = vld [vmem:[#allocation1 + $0x12] sm:$0xff] }
 0x213   : > { %9505 = vmatpush.bf16.msrb.mxu1 %v15049_v63  ;;  %v2357_v63 = vld [vmem:[#allocation1 + $0x9] sm:$0xff] }
 0x214   : > { %9518 = vmatpush.bf16.msrb.mxu2 %v15057_v0  ;;  %v2359_v0 = vld [vmem:[#allocation1 + $0x1b] sm:$0xff] }
 0x215   : > { %9531 = vmatpush.bf16.msrb.mxu3 %v15065_v1  ;;  %v15110_v1 = vld [vmem:[%s15727_s30 + $0x1130] sm:$0xff] }
 0x216   : > { %9493 = vmatpush.bf16.msrb.mxu0 %v15040_v9  ;;  %v9287_v25 = vpop.f32.mrf.mxu0 }
 0x217   : > { %9506 = vmatpush.bf16.msrb.mxu1 %v15048_v10  ;;  %v9288_v26 = vadd.f32 %v9287_v25, %v16254_v56  ;;  %v9300_v29 = vpop.f32.mrf.mxu1  ;;  %v15096_v56 = vld [vmem:[%s15727_s30 + $0x10c0] sm:$0xff] }
 0x218   : > { %9519 = vmatpush.bf16.msrb.mxu2 %v15056_v11  ;;  %v15108_v11 = vld [vmem:[%s15727_s30 + $0x1120] sm:$0xff] }
 0x219   : > { %9532 = vmatpush.bf16.msrb.mxu3 %v15064_v12  ;;  %9494 = vmatmul.bf16.vlgmr.msrb.gmra.mxu0 %v2350_v2  ;;  %v9301_v32 = vadd.f32 %v9300_v29, %v9288_v26  ;;  %v15118_v2 = vld [vmem:[%s15727_s30 + $0x1170] sm:$0xff]  ;;  %v15116_v12 = vld [vmem:[%s15727_s30 + $0x1160] sm:$0xff] }
 0x21a   : > { %9538 = vmatpush.bf16.msra.mxu0 %v15079_v13  ;;  %9507 = vmatmul.bf16.vlgmr.msrb.gmra.mxu1 %v2351_v5  ;;  %v15109_v5 = vld [vmem:[%s15727_s30 + $0x1128] sm:$0xff]  ;;  %v15106_v26 = vld [vmem:[%s15727_s30 + $0x1110] sm:$0xff] }
 0x21b   : > { %9551 = vmatpush.bf16.msra.mxu1 %v15087_v14  ;;  %9520 = vmatmul.bf16.vlgmr.msrb.gmra.mxu2 %v2352_v3  ;;  %v15126_v3 = vld [vmem:[%s15727_s30 + $0x11b0] sm:$0xff]  ;;  %v15124_v14 = vld [vmem:[%s15727_s30 + $0x11a0] sm:$0xff] }
 0x21c   : > { %9564 = vmatpush.bf16.msra.mxu2 %v15095_v15  ;;  %9533 = vmatmul.bf16.vlgmr.msrb.gmra.mxu3 %v2353_v6  ;;  %v15117_v6 = vld [vmem:[%s15727_s30 + $0x1168] sm:$0xff]  ;;  %v15132_v15 = vld [vmem:[%s15727_s30 + $0x11e0] sm:$0xff]  ;;  %v15122_v29 = vld [vmem:[%s15727_s30 + $0x1190] sm:$0xff] }
 0x21d   : > { %9577 = vmatpush.bf16.msra.mxu3 %v15103_v16 }
 0x21e   : > { %9539 = vmatpush.bf16.msra.mxu0 %v15078_v17  ;;  %v9313_v37 = vpop.f32.mrf.mxu2  ;;  %v9289_v40 = vpop.f32.mrf.mxu0  ;;  %v15107_v17 = vld [vmem:[%s15727_s30 + $0x1118] sm:$0xff] }
 0x21f   : > { %9552 = vmatpush.bf16.msra.mxu1 %v15086_v18  ;;  %v9314_v38 = vadd.f32 %v9313_v37, %v9301_v32  ;;  %v9326_v39 = vpop.f32.mrf.mxu3  ;;  %v9302_v44 = vpop.f32.mrf.mxu1  ;;  %v15115_v18 = vld [vmem:[%s15727_s30 + $0x1158] sm:$0xff]  ;;  %v15113_v32 = vld [vmem:[%s15727_s30 + $0x1148] sm:$0xff] }
 0x220   : > { %9565 = vmatpush.bf16.msra.mxu2 %v15094_v19  ;;  %v15123_v19 = vld [vmem:[%s15727_s30 + $0x1198] sm:$0xff]  ;;  %v15120_v44 = vld [vmem:[%s15727_s30 + $0x1180] sm:$0xff] }
 0x221   : > { %9578 = vmatpush.bf16.msra.mxu3 %v15102_v20  ;;  %v9327_v41 = vadd.f32 %v9326_v39, %v9314_v38  ;;  %v15131_v20 = vld [vmem:[%s15727_s30 + $0x11d8] sm:$0xff]  ;;  %v2361_v38 = vld [vmem:[#allocation1 + $0x2d] sm:$0xff] }
 0x222   : > { %9540 = vmatpush.bf16.msra.mxu0 %v15077_v21  ;;  %v2363_v39 = vld [vmem:[#allocation1 + $0x3f] sm:$0xff] }
 0x223   : > { %9553 = vmatpush.bf16.msra.mxu1 %v15085_v22 }
 0x224   : > { %9566 = vmatpush.bf16.msra.mxu2 %v15093_v23 }
 0x225   : > { %9579 = vmatpush.bf16.msra.mxu3 %v15101_v24 }
 0x226   : > { %9541 = vmatpush.bf16.msra.mxu0 %v15076_v27  ;;  %v9315_v51 = vpop.f32.mrf.mxu2  ;;  %v15114_v27 = vld [vmem:[%s15727_s30 + $0x1150] sm:$0xff] }
 0x227   : > { %9554 = vmatpush.bf16.msra.mxu1 %v15084_v28  ;;  %v9328_v52 = vpop.f32.mrf.mxu3  ;;  %v15150_v51 = vld [vmem:[%s15727_s30 + $0x1270] sm:$0xff] }
 0x228   : > { %9567 = vmatpush.bf16.msra.mxu2 %v15092_v30  ;;  %v15130_v30 = vld [vmem:[%s15727_s30 + $0x11d0] sm:$0xff] }
 0x229   : > { %9580 = vmatpush.bf16.msra.mxu3 %v15100_v31  ;;  %v15105_v31 = vld [vmem:[%s15727_s30 + $0x1108] sm:$0xff]  ;;  %v15158_v52 = vld [vmem:[%s15727_s30 + $0x12b0] sm:$0xff] }
 0x22a   : > { %9542 = vmatpush.bf16.msra.mxu0 %v15075_v33  ;;  %v15121_v33 = vld [vmem:[%s15727_s30 + $0x1188] sm:$0xff] }
 0x22b   : > { %9555 = vmatpush.bf16.msra.mxu1 %v15083_v34  ;;  %v15129_v34 = vld [vmem:[%s15727_s30 + $0x11c8] sm:$0xff] }
 0x22c   : > { %9568 = vmatpush.bf16.msra.mxu2 %v15091_v35  ;;  %v2360_v35 = vld [vmem:[#allocation1 + $0x24] sm:$0xff] }
 0x22d   : > { %9581 = vmatpush.bf16.msra.mxu3 %v15099_v36  ;;  %v2362_v36 = vld [vmem:[#allocation1 + $0x36] sm:$0xff] }
 0x22e   : > { %9543 = vmatpush.bf16.msra.mxu0 %v15074_v42  ;;  %v15104_v42 = vld [vmem:[%s15727_s30 + $0x1100] sm:$0xff] }
 0x22f   : > { %9556 = vmatpush.bf16.msra.mxu1 %v15082_v43  ;;  %v15112_v43 = vld [vmem:[%s15727_s30 + $0x1140] sm:$0xff] }
 0x230   : > { %9569 = vmatpush.bf16.msra.mxu2 %v15090_v45  ;;  %v15128_v45 = vld [vmem:[%s15727_s30 + $0x11c0] sm:$0xff] }
 0x231   : > { %9582 = vmatpush.bf16.msra.mxu3 %v15098_v46  ;;  %v15143_v46 = vld [vmem:[%s15727_s30 + $0x1238] sm:$0xff] }
 0x232   : > { %9544 = vmatpush.bf16.msra.mxu0 %v15073_v47  ;;  %v15151_v47 = vld [vmem:[%s15727_s30 + $0x1278] sm:$0xff] }
 0x233   : > { %9557 = vmatpush.bf16.msra.mxu1 %v15081_v48  ;;  %v15159_v48 = vld [vmem:[%s15727_s30 + $0x12b8] sm:$0xff] }
 0x234   : > { %9570 = vmatpush.bf16.msra.mxu2 %v15089_v49  ;;  %v15167_v49 = vld [vmem:[%s15727_s30 + $0x12f8] sm:$0xff] }
 0x235   : > { %9583 = vmatpush.bf16.msra.mxu3 %v15097_v50  ;;  %v15142_v50 = vld [vmem:[%s15727_s30 + $0x1230] sm:$0xff] }
 0x236   : > { %9545 = vmatpush.bf16.msra.mxu0 %v15072_v53  ;;  %v9339_v9 = vpop.f32.mrf.mxu0  ;;  %v15166_v53 = vld [vmem:[%s15727_s30 + $0x12f0] sm:$0xff] }
 0x237   : > { %9558 = vmatpush.bf16.msra.mxu1 %v15080_v54  ;;  %v9340_v10 = vadd.f32 %v9339_v9, %v9327_v41  ;;  %v9352_v13 = vpop.f32.mrf.mxu1  ;;  %v219_v41 = vld [vmem:[%s15717_s22 + $0x48] sm:$0xff] }
 0x238   : > { %9571 = vmatpush.bf16.msra.mxu2 %v15088_v55  ;;  %2365 = vst [vmem:[#allocation1] ss:$9 sm:$0xff] %v219_v41  ;;  %v15141_v54 = vld [vmem:[%s15727_s30 + $0x1228] sm:$0xff] }
 0x239   : > { %9584 = vmatpush.bf16.msra.mxu3 %v15096_v56  ;;  %9546 = vmatmul.bf16.vlgmr.msra.gmra.mxu0 %v2356_v61  ;;  %v9353_v16 = vadd.f32 %v9352_v13, %v9340_v10  ;;  %v15149_v55 = vld [vmem:[%s15727_s30 + $0x1268] sm:$0xff]  ;;  %v15148_v61 = vld [vmem:[%s15727_s30 + $0x1260] sm:$0xff] }
 0x23a   : > { %9590 = vmatpush.bf16.msrb.mxu0 %v15111_v57  ;;  %9559 = vmatmul.bf16.vlgmr.msra.gmra.mxu1 %v2357_v63  ;;  %v15157_v56 = vld [vmem:[%s15727_s30 + $0x12a8] sm:$0xff]  ;;  %v15156_v63 = vld [vmem:[%s15727_s30 + $0x12a0] sm:$0xff] }
 0x23b   : > { %9603 = vmatpush.bf16.msrb.mxu1 %v15119_v58  ;;  %9572 = vmatmul.bf16.vlgmr.msra.gmra.mxu2 %v2358_v62  ;;  %v15165_v57 = vld [vmem:[%s15727_s30 + $0x12e8] sm:$0xff] }
 0x23c   : > { %9616 = vmatpush.bf16.msrb.mxu2 %v15127_v59  ;;  %9585 = vmatmul.bf16.vlgmr.msra.gmra.mxu3 %v2359_v0  ;;  %v15164_v0 = vld [vmem:[%s15727_s30 + $0x12e0] sm:$0xff]  ;;  %v15197_v41 = vld [vmem:[%s15727_s30 + $0x13e8] sm:$0xff] }
 0x23d   : > { %9629 = vmatpush.bf16.msrb.mxu3 %v15135_v60  ;;  %v15140_v60 = vld [vmem:[%s15727_s30 + $0x1220] sm:$0xff] }
 0x23e   : > { %9591 = vmatpush.bf16.msrb.mxu0 %v15110_v1  ;;  %v9365_v21 = vpop.f32.mrf.mxu2  ;;  %v9341_v24 = vpop.f32.mrf.mxu0 }
 0x23f   : > { %9604 = vmatpush.bf16.msrb.mxu1 %v15118_v2  ;;  %v9366_v22 = vadd.f32 %v9365_v21, %v9353_v16  ;;  %v9378_v23 = vpop.f32.mrf.mxu3  ;;  %v9354_v28 = vpop.f32.mrf.mxu1  ;;  %v15139_v2 = vld [vmem:[%s15727_s30 + $0x1218] sm:$0xff]  ;;  %v15137_v16 = vld [vmem:[%s15727_s30 + $0x1208] sm:$0xff]  ;;  %v15152_v24 = vld [vmem:[%s15727_s30 + $0x1280] sm:$0xff] }
 0x240   : > { %9617 = vmatpush.bf16.msrb.mxu2 %v15126_v3  ;;  %v15147_v3 = vld [vmem:[%s15727_s30 + $0x1258] sm:$0xff] }
 0x241   : > { %9630 = vmatpush.bf16.msrb.mxu3 %v15134_v4  ;;  %v16322_v25 = vadd.f32 %v9378_v23, %v9366_v22  ;;  %v15155_v4 = vld [vmem:[%s15727_s30 + $0x1298] sm:$0xff]  ;;  %v15136_v22 = vld [vmem:[%s15727_s30 + $0x1200] sm:$0xff] }
 0x242   : > { %9592 = vmatpush.bf16.msrb.mxu0 %v15109_v5  ;;  %v15163_v5 = vld [vmem:[%s15727_s30 + $0x12d8] sm:$0xff]  ;;  %v15144_v23 = vld [vmem:[%s15727_s30 + $0x1240] sm:$0xff] }
 0x243   : > { %9605 = vmatpush.bf16.msrb.mxu1 %v15117_v6  ;;  %v15191_v28 = vld [vmem:[%s15727_s30 + $0x13b8] sm:$0xff] }
 0x244   : > { %9618 = vmatpush.bf16.msrb.mxu2 %v15125_v7 }
 0x245   : > { %9631 = vmatpush.bf16.msrb.mxu3 %v15133_v8 }
 0x246   : > { %9593 = vmatpush.bf16.msrb.mxu0 %v15108_v11  ;;  %v9367_v37 = vpop.f32.mrf.mxu2  ;;  %v15138_v11 = vld [vmem:[%s15727_s30 + $0x1210] sm:$0xff] }
 0x247   : > { %9606 = vmatpush.bf16.msrb.mxu1 %v15116_v12  ;;  %v9380_v40 = vpop.f32.mrf.mxu3  ;;  %v15146_v12 = vld [vmem:[%s15727_s30 + $0x1250] sm:$0xff] }
 0x248   : > { %9619 = vmatpush.bf16.msrb.mxu2 %v15124_v14  ;;  %v15154_v14 = vld [vmem:[%s15727_s30 + $0x1290] sm:$0xff]  ;;  %v15189_v40 = vld [vmem:[%s15727_s30 + $0x13a8] sm:$0xff] }
 0x249   : > { %9632 = vmatpush.bf16.msrb.mxu3 %v15132_v15  ;;  %v15162_v15 = vld [vmem:[%s15727_s30 + $0x12d0] sm:$0xff] }
 0x24a   : > { %9594 = vmatpush.bf16.msrb.mxu0 %v15107_v17  ;;  %v15145_v17 = vld [vmem:[%s15727_s30 + $0x1248] sm:$0xff]  ;;  %v15198_v37 = vld [vmem:[%s15727_s30 + $0x13f0] sm:$0xff] }
 0x24b   : > { %9607 = vmatpush.bf16.msrb.mxu1 %v15115_v18  ;;  %v15153_v18 = vld [vmem:[%s15727_s30 + $0x1288] sm:$0xff] }
 0x24c   : > { %9620 = vmatpush.bf16.msrb.mxu2 %v15123_v19  ;;  %v15161_v19 = vld [vmem:[%s15727_s30 + $0x12c8] sm:$0xff] }
 0x24d   : > { %9633 = vmatpush.bf16.msrb.mxu3 %v15131_v20 }
 0x24e   : > { %9595 = vmatpush.bf16.msrb.mxu0 %v15106_v26  ;;  %v15175_v26 = vld [vmem:[%s15727_s30 + $0x1338] sm:$0xff] }
 0x24f   : > { %9608 = vmatpush.bf16.msrb.mxu1 %v15114_v27  ;;  %v15183_v27 = vld [vmem:[%s15727_s30 + $0x1378] sm:$0xff] }
 0x250   : > { %9621 = vmatpush.bf16.msrb.mxu2 %v15122_v29  ;;  %v15199_v29 = vld [vmem:[%s15727_s30 + $0x13f8] sm:$0xff] }
 0x251   : > { %9634 = vmatpush.bf16.msrb.mxu3 %v15130_v30  ;;  %v2366_v30 = vld [vmem:[#allocation1] sm:$0xff] }
 0x252   : > { %9596 = vmatpush.bf16.msrb.mxu0 %v15105_v31  ;;  %v2368_v31 = vld [vmem:[#allocation1 + $0x12] sm:$0xff] }
 0x253   : > { %9609 = vmatpush.bf16.msrb.mxu1 %v15113_v32  ;;  %v2367_v32 = vld [vmem:[#allocation1 + $0x9] sm:$0xff] }
 0x254   : > { %9622 = vmatpush.bf16.msrb.mxu2 %v15121_v33  ;;  %v2369_v33 = vld [vmem:[#allocation1 + $0x1b] sm:$0xff] }
 0x255   : > { %9635 = vmatpush.bf16.msrb.mxu3 %v15129_v34  ;;  %v15174_v34 = vld [vmem:[%s15727_s30 + $0x1330] sm:$0xff] }
 0x256   : > { %9597 = vmatpush.bf16.msrb.mxu0 %v15104_v42  ;;  %v9391_v58 = vpop.f32.mrf.mxu0 }
 0x257   : > { %9610 = vmatpush.bf16.msrb.mxu1 %v15112_v43  ;;  %v9392_v59 = vadd.f32 %v9391_v58, %v16322_v25  ;;  %v9404_v62 = vpop.f32.mrf.mxu1  ;;  %v15160_v25 = vld [vmem:[%s15727_s30 + $0x12c0] sm:$0xff] }
 0x258   : > { %9623 = vmatpush.bf16.msrb.mxu2 %v15120_v44  ;;  %v15172_v44 = vld [vmem:[%s15727_s30 + $0x1320] sm:$0xff] }
 0x259   : > { %9636 = vmatpush.bf16.msrb.mxu3 %v15128_v45  ;;  %9598 = vmatmul.bf16.vlgmr.msrb.gmra.mxu0 %v2360_v35  ;;  %v9405_v1 = vadd.f32 %v9404_v62, %v9392_v59  ;;  %v15182_v35 = vld [vmem:[%s15727_s30 + $0x1370] sm:$0xff]  ;;  %v15180_v45 = vld [vmem:[%s15727_s30 + $0x1360] sm:$0xff] }
 0x25a   : > { %9642 = vmatpush.bf16.msra.mxu0 %v15143_v46  ;;  %9611 = vmatmul.bf16.vlgmr.msrb.gmra.mxu1 %v2361_v38  ;;  %v15173_v38 = vld [vmem:[%s15727_s30 + $0x1328] sm:$0xff]  ;;  %v15170_v59 = vld [vmem:[%s15727_s30 + $0x1310] sm:$0xff] }
 0x25b   : > { %9655 = vmatpush.bf16.msra.mxu1 %v15151_v47  ;;  %9624 = vmatmul.bf16.vlgmr.msrb.gmra.mxu2 %v2362_v36  ;;  %v15190_v36 = vld [vmem:[%s15727_s30 + $0x13b0] sm:$0xff]  ;;  %v15188_v47 = vld [vmem:[%s15727_s30 + $0x13a0] sm:$0xff] }
 0x25c   : > { %9668 = vmatpush.bf16.msra.mxu2 %v15159_v48  ;;  %9637 = vmatmul.bf16.vlgmr.msrb.gmra.mxu3 %v2363_v39  ;;  %v15181_v39 = vld [vmem:[%s15727_s30 + $0x1368] sm:$0xff]  ;;  %v15196_v48 = vld [vmem:[%s15727_s30 + $0x13e0] sm:$0xff]  ;;  %v15186_v62 = vld [vmem:[%s15727_s30 + $0x1390] sm:$0xff] }
 0x25d   : > { %9681 = vmatpush.bf16.msra.mxu3 %v15167_v49 }
 0x25e   : > { %9643 = vmatpush.bf16.msra.mxu0 %v15142_v50  ;;  %v9417_v6 = vpop.f32.mrf.mxu2  ;;  %v9393_v9 = vpop.f32.mrf.mxu0  ;;  %v15171_v50 = vld [vmem:[%s15727_s30 + $0x1318] sm:$0xff] }
 0x25f   : > { %9656 = vmatpush.bf16.msra.mxu1 %v15150_v51  ;;  %v9418_v7 = vadd.f32 %v9417_v6, %v9405_v1  ;;  %v9430_v8 = vpop.f32.mrf.mxu3  ;;  %v9406_v13 = vpop.f32.mrf.mxu1  ;;  %v15179_v51 = vld [vmem:[%s15727_s30 + $0x1358] sm:$0xff]  ;;  %v15177_v1 = vld [vmem:[%s15727_s30 + $0x1348] sm:$0xff] }
 0x260   : > { %9669 = vmatpush.bf16.msra.mxu2 %v15158_v52  ;;  %v15187_v52 = vld [vmem:[%s15727_s30 + $0x1398] sm:$0xff]  ;;  %v15184_v13 = vld [vmem:[%s15727_s30 + $0x1380] sm:$0xff] }
 0x261   : > { %9682 = vmatpush.bf16.msra.mxu3 %v15166_v53  ;;  %v9431_v10 = vadd.f32 %v9430_v8, %v9418_v7  ;;  %v15195_v53 = vld [vmem:[%s15727_s30 + $0x13d8] sm:$0xff]  ;;  %v2371_v7 = vld [vmem:[#allocation1 + $0x2d] sm:$0xff] }
 0x262   : > { %9644 = vmatpush.bf16.msra.mxu0 %v15141_v54  ;;  %v2373_v8 = vld [vmem:[#allocation1 + $0x3f] sm:$0xff] }
 0x263   : > { %9657 = vmatpush.bf16.msra.mxu1 %v15149_v55 }
 0x264   : > { %9670 = vmatpush.bf16.msra.mxu2 %v15157_v56 }
 0x265   : > { %9683 = vmatpush.bf16.msra.mxu3 %v15165_v57 }
 0x266   : > { %9645 = vmatpush.bf16.msra.mxu0 %v15140_v60  ;;  %v9419_v20 = vpop.f32.mrf.mxu2  ;;  %v15178_v60 = vld [vmem:[%s15727_s30 + $0x1350] sm:$0xff] }
 0x267   : > { %9658 = vmatpush.bf16.msra.mxu1 %v15148_v61  ;;  %v9432_v21 = vpop.f32.mrf.mxu3  ;;  %v15214_v20 = vld [vmem:[%s15727_s30 + $0x1470] sm:$0xff] }
 0x268   : > { %9671 = vmatpush.bf16.msra.mxu2 %v15156_v63  ;;  %v15194_v63 = vld [vmem:[%s15727_s30 + $0x13d0] sm:$0xff] }
 0x269   : > { %9684 = vmatpush.bf16.msra.mxu3 %v15164_v0  ;;  %v15169_v0 = vld [vmem:[%s15727_s30 + $0x1308] sm:$0xff]  ;;  %v15222_v21 = vld [vmem:[%s15727_s30 + $0x14b0] sm:$0xff] }
 0x26a   : > { %9646 = vmatpush.bf16.msra.mxu0 %v15139_v2  ;;  %v15185_v2 = vld [vmem:[%s15727_s30 + $0x1388] sm:$0xff] }
 0x26b   : > { %9659 = vmatpush.bf16.msra.mxu1 %v15147_v3  ;;  %v15193_v3 = vld [vmem:[%s15727_s30 + $0x13c8] sm:$0xff] }
 0x26c   : > { %9672 = vmatpush.bf16.msra.mxu2 %v15155_v4  ;;  %v2370_v4 = vld [vmem:[#allocation1 + $0x24] sm:$0xff] }
 0x26d   : > { %9685 = vmatpush.bf16.msra.mxu3 %v15163_v5  ;;  %v2372_v5 = vld [vmem:[#allocation1 + $0x36] sm:$0xff] }
 0x26e   : > { %9647 = vmatpush.bf16.msra.mxu0 %v15138_v11  ;;  %v15168_v11 = vld [vmem:[%s15727_s30 + $0x1300] sm:$0xff] }
 0x26f   : > { %9660 = vmatpush.bf16.msra.mxu1 %v15146_v12  ;;  %v15176_v12 = vld [vmem:[%s15727_s30 + $0x1340] sm:$0xff] }
 0x270   : > { %9673 = vmatpush.bf16.msra.mxu2 %v15154_v14  ;;  %v15192_v14 = vld [vmem:[%s15727_s30 + $0x13c0] sm:$0xff] }
 0x271   : > { %9686 = vmatpush.bf16.msra.mxu3 %v15162_v15  ;;  %v15207_v15 = vld [vmem:[%s15727_s30 + $0x1438] sm:$0xff] }
 0x272   : > { %9648 = vmatpush.bf16.msra.mxu0 %v15137_v16  ;;  %v15215_v16 = vld [vmem:[%s15727_s30 + $0x1478] sm:$0xff] }
 0x273   : > { %9661 = vmatpush.bf16.msra.mxu1 %v15145_v17  ;;  %v15223_v17 = vld [vmem:[%s15727_s30 + $0x14b8] sm:$0xff] }
 0x274   : > { %9674 = vmatpush.bf16.msra.mxu2 %v15153_v18  ;;  %v15231_v18 = vld [vmem:[%s15727_s30 + $0x14f8] sm:$0xff] }
 0x275   : > { %9687 = vmatpush.bf16.msra.mxu3 %v15161_v19  ;;  %v15206_v19 = vld [vmem:[%s15727_s30 + $0x1430] sm:$0xff] }
 0x276   : > { %9649 = vmatpush.bf16.msra.mxu0 %v15136_v22  ;;  %v9443_v42 = vpop.f32.mrf.mxu0  ;;  %v15230_v22 = vld [vmem:[%s15727_s30 + $0x14f0] sm:$0xff] }
 0x277   : > { %9662 = vmatpush.bf16.msra.mxu1 %v15144_v23  ;;  %v9444_v43 = vadd.f32 %v9443_v42, %v9431_v10  ;;  %v9456_v46 = vpop.f32.mrf.mxu1  ;;  %v220_v10 = vld [vmem:[%s15717_s22 + $0x50] sm:$0xff]  ;;  %v15205_v23 = vld [vmem:[%s15727_s30 + $0x1428] sm:$0xff] }
 0x278   : > { %9675 = vmatpush.bf16.msra.mxu2 %v15152_v24  ;;  %2375 = vst [vmem:[#allocation1] ss:$9 sm:$0xff] %v220_v10  ;;  %v15213_v24 = vld [vmem:[%s15727_s30 + $0x1468] sm:$0xff] }
 0x279   : > { %9688 = vmatpush.bf16.msra.mxu3 %v15160_v25  ;;  %9650 = vmatmul.bf16.vlgmr.msra.gmra.mxu0 %v2366_v30  ;;  %v9457_v49 = vadd.f32 %v9456_v46, %v9444_v43  ;;  %v15221_v25 = vld [vmem:[%s15727_s30 + $0x14a8] sm:$0xff]  ;;  %v15212_v30 = vld [vmem:[%s15727_s30 + $0x1460] sm:$0xff] }
 0x27a   : > { %9694 = vmatpush.bf16.msrb.mxu0 %v15175_v26  ;;  %9663 = vmatmul.bf16.vlgmr.msra.gmra.mxu1 %v2367_v32  ;;  %v15229_v26 = vld [vmem:[%s15727_s30 + $0x14e8] sm:$0xff]  ;;  %v15220_v32 = vld [vmem:[%s15727_s30 + $0x14a0] sm:$0xff] }
 0x27b   : > { %9707 = vmatpush.bf16.msrb.mxu1 %v15183_v27  ;;  %9676 = vmatmul.bf16.vlgmr.msra.gmra.mxu2 %v2368_v31  ;;  %v15261_v10 = vld [vmem:[%s15727_s30 + $0x15e8] sm:$0xff] }
 0x27c   : > { %9720 = vmatpush.bf16.msrb.mxu2 %v15191_v28  ;;  %9689 = vmatmul.bf16.vlgmr.msra.gmra.mxu3 %v2369_v33  ;;  %v15228_v33 = vld [vmem:[%s15727_s30 + $0x14e0] sm:$0xff] }
 0x27d   : > { %9733 = vmatpush.bf16.msrb.mxu3 %v15199_v29  ;;  %v15204_v29 = vld [vmem:[%s15727_s30 + $0x1420] sm:$0xff] }
 0x27e   : > { %9695 = vmatpush.bf16.msrb.mxu0 %v15174_v34  ;;  %v9469_v54 = vpop.f32.mrf.mxu2  ;;  %v9445_v57 = vpop.f32.mrf.mxu0 }
 0x27f   : > { %9708 = vmatpush.bf16.msrb.mxu1 %v15182_v35  ;;  %v9470_v55 = vadd.f32 %v9469_v54, %v9457_v49  ;;  %v9482_v56 = vpop.f32.mrf.mxu3  ;;  %v9458_v61 = vpop.f32.mrf.mxu1  ;;  %v15203_v35 = vld [vmem:[%s15727_s30 + $0x1418] sm:$0xff]  ;;  %v15201_v49 = vld [vmem:[%s15727_s30 + $0x1408] sm:$0xff]  ;;  %v15216_v57 = vld [vmem:[%s15727_s30 + $0x1480] sm:$0xff] }
 0x280   : > { %9721 = vmatpush.bf16.msrb.mxu2 %v15190_v36  ;;  %v15211_v36 = vld [vmem:[%s15727_s30 + $0x1458] sm:$0xff] }
 0x281   : > { %9734 = vmatpush.bf16.msrb.mxu3 %v15198_v37  ;;  %v16390_v58 = vadd.f32 %v9482_v56, %v9470_v55  ;;  %v15219_v37 = vld [vmem:[%s15727_s30 + $0x1498] sm:$0xff]  ;;  %v15200_v55 = vld [vmem:[%s15727_s30 + $0x1400] sm:$0xff] }
 0x282   : > { %9696 = vmatpush.bf16.msrb.mxu0 %v15173_v38  ;;  %v15227_v38 = vld [vmem:[%s15727_s30 + $0x14d8] sm:$0xff]  ;;  %v15208_v56 = vld [vmem:[%s15727_s30 + $0x1440] sm:$0xff] }
 0x283   : > { %9709 = vmatpush.bf16.msrb.mxu1 %v15181_v39  ;;  %v15255_v61 = vld [vmem:[%s15727_s30 + $0x15b8] sm:$0xff] }
 0x284   : > { %9722 = vmatpush.bf16.msrb.mxu2 %v15189_v40 }
 0x285   : > { %9735 = vmatpush.bf16.msrb.mxu3 %v15197_v41 }
 0x286   : > { %9697 = vmatpush.bf16.msrb.mxu0 %v15172_v44  ;;  %v9471_v6 = vpop.f32.mrf.mxu2  ;;  %v15202_v44 = vld [vmem:[%s15727_s30 + $0x1410] sm:$0xff] }
 0x287   : > { %9710 = vmatpush.bf16.msrb.mxu1 %v15180_v45  ;;  %v9484_v9 = vpop.f32.mrf.mxu3  ;;  %v15210_v45 = vld [vmem:[%s15727_s30 + $0x1450] sm:$0xff] }
 0x288   : > { %9723 = vmatpush.bf16.msrb.mxu2 %v15188_v47  ;;  %v15218_v47 = vld [vmem:[%s15727_s30 + $0x1490] sm:$0xff]  ;;  %v15253_v9 = vld [vmem:[%s15727_s30 + $0x15a8] sm:$0xff] }
 0x289   : > { %9736 = vmatpush.bf16.msrb.mxu3 %v15196_v48  ;;  %v15226_v48 = vld [vmem:[%s15727_s30 + $0x14d0] sm:$0xff] }
 0x28a   : > { %9698 = vmatpush.bf16.msrb.mxu0 %v15171_v50  ;;  %v15209_v50 = vld [vmem:[%s15727_s30 + $0x1448] sm:$0xff]  ;;  %v15262_v6 = vld [vmem:[%s15727_s30 + $0x15f0] sm:$0xff] }
 0x28b   : > { %9711 = vmatpush.bf16.msrb.mxu1 %v15179_v51  ;;  %v15217_v51 = vld [vmem:[%s15727_s30 + $0x1488] sm:$0xff] }
 0x28c   : > { %9724 = vmatpush.bf16.msrb.mxu2 %v15187_v52  ;;  %v15225_v52 = vld [vmem:[%s15727_s30 + $0x14c8] sm:$0xff] }
 0x28d   : > { %9737 = vmatpush.bf16.msrb.mxu3 %v15195_v53 }
 0x28e   : > { %9699 = vmatpush.bf16.msrb.mxu0 %v15170_v59  ;;  %v15239_v59 = vld [vmem:[%s15727_s30 + $0x1538] sm:$0xff] }
 0x28f   : > { %9712 = vmatpush.bf16.msrb.mxu1 %v15178_v60  ;;  %v15247_v60 = vld [vmem:[%s15727_s30 + $0x1578] sm:$0xff] }
 0x290   : > { %9725 = vmatpush.bf16.msrb.mxu2 %v15186_v62  ;;  %v15263_v62 = vld [vmem:[%s15727_s30 + $0x15f8] sm:$0xff] }
 0x291   : > { %9738 = vmatpush.bf16.msrb.mxu3 %v15194_v63  ;;  %v2376_v63 = vld [vmem:[#allocation1] sm:$0xff] }
 0x292   : > { %9700 = vmatpush.bf16.msrb.mxu0 %v15169_v0  ;;  %v2378_v0 = vld [vmem:[#allocation1 + $0x12] sm:$0xff] }
 0x293   : > { %9713 = vmatpush.bf16.msrb.mxu1 %v15177_v1  ;;  %v2377_v1 = vld [vmem:[#allocation1 + $0x9] sm:$0xff] }
 0x294   : > { %9726 = vmatpush.bf16.msrb.mxu2 %v15185_v2  ;;  %v2379_v2 = vld [vmem:[#allocation1 + $0x1b] sm:$0xff] }
 0x295   : > { %9739 = vmatpush.bf16.msrb.mxu3 %v15193_v3  ;;  %v15238_v3 = vld [vmem:[%s15727_s30 + $0x1530] sm:$0xff] }
 0x296   : > { %9701 = vmatpush.bf16.msrb.mxu0 %v15168_v11  ;;  %v9495_v27 = vpop.f32.mrf.mxu0 }
 0x297   : > { %9714 = vmatpush.bf16.msrb.mxu1 %v15176_v12  ;;  %v9496_v28 = vadd.f32 %v9495_v27, %v16390_v58  ;;  %v9508_v31 = vpop.f32.mrf.mxu1  ;;  %v15224_v58 = vld [vmem:[%s15727_s30 + $0x14c0] sm:$0xff] }
 0x298   : > { %9727 = vmatpush.bf16.msrb.mxu2 %v15184_v13  ;;  %v15236_v13 = vld [vmem:[%s15727_s30 + $0x1520] sm:$0xff] }
 0x299   : > { %9740 = vmatpush.bf16.msrb.mxu3 %v15192_v14  ;;  %9702 = vmatmul.bf16.vlgmr.msrb.gmra.mxu0 %v2370_v4  ;;  %v9509_v34 = vadd.f32 %v9508_v31, %v9496_v28  ;;  %v15246_v4 = vld [vmem:[%s15727_s30 + $0x1570] sm:$0xff]  ;;  %v15244_v14 = vld [vmem:[%s15727_s30 + $0x1560] sm:$0xff] }
 0x29a   : > { %9746 = vmatpush.bf16.msra.mxu0 %v15207_v15  ;;  %9715 = vmatmul.bf16.vlgmr.msrb.gmra.mxu1 %v2371_v7  ;;  %v15237_v7 = vld [vmem:[%s15727_s30 + $0x1528] sm:$0xff]  ;;  %v15234_v28 = vld [vmem:[%s15727_s30 + $0x1510] sm:$0xff] }
 0x29b   : > { %9759 = vmatpush.bf16.msra.mxu1 %v15215_v16  ;;  %9728 = vmatmul.bf16.vlgmr.msrb.gmra.mxu2 %v2372_v5  ;;  %v15254_v5 = vld [vmem:[%s15727_s30 + $0x15b0] sm:$0xff]  ;;  %v15252_v16 = vld [vmem:[%s15727_s30 + $0x15a0] sm:$0xff] }
 0x29c   : > { %9772 = vmatpush.bf16.msra.mxu2 %v15223_v17  ;;  %9741 = vmatmul.bf16.vlgmr.msrb.gmra.mxu3 %v2373_v8  ;;  %v15245_v8 = vld [vmem:[%s15727_s30 + $0x1568] sm:$0xff]  ;;  %v15260_v17 = vld [vmem:[%s15727_s30 + $0x15e0] sm:$0xff]  ;;  %v15250_v31 = vld [vmem:[%s15727_s30 + $0x1590] sm:$0xff] }
 0x29d   : > { %9785 = vmatpush.bf16.msra.mxu3 %v15231_v18 }
 0x29e   : > { %9747 = vmatpush.bf16.msra.mxu0 %v15206_v19  ;;  %v9521_v39 = vpop.f32.mrf.mxu2  ;;  %v9497_v42 = vpop.f32.mrf.mxu0  ;;  %v15235_v19 = vld [vmem:[%s15727_s30 + $0x1518] sm:$0xff] }
 0x29f   : > { %9760 = vmatpush.bf16.msra.mxu1 %v15214_v20  ;;  %v9522_v40 = vadd.f32 %v9521_v39, %v9509_v34  ;;  %v9534_v41 = vpop.f32.mrf.mxu3  ;;  %v9510_v46 = vpop.f32.mrf.mxu1  ;;  %v15243_v20 = vld [vmem:[%s15727_s30 + $0x1558] sm:$0xff]  ;;  %v15241_v34 = vld [vmem:[%s15727_s30 + $0x1548] sm:$0xff] }
 0x2a0   : > { %9773 = vmatpush.bf16.msra.mxu2 %v15222_v21  ;;  %v15251_v21 = vld [vmem:[%s15727_s30 + $0x1598] sm:$0xff]  ;;  %v15248_v46 = vld [vmem:[%s15727_s30 + $0x1580] sm:$0xff] }
 0x2a1   : > { %9786 = vmatpush.bf16.msra.mxu3 %v15230_v22  ;;  %v9535_v43 = vadd.f32 %v9534_v41, %v9522_v40  ;;  %v15259_v22 = vld [vmem:[%s15727_s30 + $0x15d8] sm:$0xff]  ;;  %v2381_v40 = vld [vmem:[#allocation1 + $0x2d] sm:$0xff] }
 0x2a2   : > { %9748 = vmatpush.bf16.msra.mxu0 %v15205_v23  ;;  %v2383_v41 = vld [vmem:[#allocation1 + $0x3f] sm:$0xff] }
 0x2a3   : > { %9761 = vmatpush.bf16.msra.mxu1 %v15213_v24 }
 0x2a4   : > { %9774 = vmatpush.bf16.msra.mxu2 %v15221_v25 }
 0x2a5   : > { %9787 = vmatpush.bf16.msra.mxu3 %v15229_v26 }
 0x2a6   : > { %9749 = vmatpush.bf16.msra.mxu0 %v15204_v29  ;;  %v9523_v53 = vpop.f32.mrf.mxu2  ;;  %v15242_v29 = vld [vmem:[%s15727_s30 + $0x1550] sm:$0xff] }
 0x2a7   : > { %9762 = vmatpush.bf16.msra.mxu1 %v15212_v30  ;;  %v9536_v54 = vpop.f32.mrf.mxu3  ;;  %v15278_v53 = vld [vmem:[%s15727_s30 + $0x1670] sm:$0xff] }
 0x2a8   : > { %9775 = vmatpush.bf16.msra.mxu2 %v15220_v32  ;;  %v15258_v32 = vld [vmem:[%s15727_s30 + $0x15d0] sm:$0xff] }
 0x2a9   : > { %9788 = vmatpush.bf16.msra.mxu3 %v15228_v33  ;;  %v15233_v33 = vld [vmem:[%s15727_s30 + $0x1508] sm:$0xff]  ;;  %v15286_v54 = vld [vmem:[%s15727_s30 + $0x16b0] sm:$0xff] }
 0x2aa   : > { %9750 = vmatpush.bf16.msra.mxu0 %v15203_v35  ;;  %v15249_v35 = vld [vmem:[%s15727_s30 + $0x1588] sm:$0xff] }
 0x2ab   : > { %9763 = vmatpush.bf16.msra.mxu1 %v15211_v36  ;;  %v15257_v36 = vld [vmem:[%s15727_s30 + $0x15c8] sm:$0xff] }
 0x2ac   : > { %9776 = vmatpush.bf16.msra.mxu2 %v15219_v37  ;;  %v2380_v37 = vld [vmem:[#allocation1 + $0x24] sm:$0xff] }
 0x2ad   : > { %9789 = vmatpush.bf16.msra.mxu3 %v15227_v38  ;;  %v2382_v38 = vld [vmem:[#allocation1 + $0x36] sm:$0xff] }
 0x2ae   : > { %9751 = vmatpush.bf16.msra.mxu0 %v15202_v44  ;;  %v15232_v44 = vld [vmem:[%s15727_s30 + $0x1500] sm:$0xff] }
 0x2af   : > { %9764 = vmatpush.bf16.msra.mxu1 %v15210_v45  ;;  %v15240_v45 = vld [vmem:[%s15727_s30 + $0x1540] sm:$0xff] }
 0x2b0   : > { %9777 = vmatpush.bf16.msra.mxu2 %v15218_v47  ;;  %v15256_v47 = vld [vmem:[%s15727_s30 + $0x15c0] sm:$0xff] }
 0x2b1   : > { %9790 = vmatpush.bf16.msra.mxu3 %v15226_v48  ;;  %v15271_v48 = vld [vmem:[%s15727_s30 + $0x1638] sm:$0xff] }
 0x2b2   : > { %9752 = vmatpush.bf16.msra.mxu0 %v15201_v49  ;;  %v15279_v49 = vld [vmem:[%s15727_s30 + $0x1678] sm:$0xff] }
 0x2b3   : > { %9765 = vmatpush.bf16.msra.mxu1 %v15209_v50  ;;  %v15287_v50 = vld [vmem:[%s15727_s30 + $0x16b8] sm:$0xff] }
 0x2b4   : > { %9778 = vmatpush.bf16.msra.mxu2 %v15217_v51  ;;  %v15295_v51 = vld [vmem:[%s15727_s30 + $0x16f8] sm:$0xff] }
 0x2b5   : > { %9791 = vmatpush.bf16.msra.mxu3 %v15225_v52  ;;  %v15270_v52 = vld [vmem:[%s15727_s30 + $0x1630] sm:$0xff] }
 0x2b6   : > { %9753 = vmatpush.bf16.msra.mxu0 %v15200_v55  ;;  %v9547_v11 = vpop.f32.mrf.mxu0  ;;  %v15294_v55 = vld [vmem:[%s15727_s30 + $0x16f0] sm:$0xff] }
 0x2b7   : > { %9766 = vmatpush.bf16.msra.mxu1 %v15208_v56  ;;  %v9548_v12 = vadd.f32 %v9547_v11, %v9535_v43  ;;  %v9560_v15 = vpop.f32.mrf.mxu1  ;;  %v221_v43 = vld [vmem:[%s15717_s22 + $0x58] sm:$0xff]  ;;  %v15269_v56 = vld [vmem:[%s15727_s30 + $0x1628] sm:$0xff] }
 0x2b8   : > { %9779 = vmatpush.bf16.msra.mxu2 %v15216_v57  ;;  %2385 = vst [vmem:[#allocation1] ss:$9 sm:$0xff] %v221_v43  ;;  %v15277_v57 = vld [vmem:[%s15727_s30 + $0x1668] sm:$0xff] }
 0x2b9   : > { %9792 = vmatpush.bf16.msra.mxu3 %v15224_v58  ;;  %9754 = vmatmul.bf16.vlgmr.msra.gmra.mxu0 %v2376_v63  ;;  %v9561_v18 = vadd.f32 %v9560_v15, %v9548_v12  ;;  %v15285_v58 = vld [vmem:[%s15727_s30 + $0x16a8] sm:$0xff]  ;;  %v15276_v63 = vld [vmem:[%s15727_s30 + $0x1660] sm:$0xff] }
 0x2ba   : > { %9798 = vmatpush.bf16.msrb.mxu0 %v15239_v59  ;;  %9767 = vmatmul.bf16.vlgmr.msra.gmra.mxu1 %v2377_v1  ;;  %v15293_v59 = vld [vmem:[%s15727_s30 + $0x16e8] sm:$0xff]  ;;  %v15284_v1 = vld [vmem:[%s15727_s30 + $0x16a0] sm:$0xff] }
 0x2bb   : > { %9811 = vmatpush.bf16.msrb.mxu1 %v15247_v60  ;;  %9780 = vmatmul.bf16.vlgmr.msra.gmra.mxu2 %v2378_v0  ;;  %v15325_v43 = vld [vmem:[%s15727_s30 + $0x17e8] sm:$0xff] }
 0x2bc   : > { %9824 = vmatpush.bf16.msrb.mxu2 %v15255_v61  ;;  %9793 = vmatmul.bf16.vlgmr.msra.gmra.mxu3 %v2379_v2  ;;  %v15292_v2 = vld [vmem:[%s15727_s30 + $0x16e0] sm:$0xff] }
 0x2bd   : > { %9837 = vmatpush.bf16.msrb.mxu3 %v15263_v62  ;;  %v15268_v62 = vld [vmem:[%s15727_s30 + $0x1620] sm:$0xff] }
 0x2be   : > { %9799 = vmatpush.bf16.msrb.mxu0 %v15238_v3  ;;  %v9573_v23 = vpop.f32.mrf.mxu2  ;;  %v9549_v26 = vpop.f32.mrf.mxu0 }
 0x2bf   : > { %9812 = vmatpush.bf16.msrb.mxu1 %v15246_v4  ;;  %v9574_v24 = vadd.f32 %v9573_v23, %v9561_v18  ;;  %v9586_v25 = vpop.f32.mrf.mxu3  ;;  %v9562_v30 = vpop.f32.mrf.mxu1  ;;  %v15267_v4 = vld [vmem:[%s15727_s30 + $0x1618] sm:$0xff]  ;;  %v15265_v18 = vld [vmem:[%s15727_s30 + $0x1608] sm:$0xff]  ;;  %v15280_v26 = vld [vmem:[%s15727_s30 + $0x1680] sm:$0xff] }
 0x2c0   : > { %9825 = vmatpush.bf16.msrb.mxu2 %v15254_v5  ;;  %v15275_v5 = vld [vmem:[%s15727_s30 + $0x1658] sm:$0xff] }
 0x2c1   : > { %9838 = vmatpush.bf16.msrb.mxu3 %v15262_v6  ;;  %v16458_v27 = vadd.f32 %v9586_v25, %v9574_v24  ;;  %v15283_v6 = vld [vmem:[%s15727_s30 + $0x1698] sm:$0xff]  ;;  %v15264_v24 = vld [vmem:[%s15727_s30 + $0x1600] sm:$0xff] }
 0x2c2   : > { %9800 = vmatpush.bf16.msrb.mxu0 %v15237_v7  ;;  %v15291_v7 = vld [vmem:[%s15727_s30 + $0x16d8] sm:$0xff]  ;;  %v15272_v25 = vld [vmem:[%s15727_s30 + $0x1640] sm:$0xff] }
 0x2c3   : > { %9813 = vmatpush.bf16.msrb.mxu1 %v15245_v8  ;;  %v15319_v30 = vld [vmem:[%s15727_s30 + $0x17b8] sm:$0xff] }
 0x2c4   : > { %9826 = vmatpush.bf16.msrb.mxu2 %v15253_v9 }
 0x2c5   : > { %9839 = vmatpush.bf16.msrb.mxu3 %v15261_v10 }
 0x2c6   : > { %9801 = vmatpush.bf16.msrb.mxu0 %v15236_v13  ;;  %v9575_v39 = vpop.f32.mrf.mxu2  ;;  %v15266_v13 = vld [vmem:[%s15727_s30 + $0x1610] sm:$0xff] }
 0x2c7   : > { %9814 = vmatpush.bf16.msrb.mxu1 %v15244_v14  ;;  %v9588_v42 = vpop.f32.mrf.mxu3  ;;  %v15274_v14 = vld [vmem:[%s15727_s30 + $0x1650] sm:$0xff] }
 0x2c8   : > { %9827 = vmatpush.bf16.msrb.mxu2 %v15252_v16  ;;  %v15282_v16 = vld [vmem:[%s15727_s30 + $0x1690] sm:$0xff]  ;;  %v15317_v42 = vld [vmem:[%s15727_s30 + $0x17a8] sm:$0xff] }
 0x2c9   : > { %9840 = vmatpush.bf16.msrb.mxu3 %v15260_v17  ;;  %v15290_v17 = vld [vmem:[%s15727_s30 + $0x16d0] sm:$0xff] }
 0x2ca   : > { %9802 = vmatpush.bf16.msrb.mxu0 %v15235_v19  ;;  %v15273_v19 = vld [vmem:[%s15727_s30 + $0x1648] sm:$0xff]  ;;  %v15326_v39 = vld [vmem:[%s15727_s30 + $0x17f0] sm:$0xff] }
 0x2cb   : > { %9815 = vmatpush.bf16.msrb.mxu1 %v15243_v20  ;;  %v15281_v20 = vld [vmem:[%s15727_s30 + $0x1688] sm:$0xff] }
 0x2cc   : > { %9828 = vmatpush.bf16.msrb.mxu2 %v15251_v21  ;;  %v15289_v21 = vld [vmem:[%s15727_s30 + $0x16c8] sm:$0xff] }
 0x2cd   : > { %9841 = vmatpush.bf16.msrb.mxu3 %v15259_v22 }
 0x2ce   : > { %9803 = vmatpush.bf16.msrb.mxu0 %v15234_v28  ;;  %v15303_v28 = vld [vmem:[%s15727_s30 + $0x1738] sm:$0xff] }
 0x2cf   : > { %9816 = vmatpush.bf16.msrb.mxu1 %v15242_v29  ;;  %v15311_v29 = vld [vmem:[%s15727_s30 + $0x1778] sm:$0xff] }
 0x2d0   : > { %9829 = vmatpush.bf16.msrb.mxu2 %v15250_v31  ;;  %v15327_v31 = vld [vmem:[%s15727_s30 + $0x17f8] sm:$0xff] }
 0x2d1   : > { %9842 = vmatpush.bf16.msrb.mxu3 %v15258_v32  ;;  %v2386_v32 = vld [vmem:[#allocation1] sm:$0xff] }
 0x2d2   : > { %9804 = vmatpush.bf16.msrb.mxu0 %v15233_v33  ;;  %v2388_v33 = vld [vmem:[#allocation1 + $0x12] sm:$0xff] }
 0x2d3   : > { %9817 = vmatpush.bf16.msrb.mxu1 %v15241_v34  ;;  %v2387_v34 = vld [vmem:[#allocation1 + $0x9] sm:$0xff] }
 0x2d4   : > { %9830 = vmatpush.bf16.msrb.mxu2 %v15249_v35  ;;  %v2389_v35 = vld [vmem:[#allocation1 + $0x1b] sm:$0xff] }
 0x2d5   : > { %9843 = vmatpush.bf16.msrb.mxu3 %v15257_v36  ;;  %v15302_v36 = vld [vmem:[%s15727_s30 + $0x1730] sm:$0xff] }
 0x2d6   : > { %9805 = vmatpush.bf16.msrb.mxu0 %v15232_v44  ;;  %v9599_v60 = vpop.f32.mrf.mxu0 }
 0x2d7   : > { %9818 = vmatpush.bf16.msrb.mxu1 %v15240_v45  ;;  %v9600_v61 = vadd.f32 %v9599_v60, %v16458_v27  ;;  %v9612_v0 = vpop.f32.mrf.mxu1  ;;  %v15288_v27 = vld [vmem:[%s15727_s30 + $0x16c0] sm:$0xff] }
 0x2d8   : > { %9831 = vmatpush.bf16.msrb.mxu2 %v15248_v46  ;;  %v15300_v46 = vld [vmem:[%s15727_s30 + $0x1720] sm:$0xff] }
 0x2d9   : > { %9844 = vmatpush.bf16.msrb.mxu3 %v15256_v47  ;;  %9806 = vmatmul.bf16.vlgmr.msrb.gmra.mxu0 %v2380_v37  ;;  %v9613_v3 = vadd.f32 %v9612_v0, %v9600_v61  ;;  %v15310_v37 = vld [vmem:[%s15727_s30 + $0x1770] sm:$0xff]  ;;  %v15308_v47 = vld [vmem:[%s15727_s30 + $0x1760] sm:$0xff] }
 0x2da   : > { %9850 = vmatpush.bf16.msra.mxu0 %v15271_v48  ;;  %9819 = vmatmul.bf16.vlgmr.msrb.gmra.mxu1 %v2381_v40  ;;  %v15301_v40 = vld [vmem:[%s15727_s30 + $0x1728] sm:$0xff]  ;;  %v15298_v61 = vld [vmem:[%s15727_s30 + $0x1710] sm:$0xff] }
 0x2db   : > { %9863 = vmatpush.bf16.msra.mxu1 %v15279_v49  ;;  %9832 = vmatmul.bf16.vlgmr.msrb.gmra.mxu2 %v2382_v38  ;;  %v15318_v38 = vld [vmem:[%s15727_s30 + $0x17b0] sm:$0xff]  ;;  %v15316_v49 = vld [vmem:[%s15727_s30 + $0x17a0] sm:$0xff] }
 0x2dc   : > { %9876 = vmatpush.bf16.msra.mxu2 %v15287_v50  ;;  %9845 = vmatmul.bf16.vlgmr.msrb.gmra.mxu3 %v2383_v41  ;;  %v15309_v41 = vld [vmem:[%s15727_s30 + $0x1768] sm:$0xff]  ;;  %v15324_v50 = vld [vmem:[%s15727_s30 + $0x17e0] sm:$0xff]  ;;  %v15314_v0 = vld [vmem:[%s15727_s30 + $0x1790] sm:$0xff] }
 0x2dd   : > { %9889 = vmatpush.bf16.msra.mxu3 %v15295_v51 }
 0x2de   : > { %9851 = vmatpush.bf16.msra.mxu0 %v15270_v52  ;;  %v9625_v8 = vpop.f32.mrf.mxu2  ;;  %v9601_v11 = vpop.f32.mrf.mxu0  ;;  %v15299_v52 = vld [vmem:[%s15727_s30 + $0x1718] sm:$0xff] }
 0x2df   : > { %9864 = vmatpush.bf16.msra.mxu1 %v15278_v53  ;;  %v9626_v9 = vadd.f32 %v9625_v8, %v9613_v3  ;;  %v9638_v10 = vpop.f32.mrf.mxu3  ;;  %v9614_v15 = vpop.f32.mrf.mxu1  ;;  %v15307_v53 = vld [vmem:[%s15727_s30 + $0x1758] sm:$0xff]  ;;  %v15305_v3 = vld [vmem:[%s15727_s30 + $0x1748] sm:$0xff] }
 0x2e0   : > { %9877 = vmatpush.bf16.msra.mxu2 %v15286_v54  ;;  %v15315_v54 = vld [vmem:[%s15727_s30 + $0x1798] sm:$0xff]  ;;  %v15312_v15 = vld [vmem:[%s15727_s30 + $0x1780] sm:$0xff] }
 0x2e1   : > { %9890 = vmatpush.bf16.msra.mxu3 %v15294_v55  ;;  %v9639_v12 = vadd.f32 %v9638_v10, %v9626_v9  ;;  %v15323_v55 = vld [vmem:[%s15727_s30 + $0x17d8] sm:$0xff]  ;;  %v2391_v9 = vld [vmem:[#allocation1 + $0x2d] sm:$0xff] }
 0x2e2   : > { %9852 = vmatpush.bf16.msra.mxu0 %v15269_v56  ;;  %v2393_v10 = vld [vmem:[#allocation1 + $0x3f] sm:$0xff] }
 0x2e3   : > { %9865 = vmatpush.bf16.msra.mxu1 %v15277_v57 }
 0x2e4   : > { %9878 = vmatpush.bf16.msra.mxu2 %v15285_v58 }
 0x2e5   : > { %9891 = vmatpush.bf16.msra.mxu3 %v15293_v59 }
 0x2e6   : > { %9853 = vmatpush.bf16.msra.mxu0 %v15268_v62  ;;  %v9627_v22 = vpop.f32.mrf.mxu2  ;;  %v15306_v62 = vld [vmem:[%s15727_s30 + $0x1750] sm:$0xff] }
 0x2e7   : > { %9866 = vmatpush.bf16.msra.mxu1 %v15276_v63  ;;  %v9640_v23 = vpop.f32.mrf.mxu3  ;;  %v15342_v22 = vld [vmem:[%s15727_s30 + $0x1870] sm:$0xff] }
 0x2e8   : > { %9879 = vmatpush.bf16.msra.mxu2 %v15284_v1  ;;  %v15322_v1 = vld [vmem:[%s15727_s30 + $0x17d0] sm:$0xff] }
 0x2e9   : > { %9892 = vmatpush.bf16.msra.mxu3 %v15292_v2  ;;  %v15297_v2 = vld [vmem:[%s15727_s30 + $0x1708] sm:$0xff]  ;;  %v15350_v23 = vld [vmem:[%s15727_s30 + $0x18b0] sm:$0xff] }
 0x2ea   : > { %9854 = vmatpush.bf16.msra.mxu0 %v15267_v4  ;;  %v15313_v4 = vld [vmem:[%s15727_s30 + $0x1788] sm:$0xff] }
 0x2eb   : > { %9867 = vmatpush.bf16.msra.mxu1 %v15275_v5  ;;  %v15321_v5 = vld [vmem:[%s15727_s30 + $0x17c8] sm:$0xff] }
 0x2ec   : > { %9880 = vmatpush.bf16.msra.mxu2 %v15283_v6  ;;  %v2390_v6 = vld [vmem:[#allocation1 + $0x24] sm:$0xff] }
 0x2ed   : > { %9893 = vmatpush.bf16.msra.mxu3 %v15291_v7  ;;  %v2392_v7 = vld [vmem:[#allocation1 + $0x36] sm:$0xff] }
 0x2ee   : > { %9855 = vmatpush.bf16.msra.mxu0 %v15266_v13  ;;  %v15296_v13 = vld [vmem:[%s15727_s30 + $0x1700] sm:$0xff] }
 0x2ef   : > { %9868 = vmatpush.bf16.msra.mxu1 %v15274_v14  ;;  %v15304_v14 = vld [vmem:[%s15727_s30 + $0x1740] sm:$0xff] }
 0x2f0   : > { %9881 = vmatpush.bf16.msra.mxu2 %v15282_v16  ;;  %v15320_v16 = vld [vmem:[%s15727_s30 + $0x17c0] sm:$0xff] }
 0x2f1   : > { %9894 = vmatpush.bf16.msra.mxu3 %v15290_v17  ;;  %v15335_v17 = vld [vmem:[%s15727_s30 + $0x1838] sm:$0xff] }
 0x2f2   : > { %9856 = vmatpush.bf16.msra.mxu0 %v15265_v18  ;;  %v15343_v18 = vld [vmem:[%s15727_s30 + $0x1878] sm:$0xff] }
 0x2f3   : > { %9869 = vmatpush.bf16.msra.mxu1 %v15273_v19  ;;  %v15351_v19 = vld [vmem:[%s15727_s30 + $0x18b8] sm:$0xff] }
 0x2f4   : > { %9882 = vmatpush.bf16.msra.mxu2 %v15281_v20  ;;  %v15359_v20 = vld [vmem:[%s15727_s30 + $0x18f8] sm:$0xff] }
 0x2f5   : > { %9895 = vmatpush.bf16.msra.mxu3 %v15289_v21  ;;  %v15334_v21 = vld [vmem:[%s15727_s30 + $0x1830] sm:$0xff] }
 0x2f6   : > { %9857 = vmatpush.bf16.msra.mxu0 %v15264_v24  ;;  %v9651_v44 = vpop.f32.mrf.mxu0  ;;  %v15358_v24 = vld [vmem:[%s15727_s30 + $0x18f0] sm:$0xff] }
 0x2f7   : > { %9870 = vmatpush.bf16.msra.mxu1 %v15272_v25  ;;  %v9652_v45 = vadd.f32 %v9651_v44, %v9639_v12  ;;  %v9664_v48 = vpop.f32.mrf.mxu1  ;;  %v222_v12 = vld [vmem:[%s15717_s22 + $0x60] sm:$0xff]  ;;  %v15333_v25 = vld [vmem:[%s15727_s30 + $0x1828] sm:$0xff] }
 0x2f8   : > { %9883 = vmatpush.bf16.msra.mxu2 %v15280_v26  ;;  %2395 = vst [vmem:[#allocation1] ss:$9 sm:$0xff] %v222_v12  ;;  %v15341_v26 = vld [vmem:[%s15727_s30 + $0x1868] sm:$0xff] }
 0x2f9   : > { %9896 = vmatpush.bf16.msra.mxu3 %v15288_v27  ;;  %9858 = vmatmul.bf16.vlgmr.msra.gmra.mxu0 %v2386_v32  ;;  %v9665_v51 = vadd.f32 %v9664_v48, %v9652_v45  ;;  %v15349_v27 = vld [vmem:[%s15727_s30 + $0x18a8] sm:$0xff]  ;;  %v15340_v32 = vld [vmem:[%s15727_s30 + $0x1860] sm:$0xff] }
 0x2fa   : > { %9902 = vmatpush.bf16.msrb.mxu0 %v15303_v28  ;;  %9871 = vmatmul.bf16.vlgmr.msra.gmra.mxu1 %v2387_v34  ;;  %v15357_v28 = vld [vmem:[%s15727_s30 + $0x18e8] sm:$0xff]  ;;  %v15348_v34 = vld [vmem:[%s15727_s30 + $0x18a0] sm:$0xff] }
 0x2fb   : > { %9915 = vmatpush.bf16.msrb.mxu1 %v15311_v29  ;;  %9884 = vmatmul.bf16.vlgmr.msra.gmra.mxu2 %v2388_v33  ;;  %v15389_v12 = vld [vmem:[%s15727_s30 + $0x19e8] sm:$0xff] }
 0x2fc   : > { %9928 = vmatpush.bf16.msrb.mxu2 %v15319_v30  ;;  %9897 = vmatmul.bf16.vlgmr.msra.gmra.mxu3 %v2389_v35  ;;  %v15356_v35 = vld [vmem:[%s15727_s30 + $0x18e0] sm:$0xff] }
 0x2fd   : > { %9941 = vmatpush.bf16.msrb.mxu3 %v15327_v31  ;;  %v15332_v31 = vld [vmem:[%s15727_s30 + $0x1820] sm:$0xff] }
 0x2fe   : > { %9903 = vmatpush.bf16.msrb.mxu0 %v15302_v36  ;;  %v9677_v56 = vpop.f32.mrf.mxu2  ;;  %v9653_v59 = vpop.f32.mrf.mxu0 }
 0x2ff   : > { %9916 = vmatpush.bf16.msrb.mxu1 %v15310_v37  ;;  %v9678_v57 = vadd.f32 %v9677_v56, %v9665_v51  ;;  %v9690_v58 = vpop.f32.mrf.mxu3  ;;  %v9666_v63 = vpop.f32.mrf.mxu1  ;;  %v15331_v37 = vld [vmem:[%s15727_s30 + $0x1818] sm:$0xff]  ;;  %v15329_v51 = vld [vmem:[%s15727_s30 + $0x1808] sm:$0xff]  ;;  %v15344_v59 = vld [vmem:[%s15727_s30 + $0x1880] sm:$0xff] }
 0x300   : > { %9929 = vmatpush.bf16.msrb.mxu2 %v15318_v38  ;;  %v15339_v38 = vld [vmem:[%s15727_s30 + $0x1858] sm:$0xff] }
 0x301   : > { %9942 = vmatpush.bf16.msrb.mxu3 %v15326_v39  ;;  %v16526_v60 = vadd.f32 %v9690_v58, %v9678_v57  ;;  %v15347_v39 = vld [vmem:[%s15727_s30 + $0x1898] sm:$0xff]  ;;  %v15328_v57 = vld [vmem:[%s15727_s30 + $0x1800] sm:$0xff] }
 0x302   : > { %9904 = vmatpush.bf16.msrb.mxu0 %v15301_v40  ;;  %v15355_v40 = vld [vmem:[%s15727_s30 + $0x18d8] sm:$0xff]  ;;  %v15336_v58 = vld [vmem:[%s15727_s30 + $0x1840] sm:$0xff] }
 0x303   : > { %9917 = vmatpush.bf16.msrb.mxu1 %v15309_v41  ;;  %v15383_v63 = vld [vmem:[%s15727_s30 + $0x19b8] sm:$0xff] }
 0x304   : > { %9930 = vmatpush.bf16.msrb.mxu2 %v15317_v42 }
 0x305   : > { %9943 = vmatpush.bf16.msrb.mxu3 %v15325_v43 }
 0x306   : > { %9905 = vmatpush.bf16.msrb.mxu0 %v15300_v46  ;;  %v9679_v8 = vpop.f32.mrf.mxu2  ;;  %v15330_v46 = vld [vmem:[%s15727_s30 + $0x1810] sm:$0xff] }
 0x307   : > { %9918 = vmatpush.bf16.msrb.mxu1 %v15308_v47  ;;  %v9692_v11 = vpop.f32.mrf.mxu3  ;;  %v15338_v47 = vld [vmem:[%s15727_s30 + $0x1850] sm:$0xff] }
 0x308   : > { %9931 = vmatpush.bf16.msrb.mxu2 %v15316_v49  ;;  %v15346_v49 = vld [vmem:[%s15727_s30 + $0x1890] sm:$0xff]  ;;  %v15381_v11 = vld [vmem:[%s15727_s30 + $0x19a8] sm:$0xff] }
 0x309   : > { %9944 = vmatpush.bf16.msrb.mxu3 %v15324_v50  ;;  %v15354_v50 = vld [vmem:[%s15727_s30 + $0x18d0] sm:$0xff] }
 0x30a   : > { %9906 = vmatpush.bf16.msrb.mxu0 %v15299_v52  ;;  %v15337_v52 = vld [vmem:[%s15727_s30 + $0x1848] sm:$0xff]  ;;  %v15390_v8 = vld [vmem:[%s15727_s30 + $0x19f0] sm:$0xff] }
 0x30b   : > { %9919 = vmatpush.bf16.msrb.mxu1 %v15307_v53  ;;  %v15345_v53 = vld [vmem:[%s15727_s30 + $0x1888] sm:$0xff] }
 0x30c   : > { %9932 = vmatpush.bf16.msrb.mxu2 %v15315_v54  ;;  %v15353_v54 = vld [vmem:[%s15727_s30 + $0x18c8] sm:$0xff] }
 0x30d   : > { %9945 = vmatpush.bf16.msrb.mxu3 %v15323_v55 }
 0x30e   : > { %9907 = vmatpush.bf16.msrb.mxu0 %v15298_v61  ;;  %v15367_v61 = vld [vmem:[%s15727_s30 + $0x1938] sm:$0xff] }
 0x30f   : > { %9920 = vmatpush.bf16.msrb.mxu1 %v15306_v62  ;;  %v15375_v62 = vld [vmem:[%s15727_s30 + $0x1978] sm:$0xff] }
 0x310   : > { %9933 = vmatpush.bf16.msrb.mxu2 %v15314_v0  ;;  %v15391_v0 = vld [vmem:[%s15727_s30 + $0x19f8] sm:$0xff] }
 0x311   : > { %9946 = vmatpush.bf16.msrb.mxu3 %v15322_v1  ;;  %v2396_v1 = vld [vmem:[#allocation1] sm:$0xff] }
 0x312   : > { %9908 = vmatpush.bf16.msrb.mxu0 %v15297_v2  ;;  %v2398_v2 = vld [vmem:[#allocation1 + $0x12] sm:$0xff] }
 0x313   : > { %9921 = vmatpush.bf16.msrb.mxu1 %v15305_v3  ;;  %v2397_v3 = vld [vmem:[#allocation1 + $0x9] sm:$0xff] }
 0x314   : > { %9934 = vmatpush.bf16.msrb.mxu2 %v15313_v4  ;;  %v2399_v4 = vld [vmem:[#allocation1 + $0x1b] sm:$0xff] }
 0x315   : > { %9947 = vmatpush.bf16.msrb.mxu3 %v15321_v5  ;;  %v15366_v5 = vld [vmem:[%s15727_s30 + $0x1930] sm:$0xff] }
 0x316   : > { %9909 = vmatpush.bf16.msrb.mxu0 %v15296_v13  ;;  %v9703_v29 = vpop.f32.mrf.mxu0 }
 0x317   : > { %9922 = vmatpush.bf16.msrb.mxu1 %v15304_v14  ;;  %v9704_v30 = vadd.f32 %v9703_v29, %v16526_v60  ;;  %v9716_v33 = vpop.f32.mrf.mxu1  ;;  %v15352_v60 = vld [vmem:[%s15727_s30 + $0x18c0] sm:$0xff] }
 0x318   : > { %9935 = vmatpush.bf16.msrb.mxu2 %v15312_v15  ;;  %v15364_v15 = vld [vmem:[%s15727_s30 + $0x1920] sm:$0xff] }
 0x319   : > { %9948 = vmatpush.bf16.msrb.mxu3 %v15320_v16  ;;  %9910 = vmatmul.bf16.vlgmr.msrb.gmra.mxu0 %v2390_v6  ;;  %v9717_v36 = vadd.f32 %v9716_v33, %v9704_v30  ;;  %v15374_v6 = vld [vmem:[%s15727_s30 + $0x1970] sm:$0xff]  ;;  %v15372_v16 = vld [vmem:[%s15727_s30 + $0x1960] sm:$0xff] }
 0x31a   : > { %9954 = vmatpush.bf16.msra.mxu0 %v15335_v17  ;;  %9923 = vmatmul.bf16.vlgmr.msrb.gmra.mxu1 %v2391_v9  ;;  %v15365_v9 = vld [vmem:[%s15727_s30 + $0x1928] sm:$0xff]  ;;  %v15362_v30 = vld [vmem:[%s15727_s30 + $0x1910] sm:$0xff] }
 0x31b   : > { %9967 = vmatpush.bf16.msra.mxu1 %v15343_v18  ;;  %9936 = vmatmul.bf16.vlgmr.msrb.gmra.mxu2 %v2392_v7  ;;  %v15382_v7 = vld [vmem:[%s15727_s30 + $0x19b0] sm:$0xff]  ;;  %v15380_v18 = vld [vmem:[%s15727_s30 + $0x19a0] sm:$0xff] }
 0x31c   : > { %9980 = vmatpush.bf16.msra.mxu2 %v15351_v19  ;;  %9949 = vmatmul.bf16.vlgmr.msrb.gmra.mxu3 %v2393_v10  ;;  %v15373_v10 = vld [vmem:[%s15727_s30 + $0x1968] sm:$0xff]  ;;  %v15388_v19 = vld [vmem:[%s15727_s30 + $0x19e0] sm:$0xff]  ;;  %v15378_v33 = vld [vmem:[%s15727_s30 + $0x1990] sm:$0xff] }
 0x31d   : > { %9993 = vmatpush.bf16.msra.mxu3 %v15359_v20 }
 0x31e   : > { %9955 = vmatpush.bf16.msra.mxu0 %v15334_v21  ;;  %v9729_v41 = vpop.f32.mrf.mxu2  ;;  %v9705_v44 = vpop.f32.mrf.mxu0  ;;  %v15363_v21 = vld [vmem:[%s15727_s30 + $0x1918] sm:$0xff] }
 0x31f   : > { %9968 = vmatpush.bf16.msra.mxu1 %v15342_v22  ;;  %v9730_v42 = vadd.f32 %v9729_v41, %v9717_v36  ;;  %v9742_v43 = vpop.f32.mrf.mxu3  ;;  %v9718_v48 = vpop.f32.mrf.mxu1  ;;  %v15371_v22 = vld [vmem:[%s15727_s30 + $0x1958] sm:$0xff]  ;;  %v15369_v36 = vld [vmem:[%s15727_s30 + $0x1948] sm:$0xff] }
 0x320   : > { %9981 = vmatpush.bf16.msra.mxu2 %v15350_v23  ;;  %v15379_v23 = vld [vmem:[%s15727_s30 + $0x1998] sm:$0xff]  ;;  %v15376_v48 = vld [vmem:[%s15727_s30 + $0x1980] sm:$0xff] }
 0x321   : > { %9994 = vmatpush.bf16.msra.mxu3 %v15358_v24  ;;  %v9743_v45 = vadd.f32 %v9742_v43, %v9730_v42  ;;  %v15387_v24 = vld [vmem:[%s15727_s30 + $0x19d8] sm:$0xff]  ;;  %v2401_v42 = vld [vmem:[#allocation1 + $0x2d] sm:$0xff] }
 0x322   : > { %9956 = vmatpush.bf16.msra.mxu0 %v15333_v25  ;;  %v2403_v43 = vld [vmem:[#allocation1 + $0x3f] sm:$0xff] }
 0x323   : > { %9969 = vmatpush.bf16.msra.mxu1 %v15341_v26 }
 0x324   : > { %9982 = vmatpush.bf16.msra.mxu2 %v15349_v27 }
 0x325   : > { %9995 = vmatpush.bf16.msra.mxu3 %v15357_v28 }
 0x326   : > { %9957 = vmatpush.bf16.msra.mxu0 %v15332_v31  ;;  %v9731_v55 = vpop.f32.mrf.mxu2  ;;  %v15370_v31 = vld [vmem:[%s15727_s30 + $0x1950] sm:$0xff] }
 0x327   : > { %9970 = vmatpush.bf16.msra.mxu1 %v15340_v32  ;;  %v9744_v56 = vpop.f32.mrf.mxu3  ;;  %v15406_v55 = vld [vmem:[%s15727_s30 + $0x1a70] sm:$0xff] }
 0x328   : > { %9983 = vmatpush.bf16.msra.mxu2 %v15348_v34  ;;  %v15386_v34 = vld [vmem:[%s15727_s30 + $0x19d0] sm:$0xff] }
 0x329   : > { %9996 = vmatpush.bf16.msra.mxu3 %v15356_v35  ;;  %v15361_v35 = vld [vmem:[%s15727_s30 + $0x1908] sm:$0xff]  ;;  %v15414_v56 = vld [vmem:[%s15727_s30 + $0x1ab0] sm:$0xff] }
 0x32a   : > { %9958 = vmatpush.bf16.msra.mxu0 %v15331_v37  ;;  %v15377_v37 = vld [vmem:[%s15727_s30 + $0x1988] sm:$0xff] }
 0x32b   : > { %9971 = vmatpush.bf16.msra.mxu1 %v15339_v38  ;;  %v15385_v38 = vld [vmem:[%s15727_s30 + $0x19c8] sm:$0xff] }
 0x32c   : > { %9984 = vmatpush.bf16.msra.mxu2 %v15347_v39  ;;  %v2400_v39 = vld [vmem:[#allocation1 + $0x24] sm:$0xff] }
 0x32d   : > { %9997 = vmatpush.bf16.msra.mxu3 %v15355_v40  ;;  %v2402_v40 = vld [vmem:[#allocation1 + $0x36] sm:$0xff] }
 0x32e   : > { %9959 = vmatpush.bf16.msra.mxu0 %v15330_v46  ;;  %v15360_v46 = vld [vmem:[%s15727_s30 + $0x1900] sm:$0xff] }
 0x32f   : > { %9972 = vmatpush.bf16.msra.mxu1 %v15338_v47  ;;  %v15368_v47 = vld [vmem:[%s15727_s30 + $0x1940] sm:$0xff] }
 0x330   : > { %9985 = vmatpush.bf16.msra.mxu2 %v15346_v49  ;;  %v15384_v49 = vld [vmem:[%s15727_s30 + $0x19c0] sm:$0xff] }
 0x331   : > { %9998 = vmatpush.bf16.msra.mxu3 %v15354_v50  ;;  %v15399_v50 = vld [vmem:[%s15727_s30 + $0x1a38] sm:$0xff] }
 0x332   : > { %9960 = vmatpush.bf16.msra.mxu0 %v15329_v51  ;;  %v15407_v51 = vld [vmem:[%s15727_s30 + $0x1a78] sm:$0xff] }
 0x333   : > { %9973 = vmatpush.bf16.msra.mxu1 %v15337_v52  ;;  %v15415_v52 = vld [vmem:[%s15727_s30 + $0x1ab8] sm:$0xff] }
 0x334   : > { %9986 = vmatpush.bf16.msra.mxu2 %v15345_v53  ;;  %v15423_v53 = vld [vmem:[%s15727_s30 + $0x1af8] sm:$0xff] }
 0x335   : > { %9999 = vmatpush.bf16.msra.mxu3 %v15353_v54  ;;  %v15398_v54 = vld [vmem:[%s15727_s30 + $0x1a30] sm:$0xff] }
 0x336   : > { %9961 = vmatpush.bf16.msra.mxu0 %v15328_v57  ;;  %v9755_v13 = vpop.f32.mrf.mxu0  ;;  %v15422_v57 = vld [vmem:[%s15727_s30 + $0x1af0] sm:$0xff] }
 0x337   : > { %9974 = vmatpush.bf16.msra.mxu1 %v15336_v58  ;;  %v9756_v14 = vadd.f32 %v9755_v13, %v9743_v45  ;;  %v9768_v17 = vpop.f32.mrf.mxu1  ;;  %v223_v45 = vld [vmem:[%s15717_s22 + $0x68] sm:$0xff] }
 0x338   : > { %9987 = vmatpush.bf16.msra.mxu2 %v15344_v59  ;;  %2405 = vst [vmem:[#allocation1] ss:$9 sm:$0xff] %v223_v45  ;;  %v15397_v58 = vld [vmem:[%s15727_s30 + $0x1a28] sm:$0xff] }
 0x339   : > { %10000 = vmatpush.bf16.msra.mxu3 %v15352_v60  ;;  %9962 = vmatmul.bf16.vlgmr.msra.gmra.mxu0 %v2396_v1  ;;  %v9769_v20 = vadd.f32 %v9768_v17, %v9756_v14  ;;  %v15405_v59 = vld [vmem:[%s15727_s30 + $0x1a68] sm:$0xff]  ;;  %v15404_v1 = vld [vmem:[%s15727_s30 + $0x1a60] sm:$0xff] }
 0x33a   : > { %10006 = vmatpush.bf16.msrb.mxu0 %v15367_v61  ;;  %9975 = vmatmul.bf16.vlgmr.msra.gmra.mxu1 %v2397_v3  ;;  %v15413_v60 = vld [vmem:[%s15727_s30 + $0x1aa8] sm:$0xff]  ;;  %v15412_v3 = vld [vmem:[%s15727_s30 + $0x1aa0] sm:$0xff] }
 0x33b   : > { %10019 = vmatpush.bf16.msrb.mxu1 %v15375_v62  ;;  %9988 = vmatmul.bf16.vlgmr.msra.gmra.mxu2 %v2398_v2  ;;  %v15421_v61 = vld [vmem:[%s15727_s30 + $0x1ae8] sm:$0xff] }
 0x33c   : > { %10032 = vmatpush.bf16.msrb.mxu2 %v15383_v63  ;;  %10001 = vmatmul.bf16.vlgmr.msra.gmra.mxu3 %v2399_v4  ;;  %v15420_v4 = vld [vmem:[%s15727_s30 + $0x1ae0] sm:$0xff]  ;;  %v15453_v45 = vld [vmem:[%s15727_s30 + $0x1be8] sm:$0xff] }
 0x33d   : > { %10045 = vmatpush.bf16.msrb.mxu3 %v15391_v0  ;;  %v15396_v0 = vld [vmem:[%s15727_s30 + $0x1a20] sm:$0xff] }
 0x33e   : > { %10007 = vmatpush.bf16.msrb.mxu0 %v15366_v5  ;;  %v9781_v25 = vpop.f32.mrf.mxu2  ;;  %v9757_v28 = vpop.f32.mrf.mxu0 }
 0x33f   : > { %10020 = vmatpush.bf16.msrb.mxu1 %v15374_v6  ;;  %v9782_v26 = vadd.f32 %v9781_v25, %v9769_v20  ;;  %v9794_v27 = vpop.f32.mrf.mxu3  ;;  %v9770_v32 = vpop.f32.mrf.mxu1  ;;  %v15395_v6 = vld [vmem:[%s15727_s30 + $0x1a18] sm:$0xff]  ;;  %v15393_v20 = vld [vmem:[%s15727_s30 + $0x1a08] sm:$0xff]  ;;  %v15408_v28 = vld [vmem:[%s15727_s30 + $0x1a80] sm:$0xff] }
 0x340   : > { %10033 = vmatpush.bf16.msrb.mxu2 %v15382_v7  ;;  %v15403_v7 = vld [vmem:[%s15727_s30 + $0x1a58] sm:$0xff] }
 0x341   : > { %10046 = vmatpush.bf16.msrb.mxu3 %v15390_v8  ;;  %v16594_v29 = vadd.f32 %v9794_v27, %v9782_v26  ;;  %v15411_v8 = vld [vmem:[%s15727_s30 + $0x1a98] sm:$0xff]  ;;  %v15392_v26 = vld [vmem:[%s15727_s30 + $0x1a00] sm:$0xff] }
 0x342   : > { %10008 = vmatpush.bf16.msrb.mxu0 %v15365_v9  ;;  %v15419_v9 = vld [vmem:[%s15727_s30 + $0x1ad8] sm:$0xff]  ;;  %v15400_v27 = vld [vmem:[%s15727_s30 + $0x1a40] sm:$0xff] }
 0x343   : > { %10021 = vmatpush.bf16.msrb.mxu1 %v15373_v10  ;;  %v15447_v32 = vld [vmem:[%s15727_s30 + $0x1bb8] sm:$0xff] }
 0x344   : > { %10034 = vmatpush.bf16.msrb.mxu2 %v15381_v11 }
 0x345   : > { %10047 = vmatpush.bf16.msrb.mxu3 %v15389_v12 }
 0x346   : > { %10009 = vmatpush.bf16.msrb.mxu0 %v15364_v15  ;;  %v9783_v41 = vpop.f32.mrf.mxu2  ;;  %v15394_v15 = vld [vmem:[%s15727_s30 + $0x1a10] sm:$0xff] }
 0x347   : > { %10022 = vmatpush.bf16.msrb.mxu1 %v15372_v16  ;;  %v9796_v44 = vpop.f32.mrf.mxu3  ;;  %v15402_v16 = vld [vmem:[%s15727_s30 + $0x1a50] sm:$0xff] }
 0x348   : > { %10035 = vmatpush.bf16.msrb.mxu2 %v15380_v18  ;;  %v15410_v18 = vld [vmem:[%s15727_s30 + $0x1a90] sm:$0xff]  ;;  %v15445_v44 = vld [vmem:[%s15727_s30 + $0x1ba8] sm:$0xff] }
 0x349   : > { %10048 = vmatpush.bf16.msrb.mxu3 %v15388_v19  ;;  %v15418_v19 = vld [vmem:[%s15727_s30 + $0x1ad0] sm:$0xff] }
 0x34a   : > { %10010 = vmatpush.bf16.msrb.mxu0 %v15363_v21  ;;  %v15401_v21 = vld [vmem:[%s15727_s30 + $0x1a48] sm:$0xff]  ;;  %v15454_v41 = vld [vmem:[%s15727_s30 + $0x1bf0] sm:$0xff] }
 0x34b   : > { %10023 = vmatpush.bf16.msrb.mxu1 %v15371_v22  ;;  %v15409_v22 = vld [vmem:[%s15727_s30 + $0x1a88] sm:$0xff] }
 0x34c   : > { %10036 = vmatpush.bf16.msrb.mxu2 %v15379_v23  ;;  %v15417_v23 = vld [vmem:[%s15727_s30 + $0x1ac8] sm:$0xff] }
 0x34d   : > { %10049 = vmatpush.bf16.msrb.mxu3 %v15387_v24 }
 0x34e   : > { %10011 = vmatpush.bf16.msrb.mxu0 %v15362_v30  ;;  %v15431_v30 = vld [vmem:[%s15727_s30 + $0x1b38] sm:$0xff] }
 0x34f   : > { %10024 = vmatpush.bf16.msrb.mxu1 %v15370_v31  ;;  %v15439_v31 = vld [vmem:[%s15727_s30 + $0x1b78] sm:$0xff] }
 0x350   : > { %10037 = vmatpush.bf16.msrb.mxu2 %v15378_v33  ;;  %v15455_v33 = vld [vmem:[%s15727_s30 + $0x1bf8] sm:$0xff] }
 0x351   : > { %10050 = vmatpush.bf16.msrb.mxu3 %v15386_v34  ;;  %v2406_v34 = vld [vmem:[#allocation1] sm:$0xff] }
 0x352   : > { %10012 = vmatpush.bf16.msrb.mxu0 %v15361_v35  ;;  %v2408_v35 = vld [vmem:[#allocation1 + $0x12] sm:$0xff] }
 0x353   : > { %10025 = vmatpush.bf16.msrb.mxu1 %v15369_v36  ;;  %v2407_v36 = vld [vmem:[#allocation1 + $0x9] sm:$0xff] }
 0x354   : > { %10038 = vmatpush.bf16.msrb.mxu2 %v15377_v37  ;;  %v2409_v37 = vld [vmem:[#allocation1 + $0x1b] sm:$0xff] }
 0x355   : > { %10051 = vmatpush.bf16.msrb.mxu3 %v15385_v38  ;;  %v15430_v38 = vld [vmem:[%s15727_s30 + $0x1b30] sm:$0xff] }
 0x356   : > { %10013 = vmatpush.bf16.msrb.mxu0 %v15360_v46  ;;  %v9807_v62 = vpop.f32.mrf.mxu0 }
 0x357   : > { %10026 = vmatpush.bf16.msrb.mxu1 %v15368_v47  ;;  %v9808_v63 = vadd.f32 %v9807_v62, %v16594_v29  ;;  %v9820_v2 = vpop.f32.mrf.mxu1  ;;  %v15416_v29 = vld [vmem:[%s15727_s30 + $0x1ac0] sm:$0xff] }
 0x358   : > { %10039 = vmatpush.bf16.msrb.mxu2 %v15376_v48  ;;  %v15428_v48 = vld [vmem:[%s15727_s30 + $0x1b20] sm:$0xff] }
 0x359   : > { %10052 = vmatpush.bf16.msrb.mxu3 %v15384_v49  ;;  %10014 = vmatmul.bf16.vlgmr.msrb.gmra.mxu0 %v2400_v39  ;;  %v9821_v5 = vadd.f32 %v9820_v2, %v9808_v63  ;;  %v15438_v39 = vld [vmem:[%s15727_s30 + $0x1b70] sm:$0xff]  ;;  %v15436_v49 = vld [vmem:[%s15727_s30 + $0x1b60] sm:$0xff] }
 0x35a   : > { %10058 = vmatpush.bf16.msra.mxu0 %v15399_v50  ;;  %10027 = vmatmul.bf16.vlgmr.msrb.gmra.mxu1 %v2401_v42  ;;  %v15429_v42 = vld [vmem:[%s15727_s30 + $0x1b28] sm:$0xff]  ;;  %v15426_v63 = vld [vmem:[%s15727_s30 + $0x1b10] sm:$0xff] }
 0x35b   : > { %10071 = vmatpush.bf16.msra.mxu1 %v15407_v51  ;;  %10040 = vmatmul.bf16.vlgmr.msrb.gmra.mxu2 %v2402_v40  ;;  %v15446_v40 = vld [vmem:[%s15727_s30 + $0x1bb0] sm:$0xff]  ;;  %v15444_v51 = vld [vmem:[%s15727_s30 + $0x1ba0] sm:$0xff] }
 0x35c   : > { %10084 = vmatpush.bf16.msra.mxu2 %v15415_v52  ;;  %10053 = vmatmul.bf16.vlgmr.msrb.gmra.mxu3 %v2403_v43  ;;  %v15437_v43 = vld [vmem:[%s15727_s30 + $0x1b68] sm:$0xff]  ;;  %v15452_v52 = vld [vmem:[%s15727_s30 + $0x1be0] sm:$0xff]  ;;  %v15442_v2 = vld [vmem:[%s15727_s30 + $0x1b90] sm:$0xff] }
 0x35d   : > { %10097 = vmatpush.bf16.msra.mxu3 %v15423_v53 }
 0x35e   : > { %10059 = vmatpush.bf16.msra.mxu0 %v15398_v54  ;;  %v9833_v10 = vpop.f32.mrf.mxu2  ;;  %v9809_v13 = vpop.f32.mrf.mxu0  ;;  %v15427_v54 = vld [vmem:[%s15727_s30 + $0x1b18] sm:$0xff] }
 0x35f   : > { %10072 = vmatpush.bf16.msra.mxu1 %v15406_v55  ;;  %v9834_v11 = vadd.f32 %v9833_v10, %v9821_v5  ;;  %v9846_v12 = vpop.f32.mrf.mxu3  ;;  %v9822_v17 = vpop.f32.mrf.mxu1  ;;  %v15435_v55 = vld [vmem:[%s15727_s30 + $0x1b58] sm:$0xff]  ;;  %v15433_v5 = vld [vmem:[%s15727_s30 + $0x1b48] sm:$0xff] }
 0x360   : > { %10085 = vmatpush.bf16.msra.mxu2 %v15414_v56  ;;  %v15443_v56 = vld [vmem:[%s15727_s30 + $0x1b98] sm:$0xff]  ;;  %v15440_v17 = vld [vmem:[%s15727_s30 + $0x1b80] sm:$0xff] }
 0x361   : > { %10098 = vmatpush.bf16.msra.mxu3 %v15422_v57  ;;  %v9847_v14 = vadd.f32 %v9846_v12, %v9834_v11  ;;  %v15451_v57 = vld [vmem:[%s15727_s30 + $0x1bd8] sm:$0xff]  ;;  %v2411_v11 = vld [vmem:[#allocation1 + $0x2d] sm:$0xff] }
 0x362   : > { %10060 = vmatpush.bf16.msra.mxu0 %v15397_v58  ;;  %v2413_v12 = vld [vmem:[#allocation1 + $0x3f] sm:$0xff] }
 0x363   : > { %10073 = vmatpush.bf16.msra.mxu1 %v15405_v59 }
 0x364   : > { %10086 = vmatpush.bf16.msra.mxu2 %v15413_v60 }
 0x365   : > { %10099 = vmatpush.bf16.msra.mxu3 %v15421_v61 }
 0x366   : > { %10061 = vmatpush.bf16.msra.mxu0 %v15396_v0  ;;  %v9835_v24 = vpop.f32.mrf.mxu2  ;;  %v15434_v0 = vld [vmem:[%s15727_s30 + $0x1b50] sm:$0xff] }
 0x367   : > { %10074 = vmatpush.bf16.msra.mxu1 %v15404_v1  ;;  %v9848_v25 = vpop.f32.mrf.mxu3  ;;  %v15470_v24 = vld [vmem:[%s15727_s30 + $0x1c70] sm:$0xff] }
 0x368   : > { %10087 = vmatpush.bf16.msra.mxu2 %v15412_v3  ;;  %v15450_v3 = vld [vmem:[%s15727_s30 + $0x1bd0] sm:$0xff] }
 0x369   : > { %10100 = vmatpush.bf16.msra.mxu3 %v15420_v4  ;;  %v15425_v4 = vld [vmem:[%s15727_s30 + $0x1b08] sm:$0xff]  ;;  %v15478_v25 = vld [vmem:[%s15727_s30 + $0x1cb0] sm:$0xff] }
 0x36a   : > { %10062 = vmatpush.bf16.msra.mxu0 %v15395_v6  ;;  %v15441_v6 = vld [vmem:[%s15727_s30 + $0x1b88] sm:$0xff] }
 0x36b   : > { %10075 = vmatpush.bf16.msra.mxu1 %v15403_v7  ;;  %v15449_v7 = vld [vmem:[%s15727_s30 + $0x1bc8] sm:$0xff] }
 0x36c   : > { %10088 = vmatpush.bf16.msra.mxu2 %v15411_v8  ;;  %v2410_v8 = vld [vmem:[#allocation1 + $0x24] sm:$0xff] }
 0x36d   : > { %10101 = vmatpush.bf16.msra.mxu3 %v15419_v9  ;;  %v2412_v9 = vld [vmem:[#allocation1 + $0x36] sm:$0xff] }
 0x36e   : > { %10063 = vmatpush.bf16.msra.mxu0 %v15394_v15  ;;  %v15424_v15 = vld [vmem:[%s15727_s30 + $0x1b00] sm:$0xff] }
 0x36f   : > { %10076 = vmatpush.bf16.msra.mxu1 %v15402_v16  ;;  %v15432_v16 = vld [vmem:[%s15727_s30 + $0x1b40] sm:$0xff] }
 0x370   : > { %10089 = vmatpush.bf16.msra.mxu2 %v15410_v18  ;;  %v15448_v18 = vld [vmem:[%s15727_s30 + $0x1bc0] sm:$0xff] }
 0x371   : > { %10102 = vmatpush.bf16.msra.mxu3 %v15418_v19  ;;  %v15463_v19 = vld [vmem:[%s15727_s30 + $0x1c38] sm:$0xff] }
 0x372   : > { %10064 = vmatpush.bf16.msra.mxu0 %v15393_v20  ;;  %v15471_v20 = vld [vmem:[%s15727_s30 + $0x1c78] sm:$0xff] }
 0x373   : > { %10077 = vmatpush.bf16.msra.mxu1 %v15401_v21  ;;  %v15479_v21 = vld [vmem:[%s15727_s30 + $0x1cb8] sm:$0xff] }
 0x374   : > { %10090 = vmatpush.bf16.msra.mxu2 %v15409_v22  ;;  %v15487_v22 = vld [vmem:[%s15727_s30 + $0x1cf8] sm:$0xff] }
 0x375   : > { %10103 = vmatpush.bf16.msra.mxu3 %v15417_v23  ;;  %v15462_v23 = vld [vmem:[%s15727_s30 + $0x1c30] sm:$0xff] }
 0x376   : > { %10065 = vmatpush.bf16.msra.mxu0 %v15392_v26  ;;  %v9859_v46 = vpop.f32.mrf.mxu0  ;;  %v15486_v26 = vld [vmem:[%s15727_s30 + $0x1cf0] sm:$0xff] }
 0x377   : > { %10078 = vmatpush.bf16.msra.mxu1 %v15400_v27  ;;  %v9860_v47 = vadd.f32 %v9859_v46, %v9847_v14  ;;  %v9872_v50 = vpop.f32.mrf.mxu1  ;;  %v224_v14 = vld [vmem:[%s15717_s22 + $0x70] sm:$0xff]  ;;  %v15461_v27 = vld [vmem:[%s15727_s30 + $0x1c28] sm:$0xff] }
 0x378   : > { %10091 = vmatpush.bf16.msra.mxu2 %v15408_v28  ;;  %2415 = vst [vmem:[#allocation1] ss:$9 sm:$0xff] %v224_v14  ;;  %v15469_v28 = vld [vmem:[%s15727_s30 + $0x1c68] sm:$0xff] }
 0x379   : > { %10104 = vmatpush.bf16.msra.mxu3 %v15416_v29  ;;  %10066 = vmatmul.bf16.vlgmr.msra.gmra.mxu0 %v2406_v34  ;;  %v9873_v53 = vadd.f32 %v9872_v50, %v9860_v47  ;;  %v15477_v29 = vld [vmem:[%s15727_s30 + $0x1ca8] sm:$0xff]  ;;  %v15468_v34 = vld [vmem:[%s15727_s30 + $0x1c60] sm:$0xff] }
 0x37a   : > { %10110 = vmatpush.bf16.msrb.mxu0 %v15431_v30  ;;  %10079 = vmatmul.bf16.vlgmr.msra.gmra.mxu1 %v2407_v36  ;;  %v15485_v30 = vld [vmem:[%s15727_s30 + $0x1ce8] sm:$0xff]  ;;  %v15476_v36 = vld [vmem:[%s15727_s30 + $0x1ca0] sm:$0xff] }
 0x37b   : > { %10123 = vmatpush.bf16.msrb.mxu1 %v15439_v31  ;;  %10092 = vmatmul.bf16.vlgmr.msra.gmra.mxu2 %v2408_v35  ;;  %v15517_v14 = vld [vmem:[%s15727_s30 + $0x1de8] sm:$0xff] }
 0x37c   : > { %10136 = vmatpush.bf16.msrb.mxu2 %v15447_v32  ;;  %10105 = vmatmul.bf16.vlgmr.msra.gmra.mxu3 %v2409_v37  ;;  %v15484_v37 = vld [vmem:[%s15727_s30 + $0x1ce0] sm:$0xff] }
 0x37d   : > { %10149 = vmatpush.bf16.msrb.mxu3 %v15455_v33  ;;  %v15460_v33 = vld [vmem:[%s15727_s30 + $0x1c20] sm:$0xff] }
 0x37e   : > { %10111 = vmatpush.bf16.msrb.mxu0 %v15430_v38  ;;  %v9885_v58 = vpop.f32.mrf.mxu2  ;;  %v9861_v61 = vpop.f32.mrf.mxu0 }
 0x37f   : > { %10124 = vmatpush.bf16.msrb.mxu1 %v15438_v39  ;;  %v9886_v59 = vadd.f32 %v9885_v58, %v9873_v53  ;;  %v9898_v60 = vpop.f32.mrf.mxu3  ;;  %v9874_v1 = vpop.f32.mrf.mxu1  ;;  %v15459_v39 = vld [vmem:[%s15727_s30 + $0x1c18] sm:$0xff]  ;;  %v15457_v53 = vld [vmem:[%s15727_s30 + $0x1c08] sm:$0xff]  ;;  %v15472_v61 = vld [vmem:[%s15727_s30 + $0x1c80] sm:$0xff] }
 0x380   : > { %10137 = vmatpush.bf16.msrb.mxu2 %v15446_v40  ;;  %v15467_v40 = vld [vmem:[%s15727_s30 + $0x1c58] sm:$0xff] }
 0x381   : > { %10150 = vmatpush.bf16.msrb.mxu3 %v15454_v41  ;;  %v16662_v62 = vadd.f32 %v9898_v60, %v9886_v59  ;;  %v15475_v41 = vld [vmem:[%s15727_s30 + $0x1c98] sm:$0xff]  ;;  %v15456_v59 = vld [vmem:[%s15727_s30 + $0x1c00] sm:$0xff] }
 0x382   : > { %10112 = vmatpush.bf16.msrb.mxu0 %v15429_v42  ;;  %v15483_v42 = vld [vmem:[%s15727_s30 + $0x1cd8] sm:$0xff]  ;;  %v15464_v60 = vld [vmem:[%s15727_s30 + $0x1c40] sm:$0xff] }
 0x383   : > { %10125 = vmatpush.bf16.msrb.mxu1 %v15437_v43  ;;  %v15511_v1 = vld [vmem:[%s15727_s30 + $0x1db8] sm:$0xff] }
 0x384   : > { %10138 = vmatpush.bf16.msrb.mxu2 %v15445_v44 }
 0x385   : > { %10151 = vmatpush.bf16.msrb.mxu3 %v15453_v45 }
 0x386   : > { %10113 = vmatpush.bf16.msrb.mxu0 %v15428_v48  ;;  %v9887_v10 = vpop.f32.mrf.mxu2  ;;  %v15458_v48 = vld [vmem:[%s15727_s30 + $0x1c10] sm:$0xff] }
 0x387   : > { %10126 = vmatpush.bf16.msrb.mxu1 %v15436_v49  ;;  %v9900_v13 = vpop.f32.mrf.mxu3  ;;  %v15466_v49 = vld [vmem:[%s15727_s30 + $0x1c50] sm:$0xff] }
 0x388   : > { %10139 = vmatpush.bf16.msrb.mxu2 %v15444_v51  ;;  %v15474_v51 = vld [vmem:[%s15727_s30 + $0x1c90] sm:$0xff]  ;;  %v15509_v13 = vld [vmem:[%s15727_s30 + $0x1da8] sm:$0xff] }
 0x389   : > { %10152 = vmatpush.bf16.msrb.mxu3 %v15452_v52  ;;  %v15482_v52 = vld [vmem:[%s15727_s30 + $0x1cd0] sm:$0xff] }
 0x38a   : > { %10114 = vmatpush.bf16.msrb.mxu0 %v15427_v54  ;;  %v15465_v54 = vld [vmem:[%s15727_s30 + $0x1c48] sm:$0xff]  ;;  %v15518_v10 = vld [vmem:[%s15727_s30 + $0x1df0] sm:$0xff] }
 0x38b   : > { %10127 = vmatpush.bf16.msrb.mxu1 %v15435_v55  ;;  %v15473_v55 = vld [vmem:[%s15727_s30 + $0x1c88] sm:$0xff] }
 0x38c   : > { %10140 = vmatpush.bf16.msrb.mxu2 %v15443_v56  ;;  %v15481_v56 = vld [vmem:[%s15727_s30 + $0x1cc8] sm:$0xff] }
 0x38d   : > { %10153 = vmatpush.bf16.msrb.mxu3 %v15451_v57 }
 0x38e   : > { %10115 = vmatpush.bf16.msrb.mxu0 %v15426_v63  ;;  %v15495_v63 = vld [vmem:[%s15727_s30 + $0x1d38] sm:$0xff] }
 0x38f   : > { %10128 = vmatpush.bf16.msrb.mxu1 %v15434_v0  ;;  %v15503_v0 = vld [vmem:[%s15727_s30 + $0x1d78] sm:$0xff] }
 0x390   : > { %10141 = vmatpush.bf16.msrb.mxu2 %v15442_v2  ;;  %v15519_v2 = vld [vmem:[%s15727_s30 + $0x1df8] sm:$0xff] }
 0x391   : > { %10154 = vmatpush.bf16.msrb.mxu3 %v15450_v3  ;;  %v2416_v3 = vld [vmem:[#allocation1] sm:$0xff] }
 0x392   : > { %10116 = vmatpush.bf16.msrb.mxu0 %v15425_v4  ;;  %v2418_v4 = vld [vmem:[#allocation1 + $0x12] sm:$0xff] }
 0x393   : > { %10129 = vmatpush.bf16.msrb.mxu1 %v15433_v5  ;;  %v2417_v5 = vld [vmem:[#allocation1 + $0x9] sm:$0xff] }
 0x394   : > { %10142 = vmatpush.bf16.msrb.mxu2 %v15441_v6  ;;  %v2419_v6 = vld [vmem:[#allocation1 + $0x1b] sm:$0xff] }
 0x395   : > { %10155 = vmatpush.bf16.msrb.mxu3 %v15449_v7  ;;  %v15494_v7 = vld [vmem:[%s15727_s30 + $0x1d30] sm:$0xff] }
 0x396   : > { %10117 = vmatpush.bf16.msrb.mxu0 %v15424_v15  ;;  %v9911_v31 = vpop.f32.mrf.mxu0 }
 0x397   : > { %10130 = vmatpush.bf16.msrb.mxu1 %v15432_v16  ;;  %v9912_v32 = vadd.f32 %v9911_v31, %v16662_v62  ;;  %v9924_v35 = vpop.f32.mrf.mxu1  ;;  %v15480_v62 = vld [vmem:[%s15727_s30 + $0x1cc0] sm:$0xff] }
 0x398   : > { %10143 = vmatpush.bf16.msrb.mxu2 %v15440_v17  ;;  %v15492_v17 = vld [vmem:[%s15727_s30 + $0x1d20] sm:$0xff] }
 0x399   : > { %10156 = vmatpush.bf16.msrb.mxu3 %v15448_v18  ;;  %10118 = vmatmul.bf16.vlgmr.msrb.gmra.mxu0 %v2410_v8  ;;  %v9925_v38 = vadd.f32 %v9924_v35, %v9912_v32  ;;  %v15502_v8 = vld [vmem:[%s15727_s30 + $0x1d70] sm:$0xff]  ;;  %v15500_v18 = vld [vmem:[%s15727_s30 + $0x1d60] sm:$0xff] }
 0x39a   : > { %10162 = vmatpush.bf16.msra.mxu0 %v15463_v19  ;;  %10131 = vmatmul.bf16.vlgmr.msrb.gmra.mxu1 %v2411_v11  ;;  %v15493_v11 = vld [vmem:[%s15727_s30 + $0x1d28] sm:$0xff]  ;;  %v15490_v32 = vld [vmem:[%s15727_s30 + $0x1d10] sm:$0xff] }
 0x39b   : > { %10175 = vmatpush.bf16.msra.mxu1 %v15471_v20  ;;  %10144 = vmatmul.bf16.vlgmr.msrb.gmra.mxu2 %v2412_v9  ;;  %v15510_v9 = vld [vmem:[%s15727_s30 + $0x1db0] sm:$0xff]  ;;  %v15508_v20 = vld [vmem:[%s15727_s30 + $0x1da0] sm:$0xff] }
 0x39c   : > { %10188 = vmatpush.bf16.msra.mxu2 %v15479_v21  ;;  %10157 = vmatmul.bf16.vlgmr.msrb.gmra.mxu3 %v2413_v12  ;;  %v15501_v12 = vld [vmem:[%s15727_s30 + $0x1d68] sm:$0xff]  ;;  %v15516_v21 = vld [vmem:[%s15727_s30 + $0x1de0] sm:$0xff]  ;;  %v15506_v35 = vld [vmem:[%s15727_s30 + $0x1d90] sm:$0xff] }
 0x39d   : > { %10201 = vmatpush.bf16.msra.mxu3 %v15487_v22 }
 0x39e   : > { %10163 = vmatpush.bf16.msra.mxu0 %v15462_v23  ;;  %v9937_v43 = vpop.f32.mrf.mxu2  ;;  %v9913_v46 = vpop.f32.mrf.mxu0  ;;  %v15491_v23 = vld [vmem:[%s15727_s30 + $0x1d18] sm:$0xff] }
 0x39f   : > { %10176 = vmatpush.bf16.msra.mxu1 %v15470_v24  ;;  %v9938_v44 = vadd.f32 %v9937_v43, %v9925_v38  ;;  %v9950_v45 = vpop.f32.mrf.mxu3  ;;  %v9926_v50 = vpop.f32.mrf.mxu1  ;;  %v15499_v24 = vld [vmem:[%s15727_s30 + $0x1d58] sm:$0xff]  ;;  %v15497_v38 = vld [vmem:[%s15727_s30 + $0x1d48] sm:$0xff] }
 0x3a0   : > { %10189 = vmatpush.bf16.msra.mxu2 %v15478_v25  ;;  %v15507_v25 = vld [vmem:[%s15727_s30 + $0x1d98] sm:$0xff]  ;;  %v15504_v50 = vld [vmem:[%s15727_s30 + $0x1d80] sm:$0xff] }
 0x3a1   : > { %10202 = vmatpush.bf16.msra.mxu3 %v15486_v26  ;;  %v9951_v47 = vadd.f32 %v9950_v45, %v9938_v44  ;;  %v15515_v26 = vld [vmem:[%s15727_s30 + $0x1dd8] sm:$0xff]  ;;  %v2421_v44 = vld [vmem:[#allocation1 + $0x2d] sm:$0xff] }
 0x3a2   : > { %10164 = vmatpush.bf16.msra.mxu0 %v15461_v27  ;;  %v2423_v45 = vld [vmem:[#allocation1 + $0x3f] sm:$0xff] }
 0x3a3   : > { %10177 = vmatpush.bf16.msra.mxu1 %v15469_v28 }
 0x3a4   : > { %10190 = vmatpush.bf16.msra.mxu2 %v15477_v29 }
 0x3a5   : > { %10203 = vmatpush.bf16.msra.mxu3 %v15485_v30 }
 0x3a6   : > { %10165 = vmatpush.bf16.msra.mxu0 %v15460_v33  ;;  %v9939_v57 = vpop.f32.mrf.mxu2  ;;  %v15498_v33 = vld [vmem:[%s15727_s30 + $0x1d50] sm:$0xff] }
 0x3a7   : > { %10178 = vmatpush.bf16.msra.mxu1 %v15468_v34  ;;  %v9952_v58 = vpop.f32.mrf.mxu3  ;;  %v15534_v57 = vld [vmem:[%s15727_s30 + $0x1e70] sm:$0xff] }
 0x3a8   : > { %10191 = vmatpush.bf16.msra.mxu2 %v15476_v36  ;;  %v15514_v36 = vld [vmem:[%s15727_s30 + $0x1dd0] sm:$0xff] }
 0x3a9   : > { %10204 = vmatpush.bf16.msra.mxu3 %v15484_v37  ;;  %v15489_v37 = vld [vmem:[%s15727_s30 + $0x1d08] sm:$0xff]  ;;  %v15542_v58 = vld [vmem:[%s15727_s30 + $0x1eb0] sm:$0xff] }
 0x3aa   : > { %10166 = vmatpush.bf16.msra.mxu0 %v15459_v39  ;;  %v15505_v39 = vld [vmem:[%s15727_s30 + $0x1d88] sm:$0xff] }
 0x3ab   : > { %10179 = vmatpush.bf16.msra.mxu1 %v15467_v40  ;;  %v15513_v40 = vld [vmem:[%s15727_s30 + $0x1dc8] sm:$0xff] }
 0x3ac   : > { %10192 = vmatpush.bf16.msra.mxu2 %v15475_v41  ;;  %v2420_v41 = vld [vmem:[#allocation1 + $0x24] sm:$0xff] }
 0x3ad   : > { %10205 = vmatpush.bf16.msra.mxu3 %v15483_v42  ;;  %v2422_v42 = vld [vmem:[#allocation1 + $0x36] sm:$0xff] }
 0x3ae   : > { %10167 = vmatpush.bf16.msra.mxu0 %v15458_v48  ;;  %v15488_v48 = vld [vmem:[%s15727_s30 + $0x1d00] sm:$0xff] }
 0x3af   : > { %10180 = vmatpush.bf16.msra.mxu1 %v15466_v49  ;;  %v15496_v49 = vld [vmem:[%s15727_s30 + $0x1d40] sm:$0xff] }
 0x3b0   : > { %10193 = vmatpush.bf16.msra.mxu2 %v15474_v51  ;;  %v15512_v51 = vld [vmem:[%s15727_s30 + $0x1dc0] sm:$0xff] }
 0x3b1   : > { %10206 = vmatpush.bf16.msra.mxu3 %v15482_v52  ;;  %v15527_v52 = vld [vmem:[%s15727_s30 + $0x1e38] sm:$0xff] }
 0x3b2   : > { %10168 = vmatpush.bf16.msra.mxu0 %v15457_v53  ;;  %v15535_v53 = vld [vmem:[%s15727_s30 + $0x1e78] sm:$0xff] }
 0x3b3   : > { %10181 = vmatpush.bf16.msra.mxu1 %v15465_v54  ;;  %v15543_v54 = vld [vmem:[%s15727_s30 + $0x1eb8] sm:$0xff] }
 0x3b4   : > { %10194 = vmatpush.bf16.msra.mxu2 %v15473_v55  ;;  %v15551_v55 = vld [vmem:[%s15727_s30 + $0x1ef8] sm:$0xff] }
 0x3b5   : > { %10207 = vmatpush.bf16.msra.mxu3 %v15481_v56  ;;  %v15526_v56 = vld [vmem:[%s15727_s30 + $0x1e30] sm:$0xff] }
 0x3b6   : > { %10169 = vmatpush.bf16.msra.mxu0 %v15456_v59  ;;  %v9963_v15 = vpop.f32.mrf.mxu0  ;;  %v15550_v59 = vld [vmem:[%s15727_s30 + $0x1ef0] sm:$0xff] }
 0x3b7   : > { %10182 = vmatpush.bf16.msra.mxu1 %v15464_v60  ;;  %v9964_v16 = vadd.f32 %v9963_v15, %v9951_v47  ;;  %v9976_v19 = vpop.f32.mrf.mxu1  ;;  %v225_v47 = vld [vmem:[%s15717_s22 + $0x78] sm:$0xff]  ;;  %v15525_v60 = vld [vmem:[%s15727_s30 + $0x1e28] sm:$0xff] }
 0x3b8   : > { %10195 = vmatpush.bf16.msra.mxu2 %v15472_v61  ;;  %2425 = vst [vmem:[#allocation1] ss:$9 sm:$0xff] %v225_v47  ;;  %v15533_v61 = vld [vmem:[%s15727_s30 + $0x1e68] sm:$0xff] }
 0x3b9   : > { %10208 = vmatpush.bf16.msra.mxu3 %v15480_v62  ;;  %10170 = vmatmul.bf16.vlgmr.msra.gmra.mxu0 %v2416_v3  ;;  %v9977_v22 = vadd.f32 %v9976_v19, %v9964_v16  ;;  %v15541_v62 = vld [vmem:[%s15727_s30 + $0x1ea8] sm:$0xff]  ;;  %v15532_v3 = vld [vmem:[%s15727_s30 + $0x1e60] sm:$0xff] }
 0x3ba   : > { %10214 = vmatpush.bf16.msrb.mxu0 %v15495_v63  ;;  %10183 = vmatmul.bf16.vlgmr.msra.gmra.mxu1 %v2417_v5  ;;  %v15549_v63 = vld [vmem:[%s15727_s30 + $0x1ee8] sm:$0xff]  ;;  %v15540_v5 = vld [vmem:[%s15727_s30 + $0x1ea0] sm:$0xff] }
 0x3bb   : > { %10227 = vmatpush.bf16.msrb.mxu1 %v15503_v0  ;;  %10196 = vmatmul.bf16.vlgmr.msra.gmra.mxu2 %v2418_v4  ;;  %v15581_v47 = vld [vmem:[%s15727_s30 + $0x1fe8] sm:$0xff] }
 0x3bc   : > { %10240 = vmatpush.bf16.msrb.mxu2 %v15511_v1  ;;  %10209 = vmatmul.bf16.vlgmr.msra.gmra.mxu3 %v2419_v6  ;;  %v15548_v6 = vld [vmem:[%s15727_s30 + $0x1ee0] sm:$0xff] }
 0x3bd   : > { %10253 = vmatpush.bf16.msrb.mxu3 %v15519_v2  ;;  %v15524_v2 = vld [vmem:[%s15727_s30 + $0x1e20] sm:$0xff] }
 0x3be   : > { %10215 = vmatpush.bf16.msrb.mxu0 %v15494_v7  ;;  %v9989_v27 = vpop.f32.mrf.mxu2  ;;  %v9965_v30 = vpop.f32.mrf.mxu0 }
 0x3bf   : > { %10228 = vmatpush.bf16.msrb.mxu1 %v15502_v8  ;;  %v9990_v28 = vadd.f32 %v9989_v27, %v9977_v22  ;;  %v10002_v29 = vpop.f32.mrf.mxu3  ;;  %v9978_v34 = vpop.f32.mrf.mxu1  ;;  %v15523_v8 = vld [vmem:[%s15727_s30 + $0x1e18] sm:$0xff]  ;;  %v15521_v22 = vld [vmem:[%s15727_s30 + $0x1e08] sm:$0xff]  ;;  %v15536_v30 = vld [vmem:[%s15727_s30 + $0x1e80] sm:$0xff] }
 0x3c0   : > { %10241 = vmatpush.bf16.msrb.mxu2 %v15510_v9  ;;  %v15531_v9 = vld [vmem:[%s15727_s30 + $0x1e58] sm:$0xff] }
 0x3c1   : > { %10254 = vmatpush.bf16.msrb.mxu3 %v15518_v10  ;;  %v16730_v31 = vadd.f32 %v10002_v29, %v9990_v28  ;;  %v15539_v10 = vld [vmem:[%s15727_s30 + $0x1e98] sm:$0xff]  ;;  %v15520_v28 = vld [vmem:[%s15727_s30 + $0x1e00] sm:$0xff] }
 0x3c2   : > { %10216 = vmatpush.bf16.msrb.mxu0 %v15493_v11  ;;  %v15547_v11 = vld [vmem:[%s15727_s30 + $0x1ed8] sm:$0xff]  ;;  %v15528_v29 = vld [vmem:[%s15727_s30 + $0x1e40] sm:$0xff] }
 0x3c3   : > { %10229 = vmatpush.bf16.msrb.mxu1 %v15501_v12  ;;  %v15575_v34 = vld [vmem:[%s15727_s30 + $0x1fb8] sm:$0xff] }
 0x3c4   : > { %10242 = vmatpush.bf16.msrb.mxu2 %v15509_v13 }
 0x3c5   : > { %10255 = vmatpush.bf16.msrb.mxu3 %v15517_v14 }
 0x3c6   : > { %10217 = vmatpush.bf16.msrb.mxu0 %v15492_v17  ;;  %v9991_v43 = vpop.f32.mrf.mxu2  ;;  %v15522_v17 = vld [vmem:[%s15727_s30 + $0x1e10] sm:$0xff] }
 0x3c7   : > { %10230 = vmatpush.bf16.msrb.mxu1 %v15500_v18  ;;  %v10004_v46 = vpop.f32.mrf.mxu3  ;;  %v15530_v18 = vld [vmem:[%s15727_s30 + $0x1e50] sm:$0xff] }
 0x3c8   : > { %10243 = vmatpush.bf16.msrb.mxu2 %v15508_v20  ;;  %v15538_v20 = vld [vmem:[%s15727_s30 + $0x1e90] sm:$0xff]  ;;  %v15573_v46 = vld [vmem:[%s15727_s30 + $0x1fa8] sm:$0xff] }
 0x3c9   : > { %10256 = vmatpush.bf16.msrb.mxu3 %v15516_v21  ;;  %v15546_v21 = vld [vmem:[%s15727_s30 + $0x1ed0] sm:$0xff] }
 0x3ca   : > { %10218 = vmatpush.bf16.msrb.mxu0 %v15491_v23  ;;  %v15529_v23 = vld [vmem:[%s15727_s30 + $0x1e48] sm:$0xff]  ;;  %v15582_v43 = vld [vmem:[%s15727_s30 + $0x1ff0] sm:$0xff] }
 0x3cb   : > { %10231 = vmatpush.bf16.msrb.mxu1 %v15499_v24  ;;  %v15537_v24 = vld [vmem:[%s15727_s30 + $0x1e88] sm:$0xff] }
 0x3cc   : > { %10244 = vmatpush.bf16.msrb.mxu2 %v15507_v25  ;;  %v15545_v25 = vld [vmem:[%s15727_s30 + $0x1ec8] sm:$0xff] }
 0x3cd   : > { %10257 = vmatpush.bf16.msrb.mxu3 %v15515_v26 }
 0x3ce   : > { %10219 = vmatpush.bf16.msrb.mxu0 %v15490_v32  ;;  %v15559_v32 = vld [vmem:[%s15727_s30 + $0x1f38] sm:$0xff] }
 0x3cf   : > { %10232 = vmatpush.bf16.msrb.mxu1 %v15498_v33  ;;  %v15567_v33 = vld [vmem:[%s15727_s30 + $0x1f78] sm:$0xff] }
 0x3d0   : > { %10245 = vmatpush.bf16.msrb.mxu2 %v15506_v35  ;;  %v15583_v35 = vld [vmem:[%s15727_s30 + $0x1ff8] sm:$0xff] }
 0x3d1   : > { %10258 = vmatpush.bf16.msrb.mxu3 %v15514_v36  ;;  %v2426_v36 = vld [vmem:[#allocation1] sm:$0xff] }
 0x3d2   : > { %10220 = vmatpush.bf16.msrb.mxu0 %v15489_v37  ;;  %v2428_v37 = vld [vmem:[#allocation1 + $0x12] sm:$0xff] }
 0x3d3   : > { %10233 = vmatpush.bf16.msrb.mxu1 %v15497_v38  ;;  %v2427_v38 = vld [vmem:[#allocation1 + $0x9] sm:$0xff] }
 0x3d4   : > { %10246 = vmatpush.bf16.msrb.mxu2 %v15505_v39  ;;  %v2429_v39 = vld [vmem:[#allocation1 + $0x1b] sm:$0xff] }
 0x3d5   : > { %10259 = vmatpush.bf16.msrb.mxu3 %v15513_v40  ;;  %v15558_v40 = vld [vmem:[%s15727_s30 + $0x1f30] sm:$0xff] }
 0x3d6   : > { %10221 = vmatpush.bf16.msrb.mxu0 %v15488_v48  ;;  %v10015_v0 = vpop.f32.mrf.mxu0 }
 0x3d7   : > { %10234 = vmatpush.bf16.msrb.mxu1 %v15496_v49  ;;  %v10016_v1 = vadd.f32 %v10015_v0, %v16730_v31  ;;  %v10028_v4 = vpop.f32.mrf.mxu1  ;;  %v15544_v31 = vld [vmem:[%s15727_s30 + $0x1ec0] sm:$0xff] }
 0x3d8   : > { %10247 = vmatpush.bf16.msrb.mxu2 %v15504_v50  ;;  %v15556_v50 = vld [vmem:[%s15727_s30 + $0x1f20] sm:$0xff] }
 0x3d9   : > { %10260 = vmatpush.bf16.msrb.mxu3 %v15512_v51  ;;  %10222 = vmatmul.bf16.vlgmr.msrb.gmra.mxu0 %v2420_v41  ;;  %v10029_v7 = vadd.f32 %v10028_v4, %v10016_v1  ;;  %v15566_v41 = vld [vmem:[%s15727_s30 + $0x1f70] sm:$0xff]  ;;  %v15564_v51 = vld [vmem:[%s15727_s30 + $0x1f60] sm:$0xff] }
 0x3da   : > { %10266 = vmatpush.bf16.msra.mxu0 %v15527_v52  ;;  %10235 = vmatmul.bf16.vlgmr.msrb.gmra.mxu1 %v2421_v44  ;;  %v15557_v44 = vld [vmem:[%s15727_s30 + $0x1f28] sm:$0xff]  ;;  %v15554_v1 = vld [vmem:[%s15727_s30 + $0x1f10] sm:$0xff] }
 0x3db   : > { %10279 = vmatpush.bf16.msra.mxu1 %v15535_v53  ;;  %10248 = vmatmul.bf16.vlgmr.msrb.gmra.mxu2 %v2422_v42  ;;  %v15574_v42 = vld [vmem:[%s15727_s30 + $0x1fb0] sm:$0xff]  ;;  %v15572_v53 = vld [vmem:[%s15727_s30 + $0x1fa0] sm:$0xff] }
 0x3dc   : > { %10292 = vmatpush.bf16.msra.mxu2 %v15543_v54  ;;  %10261 = vmatmul.bf16.vlgmr.msrb.gmra.mxu3 %v2423_v45  ;;  %v15565_v45 = vld [vmem:[%s15727_s30 + $0x1f68] sm:$0xff]  ;;  %v15580_v54 = vld [vmem:[%s15727_s30 + $0x1fe0] sm:$0xff]  ;;  %v15570_v4 = vld [vmem:[%s15727_s30 + $0x1f90] sm:$0xff] }
 0x3dd   : > { %10305 = vmatpush.bf16.msra.mxu3 %v15551_v55 }
 0x3de   : > { %10267 = vmatpush.bf16.msra.mxu0 %v15526_v56  ;;  %v10041_v12 = vpop.f32.mrf.mxu2  ;;  %v10017_v15 = vpop.f32.mrf.mxu0  ;;  %v15555_v56 = vld [vmem:[%s15727_s30 + $0x1f18] sm:$0xff] }
 0x3df   : > { %10280 = vmatpush.bf16.msra.mxu1 %v15534_v57  ;;  %v10042_v13 = vadd.f32 %v10041_v12, %v10029_v7  ;;  %v10054_v14 = vpop.f32.mrf.mxu3  ;;  %v10030_v19 = vpop.f32.mrf.mxu1  ;;  %v15563_v57 = vld [vmem:[%s15727_s30 + $0x1f58] sm:$0xff]  ;;  %v15561_v7 = vld [vmem:[%s15727_s30 + $0x1f48] sm:$0xff]  ;;  %v15552_v12 = vld [vmem:[%s15727_s30 + $0x1f00] sm:$0xff] }
 0x3e0   : > { %10293 = vmatpush.bf16.msra.mxu2 %v15542_v58  ;;  %v15571_v58 = vld [vmem:[%s15727_s30 + $0x1f98] sm:$0xff]  ;;  %v15576_v15 = vld [vmem:[%s15727_s30 + $0x1fc0] sm:$0xff] }
 0x3e1   : > { %10306 = vmatpush.bf16.msra.mxu3 %v15550_v59  ;;  %v10055_v16 = vadd.f32 %v10054_v14, %v10042_v13  ;;  %v15579_v59 = vld [vmem:[%s15727_s30 + $0x1fd8] sm:$0xff]  ;;  %v15560_v13 = vld [vmem:[%s15727_s30 + $0x1f40] sm:$0xff] }
 0x3e2   : > { %10268 = vmatpush.bf16.msra.mxu0 %v15525_v60  ;;  %v15568_v14 = vld [vmem:[%s15727_s30 + $0x1f80] sm:$0xff] }
 0x3e3   : > { %10281 = vmatpush.bf16.msra.mxu1 %v15533_v61  ;;  %v2433_v19 = vld [vmem:[#allocation1 + $0x3f] sm:$0xff] }
 0x3e4   : > { %10294 = vmatpush.bf16.msra.mxu2 %v15541_v62 }
 0x3e5   : > { %10307 = vmatpush.bf16.msra.mxu3 %v15549_v63 }
 0x3e6   : > { %10269 = vmatpush.bf16.msra.mxu0 %v15524_v2  ;;  %v10043_v26 = vpop.f32.mrf.mxu2  ;;  %v15562_v2 = vld [vmem:[%s15727_s30 + $0x1f50] sm:$0xff] }
 0x3e7   : > { %10282 = vmatpush.bf16.msra.mxu1 %v15532_v3  ;;  %v10056_v27 = vpop.f32.mrf.mxu3 }
 0x3e8   : > { %10295 = vmatpush.bf16.msra.mxu2 %v15540_v5  ;;  %v15578_v5 = vld [vmem:[%s15727_s30 + $0x1fd0] sm:$0xff] }
 0x3e9   : > { %10308 = vmatpush.bf16.msra.mxu3 %v15548_v6  ;;  %v15553_v6 = vld [vmem:[%s15727_s30 + $0x1f08] sm:$0xff] }
 0x3ea   : > { %10270 = vmatpush.bf16.msra.mxu0 %v15523_v8  ;;  %v15569_v8 = vld [vmem:[%s15727_s30 + $0x1f88] sm:$0xff] }
 0x3eb   : > { %10283 = vmatpush.bf16.msra.mxu1 %v15531_v9  ;;  %v15577_v9 = vld [vmem:[%s15727_s30 + $0x1fc8] sm:$0xff] }
 0x3ec   : > { %10296 = vmatpush.bf16.msra.mxu2 %v15539_v10 }
 0x3ed   : > { %10309 = vmatpush.bf16.msra.mxu3 %v15547_v11 }
 0x3ee   : > { %10271 = vmatpush.bf16.msra.mxu0 %v15522_v17  ;;  %v2431_v17 = vld [vmem:[#allocation1 + $0x2d] sm:$0xff] }
 0x3ef   : > { %10284 = vmatpush.bf16.msra.mxu1 %v15530_v18  ;;  %v2432_v18 = vld [vmem:[#allocation1 + $0x36] sm:$0xff] }
 0x3f0   : > { %10297 = vmatpush.bf16.msra.mxu2 %v15538_v20 }
 0x3f1   : > { %10310 = vmatpush.bf16.msra.mxu3 %v15546_v21 }
 0x3f2   : > { %10272 = vmatpush.bf16.msra.mxu0 %v15521_v22 }
 0x3f3   : > { %10285 = vmatpush.bf16.msra.mxu1 %v15529_v23 }
 0x3f4   : > { %10298 = vmatpush.bf16.msra.mxu2 %v15537_v24 }
 0x3f5   : > { %10311 = vmatpush.bf16.msra.mxu3 %v15545_v25 }
 0x3f6   : > { %10273 = vmatpush.bf16.msra.mxu0 %v15520_v28  ;;  %v10067_v48 = vpop.f32.mrf.mxu0 }
 0x3f7   : > { %10286 = vmatpush.bf16.msra.mxu1 %v15528_v29  ;;  %v10068_v49 = vadd.f32 %v10067_v48, %v10055_v16  ;;  %v10080_v52 = vpop.f32.mrf.mxu1  ;;  %v2430_v16 = vld [vmem:[#allocation1 + $0x24] sm:$0xff] }
 0x3f8   : > { %10299 = vmatpush.bf16.msra.mxu2 %v15536_v30 }
 0x3f9   : > { %10312 = vmatpush.bf16.msra.mxu3 %v15544_v31  ;;  %10274 = vmatmul.bf16.vlgmr.msra.gmra.mxu0 %v2426_v36  ;;  %v10081_v55 = vadd.f32 %v10080_v52, %v10068_v49 }
 0x3fa   : > { %10318 = vmatpush.bf16.msrb.mxu0 %v15559_v32  ;;  %10287 = vmatmul.bf16.vlgmr.msra.gmra.mxu1 %v2427_v38 }
 0x3fb   : > { %10331 = vmatpush.bf16.msrb.mxu1 %v15567_v33  ;;  %10300 = vmatmul.bf16.vlgmr.msra.gmra.mxu2 %v2428_v37 }
 0x3fc   : > { %10344 = vmatpush.bf16.msrb.mxu2 %v15575_v34  ;;  %10313 = vmatmul.bf16.vlgmr.msra.gmra.mxu3 %v2429_v39 }
 0x3fd   : > { %10357 = vmatpush.bf16.msrb.mxu3 %v15583_v35 }
 0x3fe   : > { %10319 = vmatpush.bf16.msrb.mxu0 %v15558_v40  ;;  %v10093_v60 = vpop.f32.mrf.mxu2  ;;  %v10069_v63 = vpop.f32.mrf.mxu0 }
 0x3ff   : > { %10332 = vmatpush.bf16.msrb.mxu1 %v15566_v41  ;;  %v10094_v61 = vadd.f32 %v10093_v60, %v10081_v55  ;;  %v10106_v62 = vpop.f32.mrf.mxu3  ;;  %v10082_v3 = vpop.f32.mrf.mxu1 }
 0x400   : > { %10345 = vmatpush.bf16.msrb.mxu2 %v15574_v42 }
 0x401   : > { %10358 = vmatpush.bf16.msrb.mxu3 %v15582_v43  ;;  %v10107_v0 = vadd.f32 %v10106_v62, %v10094_v61 }
 0x402   : > { %10320 = vmatpush.bf16.msrb.mxu0 %v15557_v44 }
 0x403   : > { %10333 = vmatpush.bf16.msrb.mxu1 %v15565_v45 }
 0x404   : > { %10346 = vmatpush.bf16.msrb.mxu2 %v15573_v46 }
 0x405   : > { %10359 = vmatpush.bf16.msrb.mxu3 %v15581_v47 }
 0x406   : > { %10321 = vmatpush.bf16.msrb.mxu0 %v15556_v50  ;;  %v10095_v10 = vpop.f32.mrf.mxu2 }
 0x407   : > { %10334 = vmatpush.bf16.msrb.mxu1 %v15564_v51  ;;  %v10108_v11 = vpop.f32.mrf.mxu3 }
 0x408   : > { %10347 = vmatpush.bf16.msrb.mxu2 %v15572_v53 }
 0x409   : > { %10360 = vmatpush.bf16.msrb.mxu3 %v15580_v54 }
 0x40a   : > { %10322 = vmatpush.bf16.msrb.mxu0 %v15555_v56 }
 0x40b   : > { %10335 = vmatpush.bf16.msrb.mxu1 %v15563_v57 }
 0x40c   : > { %10348 = vmatpush.bf16.msrb.mxu2 %v15571_v58 }
 0x40d   : > { %10361 = vmatpush.bf16.msrb.mxu3 %v15579_v59 }
 0x40e   : > { %10323 = vmatpush.bf16.msrb.mxu0 %v15554_v1 }
 0x40f   : > { %10336 = vmatpush.bf16.msrb.mxu1 %v15562_v2 }
 0x410   : > { %10349 = vmatpush.bf16.msrb.mxu2 %v15570_v4 }
 0x411   : > { %10362 = vmatpush.bf16.msrb.mxu3 %v15578_v5 }
 0x412   : > { %10324 = vmatpush.bf16.msrb.mxu0 %v15553_v6 }
 0x413   : > { %10337 = vmatpush.bf16.msrb.mxu1 %v15561_v7 }
 0x414   : > { %10350 = vmatpush.bf16.msrb.mxu2 %v15569_v8 }
 0x415   : > { %10363 = vmatpush.bf16.msrb.mxu3 %v15577_v9 }
 0x416   : > { %10325 = vmatpush.bf16.msrb.mxu0 %v15552_v12  ;;  %v10119_v20 = vpop.f32.mrf.mxu0 }
 0x417   : > { %10338 = vmatpush.bf16.msrb.mxu1 %v15560_v13  ;;  %v10120_v21 = vadd.f32 %v10119_v20, %v10107_v0  ;;  %v10132_v22 = vpop.f32.mrf.mxu1  ;;  %v209_v13 = vld [vmem:[%s15722_s27] sm:$0x3] }
 0x418   : > { %10351 = vmatpush.bf16.msrb.mxu2 %v15568_v14 }
 0x419   : > { %10364 = vmatpush.bf16.msrb.mxu3 %v15576_v15  ;;  %10326 = vmatmul.bf16.vlgmr.msrb.gmra.mxu0 %v2430_v16  ;;  %v10133_v23 = vadd.f32 %v10132_v22, %v10120_v21 }
 0x41a   : > { %10339 = vmatmul.bf16.vlgmr.msrb.gmra.mxu1 %v2431_v17 }
 0x41b   : > { %10352 = vmatmul.bf16.vlgmr.msrb.gmra.mxu2 %v2432_v18 }
 0x41c   : > { %10365 = vmatmul.bf16.vlgmr.msrb.gmra.mxu3 %v2433_v19 }
 0x41e   : > { %v10145_v24 = vpop.f32.mrf.mxu2  ;;  %v10121_v27 = vpop.f32.mrf.mxu0 }
 0x41f   : > { %v10146_v25 = vadd.f32 %v10145_v24, %v10133_v23  ;;  %v10158_v26 = vpop.f32.mrf.mxu3  ;;  %v10134_v29 = vpop.f32.mrf.mxu1 }
 0x421   : > { %v10159_v28 = vadd.f32 %v10158_v26, %v10146_v25 }
 0x426   : > { %v10147_v30 = vpop.f32.mrf.mxu2 }
 0x427   : > { %v10160_v31 = vpop.f32.mrf.mxu3 }
 0x436   : > { %v10171_v32 = vpop.f32.mrf.mxu0 }
 0x437   : > { %v10172_v33 = vadd.f32 %v10171_v32, %v10159_v28  ;;  %v10184_v34 = vpop.f32.mrf.mxu1 }
 0x439   : > { %v10185_v35 = vadd.f32 %v10184_v34, %v10172_v33 }
 0x43e   : > { %v10197_v36 = vpop.f32.mrf.mxu2  ;;  %v10173_v39 = vpop.f32.mrf.mxu0 }
 0x43f   : > { %v10198_v37 = vadd.f32 %v10197_v36, %v10185_v35  ;;  %v10210_v38 = vpop.f32.mrf.mxu3  ;;  %v10186_v41 = vpop.f32.mrf.mxu1 }
 0x441   : > { %v10211_v40 = vadd.f32 %v10210_v38, %v10198_v37 }
 0x446   : > { %v10199_v42 = vpop.f32.mrf.mxu2 }
 0x447   : > { %v10212_v43 = vpop.f32.mrf.mxu3 }
 0x456   : > { %v10223_v44 = vpop.f32.mrf.mxu0 }
 0x457   : > { %v10236_v45 = vpop.f32.mrf.mxu1  ;;  %v10224_v55 = vadd.f32 %v10223_v44, %v10211_v40 }
 0x459   : > { %v10237_v59 = vadd.f32 %v10236_v45, %v10224_v55 }
 0x45e   : > { %v10249_v46 = vpop.f32.mrf.mxu2  ;;  %v10225_v48 = vpop.f32.mrf.mxu0 }
 0x45f   : > { %v10262_v47 = vpop.f32.mrf.mxu3  ;;  %v10238_v49 = vpop.f32.mrf.mxu1  ;;  %v10250_v60 = vadd.f32 %v10249_v46, %v10237_v59 }
 0x461   : > { %v10263_v63 = vadd.f32 %v10262_v47, %v10250_v60 }
 0x466   : > { %v10251_v50 = vpop.f32.mrf.mxu2 }
 0x467   : > { %v10264_v51 = vpop.f32.mrf.mxu3 }
 0x476   : > { %v10275_v52 = vpop.f32.mrf.mxu0 }
 0x477   : > { %v10288_v53 = vpop.f32.mrf.mxu1  ;;  %v10276_v0 = vadd.f32 %v10275_v52, %v10263_v63 }
 0x479   : > { %v10289_v1 = vadd.f32 %v10288_v53, %v10276_v0 }
 0x47e   : > { %v10301_v54 = vpop.f32.mrf.mxu2  ;;  %v10277_v57 = vpop.f32.mrf.mxu0 }
 0x47f   : > { %v10314_v56 = vpop.f32.mrf.mxu3  ;;  %v10290_v58 = vpop.f32.mrf.mxu1  ;;  %v10302_v2 = vadd.f32 %v10301_v54, %v10289_v1 }
 0x481   : > { %v10315_v3 = vadd.f32 %v10314_v56, %v10302_v2 }
 0x486   : > { %v10303_v61 = vpop.f32.mrf.mxu2 }
 0x487   : > { %v10316_v62 = vpop.f32.mrf.mxu3 }
 0x496   : > { %v10327_v4 = vpop.f32.mrf.mxu0 }
 0x497   : > { %v10340_v5 = vpop.f32.mrf.mxu1  ;;  %v10328_v6 = vadd.f32 %v10327_v4, %v10315_v3 }
 0x499   : > { %v10341_v7 = vadd.f32 %v10340_v5, %v10328_v6 }
 0x49e   : > { %v10353_v8 = vpop.f32.mrf.mxu2  ;;  %v10329_v11 = vpop.f32.mrf.mxu0 }
 0x49f   : > { %v10366_v9 = vpop.f32.mrf.mxu3  ;;  %v10354_v10 = vadd.f32 %v10353_v8, %v10341_v7  ;;  %v10342_v12 = vpop.f32.mrf.mxu1 }
 0x4a1   : > { %v10367_v14 = vadd.f32 %v10366_v9, %v10354_v10 }
 0x4a3   : > { %v10370_v15 = vadd.f32 %v10367_v14, %v209_v13 }
 0x4a5   : > { %10372 = vst.msk [vmem:[%s15722_s27] sm:$0x3] %vm10371_vm1, %v10370_v15 }
 0x4a6   : > { %v10355_v16 = vpop.f32.mrf.mxu2 }
 0x4a7   : > { %v10368_v17 = vpop.f32.mrf.mxu3 }
 0x4a8 PF: > { %s12_s13 = sadd.s32 1, %s15663_s13   ;;  %s16830_s9 = smov %s15655_s11 }
 0x4a9   : > { %p9_p9 = scmp.ge.s32.totalorder %s12_s13, 6   ;;  %s16831_s10 = smov %s15659_s12 }
 0x4aa   : > { %s16832_s11 = smov %s16835_s14  ;;  %s16833_s12 = smov %s16839_s15 }
 0x4ab   :  { %11 = sbr.rel (!%p9_p9) target bundleno = 3 (0x3), region = 65 }

</bundles_post_ra>
